<compile_context>
chip_gen: v6e
topology: v6e:2x2x1
jax: 0.10.0
libtpu: 0.0.40
codegen_flags: <defaults>
</compile_context>

<pallas_src>
import functools

import jax
import jax.numpy as jnp
from jax import lax
from jax.experimental import pallas as pl
from jax.experimental.pallas import tpu as pltpu

LANE = 128       # lane width: channel dims are zero-padded to this inside VMEM
_BN_EPS = 1e-5   # PyTorch BatchNorm2d default


def _round_up(x, m):
    return (x + m - 1) // m * m


def _fold_bn(gamma, beta, mean, var, eps=_BN_EPS):
    scale = gamma * lax.rsqrt(var + eps)
    bias = beta - mean * scale
    return scale, bias


def _basic_block_kernel(x_ref, w1_ref, b1_ref, w2_ref, b2_ref, o_ref,
                        xpad_ref, mid_ref, w1p_ref, w2p_ref, bp_ref,
                        *, H, W, c_in, c_mid, c_out, mid_off):
    """Fused BasicBlock forward for one batch element.

    Flat layout: a spatially padded image row (i, j) lives at flat row
    i*(W+2)+j.  Conv outputs are computed densely over that row pitch, so the
    9 taps of a 3x3 conv are plain row-shifted slices of one 2-D buffer.

    x_ref :  (XROWS, c_in)     spatially padded, flattened input image
    w*_ref:  (9, cin, cout)    unpadded conv weights (BN scale pre-folded)
    b*_ref:  (1, cout)         unpadded folded BN bias
    o_ref :  (L, c_out)        dense conv-output rows (wrapper drops halo cols)
    xpad_ref: (XROWS, LANE)    persistent scratch, channel-padded input
    mid_ref : (MROWS, LANE)    persistent scratch, channel-padded conv1 act
    w1p/w2p : (9, LANE, LANE)  persistent scratch, channel-padded weights
    bp_ref  : (2, LANE)        persistent scratch, channel-padded biases
    """
    Wp = W + 2
    L = H * Wp                       # dense conv-output rows per image
    taps = [(kh, kw) for kh in range(3) for kw in range(3)]

    # ---- one-time init: zero scratches, scatter unpadded weights/biases ----
    @pl.when(pl.program_id(0) == 0)
    def _init():
        xpad_ref[...] = jnp.zeros_like(xpad_ref)    # lanes >= c_in must be 0
        mid_ref[...] = jnp.zeros_like(mid_ref)      # halo rows must be 0
        w1p_ref[...] = jnp.zeros_like(w1p_ref)
        w2p_ref[...] = jnp.zeros_like(w2p_ref)
        bp_ref[...] = jnp.zeros_like(bp_ref)
        for t in range(9):                           # tiny one-time scatter
            w1p_ref[t, :c_in, :c_mid] = w1_ref[t]
            w2p_ref[t, :c_mid, :c_out] = w2_ref[t]
        bp_ref[0:1, :c_mid] = b1_ref[...]
        bp_ref[1:2, :c_out] = b2_ref[...]

    # ---- stage this image (aligned, lane-masked store; halo already zero) ---
    xpad_ref[:, :c_in] = x_ref[...]

    # Rows whose column index falls in the 2 halo columns are garbage outputs.
    row = lax.broadcasted_iota(jnp.int32, (L, 1), 0)
    valid = (row % Wp) < W

    def conv3x3(src_ref, base, wp_ref):
        acc = None
        for t, (kh, kw) in enumerate(taps):
            d = base + kh * Wp + kw
            prod = jnp.dot(src_ref[d:d + L, :], wp_ref[t],
                           preferred_element_type=jnp.float32)
            acc = prod if acc is None else acc + prod
        return acc

    # ---- conv1 + bn1 + relu -------------------------------------------------
    act1 = jnp.maximum(conv3x3(xpad_ref, 0, w1p_ref) + bp_ref[0:1, :], 0.0)
    act1 = jnp.where(valid, act1, 0.0)   # keep mid-buffer halo columns zero
    mid_ref[mid_off:mid_off + L, :] = act1          # sublane-aligned store

    # ---- conv2 + bn2 + residual + relu --------------------------------------
    acc2 = conv3x3(mid_ref, mid_off - (Wp + 1), w2p_ref)
    out = acc2 + bp_ref[1:2, :] + xpad_ref[Wp + 1:Wp + 1 + L, :]  # identity res.
    out = jnp.maximum(out, 0.0)
    o_ref[...] = out[:, :c_out].astype(o_ref.dtype)


@jax.jit
def basic_block_forward(x_nchw, params):
    """BasicBlock.forward with stride=1, downsample=None, eval-mode BN."""
    N, C, H, W = x_nchw.shape
    c_in = C
    c_mid = params["w1"].shape[-1]
    c_out = params["w2"].shape[-1]
    assert c_out == c_in, "identity residual requires w == inplanes"

    Hp, Wp = H + 2, W + 2
    L = H * Wp                                   # dense conv-output rows
    max_d = 2 * Wp + 2                           # largest 3x3 tap row offset
    xrows = _round_up(max(Hp * Wp, L + max_d), 8)
    mid_off = _round_up(Wp + 1, 8)               # aligned conv1-output origin
    mrows = _round_up(max(mid_off + L, (mid_off - (Wp + 1)) + max_d + L), 8)

    # NCHW -> NHWC, 1-pixel spatial halo only (NO channel padding), flatten.
    x = jnp.transpose(x_nchw, (0, 2, 3, 1))
    x = jnp.pad(x, ((0, 0), (1, 1), (1, 1), (0, 0)))
    x = x.reshape(N, Hp * Wp, c_in)
    x = jnp.pad(x, ((0, 0), (0, xrows - Hp * Wp), (0, 0)))

    # Fold BN into (scale, bias); fold scale into the conv weights (HWIO).
    s1, b1 = _fold_bn(params["bn1_gamma"], params["bn1_beta"],
                      params["bn1_mean"], params["bn1_var"])
    s2, b2 = _fold_bn(params["bn2_gamma"], params["bn2_beta"],
                      params["bn2_mean"], params["bn2_var"])
    w1 = (params["w1"] * s1).reshape(9, c_in, c_mid)
    w2 = (params["w2"] * s2).reshape(9, c_mid, c_out)
    b1 = b1.reshape(1, c_mid)
    b2 = b2.reshape(1, c_out)

    kernel = functools.partial(
        _basic_block_kernel, H=H, W=W, c_in=c_in, c_mid=c_mid, c_out=c_out,
        mid_off=mid_off)

    out = pl.pallas_call(
        kernel,
        out_shape=jax.ShapeDtypeStruct((N, L, c_out), jnp.float32),
        grid_spec=pltpu.PrefetchScalarGridSpec(
            num_scalar_prefetch=0,
            grid=(N,),
            in_specs=[
                pl.BlockSpec((None, xrows, c_in), lambda n: (n, 0, 0)),
                pl.BlockSpec((9, c_in, c_mid), lambda n: (0, 0, 0)),
                pl.BlockSpec((1, c_mid), lambda n: (0, 0)),
                pl.BlockSpec((9, c_mid, c_out), lambda n: (0, 0, 0)),
                pl.BlockSpec((1, c_out), lambda n: (0, 0)),
            ],
            out_specs=pl.BlockSpec((None, L, c_out), lambda n: (n, 0, 0)),
            scratch_shapes=[
                pltpu.VMEM((xrows, LANE), jnp.float32),   # padded input
                pltpu.VMEM((mrows, LANE), jnp.float32),   # padded conv1 act
                pltpu.VMEM((9, LANE, LANE), jnp.float32), # padded conv1 weights
                pltpu.VMEM((9, LANE, LANE), jnp.float32), # padded conv2 weights
                pltpu.VMEM((2, LANE), jnp.float32),       # padded biases
            ],
        ),
        compiler_params=pltpu.CompilerParams(
            # "arbitrary": the program_id==0 scratch init must run on the same
            # core as every other step.  See TODO about a v7x parallel axis.
            dimension_semantics=("arbitrary",),
            vmem_limit_bytes=8 * 1024 * 1024,
        ),
    )(x, w1, b1, w2, b2)

    # Drop the halo-column garbage rows, back to NCHW.
    out = out.reshape(N, H, Wp, c_out)[:, :, :W, :]
    return jnp.transpose(out, (0, 3, 1, 2))


def _basic_block_reference(x_nchw, params):
    """Pure-JAX reference (XLA convs) for correctness checking."""
    def conv(h, w):
        return lax.conv_general_dilated(
            h, w, (1, 1), "SAME", dimension_numbers=("NHWC", "HWIO", "NHWC"))
    x = jnp.transpose(x_nchw, (0, 2, 3, 1))
    s1, b1 = _fold_bn(params["bn1_gamma"], params["bn1_beta"],
                      params["bn1_mean"], params["bn1_var"])
    s2, b2 = _fold_bn(params["bn2_gamma"], params["bn2_beta"],
                      params["bn2_mean"], params["bn2_var"])
    y = jnp.maximum(conv(x, params["w1"]) * s1 + b1, 0.0)
    y = jnp.maximum(conv(y, params["w2"]) * s2 + b2 + x, 0.0)
    return jnp.transpose(y, (0, 3, 1, 2))


def init_params(key, inplanes, v, w):
    ks = jax.random.split(key, 8)
    return {
        "w1": 0.1 * jax.random.normal(ks[0], (3, 3, inplanes, v), jnp.float32),
        "bn1_gamma": 1.0 + 0.1 * jax.random.normal(ks[1], (v,), jnp.float32),
        "bn1_beta": 0.1 * jax.random.normal(ks[2], (v,), jnp.float32),
        "bn1_mean": 0.1 * jax.random.normal(ks[3], (v,), jnp.float32),
        "bn1_var": jnp.abs(jax.random.normal(ks[4], (v,), jnp.float32)) + 0.5,
        "w2": 0.1 * jax.random.normal(ks[5], (3, 3, v, w), jnp.float32),
        "bn2_gamma": 1.0 + 0.1 * jax.random.normal(ks[6], (w,), jnp.float32),
        "bn2_beta": 0.1 * jax.random.normal(ks[7], (w,), jnp.float32),
        "bn2_mean": jnp.zeros((w,), jnp.float32),
        "bn2_var": jnp.ones((w,), jnp.float32),
    }


if __name__ == "__main__":
    key = jax.random.PRNGKey(0)
    k_x, k_p = jax.random.split(key)

    N, C, H, W = 2, 4, 16, 16          # inplanes = v = w = 4, stride = 1
    x = jax.random.normal(k_x, (N, C, H, W), jnp.float32)
    params = init_params(k_p, inplanes=C, v=C, w=C)

    out = basic_block_forward(x, params)
    out = jax.block_until_ready(out)

    assert out.shape == (N, C, H, W)
    assert bool(jnp.all(out >= 0.0))                 # final ReLU
    assert bool(jnp.all(jnp.isfinite(out)))

    ref = _basic_block_reference(x, params)
    err = float(jnp.max(jnp.abs(out - ref)))
    assert err < 1e-3, f"mismatch vs pure-JAX reference: max abs err {err}"

    print("KERNEL_OK")
</pallas_src>

<mosaic_0001>
module attributes {stable_mosaic.version = 11 : i64} {
  func.func @_basic_block_kernel(%arg0: i32, %arg1: memref<1x328x4xf32, #tpu.memory_space<vmem>>, %arg2: memref<9x4x4xf32, #tpu.memory_space<vmem>>, %arg3: memref<1x4xf32, #tpu.memory_space<vmem>>, %arg4: memref<9x4x4xf32, #tpu.memory_space<vmem>>, %arg5: memref<1x4xf32, #tpu.memory_space<vmem>>, %arg6: memref<1x288x4xf32, #tpu.memory_space<vmem>>, %arg7: memref<328x128xf32, #tpu.memory_space<vmem>>, %arg8: memref<336x128xf32, #tpu.memory_space<vmem>>, %arg9: memref<9x128x128xf32, #tpu.memory_space<vmem>>, %arg10: memref<9x128x128xf32, #tpu.memory_space<vmem>>, %arg11: memref<2x128xf32, #tpu.memory_space<vmem>>) attributes {dimension_semantics = [#tpu.dimension_semantics<arbitrary>], iteration_bounds = array<i64: 2>, scalar_prefetch = 0 : i64, scratch_operands = 5 : i64, tpu.core_type = #tpu.core_type<tc>, window_params = [{transform_indices = @transform_0, window_bounds = array<i64: 1, 328, 4>}, {pipeline_mode = #tpu.pipeline_mode<synchronous>, transform_indices = @transform_1, window_bounds = array<i64: 9, 4, 4>}, {pipeline_mode = #tpu.pipeline_mode<synchronous>, transform_indices = @transform_2, window_bounds = array<i64: 1, 4>}, {pipeline_mode = #tpu.pipeline_mode<synchronous>, transform_indices = @transform_3, window_bounds = array<i64: 9, 4, 4>}, {pipeline_mode = #tpu.pipeline_mode<synchronous>, transform_indices = @transform_4, window_bounds = array<i64: 1, 4>}, {transform_indices = @transform_5, window_bounds = array<i64: 1, 288, 4>}]} {
    %c0_i32 = arith.constant 0 : i32
    %0 = arith.cmpi eq, %arg0, %c0_i32 : i32
    %1 = arith.extui %0 : i1 to i32
    %c0_i32_0 = arith.constant 0 : i32
    %2 = arith.cmpi ne, %1, %c0_i32_0 : i32
    scf.if %2 {
      %cst_110 = arith.constant 0.000000e+00 : f32
      %134 = vector.broadcast %cst_110 : f32 to vector<328x128xf32>
      %c0_111 = arith.constant 0 : index
      %c0_112 = arith.constant 0 : index
      %135 = vector.load %arg7[%c0_111, %c0_112] : memref<328x128xf32, #tpu.memory_space<vmem>>, vector<328x128xf32>
      tpu.vector_store %arg7[%c0_111, %c0_112], %134 {strides = array<i32>} : memref<328x128xf32, #tpu.memory_space<vmem>>, vector<328x128xf32>,
      %cst_113 = arith.constant 0.000000e+00 : f32
      %136 = vector.broadcast %cst_113 : f32 to vector<336x128xf32>
      %c0_114 = arith.constant 0 : index
      %c0_115 = arith.constant 0 : index
      %137 = vector.load %arg8[%c0_114, %c0_115] : memref<336x128xf32, #tpu.memory_space<vmem>>, vector<336x128xf32>
      tpu.vector_store %arg8[%c0_114, %c0_115], %136 {strides = array<i32>} : memref<336x128xf32, #tpu.memory_space<vmem>>, vector<336x128xf32>,
      %cst_116 = arith.constant 0.000000e+00 : f32
      %138 = vector.broadcast %cst_116 : f32 to vector<9x128x128xf32>
      %c0_117 = arith.constant 0 : index
      %c0_118 = arith.constant 0 : index
      %c0_119 = arith.constant 0 : index
      %139 = vector.load %arg9[%c0_117, %c0_118, %c0_119] : memref<9x128x128xf32, #tpu.memory_space<vmem>>, vector<9x128x128xf32>
      tpu.vector_store %arg9[%c0_117, %c0_118, %c0_119], %138 {strides = array<i32>} : memref<9x128x128xf32, #tpu.memory_space<vmem>>, vector<9x128x128xf32>,
      %cst_120 = arith.constant 0.000000e+00 : f32
      %140 = vector.broadcast %cst_120 : f32 to vector<9x128x128xf32>
      %c0_121 = arith.constant 0 : index
      %c0_122 = arith.constant 0 : index
      %c0_123 = arith.constant 0 : index
      %141 = vector.load %arg10[%c0_121, %c0_122, %c0_123] : memref<9x128x128xf32, #tpu.memory_space<vmem>>, vector<9x128x128xf32>
      tpu.vector_store %arg10[%c0_121, %c0_122, %c0_123], %140 {strides = array<i32>} : memref<9x128x128xf32, #tpu.memory_space<vmem>>, vector<9x128x128xf32>,
      %cst_124 = arith.constant 0.000000e+00 : f32
      %142 = vector.broadcast %cst_124 : f32 to vector<2x128xf32>
      %c0_125 = arith.constant 0 : index
      %c0_126 = arith.constant 0 : index
      %143 = vector.load %arg11[%c0_125, %c0_126] : memref<2x128xf32, #tpu.memory_space<vmem>>, vector<2x128xf32>
      tpu.vector_store %arg11[%c0_125, %c0_126], %142 {strides = array<i32>} : memref<2x128xf32, #tpu.memory_space<vmem>>, vector<2x128xf32>,
      %c0_127 = arith.constant 0 : index
      %c0_128 = arith.constant 0 : index
      %c0_129 = arith.constant 0 : index
      %144 = vector.load %arg2[%c0_127, %c0_128, %c0_129] : memref<9x4x4xf32, #tpu.memory_space<vmem>>, vector<1x4x4xf32>
      %145 = vector.shape_cast %144 : vector<1x4x4xf32> to vector<4x4xf32>
      %c0_130 = arith.constant 0 : index
      %c0_131 = arith.constant 0 : index
      %c0_132 = arith.constant 0 : index
      %146 = vector.load %arg9[%c0_130, %c0_131, %c0_132] : memref<9x128x128xf32, #tpu.memory_space<vmem>>, vector<1x4x4xf32>
      %147 = vector.shape_cast %146 : vector<1x4x4xf32> to vector<4x4xf32>
      %148 = vector.shape_cast %145 : vector<4x4xf32> to vector<1x4x4xf32>
      tpu.vector_store %arg9[%c0_130, %c0_131, %c0_132], %148 {strides = array<i32>} : memref<9x128x128xf32, #tpu.memory_space<vmem>>, vector<1x4x4xf32>,
      %c0_133 = arith.constant 0 : index
      %c0_134 = arith.constant 0 : index
      %c0_135 = arith.constant 0 : index
      %149 = vector.load %arg4[%c0_133, %c0_134, %c0_135] : memref<9x4x4xf32, #tpu.memory_space<vmem>>, vector<1x4x4xf32>
      %150 = vector.shape_cast %149 : vector<1x4x4xf32> to vector<4x4xf32>
      %c0_136 = arith.constant 0 : index
      %c0_137 = arith.constant 0 : index
      %c0_138 = arith.constant 0 : index
      %151 = vector.load %arg10[%c0_136, %c0_137, %c0_138] : memref<9x128x128xf32, #tpu.memory_space<vmem>>, vector<1x4x4xf32>
      %152 = vector.shape_cast %151 : vector<1x4x4xf32> to vector<4x4xf32>
      %153 = vector.shape_cast %150 : vector<4x4xf32> to vector<1x4x4xf32>
      tpu.vector_store %arg10[%c0_136, %c0_137, %c0_138], %153 {strides = array<i32>} : memref<9x128x128xf32, #tpu.memory_space<vmem>>, vector<1x4x4xf32>,
      %c1_139 = arith.constant 1 : index
      %c0_140 = arith.constant 0 : index
      %c0_141 = arith.constant 0 : index
      %154 = vector.load %arg2[%c1_139, %c0_140, %c0_141] : memref<9x4x4xf32, #tpu.memory_space<vmem>>, vector<1x4x4xf32>
      %155 = vector.shape_cast %154 : vector<1x4x4xf32> to vector<4x4xf32>
      %c1_142 = arith.constant 1 : index
      %c0_143 = arith.constant 0 : index
      %c0_144 = arith.constant 0 : index
      %156 = vector.load %arg9[%c1_142, %c0_143, %c0_144] : memref<9x128x128xf32, #tpu.memory_space<vmem>>, vector<1x4x4xf32>
      %157 = vector.shape_cast %156 : vector<1x4x4xf32> to vector<4x4xf32>
      %158 = vector.shape_cast %155 : vector<4x4xf32> to vector<1x4x4xf32>
      tpu.vector_store %arg9[%c1_142, %c0_143, %c0_144], %158 {strides = array<i32>} : memref<9x128x128xf32, #tpu.memory_space<vmem>>, vector<1x4x4xf32>,
      %c1_145 = arith.constant 1 : index
      %c0_146 = arith.constant 0 : index
      %c0_147 = arith.constant 0 : index
      %159 = vector.load %arg4[%c1_145, %c0_146, %c0_147] : memref<9x4x4xf32, #tpu.memory_space<vmem>>, vector<1x4x4xf32>
      %160 = vector.shape_cast %159 : vector<1x4x4xf32> to vector<4x4xf32>
      %c1_148 = arith.constant 1 : index
      %c0_149 = arith.constant 0 : index
      %c0_150 = arith.constant 0 : index
      %161 = vector.load %arg10[%c1_148, %c0_149, %c0_150] : memref<9x128x128xf32, #tpu.memory_space<vmem>>, vector<1x4x4xf32>
      %162 = vector.shape_cast %161 : vector<1x4x4xf32> to vector<4x4xf32>
      %163 = vector.shape_cast %160 : vector<4x4xf32> to vector<1x4x4xf32>
      tpu.vector_store %arg10[%c1_148, %c0_149, %c0_150], %163 {strides = array<i32>} : memref<9x128x128xf32, #tpu.memory_space<vmem>>, vector<1x4x4xf32>,
      %c2_151 = arith.constant 2 : index
      %c0_152 = arith.constant 0 : index
      %c0_153 = arith.constant 0 : index
      %164 = vector.load %arg2[%c2_151, %c0_152, %c0_153] : memref<9x4x4xf32, #tpu.memory_space<vmem>>, vector<1x4x4xf32>
      %165 = vector.shape_cast %164 : vector<1x4x4xf32> to vector<4x4xf32>
      %c2_154 = arith.constant 2 : index
      %c0_155 = arith.constant 0 : index
      %c0_156 = arith.constant 0 : index
      %166 = vector.load %arg9[%c2_154, %c0_155, %c0_156] : memref<9x128x128xf32, #tpu.memory_space<vmem>>, vector<1x4x4xf32>
      %167 = vector.shape_cast %166 : vector<1x4x4xf32> to vector<4x4xf32>
      %168 = vector.shape_cast %165 : vector<4x4xf32> to vector<1x4x4xf32>
      tpu.vector_store %arg9[%c2_154, %c0_155, %c0_156], %168 {strides = array<i32>} : memref<9x128x128xf32, #tpu.memory_space<vmem>>, vector<1x4x4xf32>,
      %c2_157 = arith.constant 2 : index
      %c0_158 = arith.constant 0 : index
      %c0_159 = arith.constant 0 : index
      %169 = vector.load %arg4[%c2_157, %c0_158, %c0_159] : memref<9x4x4xf32, #tpu.memory_space<vmem>>, vector<1x4x4xf32>
      %170 = vector.shape_cast %169 : vector<1x4x4xf32> to vector<4x4xf32>
      %c2_160 = arith.constant 2 : index
      %c0_161 = arith.constant 0 : index
      %c0_162 = arith.constant 0 : index
      %171 = vector.load %arg10[%c2_160, %c0_161, %c0_162] : memref<9x128x128xf32, #tpu.memory_space<vmem>>, vector<1x4x4xf32>
      %172 = vector.shape_cast %171 : vector<1x4x4xf32> to vector<4x4xf32>
      %173 = vector.shape_cast %170 : vector<4x4xf32> to vector<1x4x4xf32>
      tpu.vector_store %arg10[%c2_160, %c0_161, %c0_162], %173 {strides = array<i32>} : memref<9x128x128xf32, #tpu.memory_space<vmem>>, vector<1x4x4xf32>,
      %c3_163 = arith.constant 3 : index
      %c0_164 = arith.constant 0 : index
      %c0_165 = arith.constant 0 : index
      %174 = vector.load %arg2[%c3_163, %c0_164, %c0_165] : memref<9x4x4xf32, #tpu.memory_space<vmem>>, vector<1x4x4xf32>
      %175 = vector.shape_cast %174 : vector<1x4x4xf32> to vector<4x4xf32>
      %c3_166 = arith.constant 3 : index
      %c0_167 = arith.constant 0 : index
      %c0_168 = arith.constant 0 : index
      %176 = vector.load %arg9[%c3_166, %c0_167, %c0_168] : memref<9x128x128xf32, #tpu.memory_space<vmem>>, vector<1x4x4xf32>
      %177 = vector.shape_cast %176 : vector<1x4x4xf32> to vector<4x4xf32>
      %178 = vector.shape_cast %175 : vector<4x4xf32> to vector<1x4x4xf32>
      tpu.vector_store %arg9[%c3_166, %c0_167, %c0_168], %178 {strides = array<i32>} : memref<9x128x128xf32, #tpu.memory_space<vmem>>, vector<1x4x4xf32>,
      %c3_169 = arith.constant 3 : index
      %c0_170 = arith.constant 0 : index
      %c0_171 = arith.constant 0 : index
      %179 = vector.load %arg4[%c3_169, %c0_170, %c0_171] : memref<9x4x4xf32, #tpu.memory_space<vmem>>, vector<1x4x4xf32>
      %180 = vector.shape_cast %179 : vector<1x4x4xf32> to vector<4x4xf32>
      %c3_172 = arith.constant 3 : index
      %c0_173 = arith.constant 0 : index
      %c0_174 = arith.constant 0 : index
      %181 = vector.load %arg10[%c3_172, %c0_173, %c0_174] : memref<9x128x128xf32, #tpu.memory_space<vmem>>, vector<1x4x4xf32>
      %182 = vector.shape_cast %181 : vector<1x4x4xf32> to vector<4x4xf32>
      %183 = vector.shape_cast %180 : vector<4x4xf32> to vector<1x4x4xf32>
      tpu.vector_store %arg10[%c3_172, %c0_173, %c0_174], %183 {strides = array<i32>} : memref<9x128x128xf32, #tpu.memory_space<vmem>>, vector<1x4x4xf32>,
      %c4_175 = arith.constant 4 : index
      %c0_176 = arith.constant 0 : index
      %c0_177 = arith.constant 0 : index
      %184 = vector.load %arg2[%c4_175, %c0_176, %c0_177] : memref<9x4x4xf32, #tpu.memory_space<vmem>>, vector<1x4x4xf32>
      %185 = vector.shape_cast %184 : vector<1x4x4xf32> to vector<4x4xf32>
      %c4_178 = arith.constant 4 : index
      %c0_179 = arith.constant 0 : index
      %c0_180 = arith.constant 0 : index
      %186 = vector.load %arg9[%c4_178, %c0_179, %c0_180] : memref<9x128x128xf32, #tpu.memory_space<vmem>>, vector<1x4x4xf32>
      %187 = vector.shape_cast %186 : vector<1x4x4xf32> to vector<4x4xf32>
      %188 = vector.shape_cast %185 : vector<4x4xf32> to vector<1x4x4xf32>
      tpu.vector_store %arg9[%c4_178, %c0_179, %c0_180], %188 {strides = array<i32>} : memref<9x128x128xf32, #tpu.memory_space<vmem>>, vector<1x4x4xf32>,
      %c4_181 = arith.constant 4 : index
      %c0_182 = arith.constant 0 : index
      %c0_183 = arith.constant 0 : index
      %189 = vector.load %arg4[%c4_181, %c0_182, %c0_183] : memref<9x4x4xf32, #tpu.memory_space<vmem>>, vector<1x4x4xf32>
      %190 = vector.shape_cast %189 : vector<1x4x4xf32> to vector<4x4xf32>
      %c4_184 = arith.constant 4 : index
      %c0_185 = arith.constant 0 : index
      %c0_186 = arith.constant 0 : index
      %191 = vector.load %arg10[%c4_184, %c0_185, %c0_186] : memref<9x128x128xf32, #tpu.memory_space<vmem>>, vector<1x4x4xf32>
      %192 = vector.shape_cast %191 : vector<1x4x4xf32> to vector<4x4xf32>
      %193 = vector.shape_cast %190 : vector<4x4xf32> to vector<1x4x4xf32>
      tpu.vector_store %arg10[%c4_184, %c0_185, %c0_186], %193 {strides = array<i32>} : memref<9x128x128xf32, #tpu.memory_space<vmem>>, vector<1x4x4xf32>,
      %c5_187 = arith.constant 5 : index
      %c0_188 = arith.constant 0 : index
      %c0_189 = arith.constant 0 : index
      %194 = vector.load %arg2[%c5_187, %c0_188, %c0_189] : memref<9x4x4xf32, #tpu.memory_space<vmem>>, vector<1x4x4xf32>
      %195 = vector.shape_cast %194 : vector<1x4x4xf32> to vector<4x4xf32>
      %c5_190 = arith.constant 5 : index
      %c0_191 = arith.constant 0 : index
      %c0_192 = arith.constant 0 : index
      %196 = vector.load %arg9[%c5_190, %c0_191, %c0_192] : memref<9x128x128xf32, #tpu.memory_space<vmem>>, vector<1x4x4xf32>
      %197 = vector.shape_cast %196 : vector<1x4x4xf32> to vector<4x4xf32>
      %198 = vector.shape_cast %195 : vector<4x4xf32> to vector<1x4x4xf32>
      tpu.vector_store %arg9[%c5_190, %c0_191, %c0_192], %198 {strides = array<i32>} : memref<9x128x128xf32, #tpu.memory_space<vmem>>, vector<1x4x4xf32>,
      %c5_193 = arith.constant 5 : index
      %c0_194 = arith.constant 0 : index
      %c0_195 = arith.constant 0 : index
      %199 = vector.load %arg4[%c5_193, %c0_194, %c0_195] : memref<9x4x4xf32, #tpu.memory_space<vmem>>, vector<1x4x4xf32>
      %200 = vector.shape_cast %199 : vector<1x4x4xf32> to vector<4x4xf32>
      %c5_196 = arith.constant 5 : index
      %c0_197 = arith.constant 0 : index
      %c0_198 = arith.constant 0 : index
      %201 = vector.load %arg10[%c5_196, %c0_197, %c0_198] : memref<9x128x128xf32, #tpu.memory_space<vmem>>, vector<1x4x4xf32>
      %202 = vector.shape_cast %201 : vector<1x4x4xf32> to vector<4x4xf32>
      %203 = vector.shape_cast %200 : vector<4x4xf32> to vector<1x4x4xf32>
      tpu.vector_store %arg10[%c5_196, %c0_197, %c0_198], %203 {strides = array<i32>} : memref<9x128x128xf32, #tpu.memory_space<vmem>>, vector<1x4x4xf32>,
      %c6_199 = arith.constant 6 : index
      %c0_200 = arith.constant 0 : index
      %c0_201 = arith.constant 0 : index
      %204 = vector.load %arg2[%c6_199, %c0_200, %c0_201] : memref<9x4x4xf32, #tpu.memory_space<vmem>>, vector<1x4x4xf32>
      %205 = vector.shape_cast %204 : vector<1x4x4xf32> to vector<4x4xf32>
      %c6_202 = arith.constant 6 : index
      %c0_203 = arith.constant 0 : index
      %c0_204 = arith.constant 0 : index
      %206 = vector.load %arg9[%c6_202, %c0_203, %c0_204] : memref<9x128x128xf32, #tpu.memory_space<vmem>>, vector<1x4x4xf32>
      %207 = vector.shape_cast %206 : vector<1x4x4xf32> to vector<4x4xf32>
      %208 = vector.shape_cast %205 : vector<4x4xf32> to vector<1x4x4xf32>
      tpu.vector_store %arg9[%c6_202, %c0_203, %c0_204], %208 {strides = array<i32>} : memref<9x128x128xf32, #tpu.memory_space<vmem>>, vector<1x4x4xf32>,
      %c6_205 = arith.constant 6 : index
      %c0_206 = arith.constant 0 : index
      %c0_207 = arith.constant 0 : index
      %209 = vector.load %arg4[%c6_205, %c0_206, %c0_207] : memref<9x4x4xf32, #tpu.memory_space<vmem>>, vector<1x4x4xf32>
      %210 = vector.shape_cast %209 : vector<1x4x4xf32> to vector<4x4xf32>
      %c6_208 = arith.constant 6 : index
      %c0_209 = arith.constant 0 : index
      %c0_210 = arith.constant 0 : index
      %211 = vector.load %arg10[%c6_208, %c0_209, %c0_210] : memref<9x128x128xf32, #tpu.memory_space<vmem>>, vector<1x4x4xf32>
      %212 = vector.shape_cast %211 : vector<1x4x4xf32> to vector<4x4xf32>
      %213 = vector.shape_cast %210 : vector<4x4xf32> to vector<1x4x4xf32>
      tpu.vector_store %arg10[%c6_208, %c0_209, %c0_210], %213 {strides = array<i32>} : memref<9x128x128xf32, #tpu.memory_space<vmem>>, vector<1x4x4xf32>,
      %c7_211 = arith.constant 7 : index
      %c0_212 = arith.constant 0 : index
      %c0_213 = arith.constant 0 : index
      %214 = vector.load %arg2[%c7_211, %c0_212, %c0_213] : memref<9x4x4xf32, #tpu.memory_space<vmem>>, vector<1x4x4xf32>
      %215 = vector.shape_cast %214 : vector<1x4x4xf32> to vector<4x4xf32>
      %c7_214 = arith.constant 7 : index
      %c0_215 = arith.constant 0 : index
      %c0_216 = arith.constant 0 : index
      %216 = vector.load %arg9[%c7_214, %c0_215, %c0_216] : memref<9x128x128xf32, #tpu.memory_space<vmem>>, vector<1x4x4xf32>
      %217 = vector.shape_cast %216 : vector<1x4x4xf32> to vector<4x4xf32>
      %218 = vector.shape_cast %215 : vector<4x4xf32> to vector<1x4x4xf32>
      tpu.vector_store %arg9[%c7_214, %c0_215, %c0_216], %218 {strides = array<i32>} : memref<9x128x128xf32, #tpu.memory_space<vmem>>, vector<1x4x4xf32>,
      %c7_217 = arith.constant 7 : index
      %c0_218 = arith.constant 0 : index
      %c0_219 = arith.constant 0 : index
      %219 = vector.load %arg4[%c7_217, %c0_218, %c0_219] : memref<9x4x4xf32, #tpu.memory_space<vmem>>, vector<1x4x4xf32>
      %220 = vector.shape_cast %219 : vector<1x4x4xf32> to vector<4x4xf32>
      %c7_220 = arith.constant 7 : index
      %c0_221 = arith.constant 0 : index
      %c0_222 = arith.constant 0 : index
      %221 = vector.load %arg10[%c7_220, %c0_221, %c0_222] : memref<9x128x128xf32, #tpu.memory_space<vmem>>, vector<1x4x4xf32>
      %222 = vector.shape_cast %221 : vector<1x4x4xf32> to vector<4x4xf32>
      %223 = vector.shape_cast %220 : vector<4x4xf32> to vector<1x4x4xf32>
      tpu.vector_store %arg10[%c7_220, %c0_221, %c0_222], %223 {strides = array<i32>} : memref<9x128x128xf32, #tpu.memory_space<vmem>>, vector<1x4x4xf32>,
      %c8_223 = arith.constant 8 : index
      %c0_224 = arith.constant 0 : index
      %c0_225 = arith.constant 0 : index
      %224 = vector.load %arg2[%c8_223, %c0_224, %c0_225] : memref<9x4x4xf32, #tpu.memory_space<vmem>>, vector<1x4x4xf32>
      %225 = vector.shape_cast %224 : vector<1x4x4xf32> to vector<4x4xf32>
      %c8_226 = arith.constant 8 : index
      %c0_227 = arith.constant 0 : index
      %c0_228 = arith.constant 0 : index
      %226 = vector.load %arg9[%c8_226, %c0_227, %c0_228] : memref<9x128x128xf32, #tpu.memory_space<vmem>>, vector<1x4x4xf32>
      %227 = vector.shape_cast %226 : vector<1x4x4xf32> to vector<4x4xf32>
      %228 = vector.shape_cast %225 : vector<4x4xf32> to vector<1x4x4xf32>
      tpu.vector_store %arg9[%c8_226, %c0_227, %c0_228], %228 {strides = array<i32>} : memref<9x128x128xf32, #tpu.memory_space<vmem>>, vector<1x4x4xf32>,
      %c8_229 = arith.constant 8 : index
      %c0_230 = arith.constant 0 : index
      %c0_231 = arith.constant 0 : index
      %229 = vector.load %arg4[%c8_229, %c0_230, %c0_231] : memref<9x4x4xf32, #tpu.memory_space<vmem>>, vector<1x4x4xf32>
      %230 = vector.shape_cast %229 : vector<1x4x4xf32> to vector<4x4xf32>
      %c8_232 = arith.constant 8 : index
      %c0_233 = arith.constant 0 : index
      %c0_234 = arith.constant 0 : index
      %231 = vector.load %arg10[%c8_232, %c0_233, %c0_234] : memref<9x128x128xf32, #tpu.memory_space<vmem>>, vector<1x4x4xf32>
      %232 = vector.shape_cast %231 : vector<1x4x4xf32> to vector<4x4xf32>
      %233 = vector.shape_cast %230 : vector<4x4xf32> to vector<1x4x4xf32>
      tpu.vector_store %arg10[%c8_232, %c0_233, %c0_234], %233 {strides = array<i32>} : memref<9x128x128xf32, #tpu.memory_space<vmem>>, vector<1x4x4xf32>,
      %c0_235 = arith.constant 0 : index
      %c0_236 = arith.constant 0 : index
      %234 = vector.load %arg3[%c0_235, %c0_236] : memref<1x4xf32, #tpu.memory_space<vmem>>, vector<1x4xf32>
      %c0_237 = arith.constant 0 : index
      %c0_238 = arith.constant 0 : index
      %235 = vector.load %arg11[%c0_237, %c0_238] : memref<2x128xf32, #tpu.memory_space<vmem>>, vector<1x4xf32>
      tpu.vector_store %arg11[%c0_237, %c0_238], %234 {strides = array<i32>} : memref<2x128xf32, #tpu.memory_space<vmem>>, vector<1x4xf32>,
      %c0_239 = arith.constant 0 : index
      %c0_240 = arith.constant 0 : index
      %236 = vector.load %arg5[%c0_239, %c0_240] : memref<1x4xf32, #tpu.memory_space<vmem>>, vector<1x4xf32>
      %c1_241 = arith.constant 1 : index
      %c0_242 = arith.constant 0 : index
      %237 = vector.load %arg11[%c1_241, %c0_242] : memref<2x128xf32, #tpu.memory_space<vmem>>, vector<1x4xf32>
      tpu.vector_store %arg11[%c1_241, %c0_242], %236 {strides = array<i32>} : memref<2x128xf32, #tpu.memory_space<vmem>>, vector<1x4xf32>,
    } else {
    }
    %c0 = arith.constant 0 : index
    %c0_1 = arith.constant 0 : index
    %c0_2 = arith.constant 0 : index
    %3 = vector.load %arg1[%c0, %c0_1, %c0_2] : memref<1x328x4xf32, #tpu.memory_space<vmem>>, vector<1x328x4xf32>
    %4 = vector.shape_cast %3 : vector<1x328x4xf32> to vector<328x4xf32>
    %c0_3 = arith.constant 0 : index
    %c0_4 = arith.constant 0 : index
    %5 = vector.load %arg7[%c0_3, %c0_4] : memref<328x128xf32, #tpu.memory_space<vmem>>, vector<328x4xf32>
    tpu.vector_store %arg7[%c0_3, %c0_4], %4 {strides = array<i32>} : memref<328x128xf32, #tpu.memory_space<vmem>>, vector<328x4xf32>,
    %6 = tpu.iota {dimensions = array<i32: 0>} : vector<288x1xi32>
    %c18_i32 = arith.constant 18 : i32
    %c0_i32_5 = arith.constant 0 : i32
    %7 = arith.cmpi eq, %c18_i32, %c0_i32_5 : i32
    %c1_i32 = arith.constant 1 : i32
    %8 = arith.select %7, %c1_i32, %c18_i32 : i32
    %9 = vector.broadcast %8 : i32 to vector<288x1xi32>
    %10 = arith.remsi %6, %9 : vector<288x1xi32>
    %c0_i32_6 = arith.constant 0 : i32
    %11 = vector.broadcast %c0_i32_6 : i32 to vector<288x1xi32>
    %12 = arith.cmpi ne, %10, %11 : vector<288x1xi32>
    %c0_i32_7 = arith.constant 0 : i32
    %13 = vector.broadcast %c0_i32_7 : i32 to vector<288x1xi32>
    %14 = arith.cmpi slt, %10, %13 : vector<288x1xi32>
    %c0_i32_8 = arith.constant 0 : i32
    %15 = arith.cmpi slt, %8, %c0_i32_8 : i32
    %16 = vector.broadcast %15 : i1 to vector<288x1xi1>
    %17 = vector.broadcast %16 : vector<288x1xi1> to vector<288x1xi1>
    %18 = arith.xori %14, %17 : vector<288x1xi1>
    %19 = arith.andi %18, %12 : vector<288x1xi1>
    %20 = vector.broadcast %8 : i32 to vector<288x1xi32>
    %21 = arith.addi %10, %20 : vector<288x1xi32>
    %22 = arith.select %19, %21, %10 : vector<288x1xi1>, vector<288x1xi32>
    %c16_i32 = arith.constant 16 : i32
    %23 = vector.broadcast %c16_i32 : i32 to vector<288x1xi32>
    %24 = arith.cmpi slt, %22, %23 : vector<288x1xi32>
    %c0_9 = arith.constant 0 : index
    %c0_10 = arith.constant 0 : index
    %25 = vector.load %arg7[%c0_9, %c0_10] : memref<328x128xf32, #tpu.memory_space<vmem>>, vector<288x128xf32>
    %c0_11 = arith.constant 0 : index
    %c0_12 = arith.constant 0 : index
    %c0_13 = arith.constant 0 : index
    %26 = vector.load %arg9[%c0_11, %c0_12, %c0_13] : memref<9x128x128xf32, #tpu.memory_space<vmem>>, vector<1x128x128xf32>
    %27 = vector.shape_cast %26 : vector<1x128x128xf32> to vector<128x128xf32>
    %cst = arith.constant dense<0.000000e+00> : vector<288x128xf32>
    %28 = tpu.matmul %25, %27, %cst {dimension_numbers = #tpu.dot_dimension_numbers<[1], [0], [0], [1], [0, 0, 1, 1], [], []>} : vector<288x128xf32>, vector<128x128xf32>, vector<288x128xf32> -> vector<288x128xf32>
    %c1 = arith.constant 1 : index
    %c0_14 = arith.constant 0 : index
    %29 = vector.load %arg7[%c1, %c0_14] : memref<328x128xf32, #tpu.memory_space<vmem>>, vector<288x128xf32>
    %c1_15 = arith.constant 1 : index
    %c0_16 = arith.constant 0 : index
    %c0_17 = arith.constant 0 : index
    %30 = vector.load %arg9[%c1_15, %c0_16, %c0_17] : memref<9x128x128xf32, #tpu.memory_space<vmem>>, vector<1x128x128xf32>
    %31 = vector.shape_cast %30 : vector<1x128x128xf32> to vector<128x128xf32>
    %cst_18 = arith.constant dense<0.000000e+00> : vector<288x128xf32>
    %32 = tpu.matmul %29, %31, %cst_18 {dimension_numbers = #tpu.dot_dimension_numbers<[1], [0], [0], [1], [0, 0, 1, 1], [], []>} : vector<288x128xf32>, vector<128x128xf32>, vector<288x128xf32> -> vector<288x128xf32>
    %33 = arith.addf %28, %32 : vector<288x128xf32>
    %c2 = arith.constant 2 : index
    %c0_19 = arith.constant 0 : index
    %34 = vector.load %arg7[%c2, %c0_19] : memref<328x128xf32, #tpu.memory_space<vmem>>, vector<288x128xf32>
    %c2_20 = arith.constant 2 : index
    %c0_21 = arith.constant 0 : index
    %c0_22 = arith.constant 0 : index
    %35 = vector.load %arg9[%c2_20, %c0_21, %c0_22] : memref<9x128x128xf32, #tpu.memory_space<vmem>>, vector<1x128x128xf32>
    %36 = vector.shape_cast %35 : vector<1x128x128xf32> to vector<128x128xf32>
    %cst_23 = arith.constant dense<0.000000e+00> : vector<288x128xf32>
    %37 = tpu.matmul %34, %36, %cst_23 {dimension_numbers = #tpu.dot_dimension_numbers<[1], [0], [0], [1], [0, 0, 1, 1], [], []>} : vector<288x128xf32>, vector<128x128xf32>, vector<288x128xf32> -> vector<288x128xf32>
    %38 = arith.addf %33, %37 : vector<288x128xf32>
    %c18 = arith.constant 18 : index
    %c0_24 = arith.constant 0 : index
    %39 = vector.load %arg7[%c18, %c0_24] : memref<328x128xf32, #tpu.memory_space<vmem>>, vector<288x128xf32>
    %c3 = arith.constant 3 : index
    %c0_25 = arith.constant 0 : index
    %c0_26 = arith.constant 0 : index
    %40 = vector.load %arg9[%c3, %c0_25, %c0_26] : memref<9x128x128xf32, #tpu.memory_space<vmem>>, vector<1x128x128xf32>
    %41 = vector.shape_cast %40 : vector<1x128x128xf32> to vector<128x128xf32>
    %cst_27 = arith.constant dense<0.000000e+00> : vector<288x128xf32>
    %42 = tpu.matmul %39, %41, %cst_27 {dimension_numbers = #tpu.dot_dimension_numbers<[1], [0], [0], [1], [0, 0, 1, 1], [], []>} : vector<288x128xf32>, vector<128x128xf32>, vector<288x128xf32> -> vector<288x128xf32>
    %43 = arith.addf %38, %42 : vector<288x128xf32>
    %c19 = arith.constant 19 : index
    %c0_28 = arith.constant 0 : index
    %44 = vector.load %arg7[%c19, %c0_28] : memref<328x128xf32, #tpu.memory_space<vmem>>, vector<288x128xf32>
    %c4 = arith.constant 4 : index
    %c0_29 = arith.constant 0 : index
    %c0_30 = arith.constant 0 : index
    %45 = vector.load %arg9[%c4, %c0_29, %c0_30] : memref<9x128x128xf32, #tpu.memory_space<vmem>>, vector<1x128x128xf32>
    %46 = vector.shape_cast %45 : vector<1x128x128xf32> to vector<128x128xf32>
    %cst_31 = arith.constant dense<0.000000e+00> : vector<288x128xf32>
    %47 = tpu.matmul %44, %46, %cst_31 {dimension_numbers = #tpu.dot_dimension_numbers<[1], [0], [0], [1], [0, 0, 1, 1], [], []>} : vector<288x128xf32>, vector<128x128xf32>, vector<288x128xf32> -> vector<288x128xf32>
    %48 = arith.addf %43, %47 : vector<288x128xf32>
    %c20 = arith.constant 20 : index
    %c0_32 = arith.constant 0 : index
    %49 = vector.load %arg7[%c20, %c0_32] : memref<328x128xf32, #tpu.memory_space<vmem>>, vector<288x128xf32>
    %c5 = arith.constant 5 : index
    %c0_33 = arith.constant 0 : index
    %c0_34 = arith.constant 0 : index
    %50 = vector.load %arg9[%c5, %c0_33, %c0_34] : memref<9x128x128xf32, #tpu.memory_space<vmem>>, vector<1x128x128xf32>
    %51 = vector.shape_cast %50 : vector<1x128x128xf32> to vector<128x128xf32>
    %cst_35 = arith.constant dense<0.000000e+00> : vector<288x128xf32>
    %52 = tpu.matmul %49, %51, %cst_35 {dimension_numbers = #tpu.dot_dimension_numbers<[1], [0], [0], [1], [0, 0, 1, 1], [], []>} : vector<288x128xf32>, vector<128x128xf32>, vector<288x128xf32> -> vector<288x128xf32>
    %53 = arith.addf %48, %52 : vector<288x128xf32>
    %c36 = arith.constant 36 : index
    %c0_36 = arith.constant 0 : index
    %54 = vector.load %arg7[%c36, %c0_36] : memref<328x128xf32, #tpu.memory_space<vmem>>, vector<288x128xf32>
    %c6 = arith.constant 6 : index
    %c0_37 = arith.constant 0 : index
    %c0_38 = arith.constant 0 : index
    %55 = vector.load %arg9[%c6, %c0_37, %c0_38] : memref<9x128x128xf32, #tpu.memory_space<vmem>>, vector<1x128x128xf32>
    %56 = vector.shape_cast %55 : vector<1x128x128xf32> to vector<128x128xf32>
    %cst_39 = arith.constant dense<0.000000e+00> : vector<288x128xf32>
    %57 = tpu.matmul %54, %56, %cst_39 {dimension_numbers = #tpu.dot_dimension_numbers<[1], [0], [0], [1], [0, 0, 1, 1], [], []>} : vector<288x128xf32>, vector<128x128xf32>, vector<288x128xf32> -> vector<288x128xf32>
    %58 = arith.addf %53, %57 : vector<288x128xf32>
    %c37 = arith.constant 37 : index
    %c0_40 = arith.constant 0 : index
    %59 = vector.load %arg7[%c37, %c0_40] : memref<328x128xf32, #tpu.memory_space<vmem>>, vector<288x128xf32>
    %c7 = arith.constant 7 : index
    %c0_41 = arith.constant 0 : index
    %c0_42 = arith.constant 0 : index
    %60 = vector.load %arg9[%c7, %c0_41, %c0_42] : memref<9x128x128xf32, #tpu.memory_space<vmem>>, vector<1x128x128xf32>
    %61 = vector.shape_cast %60 : vector<1x128x128xf32> to vector<128x128xf32>
    %cst_43 = arith.constant dense<0.000000e+00> : vector<288x128xf32>
    %62 = tpu.matmul %59, %61, %cst_43 {dimension_numbers = #tpu.dot_dimension_numbers<[1], [0], [0], [1], [0, 0, 1, 1], [], []>} : vector<288x128xf32>, vector<128x128xf32>, vector<288x128xf32> -> vector<288x128xf32>
    %63 = arith.addf %58, %62 : vector<288x128xf32>
    %c38 = arith.constant 38 : index
    %c0_44 = arith.constant 0 : index
    %64 = vector.load %arg7[%c38, %c0_44] : memref<328x128xf32, #tpu.memory_space<vmem>>, vector<288x128xf32>
    %c8 = arith.constant 8 : index
    %c0_45 = arith.constant 0 : index
    %c0_46 = arith.constant 0 : index
    %65 = vector.load %arg9[%c8, %c0_45, %c0_46] : memref<9x128x128xf32, #tpu.memory_space<vmem>>, vector<1x128x128xf32>
    %66 = vector.shape_cast %65 : vector<1x128x128xf32> to vector<128x128xf32>
    %cst_47 = arith.constant dense<0.000000e+00> : vector<288x128xf32>
    %67 = tpu.matmul %64, %66, %cst_47 {dimension_numbers = #tpu.dot_dimension_numbers<[1], [0], [0], [1], [0, 0, 1, 1], [], []>} : vector<288x128xf32>, vector<128x128xf32>, vector<288x128xf32> -> vector<288x128xf32>
    %68 = arith.addf %63, %67 : vector<288x128xf32>
    %c0_48 = arith.constant 0 : index
    %c0_49 = arith.constant 0 : index
    %69 = vector.load %arg11[%c0_48, %c0_49] : memref<2x128xf32, #tpu.memory_space<vmem>>, vector<1x128xf32>
    %70 = vector.broadcast %69 : vector<1x128xf32> to vector<288x128xf32>
    %71 = arith.addf %68, %70 : vector<288x128xf32>
    %cst_50 = arith.constant 0.000000e+00 : f32
    %72 = vector.broadcast %cst_50 : f32 to vector<288x128xf32>
    %73 = arith.maximumf %71, %72 : vector<288x128xf32>
    %cst_51 = arith.constant 0.000000e+00 : f32
    %74 = vector.shape_cast %24 : vector<288x1xi1> to vector<288x1xi1>
    %75 = vector.broadcast %74 : vector<288x1xi1> to vector<288x128xi1>
    %76 = vector.broadcast %cst_51 : f32 to vector<288x128xf32>
    %77 = arith.select %75, %73, %76 : vector<288x128xi1>, vector<288x128xf32>
    %c24 = arith.constant 24 : index
    %c0_52 = arith.constant 0 : index
    %78 = vector.load %arg8[%c24, %c0_52] : memref<336x128xf32, #tpu.memory_space<vmem>>, vector<288x128xf32>
    tpu.vector_store %arg8[%c24, %c0_52], %77 {strides = array<i32>} : memref<336x128xf32, #tpu.memory_space<vmem>>, vector<288x128xf32>,
    %c5_53 = arith.constant 5 : index
    %c0_54 = arith.constant 0 : index
    %79 = vector.load %arg8[%c5_53, %c0_54] : memref<336x128xf32, #tpu.memory_space<vmem>>, vector<288x128xf32>
    %c0_55 = arith.constant 0 : index
    %c0_56 = arith.constant 0 : index
    %c0_57 = arith.constant 0 : index
    %80 = vector.load %arg10[%c0_55, %c0_56, %c0_57] : memref<9x128x128xf32, #tpu.memory_space<vmem>>, vector<1x128x128xf32>
    %81 = vector.shape_cast %80 : vector<1x128x128xf32> to vector<128x128xf32>
    %cst_58 = arith.constant dense<0.000000e+00> : vector<288x128xf32>
    %82 = tpu.matmul %79, %81, %cst_58 {dimension_numbers = #tpu.dot_dimension_numbers<[1], [0], [0], [1], [0, 0, 1, 1], [], []>} : vector<288x128xf32>, vector<128x128xf32>, vector<288x128xf32> -> vector<288x128xf32>
    %c6_59 = arith.constant 6 : index
    %c0_60 = arith.constant 0 : index
    %83 = vector.load %arg8[%c6_59, %c0_60] : memref<336x128xf32, #tpu.memory_space<vmem>>, vector<288x128xf32>
    %c1_61 = arith.constant 1 : index
    %c0_62 = arith.constant 0 : index
    %c0_63 = arith.constant 0 : index
    %84 = vector.load %arg10[%c1_61, %c0_62, %c0_63] : memref<9x128x128xf32, #tpu.memory_space<vmem>>, vector<1x128x128xf32>
    %85 = vector.shape_cast %84 : vector<1x128x128xf32> to vector<128x128xf32>
    %cst_64 = arith.constant dense<0.000000e+00> : vector<288x128xf32>
    %86 = tpu.matmul %83, %85, %cst_64 {dimension_numbers = #tpu.dot_dimension_numbers<[1], [0], [0], [1], [0, 0, 1, 1], [], []>} : vector<288x128xf32>, vector<128x128xf32>, vector<288x128xf32> -> vector<288x128xf32>
    %87 = arith.addf %82, %86 : vector<288x128xf32>
    %c7_65 = arith.constant 7 : index
    %c0_66 = arith.constant 0 : index
    %88 = vector.load %arg8[%c7_65, %c0_66] : memref<336x128xf32, #tpu.memory_space<vmem>>, vector<288x128xf32>
    %c2_67 = arith.constant 2 : index
    %c0_68 = arith.constant 0 : index
    %c0_69 = arith.constant 0 : index
    %89 = vector.load %arg10[%c2_67, %c0_68, %c0_69] : memref<9x128x128xf32, #tpu.memory_space<vmem>>, vector<1x128x128xf32>
    %90 = vector.shape_cast %89 : vector<1x128x128xf32> to vector<128x128xf32>
    %cst_70 = arith.constant dense<0.000000e+00> : vector<288x128xf32>
    %91 = tpu.matmul %88, %90, %cst_70 {dimension_numbers = #tpu.dot_dimension_numbers<[1], [0], [0], [1], [0, 0, 1, 1], [], []>} : vector<288x128xf32>, vector<128x128xf32>, vector<288x128xf32> -> vector<288x128xf32>
    %92 = arith.addf %87, %91 : vector<288x128xf32>
    %c23 = arith.constant 23 : index
    %c0_71 = arith.constant 0 : index
    %93 = vector.load %arg8[%c23, %c0_71] : memref<336x128xf32, #tpu.memory_space<vmem>>, vector<288x128xf32>
    %c3_72 = arith.constant 3 : index
    %c0_73 = arith.constant 0 : index
    %c0_74 = arith.constant 0 : index
    %94 = vector.load %arg10[%c3_72, %c0_73, %c0_74] : memref<9x128x128xf32, #tpu.memory_space<vmem>>, vector<1x128x128xf32>
    %95 = vector.shape_cast %94 : vector<1x128x128xf32> to vector<128x128xf32>
    %cst_75 = arith.constant dense<0.000000e+00> : vector<288x128xf32>
    %96 = tpu.matmul %93, %95, %cst_75 {dimension_numbers = #tpu.dot_dimension_numbers<[1], [0], [0], [1], [0, 0, 1, 1], [], []>} : vector<288x128xf32>, vector<128x128xf32>, vector<288x128xf32> -> vector<288x128xf32>
    %97 = arith.addf %92, %96 : vector<288x128xf32>
    %c24_76 = arith.constant 24 : index
    %c0_77 = arith.constant 0 : index
    %98 = vector.load %arg8[%c24_76, %c0_77] : memref<336x128xf32, #tpu.memory_space<vmem>>, vector<288x128xf32>
    %c4_78 = arith.constant 4 : index
    %c0_79 = arith.constant 0 : index
    %c0_80 = arith.constant 0 : index
    %99 = vector.load %arg10[%c4_78, %c0_79, %c0_80] : memref<9x128x128xf32, #tpu.memory_space<vmem>>, vector<1x128x128xf32>
    %100 = vector.shape_cast %99 : vector<1x128x128xf32> to vector<128x128xf32>
    %cst_81 = arith.constant dense<0.000000e+00> : vector<288x128xf32>
    %101 = tpu.matmul %98, %100, %cst_81 {dimension_numbers = #tpu.dot_dimension_numbers<[1], [0], [0], [1], [0, 0, 1, 1], [], []>} : vector<288x128xf32>, vector<128x128xf32>, vector<288x128xf32> -> vector<288x128xf32>
    %102 = arith.addf %97, %101 : vector<288x128xf32>
    %c25 = arith.constant 25 : index
    %c0_82 = arith.constant 0 : index
    %103 = vector.load %arg8[%c25, %c0_82] : memref<336x128xf32, #tpu.memory_space<vmem>>, vector<288x128xf32>
    %c5_83 = arith.constant 5 : index
    %c0_84 = arith.constant 0 : index
    %c0_85 = arith.constant 0 : index
    %104 = vector.load %arg10[%c5_83, %c0_84, %c0_85] : memref<9x128x128xf32, #tpu.memory_space<vmem>>, vector<1x128x128xf32>
    %105 = vector.shape_cast %104 : vector<1x128x128xf32> to vector<128x128xf32>
    %cst_86 = arith.constant dense<0.000000e+00> : vector<288x128xf32>
    %106 = tpu.matmul %103, %105, %cst_86 {dimension_numbers = #tpu.dot_dimension_numbers<[1], [0], [0], [1], [0, 0, 1, 1], [], []>} : vector<288x128xf32>, vector<128x128xf32>, vector<288x128xf32> -> vector<288x128xf32>
    %107 = arith.addf %102, %106 : vector<288x128xf32>
    %c41 = arith.constant 41 : index
    %c0_87 = arith.constant 0 : index
    %108 = vector.load %arg8[%c41, %c0_87] : memref<336x128xf32, #tpu.memory_space<vmem>>, vector<288x128xf32>
    %c6_88 = arith.constant 6 : index
    %c0_89 = arith.constant 0 : index
    %c0_90 = arith.constant 0 : index
    %109 = vector.load %arg10[%c6_88, %c0_89, %c0_90] : memref<9x128x128xf32, #tpu.memory_space<vmem>>, vector<1x128x128xf32>
    %110 = vector.shape_cast %109 : vector<1x128x128xf32> to vector<128x128xf32>
    %cst_91 = arith.constant dense<0.000000e+00> : vector<288x128xf32>
    %111 = tpu.matmul %108, %110, %cst_91 {dimension_numbers = #tpu.dot_dimension_numbers<[1], [0], [0], [1], [0, 0, 1, 1], [], []>} : vector<288x128xf32>, vector<128x128xf32>, vector<288x128xf32> -> vector<288x128xf32>
    %112 = arith.addf %107, %111 : vector<288x128xf32>
    %c42 = arith.constant 42 : index
    %c0_92 = arith.constant 0 : index
    %113 = vector.load %arg8[%c42, %c0_92] : memref<336x128xf32, #tpu.memory_space<vmem>>, vector<288x128xf32>
    %c7_93 = arith.constant 7 : index
    %c0_94 = arith.constant 0 : index
    %c0_95 = arith.constant 0 : index
    %114 = vector.load %arg10[%c7_93, %c0_94, %c0_95] : memref<9x128x128xf32, #tpu.memory_space<vmem>>, vector<1x128x128xf32>
    %115 = vector.shape_cast %114 : vector<1x128x128xf32> to vector<128x128xf32>
    %cst_96 = arith.constant dense<0.000000e+00> : vector<288x128xf32>
    %116 = tpu.matmul %113, %115, %cst_96 {dimension_numbers = #tpu.dot_dimension_numbers<[1], [0], [0], [1], [0, 0, 1, 1], [], []>} : vector<288x128xf32>, vector<128x128xf32>, vector<288x128xf32> -> vector<288x128xf32>
    %117 = arith.addf %112, %116 : vector<288x128xf32>
    %c43 = arith.constant 43 : index
    %c0_97 = arith.constant 0 : index
    %118 = vector.load %arg8[%c43, %c0_97] : memref<336x128xf32, #tpu.memory_space<vmem>>, vector<288x128xf32>
    %c8_98 = arith.constant 8 : index
    %c0_99 = arith.constant 0 : index
    %c0_100 = arith.constant 0 : index
    %119 = vector.load %arg10[%c8_98, %c0_99, %c0_100] : memref<9x128x128xf32, #tpu.memory_space<vmem>>, vector<1x128x128xf32>
    %120 = vector.shape_cast %119 : vector<1x128x128xf32> to vector<128x128xf32>
    %cst_101 = arith.constant dense<0.000000e+00> : vector<288x128xf32>
    %121 = tpu.matmul %118, %120, %cst_101 {dimension_numbers = #tpu.dot_dimension_numbers<[1], [0], [0], [1], [0, 0, 1, 1], [], []>} : vector<288x128xf32>, vector<128x128xf32>, vector<288x128xf32> -> vector<288x128xf32>
    %122 = arith.addf %117, %121 : vector<288x128xf32>
    %c1_102 = arith.constant 1 : index
    %c0_103 = arith.constant 0 : index
    %123 = vector.load %arg11[%c1_102, %c0_103] : memref<2x128xf32, #tpu.memory_space<vmem>>, vector<1x128xf32>
    %124 = vector.broadcast %123 : vector<1x128xf32> to vector<288x128xf32>
    %125 = arith.addf %122, %124 : vector<288x128xf32>
    %c19_104 = arith.constant 19 : index
    %c0_105 = arith.constant 0 : index
    %126 = vector.load %arg7[%c19_104, %c0_105] : memref<328x128xf32, #tpu.memory_space<vmem>>, vector<288x128xf32>
    %127 = arith.addf %125, %126 : vector<288x128xf32>
    %cst_106 = arith.constant 0.000000e+00 : f32
    %128 = vector.broadcast %cst_106 : f32 to vector<288x128xf32>
    %129 = arith.maximumf %127, %128 : vector<288x128xf32>
    %130 = vector.extract_strided_slice %129 {offsets = [0, 0], sizes = [288, 4], strides = [1, 1]} : vector<288x128xf32> to vector<288x4xf32>
    %c0_107 = arith.constant 0 : index
    %c0_108 = arith.constant 0 : index
    %c0_109 = arith.constant 0 : index
    %131 = vector.load %arg6[%c0_107, %c0_108, %c0_109] : memref<1x288x4xf32, #tpu.memory_space<vmem>>, vector<1x288x4xf32>
    %132 = vector.shape_cast %131 : vector<1x288x4xf32> to vector<288x4xf32>
    %133 = vector.shape_cast %130 : vector<288x4xf32> to vector<1x288x4xf32>
    tpu.vector_store %arg6[%c0_107, %c0_108, %c0_109], %133 {strides = array<i32>} : memref<1x288x4xf32, #tpu.memory_space<vmem>>, vector<1x288x4xf32>,
    return
  }
  func.func @transform_0(%arg0: i32) -> (i32, i32, i32) {
    %c0_i32 = arith.constant 0 : i32
    %c0_i32_0 = arith.constant 0 : i32
    %c0_i32_1 = arith.constant 0 : i32
    return %arg0, %c0_i32, %c0_i32_0 : i32, i32, i32
  }
  func.func @transform_1(%arg0: i32) -> (i32, i32, i32) {
    %c0_i32 = arith.constant 0 : i32
    %c0_i32_0 = arith.constant 0 : i32
    %c0_i32_1 = arith.constant 0 : i32
    %c0_i32_2 = arith.constant 0 : i32
    return %c0_i32, %c0_i32_0, %c0_i32_1 : i32, i32, i32
  }
  func.func @transform_2(%arg0: i32) -> (i32, i32) {
    %c0_i32 = arith.constant 0 : i32
    %c0_i32_0 = arith.constant 0 : i32
    %c0_i32_1 = arith.constant 0 : i32
    return %c0_i32, %c0_i32_0 : i32, i32
  }
  func.func @transform_3(%arg0: i32) -> (i32, i32, i32) {
    %c0_i32 = arith.constant 0 : i32
    %c0_i32_0 = arith.constant 0 : i32
    %c0_i32_1 = arith.constant 0 : i32
    %c0_i32_2 = arith.constant 0 : i32
    return %c0_i32, %c0_i32_0, %c0_i32_1 : i32, i32, i32
  }
  func.func @transform_4(%arg0: i32) -> (i32, i32) {
    %c0_i32 = arith.constant 0 : i32
    %c0_i32_0 = arith.constant 0 : i32
    %c0_i32_1 = arith.constant 0 : i32
    return %c0_i32, %c0_i32_0 : i32, i32
  }
  func.func @transform_5(%arg0: i32) -> (i32, i32, i32) {
    %c0_i32 = arith.constant 0 : i32
    %c0_i32_0 = arith.constant 0 : i32
    %c0_i32_1 = arith.constant 0 : i32
    return %arg0, %c0_i32, %c0_i32_0 : i32, i32, i32
  }
}

</mosaic_0001>

<bundles_post_ra>
// kernel: basic_block_forward.1
= control target key start
LH: loop header
LB: loop body
LE: loop exit
PB: predicated region body
PF: predicated region fallthrough
CT: control target
= control target key end

     0   :  { %s10371_s18 = smov 0   ;;  %s14035_s0 = inlined_call_operand.vmem [shape: f32[2,328,4], index: 0, kind: input, shape index: {}]   ;;  %s14036_s1 = inlined_call_operand.vmem [shape: f32[9,4,4], index: 1, kind: input, shape index: {}]   ;;  %s14037_s2 = inlined_call_operand.vmem [shape: f32[1,4], index: 2, kind: input, shape index: {}]   ;;  %s14038_s3 = inlined_call_operand.vmem [shape: f32[9,4,4], index: 3, kind: input, shape index: {}]   ;;  %s14039_s4 = inlined_call_operand.vmem [shape: f32[1,4], index: 4, kind: input, shape index: {}]   ;;  %s14040_s5 = inlined_call_operand.vmem [shape: f32[2,288,4], index: 5, kind: output, shape index: {}]  }
   0x1 LB: > { %s7734_s19 = sadd.s32 4294967295, %s10338_s18   ;;  %p7738_p0 = scmp.ge.s32.totalorder %s10338_s18, 1  ;;  %s10338_s18 = sphi %s10371_s18, %s15_s18  }
   0x2   : > { %p187_p1 = scmp.lt.s32.totalorder %s10338_s18, 3 }
   0x4   : > { %p188_p2 = pnand %p7738_p0, %p187_p1 }
   0x6   : > { %191 = sbr.rel (%p188_p2) target bundleno = 1327 (0x52f), region = 40 }
   0xb   : > { %p215_p3 = scmp.lt.s32.totalorder %s7734_s19, 1  ;;  %p7741_p4 = scmp.ne.s32.totalorder %s7734_s19, 0 }
   0xd   : > { %s216_s20 = scalar_select %p215_p3, %s7734_s19, 1 }
   0xe   : > { %228 = sbr.rel (%p7741_p4) target bundleno = 216 (0xd8), region = 44 }
   0xf   : > { %s10246_s21 = smul.u32 328, %s216_s20 }
  0x10   : > { %s10247_s22 = smul.u32 288, %s216_s20 }
  0x11   : > { %s10382_s25 = scalar_lea.vmem %s14035_s0, %s10246_s21 }
  0x12   : > { %s10387_s28 = scalar_lea.vmem %s14040_s5, %s10247_s22 }
  0x13   : > { %v10392_v0 = vld [vmem:[%s14036_s1] sm:$0xf]  ;;  %vm602_vm0 = vcmask 27648   ;;  %v10340_v2 = vmov 0.0   ;;  %v7742_v3 = vld [vmem:[%s14036_s1 + $0x4] sm:$0xf] }
  0x14   : > { %v10397_v1 = vld [vmem:[%s14038_s3] sm:$0xf]  ;;  %312 = vst [vmem:[#allocation4] sm:$0xff] %v10340_v2  ;;  %229 = vst [vmem:[#allocation2] sm:$0xff] %v10340_v2  ;;  %v7743_v4 = vld [vmem:[%s14038_s3 + $0x4] sm:$0xf] }
  0x15   : > { %230 = vst [vmem:[#allocation2 + $0x8] sm:$0xff] %v10340_v2  ;;  %231 = vst [vmem:[#allocation2 + $0x10] sm:$0xff] %v10340_v2  ;;  %v7744_v5 = vld [vmem:[%s14036_s1 + $0x8] sm:$0xf]  ;;  %v7746_v7 = vld [vmem:[%s14036_s1 + $0xc] sm:$0xf] }
  0x16   : > { %232 = vst [vmem:[#allocation2 + $0x18] sm:$0xff] %v10340_v2  ;;  %233 = vst [vmem:[#allocation2 + $0x20] sm:$0xff] %v10340_v2  ;;  %v7745_v6 = vld [vmem:[%s14038_s3 + $0x8] sm:$0xf]  ;;  %v7747_v8 = vld [vmem:[%s14038_s3 + $0xc] sm:$0xf] }
  0x17   : > { %234 = vst [vmem:[#allocation2 + $0x28] sm:$0xff] %v10340_v2  ;;  %235 = vst [vmem:[#allocation2 + $0x30] sm:$0xff] %v10340_v2  ;;  %v7748_v9 = vld [vmem:[%s14036_s1 + $0x10] sm:$0xf]  ;;  %v7750_v11 = vld [vmem:[%s14036_s1 + $0x14] sm:$0xf] }
  0x18   : > { %236 = vst [vmem:[#allocation2 + $0x38] sm:$0xff] %v10340_v2  ;;  %237 = vst [vmem:[#allocation2 + $0x40] sm:$0xff] %v10340_v2  ;;  %v7749_v10 = vld [vmem:[%s14038_s3 + $0x10] sm:$0xf]  ;;  %v7751_v12 = vld [vmem:[%s14038_s3 + $0x14] sm:$0xf] }
  0x19   : > { %238 = vst [vmem:[#allocation2 + $0x48] sm:$0xff] %v10340_v2  ;;  %239 = vst [vmem:[#allocation2 + $0x50] sm:$0xff] %v10340_v2  ;;  %v7752_v13 = vld [vmem:[%s14036_s1 + $0x18] sm:$0xf]  ;;  %v7754_v15 = vld [vmem:[%s14036_s1 + $0x1c] sm:$0xf] }
  0x1a   : > { %240 = vst [vmem:[#allocation2 + $0x58] sm:$0xff] %v10340_v2  ;;  %241 = vst [vmem:[#allocation2 + $0x60] sm:$0xff] %v10340_v2  ;;  %v7753_v14 = vld [vmem:[%s14038_s3 + $0x18] sm:$0xf]  ;;  %v7755_v16 = vld [vmem:[%s14038_s3 + $0x1c] sm:$0xf] }
  0x1b   : > { %242 = vst [vmem:[#allocation2 + $0x68] sm:$0xff] %v10340_v2  ;;  %243 = vst [vmem:[#allocation2 + $0x70] sm:$0xff] %v10340_v2  ;;  %v7756_v17 = vld [vmem:[%s14036_s1 + $0x20] sm:$0xf]  ;;  %vm671_vm1 = vcmask 24576  }
  0x1c   : > { %244 = vst [vmem:[#allocation2 + $0x78] sm:$0xff] %v10340_v2  ;;  %245 = vst [vmem:[#allocation2 + $0x80] sm:$0xff] %v10340_v2  ;;  %v7757_v18 = vld [vmem:[%s14038_s3 + $0x20] sm:$0xf] }
  0x1d   : > { %246 = vst [vmem:[#allocation2 + $0x88] sm:$0xff] %v10340_v2  ;;  %247 = vst [vmem:[#allocation2 + $0x90] sm:$0xff] %v10340_v2  ;;  %v670_v19 = vld [vmem:[%s14037_s2] sm:$0x1] }
  0x1e   : > { %248 = vst [vmem:[#allocation2 + $0x98] sm:$0xff] %v10340_v2  ;;  %249 = vst [vmem:[#allocation2 + $0xa0] sm:$0xff] %v10340_v2  ;;  %v673_v20 = vld [vmem:[%s14039_s4] sm:$0x1] }
  0x1f   : > { %250 = vst [vmem:[#allocation2 + $0xa8] sm:$0xff] %v10340_v2  ;;  %251 = vst [vmem:[#allocation2 + $0xb0] sm:$0xff] %v10340_v2 }
  0x20   : > { %252 = vst [vmem:[#allocation2 + $0xb8] sm:$0xff] %v10340_v2  ;;  %253 = vst [vmem:[#allocation2 + $0xc0] sm:$0xff] %v10340_v2 }
  0x21   : > { %254 = vst [vmem:[#allocation2 + $0xc8] sm:$0xff] %v10340_v2  ;;  %255 = vst [vmem:[#allocation2 + $0xd0] sm:$0xff] %v10340_v2 }
  0x22   : > { %256 = vst [vmem:[#allocation2 + $0xd8] sm:$0xff] %v10340_v2  ;;  %257 = vst [vmem:[#allocation2 + $0xe0] sm:$0xff] %v10340_v2 }
  0x23   : > { %258 = vst [vmem:[#allocation2 + $0xe8] sm:$0xff] %v10340_v2  ;;  %259 = vst [vmem:[#allocation2 + $0xf0] sm:$0xff] %v10340_v2 }
  0x24   : > { %260 = vst [vmem:[#allocation2 + $0xf8] sm:$0xff] %v10340_v2  ;;  %261 = vst [vmem:[#allocation2 + $0x100] sm:$0xff] %v10340_v2 }
  0x25   : > { %262 = vst [vmem:[#allocation2 + $0x108] sm:$0xff] %v10340_v2  ;;  %263 = vst [vmem:[#allocation2 + $0x110] sm:$0xff] %v10340_v2 }
  0x26   : > { %264 = vst [vmem:[#allocation2 + $0x118] sm:$0xff] %v10340_v2  ;;  %265 = vst [vmem:[#allocation2 + $0x120] sm:$0xff] %v10340_v2 }
  0x27   : > { %266 = vst [vmem:[#allocation2 + $0x128] sm:$0xff] %v10340_v2  ;;  %267 = vst [vmem:[#allocation2 + $0x130] sm:$0xff] %v10340_v2 }
  0x28   : > { %268 = vst [vmem:[#allocation2 + $0x138] sm:$0xff] %v10340_v2  ;;  %269 = vst [vmem:[#allocation2 + $0x140] sm:$0xff] %v10340_v2 }
  0x29   : > { %270 = vst [vmem:[#allocation3] sm:$0xff] %v10340_v2  ;;  %271 = vst [vmem:[#allocation3 + $0x8] sm:$0xff] %v10340_v2 }
  0x2a   : > { %272 = vst [vmem:[#allocation3 + $0x10] sm:$0xff] %v10340_v2  ;;  %273 = vst [vmem:[#allocation3 + $0x18] sm:$0xff] %v10340_v2 }
  0x2b   : > { %274 = vst [vmem:[#allocation3 + $0x20] sm:$0xff] %v10340_v2  ;;  %275 = vst [vmem:[#allocation3 + $0x28] sm:$0xff] %v10340_v2 }
  0x2c   : > { %276 = vst [vmem:[#allocation3 + $0x30] sm:$0xff] %v10340_v2  ;;  %277 = vst [vmem:[#allocation3 + $0x38] sm:$0xff] %v10340_v2 }
  0x2d   : > { %278 = vst [vmem:[#allocation3 + $0x40] sm:$0xff] %v10340_v2  ;;  %279 = vst [vmem:[#allocation3 + $0x48] sm:$0xff] %v10340_v2 }
  0x2e   : > { %280 = vst [vmem:[#allocation3 + $0x50] sm:$0xff] %v10340_v2  ;;  %281 = vst [vmem:[#allocation3 + $0x58] sm:$0xff] %v10340_v2 }
  0x2f   : > { %282 = vst [vmem:[#allocation3 + $0x60] sm:$0xff] %v10340_v2  ;;  %283 = vst [vmem:[#allocation3 + $0x68] sm:$0xff] %v10340_v2 }
  0x30   : > { %284 = vst [vmem:[#allocation3 + $0x70] sm:$0xff] %v10340_v2  ;;  %285 = vst [vmem:[#allocation3 + $0x78] sm:$0xff] %v10340_v2 }
  0x31   : > { %286 = vst [vmem:[#allocation3 + $0x80] sm:$0xff] %v10340_v2  ;;  %287 = vst [vmem:[#allocation3 + $0x88] sm:$0xff] %v10340_v2 }
  0x32   : > { %288 = vst [vmem:[#allocation3 + $0x90] sm:$0xff] %v10340_v2  ;;  %289 = vst [vmem:[#allocation3 + $0x98] sm:$0xff] %v10340_v2 }
  0x33   : > { %290 = vst [vmem:[#allocation3 + $0xa0] sm:$0xff] %v10340_v2  ;;  %291 = vst [vmem:[#allocation3 + $0xa8] sm:$0xff] %v10340_v2 }
  0x34   : > { %292 = vst [vmem:[#allocation3 + $0xb0] sm:$0xff] %v10340_v2  ;;  %293 = vst [vmem:[#allocation3 + $0xb8] sm:$0xff] %v10340_v2 }
  0x35   : > { %294 = vst [vmem:[#allocation3 + $0xc0] sm:$0xff] %v10340_v2  ;;  %295 = vst [vmem:[#allocation3 + $0xc8] sm:$0xff] %v10340_v2 }
  0x36   : > { %296 = vst [vmem:[#allocation3 + $0xd0] sm:$0xff] %v10340_v2  ;;  %297 = vst [vmem:[#allocation3 + $0xd8] sm:$0xff] %v10340_v2 }
  0x37   : > { %298 = vst [vmem:[#allocation3 + $0xe0] sm:$0xff] %v10340_v2  ;;  %299 = vst [vmem:[#allocation3 + $0xe8] sm:$0xff] %v10340_v2 }
  0x38   : > { %300 = vst [vmem:[#allocation3 + $0xf0] sm:$0xff] %v10340_v2  ;;  %301 = vst [vmem:[#allocation3 + $0xf8] sm:$0xff] %v10340_v2 }
  0x39   : > { %302 = vst [vmem:[#allocation3 + $0x100] sm:$0xff] %v10340_v2  ;;  %303 = vst [vmem:[#allocation3 + $0x108] sm:$0xff] %v10340_v2 }
  0x3a   : > { %304 = vst [vmem:[#allocation3 + $0x110] sm:$0xff] %v10340_v2  ;;  %305 = vst [vmem:[#allocation3 + $0x118] sm:$0xff] %v10340_v2 }
  0x3b   : > { %306 = vst [vmem:[#allocation3 + $0x120] sm:$0xff] %v10340_v2  ;;  %307 = vst [vmem:[#allocation3 + $0x128] sm:$0xff] %v10340_v2 }
  0x3c   : > { %308 = vst [vmem:[#allocation3 + $0x130] sm:$0xff] %v10340_v2  ;;  %309 = vst [vmem:[#allocation3 + $0x138] sm:$0xff] %v10340_v2 }
  0x3d   : > { %310 = vst [vmem:[#allocation3 + $0x140] sm:$0xff] %v10340_v2  ;;  %311 = vst [vmem:[#allocation3 + $0x148] sm:$0xff] %v10340_v2 }
  0x3e   : > { %313 = vst [vmem:[#allocation4 + $0x8] sm:$0xff] %v10340_v2  ;;  %314 = vst [vmem:[#allocation4 + $0x10] sm:$0xff] %v10340_v2 }
  0x3f   : > { %315 = vst [vmem:[#allocation4 + $0x18] sm:$0xff] %v10340_v2  ;;  %316 = vst [vmem:[#allocation4 + $0x20] sm:$0xff] %v10340_v2 }
  0x40   : > { %317 = vst [vmem:[#allocation4 + $0x28] sm:$0xff] %v10340_v2  ;;  %318 = vst [vmem:[#allocation4 + $0x30] sm:$0xff] %v10340_v2 }
  0x41   : > { %319 = vst [vmem:[#allocation4 + $0x38] sm:$0xff] %v10340_v2  ;;  %320 = vst [vmem:[#allocation4 + $0x40] sm:$0xff] %v10340_v2 }
  0x42   : > { %321 = vst [vmem:[#allocation4 + $0x48] sm:$0xff] %v10340_v2  ;;  %322 = vst [vmem:[#allocation4 + $0x50] sm:$0xff] %v10340_v2 }
  0x43   : > { %323 = vst [vmem:[#allocation4 + $0x58] sm:$0xff] %v10340_v2  ;;  %324 = vst [vmem:[#allocation4 + $0x60] sm:$0xff] %v10340_v2 }
  0x44   : > { %325 = vst [vmem:[#allocation4 + $0x68] sm:$0xff] %v10340_v2  ;;  %326 = vst [vmem:[#allocation4 + $0x70] sm:$0xff] %v10340_v2 }
  0x45   : > { %327 = vst [vmem:[#allocation4 + $0x78] sm:$0xff] %v10340_v2  ;;  %328 = vst [vmem:[#allocation4 + $0x80] sm:$0xff] %v10340_v2 }
  0x46   : > { %329 = vst [vmem:[#allocation4 + $0x88] sm:$0xff] %v10340_v2  ;;  %330 = vst [vmem:[#allocation4 + $0x90] sm:$0xff] %v10340_v2 }
  0x47   : > { %331 = vst [vmem:[#allocation4 + $0x98] sm:$0xff] %v10340_v2  ;;  %332 = vst [vmem:[#allocation4 + $0xa0] sm:$0xff] %v10340_v2 }
  0x48   : > { %333 = vst [vmem:[#allocation4 + $0xa8] sm:$0xff] %v10340_v2  ;;  %334 = vst [vmem:[#allocation4 + $0xb0] sm:$0xff] %v10340_v2 }
  0x49   : > { %335 = vst [vmem:[#allocation4 + $0xb8] sm:$0xff] %v10340_v2  ;;  %336 = vst [vmem:[#allocation4 + $0xc0] sm:$0xff] %v10340_v2 }
  0x4a   : > { %337 = vst [vmem:[#allocation4 + $0xc8] sm:$0xff] %v10340_v2  ;;  %338 = vst [vmem:[#allocation4 + $0xd0] sm:$0xff] %v10340_v2 }
  0x4b   : > { %339 = vst [vmem:[#allocation4 + $0xd8] sm:$0xff] %v10340_v2  ;;  %340 = vst [vmem:[#allocation4 + $0xe0] sm:$0xff] %v10340_v2 }
  0x4c   : > { %341 = vst [vmem:[#allocation4 + $0xe8] sm:$0xff] %v10340_v2  ;;  %342 = vst [vmem:[#allocation4 + $0xf0] sm:$0xff] %v10340_v2 }
  0x4d   : > { %343 = vst [vmem:[#allocation4 + $0xf8] sm:$0xff] %v10340_v2  ;;  %344 = vst [vmem:[#allocation4 + $0x100] sm:$0xff] %v10340_v2 }
  0x4e   : > { %345 = vst [vmem:[#allocation4 + $0x108] sm:$0xff] %v10340_v2  ;;  %346 = vst [vmem:[#allocation4 + $0x110] sm:$0xff] %v10340_v2 }
  0x4f   : > { %347 = vst [vmem:[#allocation4 + $0x118] sm:$0xff] %v10340_v2  ;;  %348 = vst [vmem:[#allocation4 + $0x120] sm:$0xff] %v10340_v2 }
  0x50   : > { %349 = vst [vmem:[#allocation4 + $0x128] sm:$0xff] %v10340_v2  ;;  %350 = vst [vmem:[#allocation4 + $0x130] sm:$0xff] %v10340_v2 }
  0x51   : > { %351 = vst [vmem:[#allocation4 + $0x138] sm:$0xff] %v10340_v2  ;;  %352 = vst [vmem:[#allocation4 + $0x140] sm:$0xff] %v10340_v2 }
  0x52   : > { %353 = vst [vmem:[#allocation4 + $0x148] sm:$0xff] %v10340_v2  ;;  %354 = vst [vmem:[#allocation4 + $0x150] sm:$0xff] %v10340_v2 }
  0x53   : > { %355 = vst [vmem:[#allocation4 + $0x158] sm:$0xff] %v10340_v2  ;;  %356 = vst [vmem:[#allocation4 + $0x160] sm:$0xff] %v10340_v2 }
  0x54   : > { %357 = vst [vmem:[#allocation4 + $0x168] sm:$0xff] %v10340_v2  ;;  %358 = vst [vmem:[#allocation4 + $0x170] sm:$0xff] %v10340_v2 }
  0x55   : > { %359 = vst [vmem:[#allocation4 + $0x178] sm:$0xff] %v10340_v2  ;;  %360 = vst [vmem:[#allocation4 + $0x180] sm:$0xff] %v10340_v2 }
  0x56   : > { %361 = vst [vmem:[#allocation4 + $0x188] sm:$0xff] %v10340_v2  ;;  %362 = vst [vmem:[#allocation4 + $0x190] sm:$0xff] %v10340_v2 }
  0x57   : > { %363 = vst [vmem:[#allocation4 + $0x198] sm:$0xff] %v10340_v2  ;;  %364 = vst [vmem:[#allocation4 + $0x1a0] sm:$0xff] %v10340_v2 }
  0x58   : > { %365 = vst [vmem:[#allocation4 + $0x1a8] sm:$0xff] %v10340_v2  ;;  %366 = vst [vmem:[#allocation4 + $0x1b0] sm:$0xff] %v10340_v2 }
  0x59   : > { %367 = vst [vmem:[#allocation4 + $0x1b8] sm:$0xff] %v10340_v2  ;;  %368 = vst [vmem:[#allocation4 + $0x1c0] sm:$0xff] %v10340_v2 }
  0x5a   : > { %369 = vst [vmem:[#allocation4 + $0x1c8] sm:$0xff] %v10340_v2  ;;  %370 = vst [vmem:[#allocation4 + $0x1d0] sm:$0xff] %v10340_v2 }
  0x5b   : > { %371 = vst [vmem:[#allocation4 + $0x1d8] sm:$0xff] %v10340_v2  ;;  %372 = vst [vmem:[#allocation4 + $0x1e0] sm:$0xff] %v10340_v2 }
  0x5c   : > { %373 = vst [vmem:[#allocation4 + $0x1e8] sm:$0xff] %v10340_v2  ;;  %374 = vst [vmem:[#allocation4 + $0x1f0] sm:$0xff] %v10340_v2 }
  0x5d   : > { %375 = vst [vmem:[#allocation4 + $0x1f8] sm:$0xff] %v10340_v2  ;;  %376 = vst [vmem:[#allocation4 + $0x200] sm:$0xff] %v10340_v2 }
  0x5e   : > { %377 = vst [vmem:[#allocation4 + $0x208] sm:$0xff] %v10340_v2  ;;  %378 = vst [vmem:[#allocation4 + $0x210] sm:$0xff] %v10340_v2 }
  0x5f   : > { %379 = vst [vmem:[#allocation4 + $0x218] sm:$0xff] %v10340_v2  ;;  %380 = vst [vmem:[#allocation4 + $0x220] sm:$0xff] %v10340_v2 }
  0x60   : > { %381 = vst [vmem:[#allocation4 + $0x228] sm:$0xff] %v10340_v2  ;;  %382 = vst [vmem:[#allocation4 + $0x230] sm:$0xff] %v10340_v2 }
  0x61   : > { %383 = vst [vmem:[#allocation4 + $0x238] sm:$0xff] %v10340_v2  ;;  %384 = vst [vmem:[#allocation4 + $0x240] sm:$0xff] %v10340_v2 }
  0x62   : > { %385 = vst [vmem:[#allocation4 + $0x248] sm:$0xff] %v10340_v2  ;;  %386 = vst [vmem:[#allocation4 + $0x250] sm:$0xff] %v10340_v2 }
  0x63   : > { %387 = vst [vmem:[#allocation4 + $0x258] sm:$0xff] %v10340_v2  ;;  %388 = vst [vmem:[#allocation4 + $0x260] sm:$0xff] %v10340_v2 }
  0x64   : > { %389 = vst [vmem:[#allocation4 + $0x268] sm:$0xff] %v10340_v2  ;;  %390 = vst [vmem:[#allocation4 + $0x270] sm:$0xff] %v10340_v2 }
  0x65   : > { %391 = vst [vmem:[#allocation4 + $0x278] sm:$0xff] %v10340_v2  ;;  %392 = vst [vmem:[#allocation4 + $0x280] sm:$0xff] %v10340_v2 }
  0x66   : > { %393 = vst [vmem:[#allocation4 + $0x288] sm:$0xff] %v10340_v2  ;;  %394 = vst [vmem:[#allocation4 + $0x290] sm:$0xff] %v10340_v2 }
  0x67   : > { %395 = vst [vmem:[#allocation4 + $0x298] sm:$0xff] %v10340_v2  ;;  %396 = vst [vmem:[#allocation4 + $0x2a0] sm:$0xff] %v10340_v2 }
  0x68   : > { %397 = vst [vmem:[#allocation4 + $0x2a8] sm:$0xff] %v10340_v2  ;;  %398 = vst [vmem:[#allocation4 + $0x2b0] sm:$0xff] %v10340_v2 }
  0x69   : > { %399 = vst [vmem:[#allocation4 + $0x2b8] sm:$0xff] %v10340_v2  ;;  %400 = vst [vmem:[#allocation4 + $0x2c0] sm:$0xff] %v10340_v2 }
  0x6a   : > { %401 = vst [vmem:[#allocation4 + $0x2c8] sm:$0xff] %v10340_v2  ;;  %402 = vst [vmem:[#allocation4 + $0x2d0] sm:$0xff] %v10340_v2 }
  0x6b   : > { %403 = vst [vmem:[#allocation4 + $0x2d8] sm:$0xff] %v10340_v2  ;;  %404 = vst [vmem:[#allocation4 + $0x2e0] sm:$0xff] %v10340_v2 }
  0x6c   : > { %405 = vst [vmem:[#allocation4 + $0x2e8] sm:$0xff] %v10340_v2  ;;  %406 = vst [vmem:[#allocation4 + $0x2f0] sm:$0xff] %v10340_v2 }
  0x6d   : > { %407 = vst [vmem:[#allocation4 + $0x2f8] sm:$0xff] %v10340_v2  ;;  %408 = vst [vmem:[#allocation4 + $0x300] sm:$0xff] %v10340_v2 }
  0x6e   : > { %409 = vst [vmem:[#allocation4 + $0x308] sm:$0xff] %v10340_v2  ;;  %410 = vst [vmem:[#allocation4 + $0x310] sm:$0xff] %v10340_v2 }
  0x6f   : > { %411 = vst [vmem:[#allocation4 + $0x318] sm:$0xff] %v10340_v2  ;;  %412 = vst [vmem:[#allocation4 + $0x320] sm:$0xff] %v10340_v2 }
  0x70   : > { %413 = vst [vmem:[#allocation4 + $0x328] sm:$0xff] %v10340_v2  ;;  %414 = vst [vmem:[#allocation4 + $0x330] sm:$0xff] %v10340_v2 }
  0x71   : > { %415 = vst [vmem:[#allocation4 + $0x338] sm:$0xff] %v10340_v2  ;;  %416 = vst [vmem:[#allocation4 + $0x340] sm:$0xff] %v10340_v2 }
  0x72   : > { %417 = vst [vmem:[#allocation4 + $0x348] sm:$0xff] %v10340_v2  ;;  %418 = vst [vmem:[#allocation4 + $0x350] sm:$0xff] %v10340_v2 }
  0x73   : > { %419 = vst [vmem:[#allocation4 + $0x358] sm:$0xff] %v10340_v2  ;;  %420 = vst [vmem:[#allocation4 + $0x360] sm:$0xff] %v10340_v2 }
  0x74   : > { %421 = vst [vmem:[#allocation4 + $0x368] sm:$0xff] %v10340_v2  ;;  %422 = vst [vmem:[#allocation4 + $0x370] sm:$0xff] %v10340_v2 }
  0x75   : > { %423 = vst [vmem:[#allocation4 + $0x378] sm:$0xff] %v10340_v2  ;;  %424 = vst [vmem:[#allocation4 + $0x380] sm:$0xff] %v10340_v2 }
  0x76   : > { %425 = vst [vmem:[#allocation4 + $0x388] sm:$0xff] %v10340_v2  ;;  %426 = vst [vmem:[#allocation4 + $0x390] sm:$0xff] %v10340_v2 }
  0x77   : > { %427 = vst [vmem:[#allocation4 + $0x398] sm:$0xff] %v10340_v2  ;;  %428 = vst [vmem:[#allocation4 + $0x3a0] sm:$0xff] %v10340_v2 }
  0x78   : > { %429 = vst [vmem:[#allocation4 + $0x3a8] sm:$0xff] %v10340_v2  ;;  %430 = vst [vmem:[#allocation4 + $0x3b0] sm:$0xff] %v10340_v2 }
  0x79   : > { %431 = vst [vmem:[#allocation4 + $0x3b8] sm:$0xff] %v10340_v2  ;;  %432 = vst [vmem:[#allocation4 + $0x3c0] sm:$0xff] %v10340_v2 }
  0x7a   : > { %433 = vst [vmem:[#allocation4 + $0x3c8] sm:$0xff] %v10340_v2  ;;  %434 = vst [vmem:[#allocation4 + $0x3d0] sm:$0xff] %v10340_v2 }
  0x7b   : > { %435 = vst [vmem:[#allocation4 + $0x3d8] sm:$0xff] %v10340_v2  ;;  %436 = vst [vmem:[#allocation4 + $0x3e0] sm:$0xff] %v10340_v2 }
  0x7c   : > { %437 = vst [vmem:[#allocation4 + $0x3e8] sm:$0xff] %v10340_v2  ;;  %438 = vst [vmem:[#allocation4 + $0x3f0] sm:$0xff] %v10340_v2 }
  0x7d   : > { %439 = vst [vmem:[#allocation4 + $0x3f8] sm:$0xff] %v10340_v2  ;;  %440 = vst [vmem:[#allocation4 + $0x400] sm:$0xff] %v10340_v2 }
  0x7e   : > { %441 = vst [vmem:[#allocation4 + $0x408] sm:$0xff] %v10340_v2  ;;  %442 = vst [vmem:[#allocation4 + $0x410] sm:$0xff] %v10340_v2 }
  0x7f   : > { %443 = vst [vmem:[#allocation4 + $0x418] sm:$0xff] %v10340_v2  ;;  %444 = vst [vmem:[#allocation4 + $0x420] sm:$0xff] %v10340_v2 }
  0x80   : > { %445 = vst [vmem:[#allocation4 + $0x428] sm:$0xff] %v10340_v2  ;;  %446 = vst [vmem:[#allocation4 + $0x430] sm:$0xff] %v10340_v2 }
  0x81   : > { %447 = vst [vmem:[#allocation4 + $0x438] sm:$0xff] %v10340_v2  ;;  %448 = vst [vmem:[#allocation4 + $0x440] sm:$0xff] %v10340_v2 }
  0x82   : > { %449 = vst [vmem:[#allocation4 + $0x448] sm:$0xff] %v10340_v2  ;;  %450 = vst [vmem:[#allocation4 + $0x450] sm:$0xff] %v10340_v2 }
  0x83   : > { %451 = vst [vmem:[#allocation4 + $0x458] sm:$0xff] %v10340_v2  ;;  %452 = vst [vmem:[#allocation4 + $0x460] sm:$0xff] %v10340_v2 }
  0x84   : > { %453 = vst [vmem:[#allocation4 + $0x468] sm:$0xff] %v10340_v2  ;;  %454 = vst [vmem:[#allocation4 + $0x470] sm:$0xff] %v10340_v2 }
  0x85   : > { %455 = vst [vmem:[#allocation4 + $0x478] sm:$0xff] %v10340_v2  ;;  %456 = vst [vmem:[#allocation5] sm:$0xff] %v10340_v2 }
  0x86   : > { %457 = vst [vmem:[#allocation5 + $0x8] sm:$0xff] %v10340_v2  ;;  %458 = vst [vmem:[#allocation5 + $0x10] sm:$0xff] %v10340_v2 }
  0x87   : > { %459 = vst [vmem:[#allocation5 + $0x18] sm:$0xff] %v10340_v2  ;;  %460 = vst [vmem:[#allocation5 + $0x20] sm:$0xff] %v10340_v2 }
  0x88   : > { %461 = vst [vmem:[#allocation5 + $0x28] sm:$0xff] %v10340_v2  ;;  %462 = vst [vmem:[#allocation5 + $0x30] sm:$0xff] %v10340_v2 }
  0x89   : > { %463 = vst [vmem:[#allocation5 + $0x38] sm:$0xff] %v10340_v2  ;;  %464 = vst [vmem:[#allocation5 + $0x40] sm:$0xff] %v10340_v2 }
  0x8a   : > { %465 = vst [vmem:[#allocation5 + $0x48] sm:$0xff] %v10340_v2  ;;  %466 = vst [vmem:[#allocation5 + $0x50] sm:$0xff] %v10340_v2 }
  0x8b   : > { %467 = vst [vmem:[#allocation5 + $0x58] sm:$0xff] %v10340_v2  ;;  %468 = vst [vmem:[#allocation5 + $0x60] sm:$0xff] %v10340_v2 }
  0x8c   : > { %469 = vst [vmem:[#allocation5 + $0x68] sm:$0xff] %v10340_v2  ;;  %470 = vst [vmem:[#allocation5 + $0x70] sm:$0xff] %v10340_v2 }
  0x8d   : > { %471 = vst [vmem:[#allocation5 + $0x78] sm:$0xff] %v10340_v2  ;;  %472 = vst [vmem:[#allocation5 + $0x80] sm:$0xff] %v10340_v2 }
  0x8e   : > { %473 = vst [vmem:[#allocation5 + $0x88] sm:$0xff] %v10340_v2  ;;  %474 = vst [vmem:[#allocation5 + $0x90] sm:$0xff] %v10340_v2 }
  0x8f   : > { %475 = vst [vmem:[#allocation5 + $0x98] sm:$0xff] %v10340_v2  ;;  %476 = vst [vmem:[#allocation5 + $0xa0] sm:$0xff] %v10340_v2 }
  0x90   : > { %477 = vst [vmem:[#allocation5 + $0xa8] sm:$0xff] %v10340_v2  ;;  %478 = vst [vmem:[#allocation5 + $0xb0] sm:$0xff] %v10340_v2 }
  0x91   : > { %479 = vst [vmem:[#allocation5 + $0xb8] sm:$0xff] %v10340_v2  ;;  %480 = vst [vmem:[#allocation5 + $0xc0] sm:$0xff] %v10340_v2 }
  0x92   : > { %481 = vst [vmem:[#allocation5 + $0xc8] sm:$0xff] %v10340_v2  ;;  %482 = vst [vmem:[#allocation5 + $0xd0] sm:$0xff] %v10340_v2 }
  0x93   : > { %483 = vst [vmem:[#allocation5 + $0xd8] sm:$0xff] %v10340_v2  ;;  %484 = vst [vmem:[#allocation5 + $0xe0] sm:$0xff] %v10340_v2 }
  0x94   : > { %485 = vst [vmem:[#allocation5 + $0xe8] sm:$0xff] %v10340_v2  ;;  %486 = vst [vmem:[#allocation5 + $0xf0] sm:$0xff] %v10340_v2 }
  0x95   : > { %487 = vst [vmem:[#allocation5 + $0xf8] sm:$0xff] %v10340_v2  ;;  %488 = vst [vmem:[#allocation5 + $0x100] sm:$0xff] %v10340_v2 }
  0x96   : > { %489 = vst [vmem:[#allocation5 + $0x108] sm:$0xff] %v10340_v2  ;;  %490 = vst [vmem:[#allocation5 + $0x110] sm:$0xff] %v10340_v2 }
  0x97   : > { %491 = vst [vmem:[#allocation5 + $0x118] sm:$0xff] %v10340_v2  ;;  %492 = vst [vmem:[#allocation5 + $0x120] sm:$0xff] %v10340_v2 }
  0x98   : > { %493 = vst [vmem:[#allocation5 + $0x128] sm:$0xff] %v10340_v2  ;;  %494 = vst [vmem:[#allocation5 + $0x130] sm:$0xff] %v10340_v2 }
  0x99   : > { %495 = vst [vmem:[#allocation5 + $0x138] sm:$0xff] %v10340_v2  ;;  %496 = vst [vmem:[#allocation5 + $0x140] sm:$0xff] %v10340_v2 }
  0x9a   : > { %497 = vst [vmem:[#allocation5 + $0x148] sm:$0xff] %v10340_v2  ;;  %498 = vst [vmem:[#allocation5 + $0x150] sm:$0xff] %v10340_v2 }
  0x9b   : > { %499 = vst [vmem:[#allocation5 + $0x158] sm:$0xff] %v10340_v2  ;;  %500 = vst [vmem:[#allocation5 + $0x160] sm:$0xff] %v10340_v2 }
  0x9c   : > { %501 = vst [vmem:[#allocation5 + $0x168] sm:$0xff] %v10340_v2  ;;  %502 = vst [vmem:[#allocation5 + $0x170] sm:$0xff] %v10340_v2 }
  0x9d   : > { %503 = vst [vmem:[#allocation5 + $0x178] sm:$0xff] %v10340_v2  ;;  %504 = vst [vmem:[#allocation5 + $0x180] sm:$0xff] %v10340_v2 }
  0x9e   : > { %505 = vst [vmem:[#allocation5 + $0x188] sm:$0xff] %v10340_v2  ;;  %506 = vst [vmem:[#allocation5 + $0x190] sm:$0xff] %v10340_v2 }
  0x9f   : > { %507 = vst [vmem:[#allocation5 + $0x198] sm:$0xff] %v10340_v2  ;;  %508 = vst [vmem:[#allocation5 + $0x1a0] sm:$0xff] %v10340_v2 }
  0xa0   : > { %509 = vst [vmem:[#allocation5 + $0x1a8] sm:$0xff] %v10340_v2  ;;  %510 = vst [vmem:[#allocation5 + $0x1b0] sm:$0xff] %v10340_v2 }
  0xa1   : > { %511 = vst [vmem:[#allocation5 + $0x1b8] sm:$0xff] %v10340_v2  ;;  %512 = vst [vmem:[#allocation5 + $0x1c0] sm:$0xff] %v10340_v2 }
  0xa2   : > { %513 = vst [vmem:[#allocation5 + $0x1c8] sm:$0xff] %v10340_v2  ;;  %514 = vst [vmem:[#allocation5 + $0x1d0] sm:$0xff] %v10340_v2 }
  0xa3   : > { %515 = vst [vmem:[#allocation5 + $0x1d8] sm:$0xff] %v10340_v2  ;;  %516 = vst [vmem:[#allocation5 + $0x1e0] sm:$0xff] %v10340_v2 }
  0xa4   : > { %517 = vst [vmem:[#allocation5 + $0x1e8] sm:$0xff] %v10340_v2  ;;  %518 = vst [vmem:[#allocation5 + $0x1f0] sm:$0xff] %v10340_v2 }
  0xa5   : > { %519 = vst [vmem:[#allocation5 + $0x1f8] sm:$0xff] %v10340_v2  ;;  %520 = vst [vmem:[#allocation5 + $0x200] sm:$0xff] %v10340_v2 }
  0xa6   : > { %521 = vst [vmem:[#allocation5 + $0x208] sm:$0xff] %v10340_v2  ;;  %522 = vst [vmem:[#allocation5 + $0x210] sm:$0xff] %v10340_v2 }
  0xa7   : > { %523 = vst [vmem:[#allocation5 + $0x218] sm:$0xff] %v10340_v2  ;;  %524 = vst [vmem:[#allocation5 + $0x220] sm:$0xff] %v10340_v2 }
  0xa8   : > { %525 = vst [vmem:[#allocation5 + $0x228] sm:$0xff] %v10340_v2  ;;  %526 = vst [vmem:[#allocation5 + $0x230] sm:$0xff] %v10340_v2 }
  0xa9   : > { %527 = vst [vmem:[#allocation5 + $0x238] sm:$0xff] %v10340_v2  ;;  %528 = vst [vmem:[#allocation5 + $0x240] sm:$0xff] %v10340_v2 }
  0xaa   : > { %529 = vst [vmem:[#allocation5 + $0x248] sm:$0xff] %v10340_v2  ;;  %530 = vst [vmem:[#allocation5 + $0x250] sm:$0xff] %v10340_v2 }
  0xab   : > { %531 = vst [vmem:[#allocation5 + $0x258] sm:$0xff] %v10340_v2  ;;  %532 = vst [vmem:[#allocation5 + $0x260] sm:$0xff] %v10340_v2 }
  0xac   : > { %533 = vst [vmem:[#allocation5 + $0x268] sm:$0xff] %v10340_v2  ;;  %534 = vst [vmem:[#allocation5 + $0x270] sm:$0xff] %v10340_v2 }
  0xad   : > { %535 = vst [vmem:[#allocation5 + $0x278] sm:$0xff] %v10340_v2  ;;  %536 = vst [vmem:[#allocation5 + $0x280] sm:$0xff] %v10340_v2 }
  0xae   : > { %537 = vst [vmem:[#allocation5 + $0x288] sm:$0xff] %v10340_v2  ;;  %538 = vst [vmem:[#allocation5 + $0x290] sm:$0xff] %v10340_v2 }
  0xaf   : > { %539 = vst [vmem:[#allocation5 + $0x298] sm:$0xff] %v10340_v2  ;;  %540 = vst [vmem:[#allocation5 + $0x2a0] sm:$0xff] %v10340_v2 }
  0xb0   : > { %541 = vst [vmem:[#allocation5 + $0x2a8] sm:$0xff] %v10340_v2  ;;  %542 = vst [vmem:[#allocation5 + $0x2b0] sm:$0xff] %v10340_v2 }
  0xb1   : > { %543 = vst [vmem:[#allocation5 + $0x2b8] sm:$0xff] %v10340_v2  ;;  %544 = vst [vmem:[#allocation5 + $0x2c0] sm:$0xff] %v10340_v2 }
  0xb2   : > { %545 = vst [vmem:[#allocation5 + $0x2c8] sm:$0xff] %v10340_v2  ;;  %546 = vst [vmem:[#allocation5 + $0x2d0] sm:$0xff] %v10340_v2 }
  0xb3   : > { %547 = vst [vmem:[#allocation5 + $0x2d8] sm:$0xff] %v10340_v2  ;;  %548 = vst [vmem:[#allocation5 + $0x2e0] sm:$0xff] %v10340_v2 }
  0xb4   : > { %549 = vst [vmem:[#allocation5 + $0x2e8] sm:$0xff] %v10340_v2  ;;  %550 = vst [vmem:[#allocation5 + $0x2f0] sm:$0xff] %v10340_v2 }
  0xb5   : > { %551 = vst [vmem:[#allocation5 + $0x2f8] sm:$0xff] %v10340_v2  ;;  %552 = vst [vmem:[#allocation5 + $0x300] sm:$0xff] %v10340_v2 }
  0xb6   : > { %553 = vst [vmem:[#allocation5 + $0x308] sm:$0xff] %v10340_v2  ;;  %554 = vst [vmem:[#allocation5 + $0x310] sm:$0xff] %v10340_v2 }
  0xb7   : > { %555 = vst [vmem:[#allocation5 + $0x318] sm:$0xff] %v10340_v2  ;;  %556 = vst [vmem:[#allocation5 + $0x320] sm:$0xff] %v10340_v2 }
  0xb8   : > { %557 = vst [vmem:[#allocation5 + $0x328] sm:$0xff] %v10340_v2  ;;  %558 = vst [vmem:[#allocation5 + $0x330] sm:$0xff] %v10340_v2 }
  0xb9   : > { %559 = vst [vmem:[#allocation5 + $0x338] sm:$0xff] %v10340_v2  ;;  %560 = vst [vmem:[#allocation5 + $0x340] sm:$0xff] %v10340_v2 }
  0xba   : > { %561 = vst [vmem:[#allocation5 + $0x348] sm:$0xff] %v10340_v2  ;;  %562 = vst [vmem:[#allocation5 + $0x350] sm:$0xff] %v10340_v2 }
  0xbb   : > { %563 = vst [vmem:[#allocation5 + $0x358] sm:$0xff] %v10340_v2  ;;  %564 = vst [vmem:[#allocation5 + $0x360] sm:$0xff] %v10340_v2 }
  0xbc   : > { %565 = vst [vmem:[#allocation5 + $0x368] sm:$0xff] %v10340_v2  ;;  %566 = vst [vmem:[#allocation5 + $0x370] sm:$0xff] %v10340_v2 }
  0xbd   : > { %567 = vst [vmem:[#allocation5 + $0x378] sm:$0xff] %v10340_v2  ;;  %568 = vst [vmem:[#allocation5 + $0x380] sm:$0xff] %v10340_v2 }
  0xbe   : > { %569 = vst [vmem:[#allocation5 + $0x388] sm:$0xff] %v10340_v2  ;;  %570 = vst [vmem:[#allocation5 + $0x390] sm:$0xff] %v10340_v2 }
  0xbf   : > { %571 = vst [vmem:[#allocation5 + $0x398] sm:$0xff] %v10340_v2  ;;  %572 = vst [vmem:[#allocation5 + $0x3a0] sm:$0xff] %v10340_v2 }
  0xc0   : > { %573 = vst [vmem:[#allocation5 + $0x3a8] sm:$0xff] %v10340_v2  ;;  %574 = vst [vmem:[#allocation5 + $0x3b0] sm:$0xff] %v10340_v2 }
  0xc1   : > { %575 = vst [vmem:[#allocation5 + $0x3b8] sm:$0xff] %v10340_v2  ;;  %576 = vst [vmem:[#allocation5 + $0x3c0] sm:$0xff] %v10340_v2 }
  0xc2   : > { %577 = vst [vmem:[#allocation5 + $0x3c8] sm:$0xff] %v10340_v2  ;;  %578 = vst [vmem:[#allocation5 + $0x3d0] sm:$0xff] %v10340_v2 }
  0xc3   : > { %579 = vst [vmem:[#allocation5 + $0x3d8] sm:$0xff] %v10340_v2  ;;  %580 = vst [vmem:[#allocation5 + $0x3e0] sm:$0xff] %v10340_v2 }
  0xc4   : > { %581 = vst [vmem:[#allocation5 + $0x3e8] sm:$0xff] %v10340_v2  ;;  %582 = vst [vmem:[#allocation5 + $0x3f0] sm:$0xff] %v10340_v2 }
  0xc5   : > { %583 = vst [vmem:[#allocation5 + $0x3f8] sm:$0xff] %v10340_v2  ;;  %584 = vst [vmem:[#allocation5 + $0x400] sm:$0xff] %v10340_v2 }
  0xc6   : > { %585 = vst [vmem:[#allocation5 + $0x408] sm:$0xff] %v10340_v2  ;;  %586 = vst [vmem:[#allocation5 + $0x410] sm:$0xff] %v10340_v2 }
  0xc7   : > { %587 = vst [vmem:[#allocation5 + $0x418] sm:$0xff] %v10340_v2  ;;  %588 = vst [vmem:[#allocation5 + $0x420] sm:$0xff] %v10340_v2 }
  0xc8   : > { %589 = vst [vmem:[#allocation5 + $0x428] sm:$0xff] %v10340_v2  ;;  %590 = vst [vmem:[#allocation5 + $0x430] sm:$0xff] %v10340_v2 }
  0xc9   : > { %591 = vst [vmem:[#allocation5 + $0x438] sm:$0xff] %v10340_v2  ;;  %592 = vst [vmem:[#allocation5 + $0x440] sm:$0xff] %v10340_v2 }
  0xca   : > { %593 = vst [vmem:[#allocation5 + $0x448] sm:$0xff] %v10340_v2  ;;  %594 = vst [vmem:[#allocation5 + $0x450] sm:$0xff] %v10340_v2 }
  0xcb   : > { %595 = vst [vmem:[#allocation5 + $0x458] sm:$0xff] %v10340_v2  ;;  %596 = vst [vmem:[#allocation5 + $0x460] sm:$0xff] %v10340_v2 }
  0xcc   : > { %597 = vst [vmem:[#allocation5 + $0x468] sm:$0xff] %v10340_v2  ;;  %598 = vst [vmem:[#allocation5 + $0x470] sm:$0xff] %v10340_v2 }
  0xcd   : > { %599 = vst [vmem:[#allocation5 + $0x478] sm:$0xff] %v10340_v2  ;;  %600 = vst [vmem:[#allocation6] sm:$0x3] %v10340_v2 }
  0xce   : > { %603 = vst.msk [vmem:[#allocation4] sm:$0xf] %vm602_vm0, %v10392_v0  ;;  %605 = vst.msk [vmem:[#allocation5] sm:$0xf] %vm602_vm0, %v10397_v1 }
  0xcf   : > { %609 = vst.msk [vmem:[#allocation4 + $0x80] sm:$0xf] %vm602_vm0, %v7742_v3  ;;  %613 = vst.msk [vmem:[#allocation5 + $0x80] sm:$0xf] %vm602_vm0, %v7743_v4 }
  0xd0   : > { %617 = vst.msk [vmem:[#allocation4 + $0x100] sm:$0xf] %vm602_vm0, %v7744_v5  ;;  %621 = vst.msk [vmem:[#allocation5 + $0x100] sm:$0xf] %vm602_vm0, %v7745_v6 }
  0xd1   : > { %625 = vst.msk [vmem:[#allocation4 + $0x180] sm:$0xf] %vm602_vm0, %v7746_v7  ;;  %629 = vst.msk [vmem:[#allocation5 + $0x180] sm:$0xf] %vm602_vm0, %v7747_v8 }
  0xd2   : > { %633 = vst.msk [vmem:[#allocation4 + $0x200] sm:$0xf] %vm602_vm0, %v7748_v9  ;;  %637 = vst.msk [vmem:[#allocation5 + $0x200] sm:$0xf] %vm602_vm0, %v7749_v10 }
  0xd3   : > { %641 = vst.msk [vmem:[#allocation4 + $0x280] sm:$0xf] %vm602_vm0, %v7750_v11  ;;  %645 = vst.msk [vmem:[#allocation5 + $0x280] sm:$0xf] %vm602_vm0, %v7751_v12 }
  0xd4   : > { %649 = vst.msk [vmem:[#allocation4 + $0x300] sm:$0xf] %vm602_vm0, %v7752_v13  ;;  %653 = vst.msk [vmem:[#allocation5 + $0x300] sm:$0xf] %vm602_vm0, %v7753_v14 }
  0xd5   : > { %657 = vst.msk [vmem:[#allocation4 + $0x380] sm:$0xf] %vm602_vm0, %v7754_v15  ;;  %661 = vst.msk [vmem:[#allocation5 + $0x380] sm:$0xf] %vm602_vm0, %v7755_v16 }
  0xd6   : > { %665 = vst.msk [vmem:[#allocation4 + $0x400] sm:$0xf] %vm602_vm0, %v7756_v17  ;;  %669 = vst.msk [vmem:[#allocation5 + $0x400] sm:$0xf] %vm602_vm0, %v7757_v18 }
  0xd7   : > { %672 = vst.msk [vmem:[#allocation6] sm:$0x1] %vm671_vm1, %v670_v19  ;;  %674 = vst.msk [vmem:[#allocation6 + $0x1] sm:$0x1] %vm671_vm1, %v673_v20 }
  0xd8 PF: > { %v1511_v21 = vld [vmem:[#allocation4 + $0xf8] sm:$0xff]  ;;  %v1510_v23 = vld [vmem:[#allocation4 + $0xf0] sm:$0xff]  ;;  %v1509_v25 = vld [vmem:[#allocation4 + $0xe8] sm:$0xff]  ;;  %vm14058_vm2 = vcmask 31744  }
  0xd9   : > { %v1458_v22 = vld [vmem:[#allocation4 + $0x78] sm:$0xff]  ;;  %8698 = vmatprep.subr.mxu0 %v1511_v21  ;;  %v1457_v24 = vld [vmem:[#allocation4 + $0x70] sm:$0xff]  ;;  %v1456_v26 = vld [vmem:[#allocation4 + $0x68] sm:$0xff] }
  0xda   : > { %8784 = vmatprep.subr.mxu1 %v1458_v22  ;;  %8699 = vmatpush3.msra.mxu0 %v1511_v21  ;;  %v1508_v27 = vld [vmem:[#allocation4 + $0xe0] sm:$0xff]  ;;  %v1507_v29 = vld [vmem:[#allocation4 + $0xd8] sm:$0xff]  ;;  %v1506_v31 = vld [vmem:[#allocation4 + $0xd0] sm:$0xff] }
  0xdb   : > { %8785 = vmatpush3.msra.mxu1 %v1458_v22  ;;  %8700 = vmatprep.subr.mxu0 %v1510_v23  ;;  %v1455_v28 = vld [vmem:[#allocation4 + $0x60] sm:$0xff]  ;;  %v1454_v30 = vld [vmem:[#allocation4 + $0x58] sm:$0xff]  ;;  %v1453_v32 = vld [vmem:[#allocation4 + $0x50] sm:$0xff] }
  0xdc   : > { %8786 = vmatprep.subr.mxu1 %v1457_v24  ;;  %8701 = vmatpush3.msra.mxu0 %v1510_v23  ;;  %v1505_v33 = vld [vmem:[#allocation4 + $0xc8] sm:$0xff]  ;;  %v1504_v35 = vld [vmem:[#allocation4 + $0xc0] sm:$0xff]  ;;  %v676_v38 = vld [vmem:[%s10382_s25 + $0x8] sm:$0xff] }
  0xdd   : > { %8787 = vmatpush3.msra.mxu1 %v1457_v24  ;;  %8702 = vmatprep.subr.mxu0 %v1509_v25  ;;  %v1452_v34 = vld [vmem:[#allocation4 + $0x48] sm:$0xff]  ;;  %v1451_v37 = vld [vmem:[#allocation4 + $0x40] sm:$0xff]  ;;  %v677_v39 = vld [vmem:[%s10382_s25 + $0x10] sm:$0xff]  ;;  %718 = vst.msk [vmem:[#allocation2 + $0x8] sm:$0xff] %vm14058_vm2, %v676_v38 }
  0xde   : > { %8788 = vmatprep.subr.mxu1 %v1456_v26  ;;  %8703 = vmatpush3.msra.mxu0 %v1509_v25  ;;  %v675_v36 = vld [vmem:[%s10382_s25] sm:$0xff]  ;;  %v1503_v40 = vld [vmem:[#allocation4 + $0xb8] sm:$0xff]  ;;  %719 = vst.msk [vmem:[#allocation2 + $0x10] sm:$0xff] %vm14058_vm2, %v677_v39  ;;  %v678_v41 = vld [vmem:[%s10382_s25 + $0x18] sm:$0xff] }
  0xdf   : > { %8789 = vmatpush3.msra.mxu1 %v1456_v26  ;;  %8704 = vmatprep.subr.mxu0 %v1508_v27  ;;  %717 = vst.msk [vmem:[#allocation2] sm:$0xff] %vm14058_vm2, %v675_v36  ;;  %v679_v42 = vld [vmem:[%s10382_s25 + $0x20] sm:$0xff]  ;;  %v1450_v43 = vld [vmem:[#allocation4 + $0x38] sm:$0xff]  ;;  %720 = vst.msk [vmem:[#allocation2 + $0x18] sm:$0xff] %vm14058_vm2, %v678_v41 }
  0xe0   : > { %8790 = vmatprep.subr.mxu1 %v1455_v28  ;;  %8705 = vmatpush3.msra.mxu0 %v1508_v27  ;;  %721 = vst.msk [vmem:[#allocation2 + $0x20] sm:$0xff] %vm14058_vm2, %v679_v42  ;;  %v680_v44 = vld [vmem:[%s10382_s25 + $0x28] sm:$0xff]  ;;  %v681_v45 = vld [vmem:[%s10382_s25 + $0x30] sm:$0xff]  ;;  %v682_v47 = vld [vmem:[%s10382_s25 + $0x38] sm:$0xff] }
  0xe1   : > { %8791 = vmatpush3.msra.mxu1 %v1455_v28  ;;  %8706 = vmatprep.subr.mxu0 %v1507_v29  ;;  %v1502_v46 = vld [vmem:[#allocation4 + $0xb0] sm:$0xff]  ;;  %722 = vst.msk [vmem:[#allocation2 + $0x28] sm:$0xff] %vm14058_vm2, %v680_v44  ;;  %723 = vst.msk [vmem:[#allocation2 + $0x30] sm:$0xff] %vm14058_vm2, %v681_v45  ;;  %v683_v48 = vld [vmem:[%s10382_s25 + $0x40] sm:$0xff] }
  0xe2   : > { %8792 = vmatprep.subr.mxu1 %v1454_v30  ;;  %8707 = vmatpush3.msra.mxu0 %v1507_v29  ;;  %v1449_v49 = vld [vmem:[#allocation4 + $0x30] sm:$0xff]  ;;  %724 = vst.msk [vmem:[#allocation2 + $0x38] sm:$0xff] %vm14058_vm2, %v682_v47  ;;  %725 = vst.msk [vmem:[#allocation2 + $0x40] sm:$0xff] %vm14058_vm2, %v683_v48  ;;  %v685_v51 = vld [vmem:[%s10382_s25 + $0x50] sm:$0xff] }
  0xe3   : > { %8793 = vmatpush3.msra.mxu1 %v1454_v30  ;;  %8708 = vmatprep.subr.mxu0 %v1506_v31  ;;  %v684_v50 = vld [vmem:[%s10382_s25 + $0x48] sm:$0xff]  ;;  %727 = vst.msk [vmem:[#allocation2 + $0x50] sm:$0xff] %vm14058_vm2, %v685_v51  ;;  %v686_v52 = vld [vmem:[%s10382_s25 + $0x58] sm:$0xff]  ;;  %v687_v53 = vld [vmem:[%s10382_s25 + $0x60] sm:$0xff] }
  0xe4   : > { %8794 = vmatprep.subr.mxu1 %v1453_v32  ;;  %8709 = vmatpush3.msra.mxu0 %v1506_v31  ;;  %726 = vst.msk [vmem:[#allocation2 + $0x48] sm:$0xff] %vm14058_vm2, %v684_v50  ;;  %v688_v54 = vld [vmem:[%s10382_s25 + $0x68] sm:$0xff]  ;;  %728 = vst.msk [vmem:[#allocation2 + $0x58] sm:$0xff] %vm14058_vm2, %v686_v52  ;;  %v689_v55 = vld [vmem:[%s10382_s25 + $0x70] sm:$0xff] }
  0xe5   : > { %8795 = vmatpush3.msra.mxu1 %v1453_v32  ;;  %8710 = vmatprep.subr.mxu0 %v1505_v33  ;;  %729 = vst.msk [vmem:[#allocation2 + $0x60] sm:$0xff] %vm14058_vm2, %v687_v53  ;;  %730 = vst.msk [vmem:[#allocation2 + $0x68] sm:$0xff] %vm14058_vm2, %v688_v54  ;;  %v690_v56 = vld [vmem:[%s10382_s25 + $0x78] sm:$0xff]  ;;  %v1501_v57 = vld [vmem:[#allocation4 + $0xa8] sm:$0xff] }
  0xe6   : > { %8796 = vmatprep.subr.mxu1 %v1452_v34  ;;  %8711 = vmatpush3.msra.mxu0 %v1505_v33  ;;  %v1448_v58 = vld [vmem:[#allocation4 + $0x28] sm:$0xff]  ;;  %731 = vst.msk [vmem:[#allocation2 + $0x70] sm:$0xff] %vm14058_vm2, %v689_v55  ;;  %732 = vst.msk [vmem:[#allocation2 + $0x78] sm:$0xff] %vm14058_vm2, %v690_v56  ;;  %v1500_v60 = vld [vmem:[#allocation4 + $0xa0] sm:$0xff] }
  0xe7   : > { %8797 = vmatpush3.msra.mxu1 %v1452_v34  ;;  %8712 = vmatprep.subr.mxu0 %v1504_v35  ;;  %v691_v59 = vld [vmem:[%s10382_s25 + $0x80] sm:$0xff]  ;;  %v1447_v61 = vld [vmem:[#allocation4 + $0x20] sm:$0xff]  ;;  %v1499_v62 = vld [vmem:[#allocation4 + $0x98] sm:$0xff] }
  0xe8   : > { %8798 = vmatprep.subr.mxu1 %v1451_v37  ;;  %8713 = vmatpush3.msra.mxu0 %v1504_v35  ;;  %733 = vst.msk [vmem:[#allocation2 + $0x80] sm:$0xff] %vm14058_vm2, %v691_v59  ;;  %v1446_v63 = vld [vmem:[#allocation4 + $0x18] sm:$0xff]  ;;  %v1498_v0 = vld [vmem:[#allocation4 + $0x90] sm:$0xff]  ;;  %v1497_v2 = vld [vmem:[#allocation4 + $0x88] sm:$0xff] }
  0xe9   : > { %8799 = vmatpush3.msra.mxu1 %v1451_v37  ;;  %8714 = vmatprep.subr.mxu0 %v1503_v40  ;;  %v1445_v1 = vld [vmem:[#allocation4 + $0x10] sm:$0xff]  ;;  %v1444_v3 = vld [vmem:[#allocation4 + $0x8] sm:$0xff]  ;;  %v1496_v4 = vld [vmem:[#allocation4 + $0x80] sm:$0xff] }
  0xea   : > { %8800 = vmatprep.subr.mxu1 %v1450_v43  ;;  %8715 = vmatpush3.msra.mxu0 %v1503_v40  ;;  %v1443_v5 = vld [vmem:[#allocation4] sm:$0xff]  ;;  %v1459_v6 = vld [vmem:[#allocation2 + $0x1] sm:$0xff]  ;;  %v1460_v9 = vld [vmem:[#allocation2 + $0x9] sm:$0xff] }
  0xeb   : > { %8801 = vmatpush3.msra.mxu1 %v1450_v43  ;;  %8716 = vmatprep.subr.mxu0 %v1502_v46  ;;  %v1407_v7 = vld [vmem:[#allocation2] sm:$0xff]  ;;  %v692_v8 = vld [vmem:[%s10382_s25 + $0x88] sm:$0xff]  ;;  %v693_v10 = vld [vmem:[%s10382_s25 + $0x90] sm:$0xff] }
  0xec   : > { %8802 = vmatprep.subr.mxu1 %v1449_v49  ;;  %8717 = vmatpush3.msra.mxu0 %v1502_v46  ;;  %734 = vst.msk [vmem:[#allocation2 + $0x88] sm:$0xff] %vm14058_vm2, %v692_v8  ;;  %v694_v11 = vld [vmem:[%s10382_s25 + $0x98] sm:$0xff]  ;;  %v1408_v12 = vld [vmem:[#allocation2 + $0x8] sm:$0xff]  ;;  %735 = vst.msk [vmem:[#allocation2 + $0x90] sm:$0xff] %vm14058_vm2, %v693_v10 }
  0xed   : > { %8803 = vmatpush3.msra.mxu1 %v1449_v49  ;;  %8718 = vmatprep.subr.mxu0 %v1501_v57  ;;  %736 = vst.msk [vmem:[#allocation2 + $0x98] sm:$0xff] %vm14058_vm2, %v694_v11  ;;  %v695_v13 = vld [vmem:[%s10382_s25 + $0xa0] sm:$0xff]  ;;  %v696_v14 = vld [vmem:[%s10382_s25 + $0xa8] sm:$0xff]  ;;  %v2054_v15 = vld [vmem:[#allocation4 + $0x178] sm:$0xff] }
  0xee   : > { %8804 = vmatprep.subr.mxu1 %v1448_v58  ;;  %8719 = vmatpush3.msra.mxu0 %v1501_v57  ;;  %v1461_v16 = vld [vmem:[#allocation2 + $0x11] sm:$0xff]  ;;  %737 = vst.msk [vmem:[#allocation2 + $0xa0] sm:$0xff] %vm14058_vm2, %v695_v13  ;;  %738 = vst.msk [vmem:[#allocation2 + $0xa8] sm:$0xff] %vm14058_vm2, %v696_v14  ;;  %v699_v20 = vld [vmem:[%s10382_s25 + $0xc0] sm:$0xff] }
  0xef   : > { %8805 = vmatpush3.msra.mxu1 %v1448_v58  ;;  %8720 = vmatprep.subr.mxu0 %v1500_v60  ;;  %v697_v17 = vld [vmem:[%s10382_s25 + $0xb0] sm:$0xff]  ;;  %v698_v19 = vld [vmem:[%s10382_s25 + $0xb8] sm:$0xff]  ;;  %v2053_v21 = vld [vmem:[#allocation4 + $0x170] sm:$0xff]  ;;  %741 = vst.msk [vmem:[#allocation2 + $0xc0] sm:$0xff] %vm14058_vm2, %v699_v20 }
  0xf0   : > { %8806 = vmatprep.subr.mxu1 %v1447_v61  ;;  %8721 = vmatpush3.msra.mxu0 %v1500_v60  ;;  %v1409_v18 = vld [vmem:[#allocation2 + $0x10] sm:$0xff]  ;;  %739 = vst.msk [vmem:[#allocation2 + $0xb0] sm:$0xff] %vm14058_vm2, %v697_v17  ;;  %740 = vst.msk [vmem:[#allocation2 + $0xb8] sm:$0xff] %vm14058_vm2, %v698_v19  ;;  %v700_v23 = vld [vmem:[%s10382_s25 + $0xc8] sm:$0xff] }
  0xf1   : > { %8807 = vmatpush3.msra.mxu1 %v1447_v61  ;;  %8722 = vmatprep.subr.mxu0 %v1499_v62  ;;  %v2388_v22 = vld [vmem:[#allocation4 + $0x1f8] sm:$0xff]  ;;  %v1462_v24 = vld [vmem:[#allocation2 + $0x19] sm:$0xff]  ;;  %742 = vst.msk [vmem:[#allocation2 + $0xc8] sm:$0xff] %vm14058_vm2, %v700_v23  ;;  %v1463_v27 = vld [vmem:[#allocation2 + $0x21] sm:$0xff] }
  0xf2   : > { %8808 = vmatprep.subr.mxu1 %v1446_v63  ;;  %8723 = vmatpush3.msra.mxu0 %v1499_v62  ;;  %v1410_v25 = vld [vmem:[#allocation2 + $0x18] sm:$0xff]  ;;  %v701_v26 = vld [vmem:[%s10382_s25 + $0xd0] sm:$0xff]  ;;  %v703_v29 = vld [vmem:[%s10382_s25 + $0xe0] sm:$0xff] }
  0xf3   : > { %8809 = vmatpush3.msra.mxu1 %v1446_v63  ;;  %8724 = vmatprep.subr.mxu0 %v1498_v0  ;;  %743 = vst.msk [vmem:[#allocation2 + $0xd0] sm:$0xff] %vm14058_vm2, %v701_v26  ;;  %v702_v28 = vld [vmem:[%s10382_s25 + $0xd8] sm:$0xff]  ;;  %v1411_v30 = vld [vmem:[#allocation2 + $0x20] sm:$0xff]  ;;  %745 = vst.msk [vmem:[#allocation2 + $0xe0] sm:$0xff] %vm14058_vm2, %v703_v29 }
  0xf4   : > { %8810 = vmatprep.subr.mxu1 %v1445_v1  ;;  %8725 = vmatpush3.msra.mxu0 %v1498_v0  ;;  %v2052_v31 = vld [vmem:[#allocation4 + $0x168] sm:$0xff]  ;;  %744 = vst.msk [vmem:[#allocation2 + $0xd8] sm:$0xff] %vm14058_vm2, %v702_v28  ;;  %v1464_v32 = vld [vmem:[#allocation2 + $0x29] sm:$0xff]  ;;  %v1465_v34 = vld [vmem:[#allocation2 + $0x31] sm:$0xff] }
  0xf5   : > { %8811 = vmatpush3.msra.mxu1 %v1445_v1  ;;  %8726 = vmatprep.subr.mxu0 %v1497_v2  ;;  %v1412_v33 = vld [vmem:[#allocation2 + $0x28] sm:$0xff]  ;;  %v1413_v35 = vld [vmem:[#allocation2 + $0x30] sm:$0xff]  ;;  %v2051_v36 = vld [vmem:[#allocation4 + $0x160] sm:$0xff] }
  0xf6   : > { %8812 = vmatprep.subr.mxu1 %v1444_v3  ;;  %8727 = vmatpush3.msra.mxu0 %v1497_v2  ;;  %v2387_v37 = vld [vmem:[#allocation4 + $0x1f0] sm:$0xff]  ;;  %v1466_v38 = vld [vmem:[#allocation2 + $0x39] sm:$0xff]  ;;  %v2050_v42 = vld [vmem:[#allocation4 + $0x158] sm:$0xff] }
  0xf7   : > { %8813 = vmatpush3.msra.mxu1 %v1444_v3  ;;  %8728 = vmatprep.subr.mxu0 %v1496_v4  ;;  %v1414_v39 = vld [vmem:[#allocation2 + $0x38] sm:$0xff]  ;;  %v1467_v40 = vld [vmem:[#allocation2 + $0x41] sm:$0xff]  ;;  %v705_v45 = vld [vmem:[%s10382_s25 + $0xf0] sm:$0xff] }
  0xf8   : > { %8814 = vmatprep.subr.mxu1 %v1443_v5  ;;  %8729 = vmatpush3.msra.mxu0 %v1496_v4  ;;  %v1415_v41 = vld [vmem:[#allocation2 + $0x40] sm:$0xff]  ;;  %v704_v44 = vld [vmem:[%s10382_s25 + $0xe8] sm:$0xff]  ;;  %747 = vst.msk [vmem:[#allocation2 + $0xf0] sm:$0xff] %vm14058_vm2, %v705_v45  ;;  %v706_v49 = vld [vmem:[%s10382_s25 + $0xf8] sm:$0xff] }
  0xf9   : > { %8730 = vmatprep.mubr.f32.mxu0 %v1459_v6  ;;  %8815 = vmatpush3.msra.mxu1 %v1443_v5  ;;  %v2386_v43 = vld [vmem:[#allocation4 + $0x1e8] sm:$0xff]  ;;  %746 = vst.msk [vmem:[#allocation2 + $0xe8] sm:$0xff] %vm14058_vm2, %v704_v44  ;;  %v1468_v46 = vld [vmem:[#allocation2 + $0x49] sm:$0xff]  ;;  %v1469_v50 = vld [vmem:[#allocation2 + $0x51] sm:$0xff] }
  0xfa   : > { %8816 = vmatprep.mubr.f32.mxu1 %v1407_v7  ;;  %8731 = vmatmul.mubr.f32.vlgmr.msra.gmra.mxu0 %v1460_v9  ;;  %v1416_v47 = vld [vmem:[#allocation2 + $0x48] sm:$0xff]  ;;  %v1417_v51 = vld [vmem:[#allocation2 + $0x50] sm:$0xff]  ;;  %748 = vst.msk [vmem:[#allocation2 + $0xf8] sm:$0xff] %vm14058_vm2, %v706_v49  ;;  %v707_v52 = vld [vmem:[%s10382_s25 + $0x100] sm:$0xff] }
  0xfb   : > { %8817 = vmatmul.mubr.f32.vlgmr.msra.gmra.mxu1 %v1408_v12  ;;  %8870 = vmatprep.subr.mxu0 %v2054_v15  ;;  %v2049_v48 = vld [vmem:[#allocation4 + $0x150] sm:$0xff]  ;;  %v2385_v53 = vld [vmem:[#allocation4 + $0x1e0] sm:$0xff]  ;;  %749 = vst.msk [vmem:[#allocation2 + $0x100] sm:$0xff] %vm14058_vm2, %v707_v52  ;;  %v709_v55 = vld [vmem:[%s10382_s25 + $0x110] sm:$0xff] }
  0xfc   : > { %8733 = vmatprep.mubr.f32.mxu0 %v1461_v16  ;;  %8871 = vmatpush3.msra.mxu0 %v2054_v15  ;;  %v708_v54 = vld [vmem:[%s10382_s25 + $0x108] sm:$0xff]  ;;  %751 = vst.msk [vmem:[#allocation2 + $0x110] sm:$0xff] %vm14058_vm2, %v709_v55  ;;  %v710_v56 = vld [vmem:[%s10382_s25 + $0x118] sm:$0xff]  ;;  %v711_v59 = vld [vmem:[%s10382_s25 + $0x120] sm:$0xff] }
  0xfd   : > { %8819 = vmatprep.mubr.f32.mxu1 %v1409_v18  ;;  %8872 = vmatprep.subr.mxu0 %v2053_v21  ;;  %750 = vst.msk [vmem:[#allocation2 + $0x108] sm:$0xff] %vm14058_vm2, %v708_v54  ;;  %v1470_v57 = vld [vmem:[#allocation2 + $0x59] sm:$0xff]  ;;  %752 = vst.msk [vmem:[#allocation2 + $0x118] sm:$0xff] %vm14058_vm2, %v710_v56  ;;  %v1471_v60 = vld [vmem:[#allocation2 + $0x61] sm:$0xff] }
  0xfe   : > { %8956 = vmatprep.subr.mxu1 %v2388_v22  ;;  %8734 = vmatmul.mubr.f32.gmra.mxu0 %v1462_v24  ;;  %v1418_v58 = vld [vmem:[#allocation2 + $0x58] sm:$0xff]  ;;  %v1419_v61 = vld [vmem:[#allocation2 + $0x60] sm:$0xff]  ;;  %753 = vst.msk [vmem:[#allocation2 + $0x120] sm:$0xff] %vm14058_vm2, %v711_v59  ;;  %v2384_v63 = vld [vmem:[#allocation4 + $0x1d8] sm:$0xff] }
  0xff   : > { %8820 = vmatmul.mubr.f32.gmra.mxu1 %v1410_v25  ;;  %8873 = vmatpush3.msra.mxu0 %v2053_v21  ;;  %v2048_v62 = vld [vmem:[#allocation4 + $0x148] sm:$0xff]  ;;  %v1472_v0 = vld [vmem:[#allocation2 + $0x69] sm:$0xff]  ;;  %v1473_v2 = vld [vmem:[#allocation2 + $0x71] sm:$0xff] }
 0x100   : > { %8736 = vmatprep.mubr.f32.mxu0 %v1463_v27  ;;  %8822 = vmatprep.mubr.f32.mxu1 %v1411_v30  ;;  %v1420_v1 = vld [vmem:[#allocation2 + $0x68] sm:$0xff]  ;;  %v1421_v3 = vld [vmem:[#allocation2 + $0x70] sm:$0xff]  ;;  %v2047_v4 = vld [vmem:[#allocation4 + $0x140] sm:$0xff] }
 0x101   : > { %8874 = vmatprep.subr.mxu0 %v2052_v31  ;;  %8957 = vmatpush3.msra.mxu1 %v2388_v22  ;;  %v2383_v5 = vld [vmem:[#allocation4 + $0x1d0] sm:$0xff]  ;;  %v1474_v6 = vld [vmem:[#allocation2 + $0x79] sm:$0xff]  ;;  %v2046_v10 = vld [vmem:[#allocation4 + $0x138] sm:$0xff] }
 0x102   : > { %8875 = vmatpush3.msra.mxu0 %v2052_v31  ;;  %8958 = vmatprep.subr.mxu1 %v2387_v37  ;;  %v1422_v7 = vld [vmem:[#allocation2 + $0x78] sm:$0xff]  ;;  %v1475_v8 = vld [vmem:[#allocation2 + $0x81] sm:$0xff]  ;;  %v1476_v12 = vld [vmem:[#allocation2 + $0x89] sm:$0xff] }
 0x103   : > { %8737 = vmatmul.mubr.f32.gmra.mxu0 %v1464_v32  ;;  %8823 = vmatmul.mubr.f32.gmra.mxu1 %v1412_v33  ;;  %v1423_v9 = vld [vmem:[#allocation2 + $0x80] sm:$0xff]  ;;  %v1424_v13 = vld [vmem:[#allocation2 + $0x88] sm:$0xff]  ;;  %v1477_v14 = vld [vmem:[#allocation2 + $0x91] sm:$0xff] }
 0x104   : > { %8739 = vmatprep.mubr.f32.mxu0 %v1465_v34  ;;  %8825 = vmatprep.mubr.f32.mxu1 %v1413_v35  ;;  %v2382_v11 = vld [vmem:[#allocation4 + $0x1c8] sm:$0xff]  ;;  %v1425_v15 = vld [vmem:[#allocation2 + $0x90] sm:$0xff]  ;;  %v2045_v16 = vld [vmem:[#allocation4 + $0x130] sm:$0xff] }
 0x105   : > { %8876 = vmatprep.subr.mxu0 %v2051_v36  ;;  %8959 = vmatpush3.msra.mxu1 %v2387_v37  ;;  %v2381_v17 = vld [vmem:[#allocation4 + $0x1c0] sm:$0xff]  ;;  %v1479_v20 = vld [vmem:[#allocation2 + $0xa1] sm:$0xff]  ;;  %v2380_v23 = vld [vmem:[#allocation4 + $0x1b8] sm:$0xff] }
 0x106   : > { %8877 = vmatpush3.msra.mxu0 %v2051_v36  ;;  %8960 = vmatprep.subr.mxu1 %v2386_v43  ;;  %v1478_v18 = vld [vmem:[#allocation2 + $0x99] sm:$0xff]  ;;  %v1480_v24 = vld [vmem:[#allocation2 + $0xa9] sm:$0xff]  ;;  %v1481_v26 = vld [vmem:[#allocation2 + $0xb1] sm:$0xff] }
 0x107   : > { %8740 = vmatmul.mubr.f32.gmra.mxu0 %v1466_v38  ;;  %8826 = vmatmul.mubr.f32.gmra.mxu1 %v1414_v39  ;;  %v1426_v19 = vld [vmem:[#allocation2 + $0x98] sm:$0xff]  ;;  %v1427_v21 = vld [vmem:[#allocation2 + $0xa0] sm:$0xff]  ;;  %v1428_v25 = vld [vmem:[#allocation2 + $0xa8] sm:$0xff] }
 0x108   : > { %8742 = vmatprep.mubr.f32.mxu0 %v1467_v40  ;;  %8828 = vmatprep.mubr.f32.mxu1 %v1415_v41  ;;  %v2044_v22 = vld [vmem:[#allocation4 + $0x128] sm:$0xff]  ;;  %v1429_v27 = vld [vmem:[#allocation2 + $0xb0] sm:$0xff]  ;;  %v2043_v28 = vld [vmem:[#allocation4 + $0x120] sm:$0xff] }
 0x109   : > { %8878 = vmatprep.subr.mxu0 %v2050_v42  ;;  %8961 = vmatpush3.msra.mxu1 %v2386_v43  ;;  %v2379_v29 = vld [vmem:[#allocation4 + $0x1b0] sm:$0xff]  ;;  %v1482_v30 = vld [vmem:[#allocation2 + $0xb9] sm:$0xff]  ;;  %v2042_v34 = vld [vmem:[#allocation4 + $0x118] sm:$0xff] }
 0x10a   : > { %8879 = vmatpush3.msra.mxu0 %v2050_v42  ;;  %8962 = vmatprep.subr.mxu1 %v2385_v53  ;;  %v1430_v31 = vld [vmem:[#allocation2 + $0xb8] sm:$0xff]  ;;  %v1483_v32 = vld [vmem:[#allocation2 + $0xc1] sm:$0xff]  ;;  %v1484_v36 = vld [vmem:[#allocation2 + $0xc9] sm:$0xff] }
 0x10b   : > { %8743 = vmatmul.mubr.f32.gmra.mxu0 %v1468_v46  ;;  %8829 = vmatmul.mubr.f32.gmra.mxu1 %v1416_v47  ;;  %v1431_v33 = vld [vmem:[#allocation2 + $0xc0] sm:$0xff]  ;;  %v1432_v37 = vld [vmem:[#allocation2 + $0xc8] sm:$0xff]  ;;  %v1485_v39 = vld [vmem:[#allocation2 + $0xd1] sm:$0xff] }
 0x10c   : > { %8745 = vmatprep.mubr.f32.mxu0 %v1469_v50  ;;  %8831 = vmatprep.mubr.f32.mxu1 %v1417_v51  ;;  %v2378_v35 = vld [vmem:[#allocation4 + $0x1a8] sm:$0xff]  ;;  %v712_v38 = vld [vmem:[%s10382_s25 + $0x128] sm:$0xff]  ;;  %v1433_v40 = vld [vmem:[#allocation2 + $0xd0] sm:$0xff] }
 0x10d   : > { %8880 = vmatprep.subr.mxu0 %v2049_v48  ;;  %8963 = vmatpush3.msra.mxu1 %v2385_v53  ;;  %754 = vst.msk [vmem:[#allocation2 + $0x128] sm:$0xff] %vm14058_vm2, %v712_v38  ;;  %v713_v41 = vld [vmem:[%s10382_s25 + $0x130] sm:$0xff]  ;;  %v2041_v42 = vld [vmem:[#allocation4 + $0x110] sm:$0xff]  ;;  %v2377_v43 = vld [vmem:[#allocation4 + $0x1a0] sm:$0xff] }
 0x10e   : > { %8881 = vmatpush3.msra.mxu0 %v2049_v48  ;;  %8964 = vmatprep.subr.mxu1 %v2384_v63  ;;  %755 = vst.msk [vmem:[#allocation2 + $0x130] sm:$0xff] %vm14058_vm2, %v713_v41  ;;  %v1486_v44 = vld [vmem:[#allocation2 + $0xd9] sm:$0xff]  ;;  %v1487_v46 = vld [vmem:[#allocation2 + $0xe1] sm:$0xff]  ;;  %v2376_v49 = vld [vmem:[#allocation4 + $0x198] sm:$0xff] }
 0x10f   : > { %8746 = vmatmul.mubr.f32.gmra.mxu0 %v1470_v57  ;;  %8832 = vmatmul.mubr.f32.gmra.mxu1 %v1418_v58  ;;  %v1434_v45 = vld [vmem:[#allocation2 + $0xd8] sm:$0xff]  ;;  %v1435_v47 = vld [vmem:[#allocation2 + $0xe0] sm:$0xff]  ;;  %v1488_v50 = vld [vmem:[#allocation2 + $0xe9] sm:$0xff] }
 0x110   : > { %8748 = vmatprep.mubr.f32.mxu0 %v1471_v60  ;;  %8834 = vmatprep.mubr.f32.mxu1 %v1419_v61  ;;  %v2040_v48 = vld [vmem:[#allocation4 + $0x108] sm:$0xff]  ;;  %v1436_v51 = vld [vmem:[#allocation2 + $0xe8] sm:$0xff]  ;;  %v1489_v52 = vld [vmem:[#allocation2 + $0xf1] sm:$0xff] }
 0x111   : > { %8882 = vmatprep.subr.mxu0 %v2048_v62  ;;  %8965 = vmatpush3.msra.mxu1 %v2384_v63  ;;  %v1437_v53 = vld [vmem:[#allocation2 + $0xf0] sm:$0xff]  ;;  %v2039_v54 = vld [vmem:[#allocation4 + $0x100] sm:$0xff]  ;;  %v2375_v55 = vld [vmem:[#allocation4 + $0x190] sm:$0xff] }
 0x112   : > { %8883 = vmatpush3.msra.mxu0 %v2048_v62  ;;  %8966 = vmatprep.subr.mxu1 %v2383_v5  ;;  %v1490_v56 = vld [vmem:[#allocation2 + $0xf9] sm:$0xff]  ;;  %v1491_v58 = vld [vmem:[#allocation2 + $0x101] sm:$0xff]  ;;  %v2722_v61 = vld [vmem:[#allocation4 + $0x278] sm:$0xff] }
 0x113   : > { %8749 = vmatmul.mubr.f32.gmra.mxu0 %v1472_v0  ;;  %8835 = vmatmul.mubr.f32.gmra.mxu1 %v1420_v1  ;;  %v1438_v57 = vld [vmem:[#allocation2 + $0xf8] sm:$0xff]  ;;  %v1439_v59 = vld [vmem:[#allocation2 + $0x100] sm:$0xff]  ;;  %v1492_v62 = vld [vmem:[#allocation2 + $0x109] sm:$0xff] }
 0x114   : > { %8751 = vmatprep.mubr.f32.mxu0 %v1473_v2  ;;  %8837 = vmatprep.mubr.f32.mxu1 %v1421_v3  ;;  %v2374_v60 = vld [vmem:[#allocation4 + $0x188] sm:$0xff]  ;;  %v1440_v63 = vld [vmem:[#allocation2 + $0x108] sm:$0xff]  ;;  %v1493_v0 = vld [vmem:[#allocation2 + $0x111] sm:$0xff] }
 0x115   : > { %8884 = vmatprep.subr.mxu0 %v2047_v4  ;;  %8967 = vmatpush3.msra.mxu1 %v2383_v5  ;;  %v1441_v1 = vld [vmem:[#allocation2 + $0x110] sm:$0xff]  ;;  %v2373_v2 = vld [vmem:[#allocation4 + $0x180] sm:$0xff]  ;;  %v2002_v5 = vld [vmem:[#allocation2 + $0x2] sm:$0xff] }
 0x116   : > { %8885 = vmatpush3.msra.mxu0 %v2047_v4  ;;  %8968 = vmatprep.subr.mxu1 %v2382_v11  ;;  %v1494_v3 = vld [vmem:[#allocation2 + $0x119] sm:$0xff]  ;;  %v2714_v38 = vld [vmem:[#allocation4 + $0x238] sm:$0xff]  ;;  %v2354_v41 = vld [vmem:[#allocation2 + $0xa2] sm:$0xff] }
 0x117   : > { %8752 = vmatmul.mubr.f32.gmra.mxu0 %v1474_v6  ;;  %8838 = vmatmul.mubr.f32.gmra.mxu1 %v1422_v7  ;;  %v1442_v4 = vld [vmem:[#allocation2 + $0x118] sm:$0xff]  ;;  %v3056_v7 = vld [vmem:[#allocation4 + $0x2f8] sm:$0xff] }
 0x118   : > { %8754 = vmatprep.mubr.f32.mxu0 %v1475_v8  ;;  %8840 = vmatprep.mubr.f32.mxu1 %v1423_v9  ;;  %v2336_v6 = vld [vmem:[#allocation2 + $0x12] sm:$0xff]  ;;  %v2003_v8 = vld [vmem:[#allocation2 + $0xa] sm:$0xff]  ;;  %v2337_v9 = vld [vmem:[#allocation2 + $0x1a] sm:$0xff] }
 0x119   : > { %8886 = vmatprep.subr.mxu0 %v2046_v10  ;;  %8969 = vmatpush3.msra.mxu1 %v2382_v11  ;;  %v2721_v11 = vld [vmem:[#allocation4 + $0x270] sm:$0xff] }
 0x11a   : > { %8887 = vmatpush3.msra.mxu0 %v2046_v10  ;;  %8970 = vmatprep.subr.mxu1 %v2381_v17  ;;  %v2338_v10 = vld [vmem:[#allocation2 + $0x22] sm:$0xff] }
 0x11b   : > { %8755 = vmatmul.mubr.f32.gmra.mxu0 %v1476_v12  ;;  %8841 = vmatmul.mubr.f32.gmra.mxu1 %v1424_v13  ;;  %v2339_v12 = vld [vmem:[#allocation2 + $0x2a] sm:$0xff]  ;;  %v2340_v13 = vld [vmem:[#allocation2 + $0x32] sm:$0xff] }
 0x11c   : > { %8757 = vmatprep.mubr.f32.mxu0 %v1477_v14  ;;  %8843 = vmatprep.mubr.f32.mxu1 %v1425_v15  ;;  %v2720_v14 = vld [vmem:[#allocation4 + $0x268] sm:$0xff]  ;;  %v3055_v15 = vld [vmem:[#allocation4 + $0x2f0] sm:$0xff] }
 0x11d   : > { %8888 = vmatprep.subr.mxu0 %v2045_v16  ;;  %8971 = vmatpush3.msra.mxu1 %v2381_v17  ;;  %v2342_v17 = vld [vmem:[#allocation2 + $0x42] sm:$0xff] }
 0x11e   : > { %8889 = vmatpush3.msra.mxu0 %v2045_v16  ;;  %8972 = vmatprep.subr.mxu1 %v2380_v23  ;;  %v2341_v16 = vld [vmem:[#allocation2 + $0x3a] sm:$0xff] }
 0x11f   : > { %8758 = vmatmul.mubr.f32.gmra.mxu0 %v1478_v18  ;;  %8844 = vmatmul.mubr.f32.gmra.mxu1 %v1426_v19  ;;  %v2719_v18 = vld [vmem:[#allocation4 + $0x260] sm:$0xff]  ;;  %v3054_v19 = vld [vmem:[#allocation4 + $0x2e8] sm:$0xff] }
 0x120   : > { %8760 = vmatprep.mubr.f32.mxu0 %v1479_v20  ;;  %8846 = vmatprep.mubr.f32.mxu1 %v1427_v21  ;;  %v2343_v20 = vld [vmem:[#allocation2 + $0x4a] sm:$0xff]  ;;  %v2344_v21 = vld [vmem:[#allocation2 + $0x52] sm:$0xff] }
 0x121   : > { %8890 = vmatprep.subr.mxu0 %v2044_v22  ;;  %8973 = vmatpush3.msra.mxu1 %v2380_v23  ;;  %v3053_v23 = vld [vmem:[#allocation4 + $0x2e0] sm:$0xff] }
 0x122   : > { %8891 = vmatpush3.msra.mxu0 %v2044_v22  ;;  %8974 = vmatprep.subr.mxu1 %v2379_v29  ;;  %v2718_v22 = vld [vmem:[#allocation4 + $0x258] sm:$0xff] }
 0x123   : > { %8761 = vmatmul.mubr.f32.gmra.mxu0 %v1480_v24  ;;  %8847 = vmatmul.mubr.f32.gmra.mxu1 %v1428_v25  ;;  %v2345_v24 = vld [vmem:[#allocation2 + $0x5a] sm:$0xff]  ;;  %v2346_v25 = vld [vmem:[#allocation2 + $0x62] sm:$0xff] }
 0x124   : > { %8763 = vmatprep.mubr.f32.mxu0 %v1481_v26  ;;  %8849 = vmatprep.mubr.f32.mxu1 %v1429_v27  ;;  %v2717_v26 = vld [vmem:[#allocation4 + $0x250] sm:$0xff]  ;;  %v3052_v27 = vld [vmem:[#allocation4 + $0x2d8] sm:$0xff] }
 0x125   : > { %8892 = vmatprep.subr.mxu0 %v2043_v28  ;;  %8975 = vmatpush3.msra.mxu1 %v2379_v29  ;;  %v2348_v29 = vld [vmem:[#allocation2 + $0x72] sm:$0xff] }
 0x126   : > { %8893 = vmatpush3.msra.mxu0 %v2043_v28  ;;  %8976 = vmatprep.subr.mxu1 %v2378_v35  ;;  %v2347_v28 = vld [vmem:[#allocation2 + $0x6a] sm:$0xff] }
 0x127   : > { %8764 = vmatmul.mubr.f32.gmra.mxu0 %v1482_v30  ;;  %8850 = vmatmul.mubr.f32.gmra.mxu1 %v1430_v31  ;;  %v2716_v30 = vld [vmem:[#allocation4 + $0x248] sm:$0xff]  ;;  %v3051_v31 = vld [vmem:[#allocation4 + $0x2d0] sm:$0xff] }
 0x128   : > { %8766 = vmatprep.mubr.f32.mxu0 %v1483_v32  ;;  %8852 = vmatprep.mubr.f32.mxu1 %v1431_v33  ;;  %v2349_v32 = vld [vmem:[#allocation2 + $0x7a] sm:$0xff]  ;;  %v2350_v33 = vld [vmem:[#allocation2 + $0x82] sm:$0xff] }
 0x129   : > { %8894 = vmatprep.subr.mxu0 %v2042_v34  ;;  %8977 = vmatpush3.msra.mxu1 %v2378_v35  ;;  %v3050_v35 = vld [vmem:[#allocation4 + $0x2c8] sm:$0xff] }
 0x12a   : > { %8895 = vmatpush3.msra.mxu0 %v2042_v34  ;;  %8978 = vmatprep.subr.mxu1 %v2377_v43  ;;  %v2715_v34 = vld [vmem:[#allocation4 + $0x240] sm:$0xff] }
 0x12b   : > { %8767 = vmatmul.mubr.f32.gmra.mxu0 %v1484_v36  ;;  %8853 = vmatmul.mubr.f32.gmra.mxu1 %v1432_v37  ;;  %v2351_v36 = vld [vmem:[#allocation2 + $0x8a] sm:$0xff]  ;;  %v2352_v37 = vld [vmem:[#allocation2 + $0x92] sm:$0xff] }
 0x12c   : > { %8769 = vmatprep.mubr.f32.mxu0 %v1485_v39  ;;  %8855 = vmatprep.mubr.f32.mxu1 %v1433_v40  ;;  %v3049_v39 = vld [vmem:[#allocation4 + $0x2c0] sm:$0xff] }
 0x12d   : > { %8896 = vmatprep.subr.mxu0 %v2041_v42  ;;  %8979 = vmatpush3.msra.mxu1 %v2377_v43  ;;  %v2353_v40 = vld [vmem:[#allocation2 + $0x9a] sm:$0xff]  ;;  %v3048_v43 = vld [vmem:[#allocation4 + $0x2b8] sm:$0xff] }
 0x12e   : > { %8897 = vmatpush3.msra.mxu0 %v2041_v42  ;;  %8980 = vmatprep.subr.mxu1 %v2376_v49  ;;  %v2713_v42 = vld [vmem:[#allocation4 + $0x230] sm:$0xff] }
 0x12f   : > { %8770 = vmatmul.mubr.f32.gmra.mxu0 %v1486_v44  ;;  %8856 = vmatmul.mubr.f32.gmra.mxu1 %v1434_v45  ;;  %v2355_v44 = vld [vmem:[#allocation2 + $0xaa] sm:$0xff]  ;;  %v2356_v45 = vld [vmem:[#allocation2 + $0xb2] sm:$0xff] }
 0x130   : > { %8772 = vmatprep.mubr.f32.mxu0 %v1487_v46  ;;  %8858 = vmatprep.mubr.f32.mxu1 %v1435_v47  ;;  %v2712_v46 = vld [vmem:[#allocation4 + $0x228] sm:$0xff]  ;;  %v3047_v47 = vld [vmem:[#allocation4 + $0x2b0] sm:$0xff] }
 0x131   : > { %8898 = vmatprep.subr.mxu0 %v2040_v48  ;;  %8981 = vmatpush3.msra.mxu1 %v2376_v49  ;;  %v2358_v49 = vld [vmem:[#allocation2 + $0xc2] sm:$0xff] }
 0x132   : > { %8899 = vmatpush3.msra.mxu0 %v2040_v48  ;;  %8982 = vmatprep.subr.mxu1 %v2375_v55  ;;  %v2357_v48 = vld [vmem:[#allocation2 + $0xba] sm:$0xff] }
 0x133   : > { %8773 = vmatmul.mubr.f32.gmra.mxu0 %v1488_v50  ;;  %8859 = vmatmul.mubr.f32.gmra.mxu1 %v1436_v51  ;;  %v2711_v50 = vld [vmem:[#allocation4 + $0x220] sm:$0xff]  ;;  %v3046_v51 = vld [vmem:[#allocation4 + $0x2a8] sm:$0xff] }
 0x134   : > { %8775 = vmatprep.mubr.f32.mxu0 %v1489_v52  ;;  %8861 = vmatprep.mubr.f32.mxu1 %v1437_v53  ;;  %v2359_v52 = vld [vmem:[#allocation2 + $0xca] sm:$0xff]  ;;  %v2360_v53 = vld [vmem:[#allocation2 + $0xd2] sm:$0xff] }
 0x135   : > { %8900 = vmatprep.subr.mxu0 %v2039_v54  ;;  %8983 = vmatpush3.msra.mxu1 %v2375_v55  ;;  %v3045_v55 = vld [vmem:[#allocation4 + $0x2a0] sm:$0xff] }
 0x136   : > { %8901 = vmatpush3.msra.mxu0 %v2039_v54  ;;  %8984 = vmatprep.subr.mxu1 %v2374_v60  ;;  %v2710_v54 = vld [vmem:[#allocation4 + $0x218] sm:$0xff] }
 0x137   : > { %8776 = vmatmul.mubr.f32.gmra.mxu0 %v1490_v56  ;;  %8862 = vmatmul.mubr.f32.gmra.mxu1 %v1438_v57  ;;  %v2361_v56 = vld [vmem:[#allocation2 + $0xda] sm:$0xff]  ;;  %v2362_v57 = vld [vmem:[#allocation2 + $0xe2] sm:$0xff] }
 0x138   : > { %8778 = vmatprep.mubr.f32.mxu0 %v1491_v58  ;;  %8864 = vmatprep.mubr.f32.mxu1 %v1439_v59  ;;  %v2709_v58 = vld [vmem:[#allocation4 + $0x210] sm:$0xff]  ;;  %v3044_v59 = vld [vmem:[#allocation4 + $0x298] sm:$0xff] }
 0x139   : > { %9042 = vmatprep.subr.mxu0 %v2722_v61  ;;  %8985 = vmatpush3.msra.mxu1 %v2374_v60  ;;  %v2363_v60 = vld [vmem:[#allocation2 + $0xea] sm:$0xff] }
 0x13a   : > { %8986 = vmatprep.subr.mxu1 %v2373_v2 }
 0x13b   : > { %8779 = vmatmul.mubr.f32.gmra.mxu0 %v1492_v62  ;;  %8865 = vmatmul.mubr.f32.gmra.mxu1 %v1440_v63  ;;  %v2708_v62 = vld [vmem:[#allocation4 + $0x208] sm:$0xff]  ;;  %v3043_v63 = vld [vmem:[#allocation4 + $0x290] sm:$0xff] }
 0x13c   : > { %8781 = vmatprep.mubr.f32.mxu0 %v1493_v0  ;;  %8867 = vmatprep.mubr.f32.mxu1 %v1441_v1  ;;  %v2365_v0 = vld [vmem:[#allocation2 + $0xfa] sm:$0xff]  ;;  %v2366_v1 = vld [vmem:[#allocation2 + $0x102] sm:$0xff] }
 0x13d   : > { %8987 = vmatpush3.msra.mxu1 %v2373_v2  ;;  %v2707_v2 = vld [vmem:[#allocation4 + $0x200] sm:$0xff] }
 0x13e   : > { %9128 = vmatprep.subr.mxu1 %v3056_v7 }
 0x13f   : > { %8782 = vmatmul.mubr.f32.gmra.mxu0 %v1494_v3  ;;  %8868 = vmatmul.mubr.f32.gmra.mxu1 %v1442_v4  ;;  %v3042_v3 = vld [vmem:[#allocation4 + $0x288] sm:$0xff]  ;;  %v2367_v4 = vld [vmem:[#allocation2 + $0x10a] sm:$0xff] }
 0x140   : > { %8902 = vmatprep.mubr.f32.mxu0 %v2002_v5  ;;  %8988 = vmatprep.mubr.f32.mxu1 %v2336_v6  ;;  %v2368_v5 = vld [vmem:[#allocation2 + $0x112] sm:$0xff] }
 0x143   : > { %8903 = vmatmul.mubr.f32.vlgmr.msra.gmra.mxu0 %v2003_v8  ;;  %8989 = vmatmul.mubr.f32.vlgmr.msra.gmra.mxu1 %v2337_v9  ;;  %v2369_v8 = vld [vmem:[#allocation2 + $0x11a] sm:$0xff] }
 0x144   : > { %9043 = vmatpush3.msra.mxu0 %v2722_v61  ;;  %8905 = vmatprep.mubr.f32.mxu0 %v2336_v6  ;;  %v2364_v61 = vld [vmem:[#allocation2 + $0xf2] sm:$0xff] }
 0x145   : > { %8991 = vmatprep.mubr.f32.mxu1 %v2338_v10  ;;  %9044 = vmatprep.subr.mxu0 %v2721_v11  ;;  %v3041_v6 = vld [vmem:[#allocation4 + $0x280] sm:$0xff] }
 0x146   : > { %9045 = vmatpush3.msra.mxu0 %v2721_v11  ;;  %9129 = vmatpush3.msra.mxu1 %v3056_v7  ;;  %v3390_v7 = vld [vmem:[#allocation4 + $0x378] sm:$0xff] }
 0x147   : > { %8906 = vmatmul.mubr.f32.gmra.mxu0 %v2337_v9  ;;  %8992 = vmatmul.mubr.f32.gmra.mxu1 %v2339_v12  ;;  %v2370_v9 = vld [vmem:[#allocation2 + $0x122] sm:$0xff]  ;;  %v2371_v11 = vld [vmem:[#allocation2 + $0x12a] sm:$0xff] }
 0x148   : > { %8908 = vmatprep.mubr.f32.mxu0 %v2338_v10  ;;  %8994 = vmatprep.mubr.f32.mxu1 %v2340_v13  ;;  %v3724_v10 = vld [vmem:[#allocation4 + $0x3f8] sm:$0xff] }
 0x149   : > { %9046 = vmatprep.subr.mxu0 %v2720_v14  ;;  %9130 = vmatprep.subr.mxu1 %v3055_v15 }
 0x14a   : > { %9047 = vmatpush3.msra.mxu0 %v2720_v14  ;;  %9131 = vmatpush3.msra.mxu1 %v3055_v15  ;;  %v2671_v14 = vld [vmem:[#allocation2 + $0x1b] sm:$0xff] }
 0x14b   : > { %8909 = vmatmul.mubr.f32.gmra.mxu0 %v2339_v12  ;;  %8995 = vmatmul.mubr.f32.gmra.mxu1 %v2341_v16  ;;  %v2670_v12 = vld [vmem:[#allocation2 + $0x13] sm:$0xff]  ;;  %v3005_v15 = vld [vmem:[#allocation2 + $0x1c] sm:$0xff] }
 0x14c   : > { %8911 = vmatprep.mubr.f32.mxu0 %v2340_v13  ;;  %8997 = vmatprep.mubr.f32.mxu1 %v2342_v17  ;;  %v3004_v13 = vld [vmem:[#allocation2 + $0x14] sm:$0xff] }
 0x14d   : > { %9048 = vmatprep.subr.mxu0 %v2719_v18  ;;  %9132 = vmatprep.subr.mxu1 %v3054_v19 }
 0x14e   : > { %9049 = vmatpush3.msra.mxu0 %v2719_v18  ;;  %9133 = vmatpush3.msra.mxu1 %v3054_v19  ;;  %v3389_v18 = vld [vmem:[#allocation4 + $0x370] sm:$0xff] }
 0x14f   : > { %8912 = vmatmul.mubr.f32.gmra.mxu0 %v2341_v16  ;;  %8998 = vmatmul.mubr.f32.gmra.mxu1 %v2343_v20  ;;  %v2672_v16 = vld [vmem:[#allocation2 + $0x23] sm:$0xff]  ;;  %v2673_v19 = vld [vmem:[#allocation2 + $0x2b] sm:$0xff] }
 0x150   : > { %8914 = vmatprep.mubr.f32.mxu0 %v2342_v17  ;;  %9000 = vmatprep.mubr.f32.mxu1 %v2344_v21  ;;  %v10923_v17 = vld [vmem:[#allocation2 + $0x24] sm:$0xff] }
 0x151   : > { %9050 = vmatprep.subr.mxu0 %v2718_v22  ;;  %9134 = vmatprep.subr.mxu1 %v3053_v23 }
 0x152   : > { %9051 = vmatpush3.msra.mxu0 %v2718_v22  ;;  %9135 = vmatpush3.msra.mxu1 %v3053_v23  ;;  %v10928_v22 = vld [vmem:[#allocation2 + $0x34] sm:$0xff] }
 0x153   : > { %8915 = vmatmul.mubr.f32.gmra.mxu0 %v2343_v20  ;;  %9001 = vmatmul.mubr.f32.gmra.mxu1 %v2345_v24  ;;  %v10925_v20 = vld [vmem:[#allocation2 + $0x2c] sm:$0xff]  ;;  %v714_v23 = vld [vmem:[%s10382_s25 + $0x138] sm:$0xff] }
 0x154   : > { %8917 = vmatprep.mubr.f32.mxu0 %v2344_v21  ;;  %9003 = vmatprep.mubr.f32.mxu1 %v2346_v25  ;;  %v2674_v21 = vld [vmem:[#allocation2 + $0x33] sm:$0xff]  ;;  %756 = vst.msk [vmem:[#allocation2 + $0x138] sm:$0xff] %vm14058_vm2, %v714_v23 }
 0x155   : > { %9052 = vmatprep.subr.mxu0 %v2717_v26  ;;  %9136 = vmatprep.subr.mxu1 %v3052_v27  ;;  %v10992_v23 = vld [vmem:[#allocation2 + $0xd4] sm:$0xff] }
 0x156   : > { %9053 = vmatpush3.msra.mxu0 %v2717_v26  ;;  %9137 = vmatpush3.msra.mxu1 %v3052_v27  ;;  %v715_v26 = vld [vmem:[%s10382_s25 + $0x140] sm:$0xff] }
 0x157   : > { %8918 = vmatmul.mubr.f32.gmra.mxu0 %v2345_v24  ;;  %9004 = vmatmul.mubr.f32.gmra.mxu1 %v2347_v28  ;;  %v3388_v24 = vld [vmem:[#allocation4 + $0x368] sm:$0xff]  ;;  %757 = vst.msk [vmem:[#allocation2 + $0x140] sm:$0xff] %vm14058_vm2, %v715_v26 }
 0x158   : > { %8920 = vmatprep.mubr.f32.mxu0 %v2346_v25  ;;  %9006 = vmatprep.mubr.f32.mxu1 %v2348_v29  ;;  %v3723_v25 = vld [vmem:[#allocation4 + $0x3f0] sm:$0xff]  ;;  %v2675_v27 = vld [vmem:[#allocation2 + $0x3b] sm:$0xff] }
 0x159   : > { %9054 = vmatprep.subr.mxu0 %v2716_v30  ;;  %9138 = vmatprep.subr.mxu1 %v3051_v31  ;;  %v2695_v26 = vld [vmem:[#allocation2 + $0xdb] sm:$0xff] }
 0x15a   : > { %9055 = vmatpush3.msra.mxu0 %v2716_v30  ;;  %9139 = vmatpush3.msra.mxu1 %v3051_v31  ;;  %v10938_v30 = vld [vmem:[#allocation2 + $0x44] sm:$0xff]  ;;  %v3387_v31 = vld [vmem:[#allocation4 + $0x360] sm:$0xff] }
 0x15b   : > { %8921 = vmatmul.mubr.f32.gmra.mxu0 %v2347_v28  ;;  %9007 = vmatmul.mubr.f32.gmra.mxu1 %v2349_v32  ;;  %v10936_v28 = vld [vmem:[#allocation2 + $0x3c] sm:$0xff] }
 0x15c   : > { %8923 = vmatprep.mubr.f32.mxu0 %v2348_v29  ;;  %9009 = vmatprep.mubr.f32.mxu1 %v2350_v33  ;;  %v2676_v29 = vld [vmem:[#allocation2 + $0x43] sm:$0xff] }
 0x15d   : > { %9056 = vmatprep.subr.mxu0 %v2715_v34  ;;  %9140 = vmatprep.subr.mxu1 %v3050_v35 }
 0x15e   : > { %9057 = vmatpush3.msra.mxu0 %v2715_v34  ;;  %9141 = vmatpush3.msra.mxu1 %v3050_v35  ;;  %v10942_v34 = vld [vmem:[#allocation2 + $0x4c] sm:$0xff] }
 0x15f   : > { %8924 = vmatmul.mubr.f32.gmra.mxu0 %v2349_v32  ;;  %9010 = vmatmul.mubr.f32.gmra.mxu1 %v2351_v36  ;;  %v3722_v32 = vld [vmem:[#allocation4 + $0x3e8] sm:$0xff]  ;;  %v2678_v35 = vld [vmem:[#allocation2 + $0x53] sm:$0xff] }
 0x160   : > { %8926 = vmatprep.mubr.f32.mxu0 %v2350_v33  ;;  %9012 = vmatprep.mubr.f32.mxu1 %v2352_v37  ;;  %v2677_v33 = vld [vmem:[#allocation2 + $0x4b] sm:$0xff] }
 0x161   : > { %9058 = vmatprep.subr.mxu0 %v2714_v38  ;;  %9142 = vmatprep.subr.mxu1 %v3049_v39 }
 0x162   : > { %9059 = vmatpush3.msra.mxu0 %v2714_v38  ;;  %9143 = vmatpush3.msra.mxu1 %v3049_v39  ;;  %v3721_v38 = vld [vmem:[#allocation4 + $0x3e0] sm:$0xff] }
 0x163   : > { %8927 = vmatmul.mubr.f32.gmra.mxu0 %v2351_v36  ;;  %9013 = vmatmul.mubr.f32.gmra.mxu1 %v2353_v40  ;;  %v10944_v36 = vld [vmem:[#allocation2 + $0x54] sm:$0xff] }
 0x164   : > { %8929 = vmatprep.mubr.f32.mxu0 %v2352_v37  ;;  %9015 = vmatprep.mubr.f32.mxu1 %v2354_v41  ;;  %v3386_v37 = vld [vmem:[#allocation4 + $0x358] sm:$0xff]  ;;  %v2679_v39 = vld [vmem:[#allocation2 + $0x5b] sm:$0xff] }
 0x165   : > { %9060 = vmatprep.subr.mxu0 %v2713_v42  ;;  %9144 = vmatprep.subr.mxu1 %v3048_v43 }
 0x166   : > { %9061 = vmatpush3.msra.mxu0 %v2713_v42  ;;  %9145 = vmatpush3.msra.mxu1 %v3048_v43  ;;  %v10950_v42 = vld [vmem:[#allocation2 + $0x64] sm:$0xff] }
 0x167   : > { %8930 = vmatmul.mubr.f32.gmra.mxu0 %v2353_v40  ;;  %9016 = vmatmul.mubr.f32.gmra.mxu1 %v2355_v44  ;;  %v10948_v40 = vld [vmem:[#allocation2 + $0x5c] sm:$0xff]  ;;  %v3385_v43 = vld [vmem:[#allocation4 + $0x350] sm:$0xff] }
 0x168   : > { %8932 = vmatprep.mubr.f32.mxu0 %v2354_v41  ;;  %9018 = vmatprep.mubr.f32.mxu1 %v2356_v45  ;;  %v2680_v41 = vld [vmem:[#allocation2 + $0x63] sm:$0xff] }
 0x169   : > { %9062 = vmatprep.subr.mxu0 %v2712_v46  ;;  %9146 = vmatprep.subr.mxu1 %v3047_v47 }
 0x16a   : > { %9063 = vmatpush3.msra.mxu0 %v2712_v46  ;;  %9147 = vmatpush3.msra.mxu1 %v3047_v47  ;;  %v10954_v46 = vld [vmem:[#allocation2 + $0x6c] sm:$0xff] }
 0x16b   : > { %8933 = vmatmul.mubr.f32.gmra.mxu0 %v2355_v44  ;;  %9019 = vmatmul.mubr.f32.gmra.mxu1 %v2357_v48  ;;  %v3720_v44 = vld [vmem:[#allocation4 + $0x3d8] sm:$0xff] }
 0x16c   : > { %8935 = vmatprep.mubr.f32.mxu0 %v2356_v45  ;;  %9021 = vmatprep.mubr.f32.mxu1 %v2358_v49  ;;  %v2681_v45 = vld [vmem:[#allocation2 + $0x6b] sm:$0xff]  ;;  %v2682_v47 = vld [vmem:[#allocation2 + $0x73] sm:$0xff] }
 0x16d   : > { %9064 = vmatprep.subr.mxu0 %v2711_v50  ;;  %9148 = vmatprep.subr.mxu1 %v3046_v51 }
 0x16e   : > { %9065 = vmatpush3.msra.mxu0 %v2711_v50  ;;  %9149 = vmatpush3.msra.mxu1 %v3046_v51  ;;  %v3719_v50 = vld [vmem:[#allocation4 + $0x3d0] sm:$0xff]  ;;  %v2683_v51 = vld [vmem:[#allocation2 + $0x7b] sm:$0xff] }
 0x16f   : > { %8936 = vmatmul.mubr.f32.gmra.mxu0 %v2357_v48  ;;  %9022 = vmatmul.mubr.f32.gmra.mxu1 %v2359_v52  ;;  %v10956_v48 = vld [vmem:[#allocation2 + $0x74] sm:$0xff] }
 0x170   : > { %8938 = vmatprep.mubr.f32.mxu0 %v2358_v49  ;;  %9024 = vmatprep.mubr.f32.mxu1 %v2360_v53  ;;  %v3384_v49 = vld [vmem:[#allocation4 + $0x348] sm:$0xff] }
 0x171   : > { %9066 = vmatprep.subr.mxu0 %v2710_v54  ;;  %9150 = vmatprep.subr.mxu1 %v3045_v55 }
 0x172   : > { %9067 = vmatpush3.msra.mxu0 %v2710_v54  ;;  %9151 = vmatpush3.msra.mxu1 %v3045_v55  ;;  %v10962_v54 = vld [vmem:[#allocation2 + $0x84] sm:$0xff]  ;;  %v3383_v55 = vld [vmem:[#allocation4 + $0x340] sm:$0xff] }
 0x173   : > { %8939 = vmatmul.mubr.f32.gmra.mxu0 %v2359_v52  ;;  %9025 = vmatmul.mubr.f32.gmra.mxu1 %v2361_v56  ;;  %v10960_v52 = vld [vmem:[#allocation2 + $0x7c] sm:$0xff] }
 0x174   : > { %8941 = vmatprep.mubr.f32.mxu0 %v2360_v53  ;;  %9027 = vmatprep.mubr.f32.mxu1 %v2362_v57  ;;  %v2684_v53 = vld [vmem:[#allocation2 + $0x83] sm:$0xff] }
 0x175   : > { %9068 = vmatprep.subr.mxu0 %v2709_v58  ;;  %9152 = vmatprep.subr.mxu1 %v3044_v59 }
 0x176   : > { %9069 = vmatpush3.msra.mxu0 %v2709_v58  ;;  %9153 = vmatpush3.msra.mxu1 %v3044_v59  ;;  %v10966_v58 = vld [vmem:[#allocation2 + $0x8c] sm:$0xff] }
 0x177   : > { %8942 = vmatmul.mubr.f32.gmra.mxu0 %v2361_v56  ;;  %9028 = vmatmul.mubr.f32.gmra.mxu1 %v2363_v60  ;;  %v3718_v56 = vld [vmem:[#allocation4 + $0x3c8] sm:$0xff]  ;;  %v2686_v59 = vld [vmem:[#allocation2 + $0x93] sm:$0xff] }
 0x178   : > { %8944 = vmatprep.mubr.f32.mxu0 %v2362_v57  ;;  %9030 = vmatprep.mubr.f32.mxu1 %v2364_v61  ;;  %v2685_v57 = vld [vmem:[#allocation2 + $0x8b] sm:$0xff] }
 0x179   : > { %9070 = vmatprep.subr.mxu0 %v2708_v62  ;;  %9154 = vmatprep.subr.mxu1 %v3043_v63 }
 0x17a   : > { %9071 = vmatpush3.msra.mxu0 %v2708_v62  ;;  %9155 = vmatpush3.msra.mxu1 %v3043_v63  ;;  %v3717_v62 = vld [vmem:[#allocation4 + $0x3c0] sm:$0xff] }
 0x17b   : > { %8945 = vmatmul.mubr.f32.gmra.mxu0 %v2363_v60  ;;  %9031 = vmatmul.mubr.f32.gmra.mxu1 %v2365_v0  ;;  %v10968_v60 = vld [vmem:[#allocation2 + $0x94] sm:$0xff] }
 0x17c   : > { %8947 = vmatprep.mubr.f32.mxu0 %v2364_v61  ;;  %9033 = vmatprep.mubr.f32.mxu1 %v2366_v1  ;;  %v3382_v61 = vld [vmem:[#allocation4 + $0x338] sm:$0xff]  ;;  %v2687_v63 = vld [vmem:[#allocation2 + $0x9b] sm:$0xff] }
 0x17d   : > { %9072 = vmatprep.subr.mxu0 %v2707_v2  ;;  %9156 = vmatprep.subr.mxu1 %v3042_v3 }
 0x17e   : > { %9073 = vmatpush3.msra.mxu0 %v2707_v2  ;;  %9157 = vmatpush3.msra.mxu1 %v3042_v3  ;;  %v10974_v2 = vld [vmem:[#allocation2 + $0xa4] sm:$0xff] }
 0x17f   : > { %8948 = vmatmul.mubr.f32.gmra.mxu0 %v2365_v0  ;;  %9034 = vmatmul.mubr.f32.gmra.mxu1 %v2367_v4  ;;  %v10972_v0 = vld [vmem:[#allocation2 + $0x9c] sm:$0xff]  ;;  %v3381_v3 = vld [vmem:[#allocation4 + $0x330] sm:$0xff] }
 0x180   : > { %8950 = vmatprep.mubr.f32.mxu0 %v2366_v1  ;;  %9036 = vmatprep.mubr.f32.mxu1 %v2368_v5  ;;  %v2688_v1 = vld [vmem:[#allocation2 + $0xa3] sm:$0xff] }
 0x181   : > { %9158 = vmatprep.subr.mxu1 %v3041_v6  ;;  %9214 = vmatprep.subr.mxu0 %v3390_v7 }
 0x182   : > { %9159 = vmatpush3.msra.mxu1 %v3041_v6  ;;  %v10978_v6 = vld [vmem:[#allocation2 + $0xac] sm:$0xff] }
 0x183   : > { %8951 = vmatmul.mubr.f32.gmra.mxu0 %v2367_v4  ;;  %9037 = vmatmul.mubr.f32.gmra.mxu1 %v2369_v8  ;;  %v3716_v4 = vld [vmem:[#allocation4 + $0x3b8] sm:$0xff] }
 0x184   : > { %8953 = vmatprep.mubr.f32.mxu0 %v2368_v5  ;;  %9039 = vmatprep.mubr.f32.mxu1 %v2370_v9  ;;  %v2689_v5 = vld [vmem:[#allocation2 + $0xab] sm:$0xff]  ;;  %v3380_v9 = vld [vmem:[#allocation4 + $0x328] sm:$0xff] }
 0x185   : > { %9300 = vmatprep.subr.mxu1 %v3724_v10 }
 0x187   : > { %8954 = vmatmul.mubr.f32.gmra.mxu0 %v2369_v8  ;;  %9040 = vmatmul.mubr.f32.gmra.mxu1 %v2371_v11  ;;  %v10980_v8 = vld [vmem:[#allocation2 + $0xb4] sm:$0xff] }
 0x188   : > { %9074 = vmatprep.mubr.f32.mxu0 %v2670_v12  ;;  %9160 = vmatprep.mubr.f32.mxu1 %v3004_v13  ;;  %v2691_v11 = vld [vmem:[#allocation2 + $0xbb] sm:$0xff]  ;;  %v2692_v13 = vld [vmem:[#allocation2 + $0xc3] sm:$0xff] }
 0x189   : > { %v10984_v12 = vld [vmem:[#allocation2 + $0xbc] sm:$0xff] }
 0x18b   : > { %9075 = vmatmul.mubr.f32.vlgmr.msra.gmra.mxu0 %v2671_v14  ;;  %9161 = vmatmul.mubr.f32.vlgmr.msra.gmra.mxu1 %v3005_v15  ;;  %v10986_v14 = vld [vmem:[#allocation2 + $0xc4] sm:$0xff]  ;;  %v3379_v15 = vld [vmem:[#allocation4 + $0x320] sm:$0xff] }
 0x18c   : > { %9215 = vmatpush3.msra.mxu0 %v3390_v7  ;;  %9077 = vmatprep.mubr.f32.mxu0 %v2672_v16  ;;  %v2690_v7 = vld [vmem:[#allocation2 + $0xb3] sm:$0xff]  ;;  %v3714_v16 = vld [vmem:[#allocation4 + $0x3a8] sm:$0xff] }
 0x18d   : > { %9163 = vmatprep.mubr.f32.mxu1 %v10923_v17  ;;  %9216 = vmatprep.subr.mxu0 %v3389_v18 }
 0x18e   : > { %9217 = vmatpush3.msra.mxu0 %v3389_v18  ;;  %9301 = vmatpush3.msra.mxu1 %v3724_v10  ;;  %v3715_v10 = vld [vmem:[#allocation4 + $0x3b0] sm:$0xff] }
 0x18f   : > { %9078 = vmatmul.mubr.f32.gmra.mxu0 %v2673_v19  ;;  %9164 = vmatmul.mubr.f32.gmra.mxu1 %v10925_v20  ;;  %v2693_v18 = vld [vmem:[#allocation2 + $0xcb] sm:$0xff] }
 0x190   : > { %9080 = vmatprep.mubr.f32.mxu0 %v2674_v21  ;;  %9166 = vmatprep.mubr.f32.mxu1 %v10928_v22  ;;  %v10990_v19 = vld [vmem:[#allocation2 + $0xcc] sm:$0xff] }
 0x191   : > { %9218 = vmatprep.subr.mxu0 %v3388_v24  ;;  %9302 = vmatprep.subr.mxu1 %v3723_v25  ;;  %v2694_v21 = vld [vmem:[#allocation2 + $0xd3] sm:$0xff] }
 0x192   : > { %9219 = vmatpush3.msra.mxu0 %v3388_v24  ;;  %9303 = vmatpush3.msra.mxu1 %v3723_v25  ;;  %v3378_v24 = vld [vmem:[#allocation4 + $0x318] sm:$0xff]  ;;  %v3713_v25 = vld [vmem:[#allocation4 + $0x3a0] sm:$0xff] }
 0x193   : > { %9081 = vmatmul.mubr.f32.gmra.mxu0 %v2675_v27  ;;  %9167 = vmatmul.mubr.f32.gmra.mxu1 %v10936_v28  ;;  %v10996_v27 = vld [vmem:[#allocation2 + $0xdc] sm:$0xff] }
 0x194   : > { %9083 = vmatprep.mubr.f32.mxu0 %v2676_v29  ;;  %9169 = vmatprep.mubr.f32.mxu1 %v10938_v30  ;;  %v2696_v29 = vld [vmem:[#allocation2 + $0xe3] sm:$0xff] }
 0x195   : > { %9220 = vmatprep.subr.mxu0 %v3387_v31  ;;  %9304 = vmatprep.subr.mxu1 %v3722_v32 }
 0x196   : > { %9221 = vmatpush3.msra.mxu0 %v3387_v31  ;;  %9305 = vmatpush3.msra.mxu1 %v3722_v32  ;;  %v10998_v31 = vld [vmem:[#allocation2 + $0xe4] sm:$0xff] }
 0x197   : > { %9084 = vmatmul.mubr.f32.gmra.mxu0 %v2677_v33  ;;  %9170 = vmatmul.mubr.f32.gmra.mxu1 %v10942_v34  ;;  %v3377_v32 = vld [vmem:[#allocation4 + $0x310] sm:$0xff]  ;;  %v3712_v33 = vld [vmem:[#allocation4 + $0x398] sm:$0xff] }
 0x198   : > { %9086 = vmatprep.mubr.f32.mxu0 %v2678_v35  ;;  %9172 = vmatprep.mubr.f32.mxu1 %v10944_v36 }
 0x199   : > { %9222 = vmatprep.subr.mxu0 %v3386_v37  ;;  %9306 = vmatprep.subr.mxu1 %v3721_v38 }
 0x19a   : > { %9223 = vmatpush3.msra.mxu0 %v3386_v37  ;;  %9307 = vmatpush3.msra.mxu1 %v3721_v38 }
 0x19b   : > { %9087 = vmatmul.mubr.f32.gmra.mxu0 %v2679_v39  ;;  %9173 = vmatmul.mubr.f32.gmra.mxu1 %v10948_v40  ;;  %v2697_v39 = vld [vmem:[#allocation2 + $0xeb] sm:$0xff] }
 0x19c   : > { %9089 = vmatprep.mubr.f32.mxu0 %v2680_v41  ;;  %9175 = vmatprep.mubr.f32.mxu1 %v10950_v42  ;;  %v11004_v41 = vld [vmem:[#allocation2 + $0xec] sm:$0xff] }
 0x19d   : > { %9224 = vmatprep.subr.mxu0 %v3385_v43  ;;  %9308 = vmatprep.subr.mxu1 %v3720_v44 }
 0x19e   : > { %9225 = vmatpush3.msra.mxu0 %v3385_v43  ;;  %9309 = vmatpush3.msra.mxu1 %v3720_v44 }
 0x19f   : > { %9090 = vmatmul.mubr.f32.gmra.mxu0 %v2681_v45  ;;  %9176 = vmatmul.mubr.f32.gmra.mxu1 %v10954_v46  ;;  %v2698_v45 = vld [vmem:[#allocation2 + $0xf3] sm:$0xff] }
 0x1a0   : > { %9092 = vmatprep.mubr.f32.mxu0 %v2682_v47  ;;  %9178 = vmatprep.mubr.f32.mxu1 %v10956_v48  ;;  %v11006_v47 = vld [vmem:[#allocation2 + $0xf4] sm:$0xff] }
 0x1a1   : > { %9226 = vmatprep.subr.mxu0 %v3384_v49  ;;  %9310 = vmatprep.subr.mxu1 %v3719_v50 }
 0x1a2   : > { %9227 = vmatpush3.msra.mxu0 %v3384_v49  ;;  %9311 = vmatpush3.msra.mxu1 %v3719_v50  ;;  %v3376_v50 = vld [vmem:[#allocation4 + $0x308] sm:$0xff] }
 0x1a3   : > { %9093 = vmatmul.mubr.f32.gmra.mxu0 %v2683_v51  ;;  %9179 = vmatmul.mubr.f32.gmra.mxu1 %v10960_v52  ;;  %v3711_v51 = vld [vmem:[#allocation4 + $0x390] sm:$0xff] }
 0x1a4   : > { %9095 = vmatprep.mubr.f32.mxu0 %v2684_v53  ;;  %9181 = vmatprep.mubr.f32.mxu1 %v10962_v54 }
 0x1a5   : > { %9228 = vmatprep.subr.mxu0 %v3383_v55  ;;  %9312 = vmatprep.subr.mxu1 %v3718_v56 }
 0x1a6   : > { %9229 = vmatpush3.msra.mxu0 %v3383_v55  ;;  %9313 = vmatpush3.msra.mxu1 %v3718_v56 }
 0x1a7   : > { %9096 = vmatmul.mubr.f32.gmra.mxu0 %v2685_v57  ;;  %9182 = vmatmul.mubr.f32.gmra.mxu1 %v10966_v58  ;;  %v2699_v57 = vld [vmem:[#allocation2 + $0xfb] sm:$0xff] }
 0x1a8   : > { %9098 = vmatprep.mubr.f32.mxu0 %v2686_v59  ;;  %9184 = vmatprep.mubr.f32.mxu1 %v10968_v60  ;;  %v11014_v59 = vld [vmem:[#allocation2 + $0xfc] sm:$0xff] }
 0x1a9   : > { %9230 = vmatprep.subr.mxu0 %v3382_v61  ;;  %9314 = vmatprep.subr.mxu1 %v3717_v62 }
 0x1aa   : > { %9231 = vmatpush3.msra.mxu0 %v3382_v61  ;;  %9315 = vmatpush3.msra.mxu1 %v3717_v62 }
 0x1ab   : > { %9099 = vmatmul.mubr.f32.gmra.mxu0 %v2687_v63  ;;  %9185 = vmatmul.mubr.f32.gmra.mxu1 %v10972_v0  ;;  %v2700_v63 = vld [vmem:[#allocation2 + $0x103] sm:$0xff] }
 0x1ac   : > { %9101 = vmatprep.mubr.f32.mxu0 %v2688_v1  ;;  %9187 = vmatprep.mubr.f32.mxu1 %v10974_v2  ;;  %v11016_v1 = vld [vmem:[#allocation2 + $0x104] sm:$0xff] }
 0x1ad   : > { %9232 = vmatprep.subr.mxu0 %v3381_v3  ;;  %9316 = vmatprep.subr.mxu1 %v3716_v4 }
 0x1ae   : > { %9233 = vmatpush3.msra.mxu0 %v3381_v3  ;;  %9317 = vmatpush3.msra.mxu1 %v3716_v4  ;;  %v3375_v4 = vld [vmem:[#allocation4 + $0x300] sm:$0xff] }
 0x1af   : > { %9102 = vmatmul.mubr.f32.gmra.mxu0 %v2689_v5  ;;  %9188 = vmatmul.mubr.f32.gmra.mxu1 %v10978_v6  ;;  %v3710_v5 = vld [vmem:[#allocation4 + $0x388] sm:$0xff] }
 0x1b0   : > { %9104 = vmatprep.mubr.f32.mxu0 %v2690_v7  ;;  %9190 = vmatprep.mubr.f32.mxu1 %v10980_v8 }
 0x1b1   : > { %9234 = vmatprep.subr.mxu0 %v3380_v9  ;;  %9318 = vmatprep.subr.mxu1 %v3715_v10 }
 0x1b2   : > { %9235 = vmatpush3.msra.mxu0 %v3380_v9  ;;  %9319 = vmatpush3.msra.mxu1 %v3715_v10 }
 0x1b3   : > { %9105 = vmatmul.mubr.f32.gmra.mxu0 %v2691_v11  ;;  %9191 = vmatmul.mubr.f32.gmra.mxu1 %v10984_v12  ;;  %v2701_v11 = vld [vmem:[#allocation2 + $0x10b] sm:$0xff] }
 0x1b4   : > { %9107 = vmatprep.mubr.f32.mxu0 %v2692_v13  ;;  %9193 = vmatprep.mubr.f32.mxu1 %v10986_v14  ;;  %v11024_v13 = vld [vmem:[#allocation2 + $0x10c] sm:$0xff] }
 0x1b5   : > { %9236 = vmatprep.subr.mxu0 %v3379_v15  ;;  %9320 = vmatprep.subr.mxu1 %v3714_v16 }
 0x1b6   : > { %9237 = vmatpush3.msra.mxu0 %v3379_v15  ;;  %9321 = vmatpush3.msra.mxu1 %v3714_v16 }
 0x1b7   : > { %9108 = vmatmul.mubr.f32.gmra.mxu0 %v2693_v18  ;;  %9194 = vmatmul.mubr.f32.gmra.mxu1 %v10990_v19  ;;  %v2702_v18 = vld [vmem:[#allocation2 + $0x113] sm:$0xff] }
 0x1b8   : > { %9110 = vmatprep.mubr.f32.mxu0 %v2694_v21  ;;  %9196 = vmatprep.mubr.f32.mxu1 %v10992_v23  ;;  %v11026_v21 = vld [vmem:[#allocation2 + $0x114] sm:$0xff] }
 0x1b9   : > { %9238 = vmatprep.subr.mxu0 %v3378_v24  ;;  %9322 = vmatprep.subr.mxu1 %v3713_v25 }
 0x1ba   : > { %9239 = vmatpush3.msra.mxu0 %v3378_v24  ;;  %9323 = vmatpush3.msra.mxu1 %v3713_v25  ;;  %v8732_v35 = vpop.f32.mrf.mxu0  ;;  %v3709_v25 = vld [vmem:[#allocation4 + $0x380] sm:$0xff] }
 0x1bb   : > { %v8818_v37 = vpop.f32.mrf.mxu1  ;;  %9111 = vmatmul.mubr.f32.gmra.mxu0 %v2695_v26  ;;  %9197 = vmatmul.mubr.f32.gmra.mxu1 %v10996_v27  ;;  %v4058_v26 = vld [vmem:[#allocation4 + $0x478] sm:$0xff] }
 0x1bc   : > { %v11001_v38 = vadd.f32 %v8818_v37, %v8732_v35  ;;  %9113 = vmatprep.mubr.f32.mxu0 %v2696_v29  ;;  %9199 = vmatprep.mubr.f32.mxu1 %v10998_v31  ;;  %v1578_v43 = vpop.f32.mrf.mxu0  ;;  %v2703_v35 = vld [vmem:[#allocation2 + $0x11b] sm:$0xff] }
 0x1bd   : > { %v1823_v44 = vpop.f32.mrf.mxu1  ;;  %9240 = vmatprep.subr.mxu0 %v3377_v32  ;;  %9324 = vmatprep.subr.mxu1 %v3712_v33  ;;  %v11034_v37 = vld [vmem:[#allocation2 + $0x11c] sm:$0xff] }
 0x1be   : > { %v11008_v49 = vadd.f32 %v1823_v44, %v1578_v43  ;;  %9241 = vmatpush3.msra.mxu0 %v3377_v32  ;;  %9325 = vmatpush3.msra.mxu1 %v3712_v33  ;;  %v8735_v53 = vpop.f32.mrf.mxu0  ;;  %v2704_v44 = vld [vmem:[#allocation2 + $0x123] sm:$0xff] }
 0x1bf   : > { %v8821_v55 = vpop.f32.mrf.mxu1  ;;  %9114 = vmatmul.mubr.f32.gmra.mxu0 %v2697_v39  ;;  %9200 = vmatmul.mubr.f32.gmra.mxu1 %v11004_v41 }
 0x1c0   : > { %v11011_v56 = vadd.f32 %v8821_v55, %v8735_v53  ;;  %9116 = vmatprep.mubr.f32.mxu0 %v2698_v45  ;;  %9202 = vmatprep.mubr.f32.mxu1 %v11006_v47  ;;  %v1588_v61 = vpop.f32.mrf.mxu0  ;;  %v11036_v45 = vld [vmem:[#allocation2 + $0x124] sm:$0xff] }
 0x1c1   : > { %v1833_v62 = vpop.f32.mrf.mxu1  ;;  %9242 = vmatprep.subr.mxu0 %v3376_v50  ;;  %9326 = vmatprep.subr.mxu1 %v3711_v51 }
 0x1c2   : > { %v11018_v3 = vadd.f32 %v1833_v62, %v1588_v61  ;;  %9243 = vmatpush3.msra.mxu0 %v3376_v50  ;;  %9327 = vmatpush3.msra.mxu1 %v3711_v51  ;;  %v11044_v61 = vld [vmem:[#allocation2 + $0x12c] sm:$0xff] }
 0x1c3   : > { %v8738_v7 = vpop.f32.mrf.mxu0  ;;  %v8824_v9 = vpop.f32.mrf.mxu1  ;;  %9117 = vmatmul.mubr.f32.gmra.mxu0 %v2699_v57  ;;  %9203 = vmatmul.mubr.f32.gmra.mxu1 %v11014_v59  ;;  %v2705_v57 = vld [vmem:[#allocation2 + $0x12b] sm:$0xff] }
 0x1c4   : > { %v11021_v10 = vadd.f32 %v8824_v9, %v8738_v7  ;;  %9119 = vmatprep.mubr.f32.mxu0 %v2700_v63  ;;  %9205 = vmatprep.mubr.f32.mxu1 %v11016_v1 }
 0x1c5   : > { %v1598_v15 = vpop.f32.mrf.mxu0  ;;  %v1843_v16 = vpop.f32.mrf.mxu1  ;;  %9244 = vmatprep.subr.mxu0 %v3375_v4  ;;  %9328 = vmatprep.subr.mxu1 %v3710_v5 }
 0x1c6   : > { %v11028_v24 = vadd.f32 %v1843_v16, %v1598_v15  ;;  %9245 = vmatpush3.msra.mxu0 %v3375_v4  ;;  %9329 = vmatpush3.msra.mxu1 %v3710_v5  ;;  %v3672_v4 = vld [vmem:[#allocation2 + $0x25] sm:$0xff]  ;;  %v3673_v15 = vld [vmem:[#allocation2 + $0x2d] sm:$0xff] }
 0x1c7   : > { %v8741_v29 = vpop.f32.mrf.mxu0  ;;  %v8827_v32 = vpop.f32.mrf.mxu1  ;;  %9120 = vmatmul.mubr.f32.gmra.mxu0 %v2701_v11  ;;  %9206 = vmatmul.mubr.f32.gmra.mxu1 %v11024_v13 }
 0x1c8   : > { %v11031_v33 = vadd.f32 %v8827_v32, %v8741_v29  ;;  %9122 = vmatprep.mubr.f32.mxu0 %v2702_v18  ;;  %9208 = vmatprep.mubr.f32.mxu1 %v11026_v21  ;;  %v3674_v29 = vld [vmem:[#allocation2 + $0x35] sm:$0xff]  ;;  %v4057_v32 = vld [vmem:[#allocation4 + $0x470] sm:$0xff] }
 0x1c9   : > { %v1608_v39 = vpop.f32.mrf.mxu0  ;;  %v1853_v43 = vpop.f32.mrf.mxu1  ;;  %9330 = vmatprep.subr.mxu1 %v3709_v25  ;;  %9386 = vmatprep.subr.mxu0 %v4058_v26 }
 0x1ca   : > { %v11038_v50 = vadd.f32 %v1853_v43, %v1608_v39  ;;  %9331 = vmatpush3.msra.mxu1 %v3709_v25 }
 0x1cb   : > { %v8744_v51 = vpop.f32.mrf.mxu0  ;;  %v8830_v53 = vpop.f32.mrf.mxu1  ;;  %9123 = vmatmul.mubr.f32.gmra.mxu0 %v2703_v35  ;;  %9209 = vmatmul.mubr.f32.gmra.mxu1 %v11034_v37 }
 0x1cc   : > { %v11041_v55 = vadd.f32 %v8830_v53, %v8744_v51  ;;  %9125 = vmatprep.mubr.f32.mxu0 %v2704_v44  ;;  %9211 = vmatprep.mubr.f32.mxu1 %v11036_v45  ;;  %v3675_v44 = vld [vmem:[#allocation2 + $0x3d] sm:$0xff]  ;;  %v3676_v53 = vld [vmem:[#allocation2 + $0x45] sm:$0xff] }
 0x1cd   : > { %v1618_v62 = vpop.f32.mrf.mxu0  ;;  %v1863_v63 = vpop.f32.mrf.mxu1 }
 0x1ce   : > { %v11046_v5 = vadd.f32 %v1863_v63, %v1618_v62  ;;  %v4056_v62 = vld [vmem:[#allocation4 + $0x468] sm:$0xff] }
 0x1cf   : > { %v8747_v7 = vpop.f32.mrf.mxu0  ;;  %v8833_v9 = vpop.f32.mrf.mxu1  ;;  %9126 = vmatmul.mubr.f32.gmra.mxu0 %v2705_v57  ;;  %9212 = vmatmul.mubr.f32.gmra.mxu1 %v11044_v61 }
 0x1d0   : > { %v11049_v11 = vadd.f32 %v8833_v9, %v8747_v7  ;;  %9246 = vmatprep.mubr.f32.mxu0 %v10923_v17  ;;  %9332 = vmatprep.mubr.f32.mxu1 %v3672_v4  ;;  %v3678_v9 = vld [vmem:[#allocation2 + $0x55] sm:$0xff] }
 0x1d1   : > { %v1628_v16 = vpop.f32.mrf.mxu0  ;;  %v1873_v18 = vpop.f32.mrf.mxu1 }
 0x1d2   : > { %v11052_v25 = vadd.f32 %v1873_v18, %v1628_v16  ;;  %v4055_v16 = vld [vmem:[#allocation4 + $0x460] sm:$0xff] }
 0x1d3   : > { %v8750_v35 = vpop.f32.mrf.mxu0  ;;  %v8836_v39 = vpop.f32.mrf.mxu1  ;;  %9247 = vmatmul.mubr.f32.vlgmr.msra.gmra.mxu0 %v10925_v20  ;;  %9333 = vmatmul.mubr.f32.vlgmr.msra.gmra.mxu1 %v3673_v15 }
 0x1d4   : > { %v11055_v43 = vadd.f32 %v8836_v39, %v8750_v35  ;;  %9387 = vmatpush3.msra.mxu0 %v4058_v26  ;;  %9249 = vmatprep.mubr.f32.mxu0 %v10928_v22  ;;  %v3677_v22 = vld [vmem:[#allocation2 + $0x4d] sm:$0xff]  ;;  %v3680_v39 = vld [vmem:[#allocation2 + $0x65] sm:$0xff] }
 0x1d5   : > { %v1638_v17 = vpop.f32.mrf.mxu0  ;;  %v1883_v51 = vpop.f32.mrf.mxu1  ;;  %9335 = vmatprep.mubr.f32.mxu1 %v3674_v29  ;;  %9388 = vmatprep.subr.mxu0 %v4057_v32 }
 0x1d6   : > { %v11058_v57 = vadd.f32 %v1883_v51, %v1638_v17  ;;  %9389 = vmatpush3.msra.mxu0 %v4057_v32  ;;  %v4054_v17 = vld [vmem:[#allocation4 + $0x458] sm:$0xff] }
 0x1d7   : > { %v8753_v63 = vpop.f32.mrf.mxu0  ;;  %v8839_v4 = vpop.f32.mrf.mxu1  ;;  %9250 = vmatmul.mubr.f32.gmra.mxu0 %v10936_v28  ;;  %9336 = vmatmul.mubr.f32.gmra.mxu1 %v3675_v44 }
 0x1d8   : > { %v11061_v20 = vadd.f32 %v8839_v4, %v8753_v63  ;;  %9252 = vmatprep.mubr.f32.mxu0 %v10938_v30  ;;  %9338 = vmatprep.mubr.f32.mxu1 %v3676_v53  ;;  %v3679_v30 = vld [vmem:[#allocation2 + $0x5d] sm:$0xff]  ;;  %v3682_v4 = vld [vmem:[#allocation2 + $0x75] sm:$0xff] }
 0x1d9   : > { %v1648_v26 = vpop.f32.mrf.mxu0  ;;  %v1893_v7 = vpop.f32.mrf.mxu1  ;;  %9390 = vmatprep.subr.mxu0 %v4056_v62 }
 0x1da   : > { %v11064_v15 = vadd.f32 %v1893_v7, %v1648_v26  ;;  %9391 = vmatpush3.msra.mxu0 %v4056_v62  ;;  %v4053_v26 = vld [vmem:[#allocation4 + $0x450] sm:$0xff] }
 0x1db   : > { %v8756_v18 = vpop.f32.mrf.mxu0  ;;  %v8842_v29 = vpop.f32.mrf.mxu1  ;;  %9253 = vmatmul.mubr.f32.gmra.mxu0 %v10942_v34  ;;  %9339 = vmatmul.mubr.f32.gmra.mxu1 %v3677_v22 }
 0x1dc   : > { %v11067_v28 = vadd.f32 %v8842_v29, %v8756_v18  ;;  %9255 = vmatprep.mubr.f32.mxu0 %v10944_v36  ;;  %9341 = vmatprep.mubr.f32.mxu1 %v3678_v9  ;;  %v3681_v36 = vld [vmem:[#allocation2 + $0x6d] sm:$0xff]  ;;  %v3684_v29 = vld [vmem:[#allocation2 + $0x85] sm:$0xff] }
 0x1dd   : > { %v1658_v32 = vpop.f32.mrf.mxu0  ;;  %v1903_v35 = vpop.f32.mrf.mxu1  ;;  %9392 = vmatprep.subr.mxu0 %v4055_v16 }
 0x1de   : > { %v11070_v44 = vadd.f32 %v1903_v35, %v1658_v32  ;;  %9393 = vmatpush3.msra.mxu0 %v4055_v16  ;;  %v4052_v32 = vld [vmem:[#allocation4 + $0x448] sm:$0xff] }
 0x1df   : > { %v8759_v51 = vpop.f32.mrf.mxu0  ;;  %v8845_v53 = vpop.f32.mrf.mxu1  ;;  %9256 = vmatmul.mubr.f32.gmra.mxu0 %v10948_v40  ;;  %9342 = vmatmul.mubr.f32.gmra.mxu1 %v3679_v30 }
 0x1e0   : > { %v11073_v34 = vadd.f32 %v8845_v53, %v8759_v51  ;;  %9258 = vmatprep.mubr.f32.mxu0 %v10950_v42  ;;  %9344 = vmatprep.mubr.f32.mxu1 %v3680_v39  ;;  %v3683_v42 = vld [vmem:[#allocation2 + $0x7d] sm:$0xff]  ;;  %v3686_v53 = vld [vmem:[#allocation2 + $0x95] sm:$0xff] }
 0x1e1   : > { %v1668_v62 = vpop.f32.mrf.mxu0  ;;  %v1913_v63 = vpop.f32.mrf.mxu1  ;;  %9394 = vmatprep.subr.mxu0 %v4054_v17 }
 0x1e2   : > { %v11076_v22 = vadd.f32 %v1913_v63, %v1668_v62  ;;  %9395 = vmatpush3.msra.mxu0 %v4054_v17  ;;  %v4051_v62 = vld [vmem:[#allocation4 + $0x440] sm:$0xff] }
 0x1e3   : > { %v8762_v7 = vpop.f32.mrf.mxu0  ;;  %v8848_v9 = vpop.f32.mrf.mxu1  ;;  %9259 = vmatmul.mubr.f32.gmra.mxu0 %v10954_v46  ;;  %9345 = vmatmul.mubr.f32.gmra.mxu1 %v3681_v36 }
 0x1e4   : > { %v11079_v40 = vadd.f32 %v8848_v9, %v8762_v7  ;;  %9261 = vmatprep.mubr.f32.mxu0 %v10956_v48  ;;  %9347 = vmatprep.mubr.f32.mxu1 %v3682_v4  ;;  %v3685_v48 = vld [vmem:[#allocation2 + $0x8d] sm:$0xff]  ;;  %v3688_v9 = vld [vmem:[#allocation2 + $0xa5] sm:$0xff] }
 0x1e5   : > { %v1678_v16 = vpop.f32.mrf.mxu0  ;;  %v1923_v18 = vpop.f32.mrf.mxu1  ;;  %9396 = vmatprep.subr.mxu0 %v4053_v26 }
 0x1e6   : > { %v11082_v30 = vadd.f32 %v1923_v18, %v1678_v16  ;;  %9397 = vmatpush3.msra.mxu0 %v4053_v26  ;;  %v4050_v16 = vld [vmem:[#allocation4 + $0x438] sm:$0xff] }
 0x1e7   : > { %v8765_v35 = vpop.f32.mrf.mxu0  ;;  %v8851_v39 = vpop.f32.mrf.mxu1  ;;  %9262 = vmatmul.mubr.f32.gmra.mxu0 %v10960_v52  ;;  %9348 = vmatmul.mubr.f32.gmra.mxu1 %v3683_v42 }
 0x1e8   : > { %v11085_v46 = vadd.f32 %v8851_v39, %v8765_v35  ;;  %9264 = vmatprep.mubr.f32.mxu0 %v10962_v54  ;;  %9350 = vmatprep.mubr.f32.mxu1 %v3684_v29  ;;  %v3687_v54 = vld [vmem:[#allocation2 + $0x9d] sm:$0xff]  ;;  %v3690_v39 = vld [vmem:[#allocation2 + $0xb5] sm:$0xff] }
 0x1e9   : > { %v1688_v17 = vpop.f32.mrf.mxu0  ;;  %v1933_v51 = vpop.f32.mrf.mxu1  ;;  %9398 = vmatprep.subr.mxu0 %v4052_v32 }
 0x1ea   : > { %v11088_v36 = vadd.f32 %v1933_v51, %v1688_v17  ;;  %9399 = vmatpush3.msra.mxu0 %v4052_v32  ;;  %v4049_v17 = vld [vmem:[#allocation4 + $0x430] sm:$0xff] }
 0x1eb   : > { %v8768_v63 = vpop.f32.mrf.mxu0  ;;  %v8854_v4 = vpop.f32.mrf.mxu1  ;;  %9265 = vmatmul.mubr.f32.gmra.mxu0 %v10966_v58  ;;  %9351 = vmatmul.mubr.f32.gmra.mxu1 %v3685_v48 }
 0x1ec   : > { %v11091_v52 = vadd.f32 %v8854_v4, %v8768_v63  ;;  %9267 = vmatprep.mubr.f32.mxu0 %v10968_v60  ;;  %9353 = vmatprep.mubr.f32.mxu1 %v3686_v53  ;;  %v3689_v60 = vld [vmem:[#allocation2 + $0xad] sm:$0xff]  ;;  %v3692_v4 = vld [vmem:[#allocation2 + $0xc5] sm:$0xff] }
 0x1ed   : > { %v1698_v26 = vpop.f32.mrf.mxu0  ;;  %v1943_v7 = vpop.f32.mrf.mxu1  ;;  %9400 = vmatprep.subr.mxu0 %v4051_v62 }
 0x1ee   : > { %v11094_v42 = vadd.f32 %v1943_v7, %v1698_v26  ;;  %9401 = vmatpush3.msra.mxu0 %v4051_v62  ;;  %v4048_v26 = vld [vmem:[#allocation4 + $0x428] sm:$0xff] }
 0x1ef   : > { %v8771_v18 = vpop.f32.mrf.mxu0  ;;  %v8857_v29 = vpop.f32.mrf.mxu1  ;;  %9268 = vmatmul.mubr.f32.gmra.mxu0 %v10972_v0  ;;  %9354 = vmatmul.mubr.f32.gmra.mxu1 %v3687_v54 }
 0x1f0   : > { %v11097_v58 = vadd.f32 %v8857_v29, %v8771_v18  ;;  %9270 = vmatprep.mubr.f32.mxu0 %v10974_v2  ;;  %9356 = vmatprep.mubr.f32.mxu1 %v3688_v9  ;;  %v3691_v2 = vld [vmem:[#allocation2 + $0xbd] sm:$0xff]  ;;  %v3694_v29 = vld [vmem:[#allocation2 + $0xd5] sm:$0xff] }
 0x1f1   : > { %v1708_v32 = vpop.f32.mrf.mxu0  ;;  %v1953_v35 = vpop.f32.mrf.mxu1  ;;  %9402 = vmatprep.subr.mxu0 %v4050_v16 }
 0x1f2   : > { %v11100_v48 = vadd.f32 %v1953_v35, %v1708_v32  ;;  %9403 = vmatpush3.msra.mxu0 %v4050_v16  ;;  %v4047_v32 = vld [vmem:[#allocation4 + $0x420] sm:$0xff] }
 0x1f3   : > { %v8774_v51 = vpop.f32.mrf.mxu0  ;;  %v8860_v53 = vpop.f32.mrf.mxu1  ;;  %9271 = vmatmul.mubr.f32.gmra.mxu0 %v10978_v6  ;;  %9357 = vmatmul.mubr.f32.gmra.mxu1 %v3689_v60 }
 0x1f4   : > { %v11103_v0 = vadd.f32 %v8860_v53, %v8774_v51  ;;  %9273 = vmatprep.mubr.f32.mxu0 %v10980_v8  ;;  %9359 = vmatprep.mubr.f32.mxu1 %v3690_v39  ;;  %v3693_v8 = vld [vmem:[#allocation2 + $0xcd] sm:$0xff]  ;;  %v3696_v53 = vld [vmem:[#allocation2 + $0xe5] sm:$0xff] }
 0x1f5   : > { %v1718_v62 = vpop.f32.mrf.mxu0  ;;  %v1963_v63 = vpop.f32.mrf.mxu1  ;;  %9404 = vmatprep.subr.mxu0 %v4049_v17 }
 0x1f6   : > { %v11106_v54 = vadd.f32 %v1963_v63, %v1718_v62  ;;  %9405 = vmatpush3.msra.mxu0 %v4049_v17 }
 0x1f7   : > { %v8777_v7 = vpop.f32.mrf.mxu0  ;;  %v8863_v9 = vpop.f32.mrf.mxu1  ;;  %9274 = vmatmul.mubr.f32.gmra.mxu0 %v10984_v12  ;;  %9360 = vmatmul.mubr.f32.gmra.mxu1 %v3691_v2  ;;  %v4046_v2 = vld [vmem:[#allocation4 + $0x418] sm:$0xff] }
 0x1f8   : > { %v11109_v6 = vadd.f32 %v8863_v9, %v8777_v7  ;;  %9276 = vmatprep.mubr.f32.mxu0 %v10986_v14  ;;  %9362 = vmatprep.mubr.f32.mxu1 %v3692_v4  ;;  %v3695_v14 = vld [vmem:[#allocation2 + $0xdd] sm:$0xff]  ;;  %v3698_v7 = vld [vmem:[#allocation2 + $0xf5] sm:$0xff]  ;;  %v4045_v9 = vld [vmem:[#allocation4 + $0x410] sm:$0xff] }
 0x1f9   : > { %v1728_v16 = vpop.f32.mrf.mxu0  ;;  %v1973_v18 = vpop.f32.mrf.mxu1  ;;  %9406 = vmatprep.subr.mxu0 %v4048_v26 }
 0x1fa   : > { %v11112_v60 = vadd.f32 %v1973_v18, %v1728_v16  ;;  %9407 = vmatpush3.msra.mxu0 %v4048_v26 }
 0x1fb   : > { %v8780_v35 = vpop.f32.mrf.mxu0  ;;  %v8866_v39 = vpop.f32.mrf.mxu1  ;;  %9277 = vmatmul.mubr.f32.gmra.mxu0 %v10990_v19  ;;  %9363 = vmatmul.mubr.f32.gmra.mxu1 %v3693_v8 }
 0x1fc   : > { %v11115_v12 = vadd.f32 %v8866_v39, %v8780_v35  ;;  %9279 = vmatprep.mubr.f32.mxu0 %v10992_v23  ;;  %9365 = vmatprep.mubr.f32.mxu1 %v3694_v29  ;;  %v3697_v23 = vld [vmem:[#allocation2 + $0xed] sm:$0xff] }
 0x1fd   : > { %v11118_v17 = vpop.f32.mrf.mxu0  ;;  %v11120_v51 = vpop.f32.mrf.mxu1  ;;  %9408 = vmatprep.subr.mxu0 %v4047_v32 }
 0x1fe   : > { %9409 = vmatpush3.msra.mxu0 %v4047_v32  ;;  %v3700_v32 = vld [vmem:[#allocation2 + $0x105] sm:$0xff] }
 0x1ff   : > { %v8783_v62 = vpop.f32.mrf.mxu0  ;;  %v8869_v63 = vpop.f32.mrf.mxu1  ;;  %9280 = vmatmul.mubr.f32.gmra.mxu0 %v10996_v27  ;;  %9366 = vmatmul.mubr.f32.gmra.mxu1 %v3695_v14 }
 0x200   : > { %v11123_v19 = vadd.f32 %v8869_v63, %v8783_v62  ;;  %9282 = vmatprep.mubr.f32.mxu0 %v10998_v31  ;;  %9368 = vmatprep.mubr.f32.mxu1 %v3696_v53  ;;  %v3699_v31 = vld [vmem:[#allocation2 + $0xfd] sm:$0xff]  ;;  %v3701_v53 = vld [vmem:[#allocation2 + $0x10d] sm:$0xff] }
 0x201   : > { %v11126_v4 = vpop.f32.mrf.mxu0  ;;  %v11128_v26 = vpop.f32.mrf.mxu1  ;;  %9410 = vmatprep.subr.mxu0 %v4046_v2 }
 0x202   : > { %9411 = vmatpush3.msra.mxu0 %v4046_v2 }
 0x203   : > { %v8904_v8 = vpop.f32.mrf.mxu0  ;;  %9283 = vmatmul.mubr.f32.gmra.mxu0 %v11004_v41  ;;  %v8990_v16 = vpop.f32.mrf.mxu1  ;;  %9369 = vmatmul.mubr.f32.gmra.mxu1 %v3697_v23  ;;  %v4044_v41 = vld [vmem:[#allocation4 + $0x408] sm:$0xff] }
 0x204   : > { %v2301_v27 = vadd.f32 %v8904_v8, %v11001_v38  ;;  %9285 = vmatprep.mubr.f32.mxu0 %v11006_v47  ;;  %9371 = vmatprep.mubr.f32.mxu1 %v3698_v7 }
 0x205   : > { %v2121_v18 = vpop.f32.mrf.mxu0  ;;  %v11133_v29 = vpop.f32.mrf.mxu1  ;;  %9412 = vmatprep.subr.mxu0 %v4045_v9 }
 0x206   : > { %v11136_v35 = vadd.f32 %v2121_v18, %v11008_v49  ;;  %v11138_v39 = vadd.f32 %v8990_v16, %v2301_v27  ;;  %9413 = vmatpush3.msra.mxu0 %v4045_v9  ;;  %v3702_v49 = vld [vmem:[#allocation2 + $0x115] sm:$0xff]  ;;  %v3703_v9 = vld [vmem:[#allocation2 + $0x11d] sm:$0xff] }
 0x207   : > { %v8907_v14 = vpop.f32.mrf.mxu0  ;;  %9286 = vmatmul.mubr.f32.gmra.mxu0 %v11014_v59  ;;  %v8993_v38 = vpop.f32.mrf.mxu1  ;;  %9372 = vmatmul.mubr.f32.gmra.mxu1 %v3699_v31  ;;  %v4043_v59 = vld [vmem:[#allocation4 + $0x400] sm:$0xff] }
 0x208   : > { %v2303_v47 = vadd.f32 %v8907_v14, %v11011_v56  ;;  %9288 = vmatprep.mubr.f32.mxu0 %v11016_v1  ;;  %9374 = vmatprep.mubr.f32.mxu1 %v3700_v32  ;;  %v3372_v14 = vld [vmem:[#allocation2 + $0x134] sm:$0xff] }
 0x209   : > { %v2131_v2 = vpop.f32.mrf.mxu0  ;;  %v11143_v62 = vpop.f32.mrf.mxu1  ;;  %9414 = vmatprep.subr.mxu0 %v4044_v41 }
 0x20a   : > { %v11146_v63 = vadd.f32 %v2131_v2, %v11018_v3  ;;  %v11148_v23 = vadd.f32 %v8993_v38, %v2303_v47  ;;  %9415 = vmatpush3.msra.mxu0 %v4044_v41  ;;  %v3704_v3 = vld [vmem:[#allocation2 + $0x125] sm:$0xff]  ;;  %v3707_v2 = vld [vmem:[#allocation2 + $0x13d] sm:$0xff] }
 0x20b   : > { %v8910_v7 = vpop.f32.mrf.mxu0  ;;  %9289 = vmatmul.mubr.f32.gmra.mxu0 %v11024_v13  ;;  %v8996_v56 = vpop.f32.mrf.mxu1  ;;  %9375 = vmatmul.mubr.f32.gmra.mxu1 %v3701_v53 }
 0x20c   : > { %v2305_v1 = vadd.f32 %v8910_v7, %v11021_v10  ;;  %9291 = vmatprep.mubr.f32.mxu0 %v11026_v21  ;;  %9377 = vmatprep.mubr.f32.mxu1 %v3702_v49  ;;  %v3705_v21 = vld [vmem:[#allocation2 + $0x12d] sm:$0xff] }
 0x20d   : > { %v2141_v8 = vpop.f32.mrf.mxu0  ;;  %v11153_v16 = vpop.f32.mrf.mxu1  ;;  %9416 = vmatprep.subr.mxu0 %v4043_v59  ;;  %v4006_v7 = vld [vmem:[#allocation2 + $0x26] sm:$0xff] }
 0x20e   : > { %v11156_v27 = vadd.f32 %v2141_v8, %v11028_v24  ;;  %v11158_v31 = vadd.f32 %v8996_v56, %v2305_v1  ;;  %9417 = vmatpush3.msra.mxu0 %v4043_v59  ;;  %v3706_v24 = vld [vmem:[#allocation2 + $0x135] sm:$0xff] }
 0x20f   : > { %v8913_v13 = vpop.f32.mrf.mxu0  ;;  %9292 = vmatmul.mubr.f32.gmra.mxu0 %v11034_v37  ;;  %v8999_v18 = vpop.f32.mrf.mxu1  ;;  %9378 = vmatmul.mubr.f32.gmra.mxu1 %v3703_v9 }
 0x210   : > { %v2307_v10 = vadd.f32 %v8913_v13, %v11031_v33  ;;  %9294 = vmatprep.mubr.f32.mxu0 %v11036_v45  ;;  %9380 = vmatprep.mubr.f32.mxu1 %v3704_v3  ;;  %v3373_v45 = vld [vmem:[#allocation2 + $0x13c] sm:$0xff] }
 0x211   : > { %v2151_v32 = vpop.f32.mrf.mxu0  ;;  %v11163_v41 = vpop.f32.mrf.mxu1  ;;  %v4008_v13 = vld [vmem:[#allocation2 + $0x36] sm:$0xff] }
 0x212   : > { %v11166_v38 = vadd.f32 %v2151_v32, %v11038_v50  ;;  %v11168_v47 = vadd.f32 %v8999_v18, %v2307_v10 }
 0x213   : > { %v8916_v53 = vpop.f32.mrf.mxu0  ;;  %9295 = vmatmul.mubr.f32.gmra.mxu0 %v11044_v61  ;;  %v9002_v37 = vpop.f32.mrf.mxu1  ;;  %9381 = vmatmul.mubr.f32.gmra.mxu1 %v3705_v21 }
 0x214   : > { %v2309_v33 = vadd.f32 %v8916_v53, %v11041_v55  ;;  %9297 = vmatprep.mubr.f32.mxu0 %v3372_v14  ;;  %9383 = vmatprep.mubr.f32.mxu1 %v3706_v24  ;;  %v4007_v55 = vld [vmem:[#allocation2 + $0x2e] sm:$0xff]  ;;  %v4009_v14 = vld [vmem:[#allocation2 + $0x3e] sm:$0xff]  ;;  %v4010_v53 = vld [vmem:[#allocation2 + $0x46] sm:$0xff] }
 0x215   : > { %v2161_v49 = vpop.f32.mrf.mxu0  ;;  %v11172_v59 = vpop.f32.mrf.mxu1 }
 0x216   : > { %v11175_v50 = vadd.f32 %v2161_v49, %v11046_v5  ;;  %v11177_v56 = vadd.f32 %v9002_v37, %v2309_v33  ;;  %v4011_v49 = vld [vmem:[#allocation2 + $0x4e] sm:$0xff] }
 0x217   : > { %v8919_v1 = vpop.f32.mrf.mxu0  ;;  %9298 = vmatmul.mubr.f32.gmra.mxu0 %v3373_v45  ;;  %v9005_v61 = vpop.f32.mrf.mxu1  ;;  %9384 = vmatmul.mubr.f32.gmra.mxu1 %v3707_v2 }
 0x218   : > { %v2311_v9 = vadd.f32 %v8919_v1, %v11049_v11  ;;  %9418 = vmatprep.mubr.f32.mxu0 %v4006_v7  ;;  %v4012_v1 = vld [vmem:[#allocation2 + $0x56] sm:$0xff] }
 0x219   : > { %v2171_v8 = vpop.f32.mrf.mxu0  ;;  %v11180_v3 = vpop.f32.mrf.mxu1 }
 0x21a   : > { %v11183_v18 = vadd.f32 %v2171_v8, %v11052_v25  ;;  %v11185_v10 = vadd.f32 %v9005_v61, %v2311_v9 }
 0x21b   : > { %v8922_v5 = vpop.f32.mrf.mxu0  ;;  %9419 = vmatmul.mubr.f32.vlgmr.msra.gmra.mxu0 %v4007_v55  ;;  %v9008_v21 = vpop.f32.mrf.mxu1 }
 0x21c   : > { %v2313_v32 = vadd.f32 %v8922_v5, %v11055_v43  ;;  %9421 = vmatprep.mubr.f32.mxu0 %v4008_v13 }
 0x21d   : > { %v2181_v24 = vpop.f32.mrf.mxu0  ;;  %v11188_v11 = vpop.f32.mrf.mxu1 }
 0x21e   : > { %v11191_v37 = vadd.f32 %v2181_v24, %v11058_v57  ;;  %v11193_v33 = vadd.f32 %v9008_v21, %v2313_v32  ;;  %v4665_v57 = vld [vmem:[#allocation5 + $0xf8] sm:$0xff]  ;;  %v4014_v32 = vld [vmem:[#allocation2 + $0x66] sm:$0xff] }
 0x21f   : > { %v8925_v25 = vpop.f32.mrf.mxu0  ;;  %9422 = vmatmul.mubr.f32.gmra.mxu0 %v4009_v14  ;;  %v9011_v45 = vpop.f32.mrf.mxu1  ;;  %9472 = vmatprep.subr.mxu1 %v4665_v57 }
 0x220   : > { %v2315_v2 = vadd.f32 %v8925_v25, %v11061_v20  ;;  %9424 = vmatprep.mubr.f32.mxu0 %v4010_v53  ;;  %v4013_v20 = vld [vmem:[#allocation2 + $0x5e] sm:$0xff]  ;;  %9473 = vmatpush3.msra.mxu1 %v4665_v57 }
 0x221   : > { %v2191_v7 = vpop.f32.mrf.mxu0  ;;  %v11196_v43 = vpop.f32.mrf.mxu1 }
 0x222   : > { %v11199_v61 = vadd.f32 %v2191_v7, %v11064_v15  ;;  %v11201_v9 = vadd.f32 %v9011_v45, %v2315_v2  ;;  %v4015_v45 = vld [vmem:[#allocation2 + $0x6e] sm:$0xff]  ;;  %v4016_v7 = vld [vmem:[#allocation2 + $0x76] sm:$0xff] }
 0x223   : > { %v8928_v55 = vpop.f32.mrf.mxu0  ;;  %9425 = vmatmul.mubr.f32.gmra.mxu0 %v4011_v49  ;;  %v9014_v8 = vpop.f32.mrf.mxu1 }
 0x224   : > { %v2317_v13 = vadd.f32 %v8928_v55, %v11067_v28  ;;  %9427 = vmatprep.mubr.f32.mxu0 %v4012_v1  ;;  %v4664_v28 = vld [vmem:[#allocation5 + $0xf0] sm:$0xff] }
 0x225   : > { %v2201_v5 = vpop.f32.mrf.mxu0  ;;  %v11204_v21 = vpop.f32.mrf.mxu1  ;;  %9474 = vmatprep.subr.mxu1 %v4664_v28 }
 0x226   : > { %v11207_v14 = vadd.f32 %v2201_v5, %v11070_v44  ;;  %v11209_v15 = vadd.f32 %v9014_v8, %v2317_v13  ;;  %9475 = vmatpush3.msra.mxu1 %v4664_v28  ;;  %v4663_v13 = vld [vmem:[#allocation5 + $0xe8] sm:$0xff]  ;;  %v4662_v28 = vld [vmem:[#allocation5 + $0xe0] sm:$0xff] }
 0x227   : > { %v8931_v24 = vpop.f32.mrf.mxu0  ;;  %9428 = vmatmul.mubr.f32.gmra.mxu0 %v4013_v20  ;;  %v9017_v53 = vpop.f32.mrf.mxu1  ;;  %9476 = vmatprep.subr.mxu1 %v4663_v13 }
 0x228   : > { %v2319_v25 = vadd.f32 %v8931_v24, %v11073_v34  ;;  %9430 = vmatprep.mubr.f32.mxu0 %v4014_v32  ;;  %v4017_v34 = vld [vmem:[#allocation2 + $0x7e] sm:$0xff]  ;;  %v4018_v32 = vld [vmem:[#allocation2 + $0x86] sm:$0xff]  ;;  %9477 = vmatpush3.msra.mxu1 %v4663_v13  ;;  %v4661_v13 = vld [vmem:[#allocation5 + $0xd8] sm:$0xff] }
 0x229   : > { %v2211_v2 = vpop.f32.mrf.mxu0  ;;  %v11212_v49 = vpop.f32.mrf.mxu1  ;;  %9478 = vmatprep.subr.mxu1 %v4662_v28 }
 0x22a   : > { %v11215_v1 = vadd.f32 %v2211_v2, %v11076_v22  ;;  %v11217_v44 = vadd.f32 %v9017_v53, %v2319_v25  ;;  %9479 = vmatpush3.msra.mxu1 %v4662_v28 }
 0x22b   : > { %v8934_v57 = vpop.f32.mrf.mxu0  ;;  %9431 = vmatmul.mubr.f32.gmra.mxu0 %v4015_v45  ;;  %v9020_v55 = vpop.f32.mrf.mxu1  ;;  %9480 = vmatprep.subr.mxu1 %v4661_v13 }
 0x22c   : > { %v2321_v8 = vadd.f32 %v8934_v57, %v11079_v40  ;;  %9433 = vmatprep.mubr.f32.mxu0 %v4016_v7  ;;  %v4019_v40 = vld [vmem:[#allocation2 + $0x8e] sm:$0xff]  ;;  %v4020_v57 = vld [vmem:[#allocation2 + $0x96] sm:$0xff]  ;;  %9481 = vmatpush3.msra.mxu1 %v4661_v13 }
 0x22d   : > { %v2221_v20 = vpop.f32.mrf.mxu0  ;;  %v11220_v5 = vpop.f32.mrf.mxu1 }
 0x22e   : > { %14120 = vst [vmem:[#allocation7_spill] sm:$0xff] %v11220_v5  ;;  %v11223_v24 = vadd.f32 %v2221_v20, %v11082_v30  ;;  %v11225_v22 = vadd.f32 %v9020_v55, %v2321_v8 }
 0x22f   : > { %v8937_v53 = vpop.f32.mrf.mxu0  ;;  %9434 = vmatmul.mubr.f32.gmra.mxu0 %v4017_v34  ;;  %v9023_v25 = vpop.f32.mrf.mxu1 }
 0x230   : > { %v2323_v45 = vadd.f32 %v8937_v53, %v11085_v46  ;;  %9436 = vmatprep.mubr.f32.mxu0 %v4018_v32  ;;  %v4021_v46 = vld [vmem:[#allocation2 + $0x9e] sm:$0xff]  ;;  %v4022_v53 = vld [vmem:[#allocation2 + $0xa6] sm:$0xff] }
 0x231   : > { %v2231_v2 = vpop.f32.mrf.mxu0  ;;  %v11228_v7 = vpop.f32.mrf.mxu1 }
 0x232   : > { %14121 = vst [vmem:[#allocation8_spill] sm:$0xff] %v11228_v7  ;;  %v11231_v5 = vadd.f32 %v2231_v2, %v11088_v36  ;;  %v11233_v30 = vadd.f32 %v9023_v25, %v2323_v45 }
 0x233   : > { %v8940_v55 = vpop.f32.mrf.mxu0  ;;  %9437 = vmatmul.mubr.f32.gmra.mxu0 %v4019_v40  ;;  %v9026_v8 = vpop.f32.mrf.mxu1 }
 0x234   : > { %v2325_v34 = vadd.f32 %v8940_v55, %v11091_v52  ;;  %9439 = vmatprep.mubr.f32.mxu0 %v4020_v57  ;;  %v4023_v52 = vld [vmem:[#allocation2 + $0xae] sm:$0xff]  ;;  %v4024_v57 = vld [vmem:[#allocation2 + $0xb6] sm:$0xff] }
 0x235   : > { %v2241_v20 = vpop.f32.mrf.mxu0  ;;  %v11236_v32 = vpop.f32.mrf.mxu1 }
 0x236   : > { %14122 = vst [vmem:[#allocation9_spill] sm:$0xff] %v11236_v32  ;;  %v11239_v7 = vadd.f32 %v2241_v20, %v11094_v42  ;;  %v11241_v36 = vadd.f32 %v9026_v8, %v2325_v34  ;;  %v4660_v42 = vld [vmem:[#allocation5 + $0xd0] sm:$0xff] }
 0x237   : > { %v8943_v25 = vpop.f32.mrf.mxu0  ;;  %9440 = vmatmul.mubr.f32.gmra.mxu0 %v4021_v46  ;;  %v9029_v45 = vpop.f32.mrf.mxu1  ;;  %9482 = vmatprep.subr.mxu1 %v4660_v42 }
 0x238   : > { %v2327_v40 = vadd.f32 %v8943_v25, %v11097_v58  ;;  %9442 = vmatprep.mubr.f32.mxu0 %v4022_v53  ;;  %v4025_v58 = vld [vmem:[#allocation2 + $0xbe] sm:$0xff]  ;;  %9483 = vmatpush3.msra.mxu1 %v4660_v42  ;;  %v4026_v53 = vld [vmem:[#allocation2 + $0xc6] sm:$0xff] }
 0x239   : > { %v2251_v28 = vpop.f32.mrf.mxu0  ;;  %v11244_v2 = vpop.f32.mrf.mxu1 }
 0x23a   : > { %v11247_v55 = vadd.f32 %v2251_v28, %v11100_v48  ;;  %v11249_v32 = vadd.f32 %v9029_v45, %v2327_v40  ;;  %v4659_v45 = vld [vmem:[#allocation5 + $0xc8] sm:$0xff] }
 0x23b   : > { %v8946_v8 = vpop.f32.mrf.mxu0  ;;  %9443 = vmatmul.mubr.f32.gmra.mxu0 %v4023_v52  ;;  %v9032_v34 = vpop.f32.mrf.mxu1  ;;  %9484 = vmatprep.subr.mxu1 %v4659_v45 }
 0x23c   : > { %v2329_v46 = vadd.f32 %v8946_v8, %v11103_v0  ;;  %9445 = vmatprep.mubr.f32.mxu0 %v4024_v57  ;;  %v4027_v0 = vld [vmem:[#allocation2 + $0xce] sm:$0xff]  ;;  %9485 = vmatpush3.msra.mxu1 %v4659_v45  ;;  %v4028_v8 = vld [vmem:[#allocation2 + $0xd6] sm:$0xff] }
 0x23d   : > { %v2261_v13 = vpop.f32.mrf.mxu0  ;;  %v11252_v20 = vpop.f32.mrf.mxu1 }
 0x23e   : > { %14123 = vst [vmem:[#allocation10_spill] sm:$0xff] %v11252_v20  ;;  %v11255_v25 = vadd.f32 %v2261_v13, %v11106_v54  ;;  %v11257_v48 = vadd.f32 %v9032_v34, %v2329_v46  ;;  %v4658_v34 = vld [vmem:[#allocation5 + $0xc0] sm:$0xff] }
 0x23f   : > { %v8949_v40 = vpop.f32.mrf.mxu0  ;;  %9446 = vmatmul.mubr.f32.gmra.mxu0 %v4025_v58  ;;  %v9035_v52 = vpop.f32.mrf.mxu1  ;;  %9486 = vmatprep.subr.mxu1 %v4658_v34 }
 0x240   : > { %v2331_v28 = vadd.f32 %v8949_v40, %v11109_v6  ;;  %9448 = vmatprep.mubr.f32.mxu0 %v4026_v53  ;;  %v1984_v6 = vadd.f32 %v11120_v51, %v11118_v17  ;;  %v4029_v53 = vld [vmem:[#allocation2 + $0xde] sm:$0xff]  ;;  %9487 = vmatpush3.msra.mxu1 %v4658_v34  ;;  %v4032_v34 = vld [vmem:[#allocation2 + $0xf6] sm:$0xff] }
 0x241   : > { %v2271_v57 = vpop.f32.mrf.mxu0  ;;  %v11260_v42 = vpop.f32.mrf.mxu1 }
 0x242   : > { %14124 = vst [vmem:[#allocation11_spill] sm:$0xff] %v11260_v42  ;;  %v11263_v20 = vadd.f32 %v2271_v57, %v11112_v60  ;;  %v11265_v54 = vadd.f32 %v9035_v52, %v2331_v28  ;;  %v4030_v60 = vld [vmem:[#allocation2 + $0xe6] sm:$0xff]  ;;  %v4657_v28 = vld [vmem:[#allocation5 + $0xb8] sm:$0xff] }
 0x243   : > { %v8952_v46 = vpop.f32.mrf.mxu0  ;;  %9449 = vmatmul.mubr.f32.gmra.mxu0 %v4027_v0  ;;  %v9038_v58 = vpop.f32.mrf.mxu1  ;;  %9488 = vmatprep.subr.mxu1 %v4657_v28 }
 0x244   : > { %14125 = vst [vmem:[#allocation12_spill] sm:$0xff] %v11263_v20  ;;  %v2333_v13 = vadd.f32 %v8952_v46, %v11115_v12  ;;  %9451 = vmatprep.mubr.f32.mxu0 %v4028_v8  ;;  %v4612_v20 = vld [vmem:[#allocation5 + $0x78] sm:$0xff]  ;;  %9489 = vmatpush3.msra.mxu1 %v4657_v28  ;;  %v4611_v46 = vld [vmem:[#allocation5 + $0x70] sm:$0xff] }
 0x245   : > { %v2281_v45 = vpop.f32.mrf.mxu0  ;;  %v11270_v40 = vpop.f32.mrf.mxu1  ;;  %v4031_v12 = vld [vmem:[#allocation2 + $0xee] sm:$0xff]  ;;  %9558 = vmatprep.subr.mxu0 %v4612_v20 }
 0x246   : > { %14126 = vst [vmem:[#allocation13_spill] sm:$0xff] %v11270_v40  ;;  %v11272_v57 = vadd.f32 %v2281_v45, %v1984_v6  ;;  %v11274_v52 = vadd.f32 %v9038_v58, %v2333_v13  ;;  %9559 = vmatpush3.msra.mxu0 %v4612_v20  ;;  %v4033_v45 = vld [vmem:[#allocation2 + $0xfe] sm:$0xff] }
 0x247   : > { %v8955_v0 = vpop.f32.mrf.mxu0  ;;  %9452 = vmatmul.mubr.f32.gmra.mxu0 %v4029_v53  ;;  %v9041_v42 = vpop.f32.mrf.mxu1  ;;  %9560 = vmatprep.subr.mxu0 %v4611_v46  ;;  %v4610_v53 = vld [vmem:[#allocation5 + $0x68] sm:$0xff] }
 0x248   : > { %14127 = vst [vmem:[#allocation14_spill] sm:$0xff] %v11272_v57  ;;  %v2335_v17 = vadd.f32 %v8955_v0, %v11123_v19  ;;  %9454 = vmatprep.mubr.f32.mxu0 %v4030_v60  ;;  %v4656_v60 = vld [vmem:[#allocation5 + $0xb0] sm:$0xff]  ;;  %9561 = vmatpush3.msra.mxu0 %v4611_v46  ;;  %v4036_v57 = vld [vmem:[#allocation2 + $0x116] sm:$0xff] }
 0x249   : > { %v11277_v51 = vpop.f32.mrf.mxu0  ;;  %v11279_v8 = vpop.f32.mrf.mxu1  ;;  %9490 = vmatprep.subr.mxu1 %v4656_v60  ;;  %9562 = vmatprep.subr.mxu0 %v4610_v53  ;;  %v4035_v46 = vld [vmem:[#allocation2 + $0x10e] sm:$0xff] }
 0x24a   : > { %14128 = vst [vmem:[#allocation15_spill] sm:$0xff] %v11279_v8  ;;  %v11281_v58 = vadd.f32 %v9041_v42, %v2335_v17  ;;  %v4034_v8 = vld [vmem:[#allocation2 + $0x106] sm:$0xff]  ;;  %v4609_v42 = vld [vmem:[#allocation5 + $0x60] sm:$0xff]  ;;  %9491 = vmatpush3.msra.mxu1 %v4656_v60  ;;  %9563 = vmatpush3.msra.mxu0 %v4610_v53 }
 0x24b   : > { %v9076_v6 = vpop.f32.mrf.mxu0  ;;  %9455 = vmatmul.mubr.f32.gmra.mxu0 %v4031_v12  ;;  %v9162_v13 = vpop.f32.mrf.mxu1  ;;  %9564 = vmatprep.subr.mxu0 %v4609_v42  ;;  %v4037_v60 = vld [vmem:[#allocation2 + $0x11e] sm:$0xff] }
 0x24c   : > { %v2969_v19 = vadd.f32 %v9076_v6, %v11138_v39  ;;  %9457 = vmatprep.mubr.f32.mxu0 %v4032_v34  ;;  %v4608_v39 = vld [vmem:[#allocation5 + $0x58] sm:$0xff]  ;;  %v4655_v6 = vld [vmem:[#allocation5 + $0xa8] sm:$0xff]  ;;  %9565 = vmatpush3.msra.mxu0 %v4609_v42  ;;  %v4654_v42 = vld [vmem:[#allocation5 + $0xa0] sm:$0xff] }
 0x24d   : > { %v11284_v28 = vpop.f32.mrf.mxu0  ;;  %v11286_v0 = vpop.f32.mrf.mxu1  ;;  %9492 = vmatprep.subr.mxu1 %v4655_v6  ;;  %9566 = vmatprep.subr.mxu0 %v4608_v39 }
 0x24e   : > { %14129 = vst [vmem:[#allocation16_spill] sm:$0xff] %v11286_v0  ;;  %v11288_v20 = vadd.f32 %v9162_v13, %v2969_v19  ;;  %v4607_v13 = vld [vmem:[#allocation5 + $0x50] sm:$0xff]  ;;  %9493 = vmatpush3.msra.mxu1 %v4655_v6  ;;  %9567 = vmatpush3.msra.mxu0 %v4608_v39 }
 0x24f   : > { %v9079_v17 = vpop.f32.mrf.mxu0  ;;  %9458 = vmatmul.mubr.f32.gmra.mxu0 %v4033_v45  ;;  %v9165_v12 = vpop.f32.mrf.mxu1  ;;  %9568 = vmatprep.subr.mxu0 %v4607_v13  ;;  %v4039_v6 = vld [vmem:[#allocation2 + $0x12e] sm:$0xff] }
 0x250   : > { %14130 = vst [vmem:[#allocation17_spill] sm:$0xff] %v11288_v20  ;;  %v2971_v34 = vadd.f32 %v9079_v17, %v11148_v23  ;;  %9460 = vmatprep.mubr.f32.mxu0 %v4034_v8  ;;  %v4606_v23 = vld [vmem:[#allocation5 + $0x48] sm:$0xff]  ;;  %9569 = vmatpush3.msra.mxu0 %v4607_v13  ;;  %v4653_v13 = vld [vmem:[#allocation5 + $0x98] sm:$0xff] }
 0x251   : > { %v11291_v0 = vpop.f32.mrf.mxu0  ;;  %v11293_v40 = vpop.f32.mrf.mxu1  ;;  %9494 = vmatprep.subr.mxu1 %v4654_v42  ;;  %9570 = vmatprep.subr.mxu0 %v4606_v23 }
 0x252   : > { %14131 = vst [vmem:[#allocation18_spill] sm:$0xff] %v11293_v40  ;;  %v11295_v53 = vadd.f32 %v9165_v12, %v2971_v34  ;;  %v4038_v40 = vld [vmem:[#allocation2 + $0x126] sm:$0xff]  ;;  %v4605_v12 = vld [vmem:[#allocation5 + $0x40] sm:$0xff]  ;;  %9495 = vmatpush3.msra.mxu1 %v4654_v42  ;;  %9571 = vmatpush3.msra.mxu0 %v4606_v23 }
 0x253   : > { %v9082_v19 = vpop.f32.mrf.mxu0  ;;  %9461 = vmatmul.mubr.f32.gmra.mxu0 %v4035_v46  ;;  %v9168_v45 = vpop.f32.mrf.mxu1  ;;  %9572 = vmatprep.subr.mxu0 %v4605_v12  ;;  %v4041_v42 = vld [vmem:[#allocation2 + $0x13e] sm:$0xff] }
 0x254   : > { %14132 = vst [vmem:[#allocation19_spill] sm:$0xff] %v11295_v53  ;;  %v2973_v8 = vadd.f32 %v9082_v19, %v11158_v31  ;;  %9463 = vmatprep.mubr.f32.mxu0 %v4036_v57  ;;  %v4604_v31 = vld [vmem:[#allocation5 + $0x38] sm:$0xff]  ;;  %9573 = vmatpush3.msra.mxu0 %v4605_v12 }
 0x255   : > { %v11298_v17 = vpop.f32.mrf.mxu0  ;;  %v11300_v20 = vpop.f32.mrf.mxu1  ;;  %9496 = vmatprep.subr.mxu1 %v4653_v13  ;;  %9574 = vmatprep.subr.mxu0 %v4604_v31 }
 0x256   : > { %14133 = vst [vmem:[#allocation20_spill] sm:$0xff] %v11300_v20  ;;  %v11302_v39 = vadd.f32 %v9168_v45, %v2973_v8  ;;  %v4040_v20 = vld [vmem:[#allocation2 + $0x136] sm:$0xff]  ;;  %v4603_v45 = vld [vmem:[#allocation5 + $0x30] sm:$0xff]  ;;  %9497 = vmatpush3.msra.mxu1 %v4653_v13  ;;  %9575 = vmatpush3.msra.mxu0 %v4604_v31 }
 0x257   : > { %v9085_v34 = vpop.f32.mrf.mxu0  ;;  %9464 = vmatmul.mubr.f32.gmra.mxu0 %v4037_v60  ;;  %v9171_v46 = vpop.f32.mrf.mxu1  ;;  %9576 = vmatprep.subr.mxu0 %v4603_v45 }
 0x258   : > { %14134 = vst [vmem:[#allocation21_spill] sm:$0xff] %v11302_v39  ;;  %v2975_v57 = vadd.f32 %v9085_v34, %v11168_v47  ;;  %9466 = vmatprep.mubr.f32.mxu0 %v4038_v40  ;;  %v4602_v47 = vld [vmem:[#allocation5 + $0x28] sm:$0xff]  ;;  %9577 = vmatpush3.msra.mxu0 %v4603_v45  ;;  %v4601_v39 = vld [vmem:[#allocation5 + $0x20] sm:$0xff]  ;;  %v4652_v45 = vld [vmem:[#allocation5 + $0x90] sm:$0xff] }
 0x259   : > { %v11305_v19 = vpop.f32.mrf.mxu0  ;;  %v11307_v53 = vpop.f32.mrf.mxu1  ;;  %9578 = vmatprep.subr.mxu0 %v4602_v47  ;;  %9498 = vmatprep.subr.mxu1 %v4652_v45 }
 0x25a   : > { %v11309_v23 = vadd.f32 %v9171_v46, %v2975_v57  ;;  %9579 = vmatpush3.msra.mxu0 %v4602_v47  ;;  %9499 = vmatpush3.msra.mxu1 %v4652_v45  ;;  %v4561_v45 = vld [vmem:[#allocation3 + $0x5] sm:$0xff] }
 0x25b   : > { %v9088_v8 = vpop.f32.mrf.mxu0  ;;  %9467 = vmatmul.mubr.f32.gmra.mxu0 %v4039_v6  ;;  %v9174_v60 = vpop.f32.mrf.mxu1  ;;  %9580 = vmatprep.subr.mxu0 %v4601_v39  ;;  %v4600_v6 = vld [vmem:[#allocation5 + $0x18] sm:$0xff] }
 0x25c   : > { %14135 = vst [vmem:[#allocation22_spill] sm:$0xff] %v11309_v23  ;;  %v2977_v40 = vadd.f32 %v9088_v8, %v11177_v56  ;;  %9469 = vmatprep.mubr.f32.mxu0 %v4040_v20  ;;  %9581 = vmatpush3.msra.mxu0 %v4601_v39  ;;  %v4599_v8 = vld [vmem:[#allocation5 + $0x10] sm:$0xff] }
 0x25d   : > { %v11312_v12 = vpop.f32.mrf.mxu0  ;;  %v11314_v34 = vpop.f32.mrf.mxu1  ;;  %9582 = vmatprep.subr.mxu0 %v4600_v6 }
 0x25e   : > { %v11316_v46 = vadd.f32 %v9174_v60, %v2977_v40  ;;  %9583 = vmatpush3.msra.mxu0 %v4600_v6  ;;  %v4651_v40 = vld [vmem:[#allocation5 + $0x88] sm:$0xff]  ;;  %v4613_v6 = vld [vmem:[#allocation3 + $0x6] sm:$0xff] }
 0x25f   : > { %v9091_v31 = vpop.f32.mrf.mxu0  ;;  %9470 = vmatmul.mubr.f32.gmra.mxu0 %v4041_v42  ;;  %v9177_v57 = vpop.f32.mrf.mxu1  ;;  %9584 = vmatprep.subr.mxu0 %v4599_v8  ;;  %v4598_v42 = vld [vmem:[#allocation5 + $0x8] sm:$0xff] }
 0x260   : > { %14136 = vst [vmem:[#allocation23_spill] sm:$0xff] %v11316_v46  ;;  %v2979_v13 = vadd.f32 %v9091_v31, %v11185_v10  ;;  %9500 = vmatprep.subr.mxu1 %v4651_v40  ;;  %9585 = vmatpush3.msra.mxu0 %v4599_v8  ;;  %v4562_v8 = vld [vmem:[#allocation3 + $0xd] sm:$0xff] }
 0x261   : > { %v11319_v56 = vpop.f32.mrf.mxu0  ;;  %v11321_v20 = vpop.f32.mrf.mxu1  ;;  %9501 = vmatpush3.msra.mxu1 %v4651_v40  ;;  %9586 = vmatprep.subr.mxu0 %v4598_v42 }
 0x262   : > { %14137 = vst [vmem:[#allocation24_spill] sm:$0xff] %v11321_v20  ;;  %v11323_v23 = vadd.f32 %v9177_v57, %v2979_v13  ;;  %v4650_v57 = vld [vmem:[#allocation5 + $0x80] sm:$0xff]  ;;  %9587 = vmatpush3.msra.mxu0 %v4598_v42  ;;  %9504 = vmatprep.mubr.f32.mxu1 %v4613_v6 }
 0x263   : > { %v9094_v60 = vpop.f32.mrf.mxu0  ;;  %v9180_v47 = vpop.f32.mrf.mxu1  ;;  %v4597_v13 = vld [vmem:[#allocation5] sm:$0xff]  ;;  %9502 = vmatprep.subr.mxu1 %v4650_v57  ;;  %9590 = vmatprep.mubr.f32.mxu0 %v4561_v45 }
 0x264   : > { %14138 = vst [vmem:[#allocation25_spill] sm:$0xff] %v11323_v23  ;;  %v2981_v10 = vadd.f32 %v9094_v60, %v11193_v33  ;;  %9503 = vmatpush3.msra.mxu1 %v4650_v57  ;;  %9588 = vmatprep.subr.mxu0 %v4597_v13  ;;  %v4614_v33 = vld [vmem:[#allocation3 + $0xe] sm:$0xff] }
 0x265   : > { %v11326_v39 = vpop.f32.mrf.mxu0  ;;  %v11328_v31 = vpop.f32.mrf.mxu1  ;;  %9589 = vmatpush3.msra.mxu0 %v4597_v13  ;;  %9505 = vmatmul.mubr.f32.vlgmr.msra.gmra.mxu1 %v4614_v33 }
 0x266   : > { %14139 = vst [vmem:[#allocation26_spill] sm:$0xff] %v11326_v39  ;;  %14140 = vst [vmem:[#allocation27_spill] sm:$0xff] %v11328_v31  ;;  %v11330_v23 = vadd.f32 %v9180_v47, %v2981_v10  ;;  %9591 = vmatmul.mubr.f32.vlgmr.msra.gmra.mxu0 %v4562_v8 }
 0x267   : > { %v9097_v46 = vpop.f32.mrf.mxu0  ;;  %v9183_v20 = vpop.f32.mrf.mxu1 }
 0x268   : > { %14141 = vst [vmem:[#allocation28_spill] sm:$0xff] %v11330_v23  ;;  %v2983_v60 = vadd.f32 %v9097_v46, %v11201_v9 }
 0x269   : > { %v11333_v40 = vpop.f32.mrf.mxu0  ;;  %v11335_v31 = vpop.f32.mrf.mxu1 }
 0x26a   : > { %14142 = vst [vmem:[#allocation29_spill] sm:$0xff] %v11335_v31  ;;  %v11337_v47 = vadd.f32 %v9183_v20, %v2983_v60  ;;  %v5208_v20 = vld [vmem:[#allocation5 + $0x178] sm:$0xff]  ;;  %v758_v60 = vlaneseq }
 0x26b   : > { %v9100_v42 = vpop.f32.mrf.mxu0  ;;  %v9186_v10 = vpop.f32.mrf.mxu1  ;;  %9644 = vmatprep.subr.mxu1 %v5208_v20 }
 0x26c   : > { %14143 = vst [vmem:[#allocation30_spill] sm:$0xff] %v11337_v47  ;;  %v2985_v57 = vadd.f32 %v9100_v42, %v11209_v15  ;;  %9645 = vmatpush3.msra.mxu1 %v5208_v20  ;;  %v11360_v47 = vshrl.u32 %v758_v60, 7 }
 0x26d   : > { %v11340_v23 = vpop.f32.mrf.mxu0  ;;  %v11342_v39 = vpop.f32.mrf.mxu1 }
 0x26e   : > { %v11344_v9 = vadd.f32 %v9186_v10, %v2985_v57 }
 0x26f   : > { %v9103_v46 = vpop.f32.mrf.mxu0  ;;  %v9189_v13 = vpop.f32.mrf.mxu1 }
 0x270   : > { %14144 = vst [vmem:[#allocation31_spill] sm:$0xff] %v11344_v9  ;;  %v2987_v6 = vadd.f32 %v9103_v46, %v11217_v44 }
 0x271   : > { %v11347_v31 = vpop.f32.mrf.mxu0  ;;  %v11349_v45 = vpop.f32.mrf.mxu1 }
 0x272   : > { %14145 = vst [vmem:[#allocation32_spill] sm:$0xff] %v11349_v45  ;;  %v11351_v33 = vadd.f32 %v9189_v13, %v2987_v6  ;;  %v5207_v45 = vld [vmem:[#allocation5 + $0x170] sm:$0xff] }
 0x273   : > { %v9106_v8 = vpop.f32.mrf.mxu0  ;;  %v9192_v15 = vpop.f32.mrf.mxu1  ;;  %9646 = vmatprep.subr.mxu1 %v5207_v45 }
 0x274   : > { %14146 = vst [vmem:[#allocation33_spill] sm:$0xff] %v11351_v33  ;;  %v2989_v42 = vadd.f32 %v9106_v8, %v11225_v22  ;;  %9647 = vmatpush3.msra.mxu1 %v5207_v45 }
 0x275   : > { %v11354_v10 = vpop.f32.mrf.mxu0  ;;  %v11356_v57 = vpop.f32.mrf.mxu1 }
 0x276   : > { %14147 = vst [vmem:[#allocation34_spill] sm:$0xff] %v11356_v57  ;;  %v11358_v9 = vadd.f32 %v9192_v15, %v2989_v42  ;;  %v11370_v15 = vadd.s32 8, %v11360_v47  ;;  %v5206_v42 = vld [vmem:[#allocation5 + $0x168] sm:$0xff]  ;;  %v5205_v57 = vld [vmem:[#allocation5 + $0x160] sm:$0xff] }
 0x277   : > { %v9109_v44 = vpop.f32.mrf.mxu0  ;;  %v9195_v46 = vpop.f32.mrf.mxu1  ;;  %9648 = vmatprep.subr.mxu1 %v5206_v42 }
 0x278   : > { %14148 = vst [vmem:[#allocation35_spill] sm:$0xff] %v11358_v9  ;;  %v2991_v13 = vadd.f32 %v9109_v44, %v11233_v30  ;;  %9649 = vmatpush3.msra.mxu1 %v5206_v42 }
 0x279   : > { %v11363_v6 = vpop.f32.mrf.mxu0  ;;  %v11365_v33 = vpop.f32.mrf.mxu1  ;;  %9650 = vmatprep.subr.mxu1 %v5205_v57 }
 0x27a   : > { %14149 = vst [vmem:[#allocation36_spill] sm:$0xff] %v11363_v6  ;;  %14150 = vst [vmem:[#allocation37_spill] sm:$0xff] %v11365_v33  ;;  %v11367_v22 = vadd.f32 %v9195_v46, %v2991_v13  ;;  %v11380_v46 = vmul.u32.u64.low 3817748708, %v11370_v15  ;;  %v11381_v13 = vmul.u32.u64.high 3817748708, %v11370_v15, %v11380_v46  ;;  %9651 = vmatpush3.msra.mxu1 %v5205_v57  ;;  %v2634_v57 = vadd.f32 %v11133_v29, %v11136_v35 }
 0x27b   : > { %v9112_v20 = vpop.f32.mrf.mxu0  ;;  %v9198_v8 = vpop.f32.mrf.mxu1  ;;  %v11398_v46 = vadd.s32 16, %v11360_v47  ;;  %v2642_v29 = vadd.f32 %v11172_v59, %v11175_v50  ;;  %v11429_v35 = vadd.f32 %v11180_v3, %v11183_v18  ;;  %v11446_v50 = vadd.s32 40, %v11360_v47  ;;  %v14159_v18 = vld [vmem:[#allocation7_spill] sm:$0xff] }
 0x27c   : > { %14151 = vst [vmem:[#allocation38_spill] sm:$0xff] %v11367_v22  ;;  %v2993_v60 = vadd.f32 %v9112_v20, %v11241_v36  ;;  %v11384_v22 = vadd.s32 24, %v11360_v47  ;;  %v11450_v3 = vadd.f32 %v11212_v49, %v11215_v1  ;;  %v11471_v49 = vadd.f32 %v11244_v2, %v11247_v55 }
 0x27d   : > { %v11373_v9 = vpop.f32.mrf.mxu0  ;;  %v11375_v30 = vpop.f32.mrf.mxu1 }
 0x27e   : > { %14152 = vst [vmem:[#allocation39_spill] sm:$0xff] %v11373_v9  ;;  %14153 = vst [vmem:[#allocation40_spill] sm:$0xff] %v11375_v30  ;;  %v11377_v44 = vadd.f32 %v9198_v8, %v2993_v60  ;;  %v11392_v8 = vmul.u32.u64.low 3817748708, %v11360_v47  ;;  %v11393_v42 = vmul.u32.u64.high 3817748708, %v11360_v47, %v11392_v8 }
 0x27f   : > { %v9115_v33 = vpop.f32.mrf.mxu0  ;;  %v9201_v45 = vpop.f32.mrf.mxu1 }
 0x280   : > { %14154 = vst [vmem:[#allocation41_spill] sm:$0xff] %v11377_v44  ;;  %v2995_v36 = vadd.f32 %v9115_v33, %v11249_v32  ;;  %v11401_v6 = vmul.u32.u64.low 3817748708, %v11384_v22  ;;  %v11402_v32 = vmul.u32.u64.high 3817748708, %v11384_v22, %v11401_v6  ;;  %v5204_v33 = vld [vmem:[#allocation5 + $0x158] sm:$0xff] }
 0x281   : > { %v11387_v20 = vpop.f32.mrf.mxu0  ;;  %v11389_v9 = vpop.f32.mrf.mxu1  ;;  %9652 = vmatprep.subr.mxu1 %v5204_v33 }
 0x282   : > { %14155 = vst [vmem:[#allocation42_spill] sm:$0xff] %v11387_v20  ;;  %14156 = vst [vmem:[#allocation43_spill] sm:$0xff] %v11389_v9  ;;  %v11395_v60 = vadd.f32 %v9201_v45, %v2995_v36  ;;  %v1994_v9 = vadd.f32 %v11128_v26, %v11126_v4  ;;  %v2636_v45 = vadd.f32 %v11143_v62, %v11146_v63  ;;  %9653 = vmatpush3.msra.mxu1 %v5204_v33 }
 0x283   : > { %v9118_v44 = vpop.f32.mrf.mxu0  ;;  %v9204_v30 = vpop.f32.mrf.mxu1  ;;  %v2638_v36 = vadd.f32 %v11153_v16, %v11156_v27  ;;  %v11422_v4 = vmul.u32.u64.low 3817748708, %v11398_v46  ;;  %v11423_v26 = vmul.u32.u64.high 3817748708, %v11398_v46, %v11422_v4  ;;  %v11433_v62 = vadd.f32 %v11188_v11, %v11191_v37  ;;  %v14160_v37 = vld [vmem:[#allocation8_spill] sm:$0xff] }
 0x284   : > { %14157 = vst [vmem:[#allocation44_spill] sm:$0xff] %v11395_v60  ;;  %v2997_v20 = vadd.f32 %v9118_v44, %v11257_v48  ;;  %v2640_v48 = vadd.f32 %v11163_v41, %v11166_v38  ;;  %v812_v27 = vshrl.u32 %v11381_v13, 4  ;;  %v11438_v41 = vadd.f32 %v11196_v43, %v11199_v61 }
 0x285   : > { %v11413_v8 = vpop.f32.mrf.mxu0  ;;  %v11415_v60 = vpop.f32.mrf.mxu1  ;;  %v11442_v38 = vadd.f32 %v11204_v21, %v11207_v14  ;;  %v11454_v11 = vadd.f32 %v14159_v18, %v11223_v24  ;;  %v11458_v43 = vadd.f32 %v14160_v37, %v11231_v5  ;;  %v801_v14 = vshrl.u32 %v11393_v42, 4  ;;  %v14163_v24 = vld [vmem:[#allocation10_spill] sm:$0xff]  ;;  %v14165_v42 = vld [vmem:[#allocation11_spill] sm:$0xff] }
 0x286   : > { %v11419_v6 = vadd.f32 %v9204_v30, %v2997_v20  ;;  %v14161_v30 = vld [vmem:[#allocation9_spill] sm:$0xff]  ;;  %v11476_v5 = vadd.s32 32, %v11360_v47  ;;  %v11480_v13 = vadd.f32 %v14163_v24, %v11255_v25  ;;  %v14164_v20 = vld [vmem:[#allocation12_spill] sm:$0xff]  ;;  %v834_v2 = vshrl.u32 %v11402_v32, 4 }
 0x287   : > { %v9121_v63 = vpop.f32.mrf.mxu0  ;;  %v9207_v16 = vpop.f32.mrf.mxu1  ;;  %v11467_v44 = vadd.f32 %v14161_v30, %v11239_v7  ;;  %v11484_v33 = vadd.f32 %v14165_v42, %v14164_v20  ;;  %v11493_v18 = vadd.s32 56, %v11360_v47  ;;  %v2334_v25 = vadd.f32 %v11277_v51, %v1994_v9 }
 0x288   : > { %14158 = vst [vmem:[#allocation45_spill] sm:$0xff] %v11419_v6  ;;  %v2999_v59 = vadd.f32 %v9121_v63, %v11265_v54  ;;  %v5203_v54 = vld [vmem:[#allocation5 + $0x150] sm:$0xff]  ;;  %v813_v63 = vmul.u32 18, %v812_v27  ;;  %v2968_v37 = vadd.f32 %v11284_v28, %v2634_v57  ;;  %v2970_v30 = vadd.f32 %v11291_v0, %v2636_v45 }
 0x289   : > { %v11460_v61 = vpop.f32.mrf.mxu0  ;;  %v11462_v21 = vpop.f32.mrf.mxu1  ;;  %9654 = vmatprep.subr.mxu1 %v5203_v54  ;;  %v802_v32 = vmul.u32 18, %v801_v14  ;;  %v823_v20 = vshrl.u32 %v11423_v26, 4  ;;  %v2972_v51 = vadd.f32 %v11298_v17, %v2638_v36  ;;  %v2974_v28 = vadd.f32 %v11305_v19, %v2640_v48  ;;  %v14169_v17 = vld [vmem:[#allocation13_spill] sm:$0xff]  ;;  %v14170_v19 = vld [vmem:[#allocation15_spill] sm:$0xff] }
 0x28a   : > { %v11473_v1 = vadd.f32 %v9207_v16, %v2999_v59  ;;  %9655 = vmatpush3.msra.mxu1 %v5203_v54  ;;  %v11489_v16 = vmul.u32.u64.low 3817748708, %v11446_v50  ;;  %v11490_v59 = vmul.u32.u64.high 3817748708, %v11446_v50, %v11489_v16  ;;  %v5202_v54 = vld [vmem:[#allocation5 + $0x148] sm:$0xff]  ;;  %v835_v57 = vmul.u32 18, %v834_v2  ;;  %v14198_v6 = vld [vmem:[#allocation21_spill] sm:$0xff] }
 0x28b   : > { %v9124_v7 = vpop.f32.mrf.mxu0  ;;  %v9210_v4 = vpop.f32.mrf.mxu1  ;;  %9656 = vmatprep.subr.mxu1 %v5202_v54  ;;  %v11512_v45 = vadd.s32 48, %v11360_v47  ;;  %v11516_v26 = vsub.s32 %v11370_v15, %v813_v63  ;;  %v14168_v16 = vld [vmem:[#allocation14_spill] sm:$0xff]  ;;  %v11527_v48 = vadd.f32 %v14170_v19, %v2334_v25  ;;  %v14171_v2 = vld [vmem:[#allocation16_spill] sm:$0xff]  ;;  %v824_v25 = vmul.u32 18, %v823_v20  ;;  %v14180_v20 = vld [vmem:[#allocation17_spill] sm:$0xff] }
 0x28c   : > { %14162 = vst [vmem:[#allocation7_spill] sm:$0xff] %v11473_v1  ;;  %v3001_v55 = vadd.f32 %v9124_v7, %v11274_v52  ;;  %v11506_v42 = vmul.u32.u64.low 3817748708, %v11476_v5  ;;  %v11507_v7 = vmul.u32.u64.high 3817748708, %v11476_v5, %v11506_v42  ;;  %9657 = vmatpush3.msra.mxu1 %v5202_v54  ;;  %v11524_v36 = vadd.f32 %v14169_v17, %v14168_v16  ;;  %v5201_v63 = vld [vmem:[#allocation5 + $0x140] sm:$0xff]  ;;  %v5542_v17 = vld [vmem:[#allocation5 + $0x1f8] sm:$0xff] }
 0x28d   : > { %v11498_v24 = vpop.f32.mrf.mxu0  ;;  %v11500_v27 = vpop.f32.mrf.mxu1  ;;  %14167 = vst [vmem:[#allocation9_spill] sm:$0xff] %v11516_v26  ;;  %v11530_v42 = vadd.f32 %v14171_v2, %v2968_v37  ;;  %v2976_v54 = vadd.f32 %v11312_v12, %v2642_v29  ;;  %v11543_v16 = vsub.s32 %v11360_v47, %v802_v32  ;;  %9658 = vmatprep.subr.mxu1 %v5201_v63  ;;  %v14176_v37 = vld [vmem:[#allocation20_spill] sm:$0xff]  ;;  %vm1192_vm3 = vcmp.ne.s32.totalorder %v11516_v26, 0 }
 0x28e   : > { %v11502_v52 = vadd.f32 %v9210_v4, %v3001_v55  ;;  %v11519_v4 = vmul.u32.u64.low 3817748708, %v11493_v18  ;;  %v11520_v55 = vmul.u32.u64.high 3817748708, %v11493_v18, %v11519_v4  ;;  %v11546_v19 = vadd.f32 %v14176_v37, %v2972_v51  ;;  %9659 = vmatpush3.msra.mxu1 %v5201_v63  ;;  %9730 = vmatprep.subr.mxu0 %v5542_v17  ;;  %v5200_v63 = vld [vmem:[#allocation5 + $0x138] sm:$0xff] }
 0x28f   : > { %v9127_v0 = vpop.f32.mrf.mxu0  ;;  %v9213_v9 = vpop.f32.mrf.mxu1  ;;  %14175 = vst [vmem:[#allocation11_spill] sm:$0xff] %v11543_v16  ;;  %v11551_v2 = vsub.s32 %v11384_v22, %v835_v57  ;;  %v11558_v32 = vadd.f32 %v11307_v53, %v2974_v28  ;;  %v856_v51 = vshrl.u32 %v11490_v59, 4  ;;  %9731 = vmatpush3.msra.mxu0 %v5542_v17  ;;  %v11566_v22 = vadd.f32 %v11314_v34, %v2976_v54  ;;  %v5540_v54 = vld [vmem:[#allocation5 + $0x1e8] sm:$0xff] }
 0x290   : > { %14166 = vst [vmem:[#allocation8_spill] sm:$0xff] %v11502_v52  ;;  %v3003_v14 = vadd.f32 %v9127_v0, %v11281_v58  ;;  %v14172_v0 = vld [vmem:[#allocation18_spill] sm:$0xff]  ;;  %14177 = vst [vmem:[#allocation14_spill] sm:$0xff] %v11546_v19  ;;  %vm1228_vm4 = vcmp.lt.s32.totalorder %v11516_v26, 0  ;;  %v11574_v53 = vadd.s32 18, %v11516_v26  ;;  %v11577_v28 = vadd.s32 72, %v11360_v47  ;;  %9660 = vmatprep.subr.mxu1 %v5200_v63 }
 0x291   : > { %v11533_v58 = vpop.f32.mrf.mxu0  ;;  %v11535_v15 = vpop.f32.mrf.mxu1  ;;  %v11538_v52 = vadd.f32 %v14172_v0, %v2970_v30  ;;  %14178 = vst [vmem:[#allocation13_spill] sm:$0xff] %v11551_v2  ;;  %v11554_v30 = vmul.u32.u64.low 3817748708, %v11512_v45  ;;  %v11555_v0 = vmul.u32.u64.high 3817748708, %v11512_v45, %v11554_v30  ;;  %14179 = vst [vmem:[#allocation15_spill] sm:$0xff] %v11558_v32  ;;  %vm1191_vm5 = vcmp.ne.s32.totalorder %v11543_v16, 0  ;;  %9661 = vmatpush3.msra.mxu1 %v5200_v63  ;;  %v5536_v26 = vld [vmem:[#allocation5 + $0x1c8] sm:$0xff] }
 0x292   : > { %v11540_v4 = vadd.f32 %v9213_v9, %v3003_v14  ;;  %v5541_v14 = vld [vmem:[#allocation5 + $0x1f0] sm:$0xff]  ;;  %14181 = vst [vmem:[#allocation16_spill] sm:$0xff] %v11566_v22  ;;  %14183 = vst [vmem:[#allocation20_spill] sm:$0xff] %v11574_v53  ;;  %vm1227_vm6 = vcmp.lt.s32.totalorder %v11543_v16, 0  ;;  %v11582_v34 = vsub.s32 %v11398_v46, %v824_v25  ;;  %v845_v59 = vshrl.u32 %v11507_v7, 4  ;;  %v14186_v46 = vld [vmem:[#allocation19_spill] sm:$0xff] }
 0x293   : > { %14173 = vst [vmem:[#allocation10_spill] sm:$0xff] %v11538_v52  ;;  %v9248_v12 = vpop.f32.mrf.mxu0  ;;  %v11548_v29 = vpop.f32.mrf.mxu1  ;;  %9732 = vmatprep.subr.mxu0 %v5541_v14  ;;  %v2978_v17 = vadd.f32 %v11319_v56, %v11429_v35  ;;  %v11588_v30 = vadd.s32 18, %v11543_v16  ;;  %vm1194_vm7 = vcmp.ne.s32.totalorder %v11551_v2, 0  ;;  %vm1230_vm8 = vcmp.lt.s32.totalorder %v11551_v2, 0  ;;  %v5539_v35 = vld [vmem:[#allocation5 + $0x1e0] sm:$0xff]  ;;  %vm11617_vm9 = vmand %vm1228_vm4, %vm1192_vm3  ;;  %v14211_v53 = vld [vmem:[#allocation24_spill] sm:$0xff] }
 0x294   : > { %14174 = vst [vmem:[#allocation12_spill] sm:$0xff] %v11540_v4  ;;  %v11561_v9 = vadd.f32 %v9248_v12, %v14180_v20  ;;  %14184 = vst [vmem:[#allocation17_spill] sm:$0xff] %v11582_v34  ;;  %9733 = vmatpush3.msra.mxu0 %v5541_v14  ;;  %v11592_v20 = vadd.s32 64, %v11360_v47  ;;  %v857_v14 = vmul.u32 18, %v856_v51  ;;  %v878_v56 = vshrl.u32 %v11520_v55, 4 }
 0x295   : > { %v11568_v57 = vpop.f32.mrf.mxu0  ;;  %v11570_v37 = vpop.f32.mrf.mxu1  ;;  %14185 = vst [vmem:[#allocation46_spill] sm:$0xff] %v11588_v30  ;;  %9734 = vmatprep.subr.mxu0 %v5540_v54  ;;  %v11604_v22 = vadd.s32 18, %v11551_v2  ;;  %v11607_v63 = vmul.u32.u64.low 3817748708, %v11577_v28  ;;  %v11608_v1 = vmul.u32.u64.high 3817748708, %v11577_v28, %v11607_v63  ;;  %v14191_v55 = vmov 0  ;;  %vm11632_vm12 = vmand %vm1227_vm6, %vm1191_vm5 }
 0x296   : > { %14182 = vst [vmem:[#allocation18_spill] sm:$0xff] %v11570_v37  ;;  %9735 = vmatpush3.msra.mxu0 %v5540_v54  ;;  %v14192_v55 = vsel %vm11617_vm9, 4294967295, %v14191_v55  ;;  %vm1193_vm10 = vcmp.ne.s32.totalorder %v11582_v34, 0  ;;  %vm1229_vm11 = vcmp.lt.s32.totalorder %v11582_v34, 0  ;;  %v846_v51 = vmul.u32 18, %v845_v59  ;;  %v14194_v63 = vld [vmem:[#allocation26_spill] sm:$0xff]  ;;  %vm11650_vm13 = vmand %vm1230_vm8, %vm1194_vm7 }
 0x297   : > { %v9251_v12 = vpop.f32.mrf.mxu0  ;;  %v11597_v7 = vpop.f32.mrf.mxu1  ;;  %14190 = vst [vmem:[#allocation49_spill] sm:$0xff] %v11604_v22  ;;  %9736 = vmatprep.subr.mxu0 %v5539_v35  ;;  %14193 = vst [vmem:[#allocation50_spill] sm:$0xff] %v14192_v55  ;;  %v11624_v54 = vadd.s32 80, %v11360_v47  ;;  %v2980_v32 = vadd.f32 %v14194_v63, %v11433_v62  ;;  %v11638_v59 = vmul.u32.u64.low 3817748708, %v11592_v20  ;;  %v11639_v37 = vmul.u32.u64.high 3817748708, %v11592_v20, %v11638_v59  ;;  %v14232_v22 = vld [vmem:[#allocation25_spill] sm:$0xff] }
 0x298   : > { %v11595_v25 = vadd.f32 %v9251_v12, %v14186_v46  ;;  %14188 = vst [vmem:[#allocation47_spill] sm:$0xff] %v11597_v7  ;;  %v11611_v12 = vadd.s32 88, %v11360_v47  ;;  %9737 = vmatpush3.msra.mxu0 %v5539_v35  ;;  %v5538_v46 = vld [vmem:[#allocation5 + $0x1d8] sm:$0xff]  ;;  %v14195_v7 = vmov 0  ;;  %v5199_v35 = vld [vmem:[#allocation5 + $0x130] sm:$0xff]  ;;  %v14201_v63 = vmov 0  ;;  %vm11672_vm14 = vmand %vm1229_vm11, %vm1193_vm10 }
 0x299   : > { %v11601_v4 = vpop.f32.mrf.mxu0  ;;  %v14196_v7 = vsel %vm11632_vm12, 4294967295, %v14195_v7  ;;  %9738 = vmatprep.subr.mxu0 %v5538_v46  ;;  %v11644_v62 = vpop.f32.mrf.mxu1  ;;  %v14202_v63 = vsel %vm11650_vm13, 4294967295, %v14201_v63  ;;  %v11658_v59 = vsub.s32 %v11446_v50, %v857_v14  ;;  %v879_v52 = vmul.u32 18, %v878_v56  ;;  %9662 = vmatprep.subr.mxu1 %v5199_v35 }
 0x29a   : > { %14187 = vst [vmem:[#allocation19_spill] sm:$0xff] %v11595_v25  ;;  %14189 = vst [vmem:[#allocation48_spill] sm:$0xff] %v11601_v4  ;;  %v867_v25 = vshrl.u32 %v11555_v0, 4  ;;  %v11655_v0 = vadd.s32 18, %v11582_v34  ;;  %9739 = vmatpush3.msra.mxu0 %v5538_v46  ;;  %v14207_v50 = vmov 0  ;;  %9663 = vmatpush3.msra.mxu1 %v5199_v35  ;;  %v11692_v55 = vadd.f32 %v14211_v53, %v2978_v17  ;;  %v5535_v17 = vld [vmem:[#allocation5 + $0x1c0] sm:$0xff] }
 0x29b   : > { %v9254_v19 = vpop.f32.mrf.mxu0  ;;  %14197 = vst [vmem:[#allocation26_spill] sm:$0xff] %v14196_v7  ;;  %14200 = vst [vmem:[#allocation51_spill] sm:$0xff] %v11644_v62  ;;  %v14208_v50 = vsel %vm11672_vm14, 4294967295, %v14207_v50  ;;  %v11677_v14 = vmul.u32.u64.low 3817748708, %v11611_v12  ;;  %v11678_v56 = vmul.u32.u64.high 3817748708, %v11611_v12, %v11677_v14  ;;  %v11701_v16 = vpop.f32.mrf.mxu1  ;;  %vm1196_vm15 = vcmp.ne.s32.totalorder %v11658_v59, 0 }
 0x29c   : > { %v11642_v4 = vadd.f32 %v9254_v19, %v14198_v6  ;;  %14203 = vst [vmem:[#allocation52_spill] sm:$0xff] %v14202_v63  ;;  %14204 = vst [vmem:[#allocation53_spill] sm:$0xff] %v11655_v0  ;;  %v5537_v6 = vld [vmem:[#allocation5 + $0x1d0] sm:$0xff]  ;;  %v2982_v19 = vadd.f32 %v11333_v40, %v11438_v41  ;;  %v11685_v41 = vsub.s32 %v11476_v5, %v846_v51  ;;  %v14213_v14 = vld [vmem:[#allocation27_spill] sm:$0xff]  ;;  %v868_v5 = vmul.u32 18, %v867_v25 }
 0x29d   : > { %14205 = vst [vmem:[#allocation54_spill] sm:$0xff] %v11658_v59  ;;  %14209 = vst [vmem:[#allocation56_spill] sm:$0xff] %v14208_v50  ;;  %9740 = vmatprep.subr.mxu0 %v5537_v6  ;;  %v11688_v46 = vmul.u32.u64.low 3817748708, %v11624_v54  ;;  %v11689_v62 = vmul.u32.u64.high 3817748708, %v11624_v54, %v11688_v46  ;;  %v11695_v35 = vadd.f32 %v14213_v14, %v2980_v32  ;;  %v5198_v51 = vld [vmem:[#allocation5 + $0x128] sm:$0xff]  ;;  %v11712_v53 = vsub.s32 %v11493_v18, %v879_v52  ;;  %v14217_v25 = vld [vmem:[#allocation29_spill] sm:$0xff]  ;;  %v11742_v0 = vpop.f32.mrf.mxu1 }
 0x29e   : > { %14199 = vst [vmem:[#allocation21_spill] sm:$0xff] %v11642_v4  ;;  %v11662_v4 = vpop.f32.mrf.mxu0  ;;  %14210 = vst [vmem:[#allocation57_spill] sm:$0xff] %v11685_v41  ;;  %9741 = vmatpush3.msra.mxu0 %v5537_v6  ;;  %v14215_v46 = vld [vmem:[#allocation22_spill] sm:$0xff]  ;;  %9664 = vmatprep.subr.mxu1 %v5198_v51  ;;  %v11715_v14 = vadd.f32 %v14217_v25, %v2982_v19  ;;  %vm1232_vm0 = vcmp.lt.s32.totalorder %v11658_v59, 0  ;;  %vm1195_vm1 = vcmp.ne.s32.totalorder %v11685_v41, 0  ;;  %vm1231_vm3 = vcmp.lt.s32.totalorder %v11685_v41, 0 }
 0x29f   : > { %14206 = vst [vmem:[#allocation55_spill] sm:$0xff] %v11662_v4  ;;  %14212 = vst [vmem:[#allocation24_spill] sm:$0xff] %v11692_v55  ;;  %9742 = vmatprep.subr.mxu0 %v5536_v26  ;;  %9665 = vmatpush3.msra.mxu1 %v5198_v51  ;;  %v11727_v18 = vadd.s32 18, %v11685_v41  ;;  %v11730_v52 = vadd.s32 104, %v11360_v47  ;;  %v2984_v19 = vadd.f32 %v11340_v23, %v11442_v38  ;;  %v889_v32 = vshrl.u32 %v11639_v37, 4  ;;  %v5197_v34 = vld [vmem:[#allocation5 + $0x120] sm:$0xff] }
 0x2a0   : > { %14214 = vst [vmem:[#allocation27_spill] sm:$0xff] %v11695_v35  ;;  %v9257_v4 = vpop.f32.mrf.mxu0  ;;  %14216 = vst [vmem:[#allocation22_spill] sm:$0xff] %v11712_v53  ;;  %9743 = vmatpush3.msra.mxu0 %v5536_v26  ;;  %v5534_v26 = vld [vmem:[#allocation5 + $0x1b8] sm:$0xff]  ;;  %v11739_v25 = vsub.s32 %v11512_v45, %v868_v5  ;;  %v14222_v50 = vld [vmem:[#allocation23_spill] sm:$0xff]  ;;  %vm1198_vm4 = vcmp.ne.s32.totalorder %v11712_v53, 0  ;;  %vm1234_vm5 = vcmp.lt.s32.totalorder %v11712_v53, 0  ;;  %9666 = vmatprep.subr.mxu1 %v5197_v34 }
 0x2a1   : > { %v11704_v6 = vadd.f32 %v9257_v4, %v14215_v46  ;;  %14218 = vst [vmem:[#allocation29_spill] sm:$0xff] %v11715_v14  ;;  %v11721_v4 = vadd.s32 18, %v11658_v59  ;;  %v900_v46 = vshrl.u32 %v11608_v1, 4  ;;  %9744 = vmatprep.subr.mxu0 %v5535_v17  ;;  %14220 = vst [vmem:[#allocation59_spill] sm:$0xff] %v11727_v18  ;;  %v11736_v1 = vadd.f32 %v11347_v31, %v11450_v3  ;;  %v5533_v31 = vld [vmem:[#allocation5 + $0x1b0] sm:$0xff] }
 0x2a2   : > { %v11717_v40 = vpop.f32.mrf.mxu0  ;;  %9745 = vmatpush3.msra.mxu0 %v5535_v17  ;;  %14221 = vst [vmem:[#allocation60_spill] sm:$0xff] %v11739_v25  ;;  %v11750_v23 = vadd.s32 96, %v11360_v47  ;;  %v11755_v3 = vadd.s32 18, %v11712_v53  ;;  %v922_v37 = vshrl.u32 %v11678_v56, 4  ;;  %9667 = vmatpush3.msra.mxu1 %v5197_v34  ;;  %v2988_v5 = vadd.f32 %v11354_v10, %v11454_v11  ;;  %vm11767_vm6 = vmand %vm1232_vm0, %vm1196_vm15  ;;  %v5532_v34 = vld [vmem:[#allocation5 + $0x1a8] sm:$0xff] }
 0x2a3   : > { %14219 = vst [vmem:[#allocation58_spill] sm:$0xff] %v11721_v4  ;;  %9746 = vmatprep.subr.mxu0 %v5534_v26  ;;  %v901_v45 = vmul.u32 18, %v900_v46  ;;  %v911_v46 = vshrl.u32 %v11689_v62, 4  ;;  %vm11780_vm7 = vmand %vm1231_vm3, %vm1195_vm1  ;;  %v14229_v10 = vmov 0  ;;  %vm1197_vm8 = vcmp.ne.s32.totalorder %v11739_v25, 0  ;;  %v14246_v18 = vld [vmem:[#allocation32_spill] sm:$0xff] }
 0x2a4   : > { %v9260_v51 = vpop.f32.mrf.mxu0  ;;  %9747 = vmatpush3.msra.mxu0 %v5534_v26  ;;  %14225 = vst [vmem:[#allocation62_spill] sm:$0xff] %v11755_v3  ;;  %v14226_v26 = vmov 0  ;;  %v14230_v10 = vsel %vm11780_vm7, 4294967295, %v14229_v10  ;;  %vm1233_vm10 = vcmp.lt.s32.totalorder %v11739_v25, 0  ;;  %v890_v11 = vmul.u32 18, %v889_v32  ;;  %v5531_v32 = vld [vmem:[#allocation5 + $0x1a0] sm:$0xff]  ;;  %vm11807_vm11 = vmand %vm1234_vm5, %vm1198_vm4 }
 0x2a5   : > { %v11745_v17 = vadd.f32 %v9260_v51, %v14222_v50  ;;  %v11759_v50 = vadd.s32 120, %v11360_v47  ;;  %9748 = vmatprep.subr.mxu0 %v5533_v31  ;;  %v14227_v26 = vsel %vm11767_vm6, 4294967295, %v14226_v26  ;;  %14231 = vst [vmem:[#allocation64_spill] sm:$0xff] %v14230_v10  ;;  %v11787_v62 = vadd.s32 112, %v11360_v47  ;;  %vm11833_vm15 = vmand %vm1233_vm10, %vm1197_vm8  ;;  %v14248_v59 = vld [vmem:[#allocation28_spill] sm:$0xff] }
 0x2a6   : > { %v11752_v38 = vpop.f32.mrf.mxu0  ;;  %14228 = vst [vmem:[#allocation63_spill] sm:$0xff] %v14227_v26  ;;  %v11773_v56 = vmul.u32.u64.low 3817748708, %v11730_v52  ;;  %v11774_v51 = vmul.u32.u64.high 3817748708, %v11730_v52, %v11773_v56  ;;  %9749 = vmatpush3.msra.mxu0 %v5533_v31  ;;  %v11789_v31 = vpop.f32.mrf.mxu1  ;;  %v11795_v14 = vadd.s32 18, %v11739_v25  ;;  %v14236_v55 = vmov 0 }
 0x2a7   : > { %14223 = vst [vmem:[#allocation23_spill] sm:$0xff] %v11745_v17  ;;  %14224 = vst [vmem:[#allocation61_spill] sm:$0xff] %v11752_v38  ;;  %v5196_v56 = vld [vmem:[#allocation5 + $0x118] sm:$0xff]  ;;  %9750 = vmatprep.subr.mxu0 %v5532_v34  ;;  %v11798_v30 = vmul.u32.u64.low 3817748708, %v11750_v23  ;;  %v11799_v7 = vmul.u32.u64.high 3817748708, %v11750_v23, %v11798_v30  ;;  %v14237_v55 = vsel %vm11807_vm11, 4294967295, %v14236_v55  ;;  %v11819_v17 = vadd.f32 %v11342_v39, %v2984_v19 }
 0x2a8   : > { %v9263_v2 = vpop.f32.mrf.mxu0  ;;  %14234 = vst [vmem:[#allocation65_spill] sm:$0xff] %v11795_v14  ;;  %9668 = vmatprep.subr.mxu1 %v5196_v56  ;;  %9751 = vmatpush3.msra.mxu0 %v5532_v34  ;;  %14238 = vst [vmem:[#allocation67_spill] sm:$0xff] %v14237_v55  ;;  %v5195_v34 = vld [vmem:[#allocation5 + $0x110] sm:$0xff]  ;;  %v912_v39 = vmul.u32 18, %v911_v46  ;;  %v5530_v19 = vld [vmem:[#allocation5 + $0x198] sm:$0xff]  ;;  %v11840_v10 = vsub.s32 %v11592_v20, %v890_v11  ;;  %v11848_v46 = vadd.f32 %v14246_v18, %v11736_v1  ;;  %v14277_v55 = vmov 0 }
 0x2a9   : > { %v11792_v63 = vadd.f32 %v9263_v2, %v14232_v22  ;;  %v11812_v2 = vsub.s32 %v11577_v28, %v901_v45  ;;  %v923_v22 = vmul.u32 18, %v922_v37  ;;  %9669 = vmatpush3.msra.mxu1 %v5196_v56  ;;  %9752 = vmatprep.subr.mxu0 %v5531_v32  ;;  %14240 = vst [vmem:[#allocation69_spill] sm:$0xff] %v11819_v17  ;;  %v5529_v45 = vld [vmem:[#allocation5 + $0x190] sm:$0xff]  ;;  %v14250_v20 = vld [vmem:[#allocation34_spill] sm:$0xff] }
 0x2aa   : > { %v11801_v35 = vpop.f32.mrf.mxu0  ;;  %9670 = vmatprep.subr.mxu1 %v5195_v34  ;;  %9753 = vmatpush3.msra.mxu0 %v5531_v32  ;;  %v14244_v37 = vld [vmem:[#allocation36_spill] sm:$0xff]  ;;  %v11843_v28 = vmul.u32.u64.low 3817748708, %v11787_v62  ;;  %v11844_v41 = vmul.u32.u64.high 3817748708, %v11787_v62, %v11843_v28  ;;  %14247 = vst [vmem:[#allocation32_spill] sm:$0xff] %v11848_v46  ;;  %v11850_v32 = vpop.f32.mrf.mxu1  ;;  %v11860_v11 = vadd.f32 %v14250_v20, %v2988_v5  ;;  %v944_v5 = vshrl.u32 %v11774_v51, 4 }
 0x2ab   : > { %14233 = vst [vmem:[#allocation25_spill] sm:$0xff] %v11792_v63  ;;  %14235 = vst [vmem:[#allocation66_spill] sm:$0xff] %v11801_v35  ;;  %v11815_v63 = vmul.u32.u64.low 3817748708, %v11759_v50  ;;  %v11816_v30 = vmul.u32.u64.high 3817748708, %v11759_v50, %v11815_v63  ;;  %v5194_v35 = vld [vmem:[#allocation5 + $0x108] sm:$0xff]  ;;  %v2990_v56 = vadd.f32 %v14244_v37, %v11458_v43  ;;  %9671 = vmatpush3.msra.mxu1 %v5195_v34  ;;  %9754 = vmatprep.subr.mxu0 %v5530_v19  ;;  %vm1200_vm0 = vcmp.ne.s32.totalorder %v11812_v2, 0 }
 0x2ac   : > { %14239 = vst [vmem:[#allocation68_spill] sm:$0xff] %v11812_v2  ;;  %v14241_v63 = vmov 0  ;;  %v9266_v38 = vpop.f32.mrf.mxu0  ;;  %14245 = vst [vmem:[#allocation36_spill] sm:$0xff] %v11840_v10  ;;  %9672 = vmatprep.subr.mxu1 %v5194_v35  ;;  %9755 = vmatpush3.msra.mxu0 %v5530_v19  ;;  %vm1236_vm1 = vcmp.lt.s32.totalorder %v11812_v2, 0  ;;  %v11874_v1 = vadd.s32 18, %v11812_v2  ;;  %v5193_v28 = vld [vmem:[#allocation5 + $0x100] sm:$0xff] }
 0x2ad   : > { %v14242_v63 = vsel %vm11833_vm15, 4294967295, %v14241_v63  ;;  %v11853_v4 = vadd.f32 %v9266_v38, %v14248_v59  ;;  %14251 = vst [vmem:[#allocation34_spill] sm:$0xff] %v11860_v11  ;;  %v11870_v59 = vsub.s32 %v11611_v12, %v923_v22  ;;  %9673 = vmatpush3.msra.mxu1 %v5194_v35  ;;  %9756 = vmatprep.subr.mxu0 %v5529_v45  ;;  %v5528_v19 = vld [vmem:[#allocation5 + $0x188] sm:$0xff]  ;;  %v14254_v37 = vld [vmem:[#allocation37_spill] sm:$0xff]  ;;  %vm1199_vm3 = vcmp.ne.s32.totalorder %v11840_v10, 0  ;;  %vm11916_vm8 = vmand %vm1236_vm1, %vm1200_vm0 }
 0x2ae   : > { %14243 = vst [vmem:[#allocation70_spill] sm:$0xff] %v14242_v63  ;;  %v11862_v34 = vpop.f32.mrf.mxu0  ;;  %v11877_v38 = vsub.s32 %v11624_v54, %v912_v39  ;;  %9757 = vmatpush3.msra.mxu0 %v5529_v45  ;;  %v11881_v20 = vadd.f32 %v14254_v37, %v2990_v56  ;;  %vm1235_vm4 = vcmp.lt.s32.totalorder %v11840_v10, 0  ;;  %v11886_v35 = vadd.s32 136, %v11360_v47  ;;  %9674 = vmatprep.subr.mxu1 %v5193_v28  ;;  %v5527_v54 = vld [vmem:[#allocation5 + $0x180] sm:$0xff]  ;;  %v11890_v39 = vpop.f32.mrf.mxu1 }
 0x2af   : > { %14249 = vst [vmem:[#allocation28_spill] sm:$0xff] %v11853_v4  ;;  %14252 = vst [vmem:[#allocation71_spill] sm:$0xff] %v11870_v59  ;;  %9758 = vmatprep.subr.mxu0 %v5528_v19  ;;  %v14256_v22 = vld [vmem:[#allocation39_spill] sm:$0xff]  ;;  %v14257_v45 = vld [vmem:[#allocation30_spill] sm:$0xff]  ;;  %v11896_v56 = vadd.s32 18, %v11840_v10  ;;  %v933_v37 = vshrl.u32 %v11799_v7, 4  ;;  %9675 = vmatpush3.msra.mxu1 %v5193_v28 }
 0x2b0   : > { %14253 = vst [vmem:[#allocation72_spill] sm:$0xff] %v11877_v38  ;;  %14255 = vst [vmem:[#allocation37_spill] sm:$0xff] %v11881_v20  ;;  %v9269_v12 = vpop.f32.mrf.mxu0  ;;  %v2992_v51 = vadd.f32 %v14256_v22, %v11467_v44  ;;  %9759 = vmatpush3.msra.mxu0 %v5528_v19  ;;  %vm1202_vm5 = vcmp.ne.s32.totalorder %v11870_v59, 0  ;;  %v966_v44 = vshrl.u32 %v11816_v30, 4  ;;  %v11905_v22 = vadd.s32 128, %v11360_v47  ;;  %v5876_v28 = vld [vmem:[#allocation5 + $0x278] sm:$0xff]  ;;  %v11930_v14 = vpop.f32.mrf.mxu1 }
 0x2b1   : > { %v11893_v18 = vadd.f32 %v9269_v12, %v14257_v45  ;;  %14259 = vst [vmem:[#allocation30_spill] sm:$0xff] %v11896_v56  ;;  %9760 = vmatprep.subr.mxu0 %v5527_v54  ;;  %vm1201_vm10 = vcmp.ne.s32.totalorder %v11877_v38, 0  ;;  %v945_v12 = vmul.u32 18, %v944_v5  ;;  %v11910_v7 = vadd.s32 152, %v11360_v47  ;;  %9816 = vmatprep.subr.mxu1 %v5876_v28  ;;  %v14264_v63 = vld [vmem:[#allocation31_spill] sm:$0xff]  ;;  %vm11939_vm0 = vmand %vm1235_vm4, %vm1199_vm3 }
 0x2b2   : > { %v11899_v43 = vpop.f32.mrf.mxu0  ;;  %9761 = vmatpush3.msra.mxu0 %v5527_v54  ;;  %v14261_v30 = vmov 0  ;;  %v955_v45 = vshrl.u32 %v11844_v41, 4  ;;  %v11922_v20 = vmul.u32.u64.low 3817748708, %v11886_v35  ;;  %v11923_v11 = vmul.u32.u64.high 3817748708, %v11886_v35, %v11922_v20  ;;  %v14263_v54 = vld [vmem:[#allocation42_spill] sm:$0xff] }
 0x2b3   : > { %14258 = vst [vmem:[#allocation39_spill] sm:$0xff] %v11893_v18  ;;  %14260 = vst [vmem:[#allocation73_spill] sm:$0xff] %v11899_v43  ;;  %v14262_v30 = vsel %vm11916_vm8, 4294967295, %v14261_v30  ;;  %v11926_v5 = vadd.s32 144, %v11360_v47  ;;  %v2994_v25 = vadd.f32 %v14263_v54, %v11471_v49  ;;  %v14266_v41 = vmov 0  ;;  %v14280_v18 = vld [vmem:[#allocation40_spill] sm:$0xff] }
 0x2b4   : > { %v9272_v19 = vpop.f32.mrf.mxu0  ;;  %v14267_v41 = vsel %vm11939_vm0, 4294967295, %v14266_v41  ;;  %v11944_v20 = vadd.s32 18, %v11870_v59  ;;  %v934_v28 = vmul.u32 18, %v933_v37  ;;  %vm14271_vm1 = vcmp.lt.s32.totalorder %v11870_v59, 0 }
 0x2b5   : > { %v11933_v46 = vadd.f32 %v9272_v19, %v14264_v63  ;;  %14268 = vst [vmem:[#allocation31_spill] sm:$0xff] %v14267_v41  ;;  %vm11952_vm2 = vmand %vm14271_vm1, %vm1202_vm5  ;;  %v14272_v49 = vmov 0  ;;  %v11957_v63 = vadd.s32 18, %v11877_v38  ;;  %v967_v19 = vmul.u32 18, %v966_v44  ;;  %v14333_v41 = vld [vmem:[#allocation45_spill] sm:$0xff] }
 0x2b6   : > { %14269 = vst [vmem:[#allocation74_spill] sm:$0xff] %v11944_v20  ;;  %v11946_v53 = vpop.f32.mrf.mxu0  ;;  %v14273_v49 = vsel %vm11952_vm2, 4294967295, %v14272_v49  ;;  %v11960_v54 = vmul.u32.u64.low 3817748708, %v11905_v22  ;;  %v11961_v3 = vmul.u32.u64.high 3817748708, %v11905_v22, %v11960_v54  ;;  %v2996_v37 = vadd.f32 %v11413_v8, %v11480_v13 }
 0x2b7   : > { %14265 = vst [vmem:[#allocation42_spill] sm:$0xff] %v11933_v46  ;;  %14270 = vst [vmem:[#allocation75_spill] sm:$0xff] %v11946_v53  ;;  %vm14276_vm3 = vcmp.lt.s32.totalorder %v11877_v38, 0  ;;  %v11974_v26 = vsub.s32 %v11730_v52, %v945_v12  ;;  %v11977_v44 = vmul.u32.u64.low 3817748708, %v11910_v7  ;;  %v11978_v46 = vmul.u32.u64.high 3817748708, %v11910_v7, %v11977_v44  ;;  %v11991_v52 = vpop.f32.mrf.mxu1  ;;  %v14282_v12 = vld [vmem:[#allocation33_spill] sm:$0xff] }
 0x2b8   : > { %14274 = vst [vmem:[#allocation76_spill] sm:$0xff] %v14273_v49  ;;  %14275 = vst [vmem:[#allocation77_spill] sm:$0xff] %v11957_v63  ;;  %v9275_v53 = vpop.f32.mrf.mxu0  ;;  %v956_v13 = vmul.u32 18, %v955_v45  ;;  %v11985_v54 = vmul.u32.u64.low 3817748708, %v11926_v5  ;;  %v11986_v17 = vmul.u32.u64.high 3817748708, %v11926_v5, %v11985_v54  ;;  %v11989_v4 = vadd.f32 %v14280_v18, %v2992_v51  ;;  %v14283_v45 = vld [vmem:[#allocation43_spill] sm:$0xff] }
 0x2b9   : > { %vm11969_vm4 = vmand %vm14276_vm3, %vm1201_vm10  ;;  %v11994_v43 = vadd.f32 %v9275_v53, %v14282_v12  ;;  %v12001_v8 = vsub.s32 %v11750_v23, %v934_v28  ;;  %v12004_v2 = vadd.f32 %v14283_v45, %v2994_v25  ;;  %v12017_v51 = vsub.s32 %v11759_v50, %v967_v19  ;;  %v12036_v19 = vpop.f32.mrf.mxu1 }
 0x2ba   : > { %v14278_v55 = vsel %vm11969_vm4, 4294967295, %v14277_v55  ;;  %14281 = vst [vmem:[#allocation40_spill] sm:$0xff] %v11989_v4  ;;  %v12006_v54 = vpop.f32.mrf.mxu0  ;;  %v12020_v23 = vadd.f32 %v11415_v60, %v2996_v37  ;;  %v2998_v25 = vadd.f32 %v11460_v61, %v11484_v33  ;;  %v12026_v28 = vadd.s32 168, %v11360_v47  ;;  %v14288_v37 = vld [vmem:[#allocation35_spill] sm:$0xff] }
 0x2bb   : > { %14279 = vst [vmem:[#allocation78_spill] sm:$0xff] %v14278_v55  ;;  %14284 = vst [vmem:[#allocation33_spill] sm:$0xff] %v12004_v2  ;;  %v12030_v45 = vadd.s32 18, %v11974_v26  ;;  %v12033_v50 = vsub.s32 %v11787_v62, %v956_v13  ;;  %v988_v60 = vshrl.u32 %v11923_v11, 4  ;;  %v12044_v33 = vadd.s32 160, %v11360_v47  ;;  %v12067_v38 = vpop.f32.mrf.mxu1 }
 0x2bc   : > { %14285 = vst [vmem:[#allocation43_spill] sm:$0xff] %v12017_v51  ;;  %14286 = vst [vmem:[#allocation79_spill] sm:$0xff] %v12020_v23  ;;  %v9278_v12 = vpop.f32.mrf.mxu0  ;;  %v12049_v18 = vadd.s32 18, %v12001_v8  ;;  %v977_v62 = vshrl.u32 %v11961_v3, 4  ;;  %v1010_v11 = vshrl.u32 %v11978_v46, 4  ;;  %v999_v2 = vshrl.u32 %v11986_v17, 4 }
 0x2bd   : > { %14287 = vst [vmem:[#allocation80_spill] sm:$0xff] %v12033_v50  ;;  %v12039_v61 = vadd.f32 %v9278_v12, %v14288_v37  ;;  %v12056_v13 = vmul.u32.u64.low 3817748708, %v12026_v28  ;;  %v12057_v12 = vmul.u32.u64.high 3817748708, %v12026_v28, %v12056_v13  ;;  %v12060_v37 = vadd.s32 184, %v11360_v47  ;;  %v14291_v3 = vld [vmem:[#allocation38_spill] sm:$0xff]  ;;  %v12133_v10 = vpop.f32.mrf.mxu1 }
 0x2be   : > { %v12046_v53 = vpop.f32.mrf.mxu0  ;;  %v989_v23 = vmul.u32 18, %v988_v60  ;;  %v12065_v4 = vadd.s32 176, %v11360_v47  ;;  %vm14293_vm5 = vcmp.ne.s32.totalorder %v11974_v26, 0  ;;  %vm14294_vm10 = vcmp.lt.s32.totalorder %v11974_v26, 0 }
 0x2bf   : > { %14289 = vst [vmem:[#allocation35_spill] sm:$0xff] %v12039_v61  ;;  %14290 = vst [vmem:[#allocation81_spill] sm:$0xff] %v12046_v53  ;;  %v14295_v13 = vmov 0  ;;  %vm1241_vm3 = vcmp.lt.s32.totalorder %v12033_v50, 0  ;;  %v12082_v17 = vmul.u32.u64.low 3817748708, %v12044_v33  ;;  %v12083_v60 = vmul.u32.u64.high 3817748708, %v12044_v33, %v12082_v17 }
 0x2c0   : > { %v9281_v44 = vpop.f32.mrf.mxu0  ;;  %vm12076_vm1 = vmand %vm14294_vm10, %vm14293_vm5  ;;  %v3000_v63 = vadd.f32 %v11498_v24, %v11524_v36  ;;  %vm14298_vm4 = vcmp.ne.s32.totalorder %v12001_v8, 0  ;;  %vm14299_vm5 = vcmp.lt.s32.totalorder %v12001_v8, 0  ;;  %v12100_v55 = vadd.s32 18, %v12017_v51 }
 0x2c1   : > { %v12070_v46 = vadd.f32 %v9281_v44, %v14291_v3  ;;  %v14296_v13 = vsel %vm12076_vm1, 4294967295, %v14295_v13  ;;  %v3002_v44 = vadd.f32 %v11533_v58, %v11527_v48  ;;  %vm12095_vm10 = vmand %vm14299_vm5, %vm14298_vm4  ;;  %v978_v17 = vmul.u32 18, %v977_v62 }
 0x2c2   : > { %v12089_v3 = vpop.f32.mrf.mxu0  ;;  %14302 = vst [vmem:[#allocation83_spill] sm:$0xff] %v12100_v55  ;;  %vm14303_vm2 = vcmp.ne.s32.totalorder %v12017_v51, 0  ;;  %vm14304_vm0 = vcmp.lt.s32.totalorder %v12017_v51, 0  ;;  %v14305_v24 = vmov 0  ;;  %v12111_v36 = vadd.s32 18, %v12033_v50  ;;  %v14367_v51 = vld [vmem:[#allocation8_spill] sm:$0xff] }
 0x2c3   : > { %14292 = vst [vmem:[#allocation38_spill] sm:$0xff] %v12070_v46  ;;  %14297 = vst [vmem:[#allocation82_spill] sm:$0xff] %v12089_v3  ;;  %v14300_v46 = vmov 0  ;;  %v1011_v48 = vmul.u32 18, %v1010_v11  ;;  %v12114_v58 = vmul.u32.u64.low 3817748708, %v12060_v37  ;;  %v12115_v3 = vmul.u32.u64.high 3817748708, %v12060_v37, %v12114_v58 }
 0x2c4   : > { %v14301_v46 = vsel %vm12095_vm10, 4294967295, %v14300_v46  ;;  %vm12106_vm8 = vmand %vm14304_vm0, %vm14303_vm2  ;;  %14308 = vst [vmem:[#allocation85_spill] sm:$0xff] %v12111_v36  ;;  %v9284_v61 = vpop.f32.mrf.mxu0  ;;  %vm14309_vm4 = vcmp.ne.s32.totalorder %v12033_v50, 0  ;;  %v14310_v62 = vmov 0  ;;  %v12124_v53 = vsub.s32 %v11886_v35, %v989_v23  ;;  %v14315_v58 = vld [vmem:[#allocation41_spill] sm:$0xff]  ;;  %v14339_v50 = vld [vmem:[#allocation55_spill] sm:$0xff] }
 0x2c5   : > { %v14306_v24 = vsel %vm12106_vm8, 4294967295, %v14305_v24  ;;  %vm12119_vm5 = vmand %vm1241_vm3, %vm14309_vm4  ;;  %v1000_v59 = vmul.u32 18, %v999_v2  ;;  %v12127_v20 = vmul.u32.u64.low 3817748708, %v12065_v4  ;;  %v12128_v49 = vmul.u32.u64.high 3817748708, %v12065_v4, %v12127_v20 }
 0x2c6   : > { %14307 = vst [vmem:[#allocation84_spill] sm:$0xff] %v14306_v24  ;;  %v14311_v62 = vsel %vm12119_vm5, 4294967295, %v14310_v62  ;;  %14313 = vst [vmem:[#allocation87_spill] sm:$0xff] %v12124_v53  ;;  %v12131_v11 = vadd.f32 %v11462_v21, %v2998_v25  ;;  %v12136_v56 = vadd.f32 %v9284_v61, %v14315_v58  ;;  %v12147_v35 = vadd.f32 %v11500_v27, %v3000_v63  ;;  %v12152_v20 = vpop.f32.mrf.mxu0 }
 0x2c7   : > { %14312 = vst [vmem:[#allocation86_spill] sm:$0xff] %v14311_v62  ;;  %v12150_v21 = vadd.f32 %v11535_v15, %v3002_v44  ;;  %14319 = vst [vmem:[#allocation91_spill] sm:$0xff] %v12152_v20  ;;  %v12159_v25 = vsub.s32 %v11905_v22, %v978_v17  ;;  %v3636_v61 = vadd.f32 %v11568_v57, %v11530_v42  ;;  %v1032_v63 = vshrl.u32 %v12057_v12, 4  ;;  %v12180_v57 = vpop.f32.mrf.mxu1  ;;  %v14323_v22 = vld [vmem:[#allocation44_spill] sm:$0xff] }
 0x2c8   : > { %14314 = vst [vmem:[#allocation88_spill] sm:$0xff] %v12131_v11  ;;  %14316 = vst [vmem:[#allocation41_spill] sm:$0xff] %v12136_v56  ;;  %v12168_v15 = vsub.s32 %v11910_v7, %v1011_v48  ;;  %v12173_v44 = vadd.f32 %v11548_v29, %v11561_v9  ;;  %v9287_v58 = vpop.f32.mrf.mxu0  ;;  %vm1208_vm2 = vcmp.ne.s32.totalorder %v12124_v53, 0  ;;  %vm1244_vm0 = vcmp.lt.s32.totalorder %v12124_v53, 0  ;;  %v14326_v9 = vld [vmem:[#allocation10_spill] sm:$0xff]  ;;  %v14327_v48 = vld [vmem:[#allocation48_spill] sm:$0xff] }
 0x2c9   : > { %14317 = vst [vmem:[#allocation89_spill] sm:$0xff] %v12147_v35  ;;  %14318 = vst [vmem:[#allocation90_spill] sm:$0xff] %v12150_v21  ;;  %v12178_v42 = vsub.s32 %v11926_v5, %v1000_v59  ;;  %v12183_v17 = vadd.f32 %v9287_v58, %v14323_v22  ;;  %v12186_v7 = vadd.s32 18, %v12124_v53  ;;  %v1021_v12 = vshrl.u32 %v12083_v60, 4  ;;  %v12214_v2 = vpop.f32.mrf.mxu1  ;;  %v14337_v56 = vld [vmem:[#allocation47_spill] sm:$0xff] }
 0x2ca   : > { %14320 = vst [vmem:[#allocation92_spill] sm:$0xff] %v12159_v25  ;;  %14321 = vst [vmem:[#allocation93_spill] sm:$0xff] %v12168_v15  ;;  %v12190_v29 = vadd.s32 200, %v11360_v47  ;;  %v3638_v27 = vadd.f32 %v14327_v48, %v14326_v9  ;;  %v12194_v23 = vpop.f32.mrf.mxu0  ;;  %vm1243_vm4 = vcmp.lt.s32.totalorder %v12159_v25, 0  ;;  %v12199_v59 = vadd.s32 18, %v12159_v25 }
 0x2cb   : > { %14322 = vst [vmem:[#allocation94_spill] sm:$0xff] %v12178_v42  ;;  %14324 = vst [vmem:[#allocation44_spill] sm:$0xff] %v12183_v17  ;;  %v14330_v5 = vmov 0  ;;  %vm1210_vm8 = vcmp.ne.s32.totalorder %v12168_v15, 0  ;;  %vm1246_vm10 = vcmp.lt.s32.totalorder %v12168_v15, 0  ;;  %v1033_v60 = vmul.u32 18, %v1032_v63 }
 0x2cc   : > { %14325 = vst [vmem:[#allocation95_spill] sm:$0xff] %v12186_v7  ;;  %14328 = vst [vmem:[#allocation10_spill] sm:$0xff] %v12194_v23  ;;  %v1054_v58 = vshrl.u32 %v12115_v3, 4  ;;  %v9290_v22 = vpop.f32.mrf.mxu0  ;;  %vm1209_vm1 = vcmp.ne.s32.totalorder %v12178_v42, 0  ;;  %v1043_v9 = vshrl.u32 %v12128_v49, 4  ;;  %v12212_v48 = vadd.s32 192, %v11360_v47 }
 0x2cd   : > { %14329 = vst [vmem:[#allocation48_spill] sm:$0xff] %v12199_v59  ;;  %vm12201_vm5 = vmand %vm1244_vm0, %vm1208_vm2  ;;  %v12217_v21 = vadd.f32 %v9290_v22, %v14333_v41  ;;  %v1022_v35 = vmul.u32 18, %v1021_v12  ;;  %v12220_v63 = vmul.u32.u64.low 3817748708, %v12190_v29  ;;  %v12221_v11 = vmul.u32.u64.high 3817748708, %v12190_v29, %v12220_v63  ;;  %v14335_v3 = vld [vmem:[#allocation18_spill] sm:$0xff]  ;;  %v14336_v23 = vld [vmem:[#allocation19_spill] sm:$0xff] }
 0x2ce   : > { %v14331_v5 = vsel %vm12201_vm5, 4294967295, %v14330_v5  ;;  %v12224_v17 = vadd.f32 %v14335_v3, %v3636_v61  ;;  %v12228_v20 = vadd.f32 %v14337_v56, %v14336_v23  ;;  %v14338_v49 = vld [vmem:[#allocation14_spill] sm:$0xff]  ;;  %v12232_v62 = vpop.f32.mrf.mxu0  ;;  %vm14341_vm2 = vcmp.ne.s32.totalorder %v12159_v25, 0  ;;  %v14345_v56 = vld [vmem:[#allocation15_spill] sm:$0xff]  ;;  %vm12252_vm3 = vmand %vm1246_vm10, %vm1210_vm8 }
 0x2cf   : > { %14332 = vst [vmem:[#allocation96_spill] sm:$0xff] %v14331_v5  ;;  %14334 = vst [vmem:[#allocation45_spill] sm:$0xff] %v12217_v21  ;;  %v3640_v36 = vadd.f32 %v14339_v50, %v14338_v49  ;;  %v14342_v61 = vmov 0  ;;  %v3642_v23 = vadd.f32 %v11717_v40, %v14345_v56  ;;  %v14346_v50 = vmov 0  ;;  %v14357_v7 = vld [vmem:[#allocation7_spill] sm:$0xff]  ;;  %v14406_v25 = vld [vmem:[#allocation29_spill] sm:$0xff] }
 0x2d0   : > { %14340 = vst [vmem:[#allocation18_spill] sm:$0xff] %v12232_v62  ;;  %vm12242_vm0 = vmand %vm1243_vm4, %vm14341_vm2  ;;  %v14347_v50 = vsel %vm12252_vm3, 4294967295, %v14346_v50  ;;  %v12257_v12 = vadd.s32 18, %v12168_v15  ;;  %v12260_v22 = vadd.s32 18, %v12178_v42  ;;  %v1055_v63 = vmul.u32 18, %v1054_v58  ;;  %v9293_v3 = vpop.f32.mrf.mxu0  ;;  %v14356_v62 = vld [vmem:[#allocation51_spill] sm:$0xff]  ;;  %v12280_v58 = vpop.f32.mrf.mxu1 }
 0x2d1   : > { %v14343_v61 = vsel %vm12242_vm0, 4294967295, %v14342_v61  ;;  %14348 = vst [vmem:[#allocation47_spill] sm:$0xff] %v14347_v50  ;;  %vm14351_vm4 = vcmp.lt.s32.totalorder %v12178_v42, 0  ;;  %v14352_v40 = vmov 0  ;;  %v12271_v49 = vsub.s32 %v12026_v28, %v1033_v60  ;;  %v14360_v60 = vld [vmem:[#allocation21_spill] sm:$0xff] }
 0x2d2   : > { %14344 = vst [vmem:[#allocation19_spill] sm:$0xff] %v14343_v61  ;;  %14349 = vst [vmem:[#allocation14_spill] sm:$0xff] %v12257_v12  ;;  %v1044_v56 = vmul.u32 18, %v1043_v9  ;;  %v12274_v41 = vmul.u32.u64.low 3817748708, %v12212_v48  ;;  %v12275_v21 = vmul.u32.u64.high 3817748708, %v12212_v48, %v12274_v41  ;;  %v12278_v53 = vadd.f32 %v14356_v62, %v3638_v27  ;;  %v14395_v12 = vld [vmem:[#allocation11_spill] sm:$0xff] }
 0x2d3   : > { %14350 = vst [vmem:[#allocation55_spill] sm:$0xff] %v12260_v22  ;;  %vm12266_vm2 = vmand %vm14351_vm4, %vm1209_vm1  ;;  %v12283_v5 = vadd.f32 %v9293_v3, %v14357_v7  ;;  %v12290_v28 = vsub.s32 %v12044_v33, %v1022_v35  ;;  %v12294_v9 = vadd.f32 %v11701_v16, %v14360_v60  ;;  %v12297_v62 = vadd.f32 %v11742_v0, %v3640_v36  ;;  %v12303_v7 = vpop.f32.mrf.mxu0  ;;  %v14364_v33 = vld [vmem:[#allocation61_spill] sm:$0xff]  ;;  %v14365_v35 = vld [vmem:[#allocation23_spill] sm:$0xff]  ;;  %v12332_v16 = vpop.f32.mrf.mxu1 }
 0x2d4   : > { %v14353_v40 = vsel %vm12266_vm2, 4294967295, %v14352_v40  ;;  %14355 = vst [vmem:[#allocation97_spill] sm:$0xff] %v12271_v49  ;;  %v12301_v27 = vadd.f32 %v11789_v31, %v11704_v6  ;;  %14361 = vst [vmem:[#allocation21_spill] sm:$0xff] %v12303_v7  ;;  %v12306_v41 = vadd.s32 216, %v11360_v47  ;;  %v12309_v3 = vadd.f32 %v11850_v32, %v3642_v23  ;;  %v14363_v31 = vld [vmem:[#allocation16_spill] sm:$0xff]  ;;  %v14407_v59 = vld [vmem:[#allocation73_spill] sm:$0xff] }
 0x2d5   : > { %14354 = vst [vmem:[#allocation15_spill] sm:$0xff] %v14353_v40  ;;  %14358 = vst [vmem:[#allocation51_spill] sm:$0xff] %v12283_v5  ;;  %v12320_v6 = vsub.s32 %v12060_v37, %v1055_v63  ;;  %v3644_v36 = vadd.f32 %v14364_v33, %v14363_v31  ;;  %v12326_v32 = vadd.f32 %v11890_v39, %v14365_v35  ;;  %v9296_v23 = vpop.f32.mrf.mxu0  ;;  %vm1248_vm1 = vcmp.lt.s32.totalorder %v12271_v49, 0  ;;  %v14372_v33 = vld [vmem:[#allocation66_spill] sm:$0xff] }
 0x2d6   : > { %14359 = vst [vmem:[#allocation7_spill] sm:$0xff] %v12290_v28  ;;  %v12330_v60 = vsub.s32 %v12065_v4, %v1044_v56  ;;  %v12335_v0 = vadd.f32 %v9296_v23, %v14367_v51  ;;  %v1076_v37 = vshrl.u32 %v12221_v11, 4  ;;  %v12348_v4 = vadd.s32 208, %v11360_v47  ;;  %v14371_v11 = vld [vmem:[#allocation24_spill] sm:$0xff] }
 0x2d7   : > { %14362 = vst [vmem:[#allocation98_spill] sm:$0xff] %v12320_v6  ;;  %v12340_v63 = vpop.f32.mrf.mxu0  ;;  %v12344_v39 = vmul.u32.u64.low 3817748708, %v12306_v41  ;;  %v12345_v31 = vmul.u32.u64.high 3817748708, %v12306_v41, %v12344_v39  ;;  %v12351_v51 = vadd.s32 18, %v12271_v49  ;;  %v12354_v56 = vadd.s32 18, %v12290_v28 }
 0x2d8   : > { %14366 = vst [vmem:[#allocation16_spill] sm:$0xff] %v12330_v60  ;;  %14368 = vst [vmem:[#allocation61_spill] sm:$0xff] %v12335_v0  ;;  %v3646_v35 = vadd.f32 %v14372_v33, %v14371_v11  ;;  %v14374_v39 = vld [vmem:[#allocation20_spill] sm:$0xff]  ;;  %vm14379_vm2 = vcmp.ne.s32.totalorder %v12271_v49, 0  ;;  %v14380_v42 = vmov 0  ;;  %v1065_v11 = vshrl.u32 %v12275_v21, 4 }
 0x2d9   : > { %14369 = vst [vmem:[#allocation23_spill] sm:$0xff] %v12340_v63  ;;  %14370 = vst [vmem:[#allocation8_spill] sm:$0xff] %v12351_v51  ;;  %v9299_v23 = vpop.f32.mrf.mxu0  ;;  %v14375_v63 = vld [vmem:[#allocation9_spill] sm:$0xff]  ;;  %v14383_v0 = vld [vmem:[#allocation27_spill] sm:$0xff]  ;;  %v14388_v22 = vmov 0  ;;  %v12394_v40 = vadd.s32 18, %v12320_v6  ;;  %v3650_v61 = vadd.f32 %v14407_v59, %v14406_v25 }
 0x2da   : > { %v14376_v5 = vsel %vm11617_vm9, %v14374_v39, %v14375_v63  ;;  %vm12371_vm3 = vmand %vm1248_vm1, %vm14379_vm2  ;;  %v3648_v33 = vadd.f32 %v11862_v34, %v14383_v0  ;;  %v12380_v63 = vpop.f32.mrf.mxu1  ;;  %vm14386_vm9 = vcmp.ne.s32.totalorder %v12290_v28, 0  ;;  %vm14387_vm2 = vcmp.lt.s32.totalorder %v12290_v28, 0  ;;  %v14394_v0 = vld [vmem:[#allocation46_spill] sm:$0xff]  ;;  %v14415_v49 = vld [vmem:[#allocation49_spill] sm:$0xff] }
 0x2db   : > { %vm12365_vm4 = vcmp.lt.s32.totalorder %v14376_v5, 16  ;;  %v14381_v42 = vsel %vm12371_vm3, 4294967295, %v14380_v42  ;;  %v14384_v5 = vld [vmem:[#allocation12_spill] sm:$0xff]  ;;  %vm12389_vm1 = vmand %vm14387_vm2, %vm14386_vm9  ;;  %14391 = vst [vmem:[#allocation20_spill] sm:$0xff] %v12394_v40  ;;  %v1077_v21 = vmul.u32 18, %v1076_v37  ;;  %v12396_v15 = vpop.f32.mrf.mxu0  ;;  %vm14399_vm9 = vcmp.ne.s32.totalorder %v12320_v6, 0 }
 0x2dc   : > { %14382 = vst [vmem:[#allocation24_spill] sm:$0xff] %v14381_v42  ;;  %v12383_v39 = vadd.f32 %v9299_v23, %v14384_v5  ;;  %v14389_v22 = vsel %vm12389_vm1, 4294967295, %v14388_v22  ;;  %14392 = vst [vmem:[#allocation9_spill] sm:$0xff] %v12396_v15  ;;  %v14396_v23 = vsel %vm11632_vm12, %v14394_v0, %v14395_v12  ;;  %vm14400_vm2 = vcmp.lt.s32.totalorder %v12320_v6, 0  ;;  %v14416_v51 = vld [vmem:[#allocation13_spill] sm:$0xff]  ;;  %v14431_v6 = vld [vmem:[#allocation58_spill] sm:$0xff] }
 0x2dd   : > { %14390 = vst [vmem:[#allocation50_spill] sm:$0xff] %v14389_v22  ;;  %vm12403_vm10 = vcmp.lt.s32.totalorder %v14396_v23, 16  ;;  %vm12411_vm8 = vmand %vm14400_vm2, %vm14399_vm9  ;;  %v12416_v37 = vadd.s32 18, %v12330_v60  ;;  %v12419_v34 = vmul.u32.u64.low 3817748708, %v12348_v4  ;;  %v12420_v15 = vmul.u32.u64.high 3817748708, %v12348_v4, %v12419_v34  ;;  %v14405_v23 = vld [vmem:[#allocation25_spill] sm:$0xff]  ;;  %v9420_v59 = vpop.f32.mrf.mxu0 }
 0x2de   : > { %14385 = vst [vmem:[#allocation66_spill] sm:$0xff] %v12383_v39  ;;  %v14401_v39 = vmov 0  ;;  %v12423_v12 = vadd.s32 232, %v11360_v47  ;;  %v12426_v0 = vadd.f32 %v11930_v14, %v3644_v36  ;;  %v12430_v50 = vadd.f32 %v11991_v52, %v14405_v23  ;;  %v6210_v14 = vld [vmem:[#allocation5 + $0x2f8] sm:$0xff]  ;;  %v14413_v36 = vld [vmem:[#allocation28_spill] sm:$0xff] }
 0x2df   : > { %v14402_v39 = vsel %vm12411_vm8, 4294967295, %v14401_v39  ;;  %14404 = vst [vmem:[#allocation12_spill] sm:$0xff] %v12416_v37  ;;  %vm14408_vm12 = vcmp.ne.s32.totalorder %v12330_v60, 0  ;;  %vm14409_vm9 = vcmp.lt.s32.totalorder %v12330_v60, 0  ;;  %v14410_v34 = vmov 0  ;;  %9902 = vmatprep.subr.mxu0 %v6210_v14  ;;  %v14422_v14 = vld [vmem:[#allocation17_spill] sm:$0xff] }
 0x2e0   : > { %14403 = vst [vmem:[#allocation27_spill] sm:$0xff] %v14402_v39  ;;  %vm12442_vm2 = vmand %vm14409_vm9, %vm14408_vm12  ;;  %v12447_v52 = vadd.f32 %v12036_v19, %v3646_v35  ;;  %v12451_v25 = vadd.f32 %v12067_v38, %v14413_v36  ;;  %v12453_v23 = vld [vmem:[#allocation6] ss:$0 sm:$0xff]  ;;  %v14417_v42 = vsel %vm11650_vm13, %v14415_v49, %v14416_v51  ;;  %v1066_v35 = vmul.u32 18, %v1065_v11  ;;  %v12471_v36 = vpop.f32.mrf.mxu1  ;;  %v4125_v51 = vpop.f32.mrf.mxu0  ;;  %v14421_v11 = vld [vmem:[#allocation53_spill] sm:$0xff] }
 0x2e1   : > { %v14411_v34 = vsel %vm12442_vm2, 4294967295, %v14410_v34  ;;  %vm12460_vm12 = vcmp.lt.s32.totalorder %v14417_v42, 16  ;;  %v12469_v38 = vadd.f32 %v12133_v10, %v3648_v33  ;;  %v4305_v55 = vadd.f32 %v9420_v59, %v12173_v44  ;;  %v14426_v59 = vld [vmem:[#allocation39_spill] sm:$0xff]  ;;  %v14427_v42 = vld [vmem:[#allocation69_spill] sm:$0xff]  ;;  %v14429_v60 = vld [vmem:[#allocation42_spill] sm:$0xff] }
 0x2e2   : > { %14412 = vst [vmem:[#allocation26_spill] sm:$0xff] %v14411_v34  ;;  %v12479_v49 = vsub.s32 %v12190_v29, %v1077_v21  ;;  %v14423_v19 = vsel %vm11672_vm14, %v14421_v11, %v14422_v14  ;;  %v1098_v33 = vshrl.u32 %v12345_v31, 4  ;;  %v12501_v22 = vadd.f32 %v12180_v57, %v14426_v59  ;;  %v14428_v34 = vld [vmem:[#allocation75_spill] sm:$0xff]  ;;  %v9423_v37 = vpop.f32.mrf.mxu0  ;;  %v14432_v57 = vld [vmem:[#allocation54_spill] sm:$0xff] }
 0x2e3   : > { %vm12486_vm13 = vcmp.lt.s32.totalorder %v14423_v19, 16  ;;  %v12496_v29 = vmul.u32.u64.low 3817748708, %v12423_v12  ;;  %v12497_v21 = vmul.u32.u64.high 3817748708, %v12423_v12, %v12496_v29  ;;  %v12504_v19 = vadd.f32 %v12214_v2, %v3650_v61  ;;  %v14444_v40 = vld [vmem:[#allocation22_spill] sm:$0xff] }
 0x2e4   : > { %v4346_v11 = vadd.f32 %v12453_v23, %v4305_v55  ;;  %v4304_v14 = vadd.f32 %v4125_v51, %v12224_v17  ;;  %v3652_v44 = vadd.f32 %v14428_v34, %v14427_v42  ;;  %v12512_v31 = vadd.f32 %v12280_v58, %v14429_v60  ;;  %v12529_v34 = vpop.f32.mrf.mxu1  ;;  %v14437_v51 = vld [vmem:[#allocation59_spill] sm:$0xff]  ;;  %v14438_v29 = vld [vmem:[#allocation57_spill] sm:$0xff] }
 0x2e5   : > { %v14433_v59 = vsel %vm11767_vm6, %v14431_v6, %v14432_v57  ;;  %v12524_v61 = vsub.s32 %v12212_v48, %v1066_v35  ;;  %v12527_v17 = vadd.s32 224, %v11360_v47  ;;  %v4307_v55 = vadd.f32 %v9423_v37, %v12228_v20  ;;  %v4135_v6 = vpop.f32.mrf.mxu0 }
 0x2e6   : > { %vm12519_vm14 = vcmp.lt.s32.totalorder %v14433_v59, 16  ;;  %v4382_v58 = vmax.f32 %v4346_v11, 0.0  ;;  %v4345_v60 = vadd.f32 %v12453_v23, %v4304_v14  ;;  %vm1216_vm9 = vcmp.ne.s32.totalorder %v12479_v49, 0 }
 0x2e7   : > { %v14439_v57 = vsel %vm11780_vm7, %v14437_v51, %v14438_v29  ;;  %v12545_v35 = vadd.s32 18, %v12479_v49  ;;  %v1099_v11 = vmul.u32 18, %v1098_v33  ;;  %v1087_v20 = vshrl.u32 %v12420_v15, 4  ;;  %v9426_v51 = vpop.f32.mrf.mxu0 }
 0x2e8   : > { %vm12539_vm6 = vcmp.lt.s32.totalorder %v14439_v57, 16  ;;  %v4490_v37 = vsel %vm12365_vm4, %v4382_v58, 0.0  ;;  %v4381_v14 = vmax.f32 %v4345_v60, 0.0  ;;  %v4348_v59 = vadd.f32 %v12453_v23, %v4307_v55  ;;  %v14443_v57 = vld [vmem:[#allocation62_spill] sm:$0xff] }
 0x2e9   : > { %v4306_v42 = vadd.f32 %v4135_v6, %v12278_v53  ;;  %4526 = vst [vmem:[#allocation3 + $0x20] sm:$0xff] %v4490_v37  ;;  %v14445_v39 = vsel %vm11807_vm11, %v14443_v57, %v14444_v40  ;;  %vm1251_vm4 = vcmp.lt.s32.totalorder %v12524_v61, 0  ;;  %v12567_v53 = vpop.f32.mrf.mxu1  ;;  %vm14448_vm11 = vcmp.lt.s32.totalorder %v12479_v49, 0  ;;  %v14451_v6 = vld [vmem:[#allocation32_spill] sm:$0xff]  ;;  %v4145_v37 = vpop.f32.mrf.mxu0 }
 0x2ea   : > { %vm12557_vm7 = vcmp.lt.s32.totalorder %v14445_v39, 16  ;;  %v12564_v15 = vmul.u32.u64.low 3817748708, %v12527_v17  ;;  %v12565_v7 = vmul.u32.u64.high 3817748708, %v12527_v17, %v12564_v15  ;;  %v4489_v33 = vsel %vm12403_vm10, %v4381_v14, 0.0  ;;  %vm12577_vm2 = vmand %vm14448_vm11, %vm1216_vm9 }
 0x2eb   : > { %v4384_v58 = vmax.f32 %v4348_v59, 0.0  ;;  %v4347_v40 = vadd.f32 %v12453_v23, %v4306_v42  ;;  %v4309_v39 = vadd.f32 %v9426_v51, %v12294_v9  ;;  %v12582_v55 = vadd.f32 %v12332_v16, %v3652_v44  ;;  %4525 = vst [vmem:[#allocation3 + $0x18] sm:$0xff] %v4489_v33  ;;  %v14453_v59 = vld [vmem:[#allocation65_spill] sm:$0xff]  ;;  %v14454_v9 = vld [vmem:[#allocation60_spill] sm:$0xff]  ;;  %v9429_v24 = vpop.f32.mrf.mxu0 }
 0x2ec   : > { %v3654_v5 = vadd.f32 %v12006_v54, %v14451_v6  ;;  %v14455_v42 = vsel %vm11833_vm15, %v14453_v59, %v14454_v9  ;;  %v12596_v29 = vadd.s32 18, %v12524_v61  ;;  %v1120_v16 = vshrl.u32 %v12497_v21, 4  ;;  %v14462_v21 = vld [vmem:[#allocation68_spill] sm:$0xff] }
 0x2ed   : > { %vm12591_vm10 = vcmp.lt.s32.totalorder %v14455_v42, 16  ;;  %v4492_v44 = vsel %vm12460_vm12, %v4384_v58, 0.0  ;;  %v4383_v54 = vmax.f32 %v4347_v40, 0.0  ;;  %v4350_v57 = vadd.f32 %v12453_v23, %v4309_v39  ;;  %v4155_v9 = vpop.f32.mrf.mxu0  ;;  %v14466_v42 = vld [vmem:[#allocation31_spill] sm:$0xff] }
 0x2ee   : > { %v4308_v15 = vadd.f32 %v4145_v37, %v12297_v62  ;;  %vm14458_vm9 = vcmp.ne.s32.totalorder %v12524_v61, 0  ;;  %v14459_v33 = vmov 0  ;;  %v12613_v6 = vadd.f32 %v12380_v63, %v11994_v43  ;;  %4528 = vst [vmem:[#allocation3 + $0x30] sm:$0xff] %v4492_v44  ;;  %v12631_v63 = vpop.f32.mrf.mxu1  ;;  %v14504_v62 = vld [vmem:[#allocation83_spill] sm:$0xff] }
 0x2ef   : > { %vm12607_vm15 = vmand %vm1251_vm4, %vm14458_vm9  ;;  %vm14461_vm12 = vnez %v14262_v30  ;;  %v1360_v40 = vsel %vm12577_vm2, %v12545_v35, %v12479_v49  ;;  %v12629_v39 = vsub.s32 %v12306_v41, %v1099_v11  ;;  %v1088_v43 = vmul.u32 18, %v1087_v20  ;;  %v14468_v41 = vld [vmem:[#allocation30_spill] sm:$0xff]  ;;  %v14469_v11 = vld [vmem:[#allocation36_spill] sm:$0xff] }
 0x2f0   : > { %v14460_v33 = vsel %vm12607_vm15, 4294967295, %v14459_v33  ;;  %v14463_v58 = vsel %vm14461_vm12, %v11874_v1, %v14462_v21  ;;  %v4491_v30 = vsel %vm12486_vm13, %v4383_v54, 0.0  ;;  %v4386_v37 = vmax.f32 %v4350_v57, 0.0  ;;  %v14473_v21 = vld [vmem:[#allocation76_spill] sm:$0xff] }
 0x2f1   : > { %vm12620_vm11 = vcmp.lt.s32.totalorder %v14463_v58, 16  ;;  %v4349_v1 = vadd.f32 %v12453_v23, %v4308_v15  ;;  %v4311_v14 = vadd.f32 %v9429_v24, %v12301_v27  ;;  %v12638_v59 = vadd.f32 %v12471_v36, %v3654_v5  ;;  %4527 = vst [vmem:[#allocation3 + $0x28] sm:$0xff] %v4491_v30  ;;  %v9432_v24 = vpop.f32.mrf.mxu0  ;;  %v14475_v58 = vld [vmem:[#allocation74_spill] sm:$0xff]  ;;  %v14476_v30 = vld [vmem:[#allocation71_spill] sm:$0xff] }
 0x2f2   : > { %vm14467_vm4 = vnez %v14466_v42  ;;  %v1121_v27 = vmul.u32 18, %v1120_v16  ;;  %v12654_v36 = vadd.s32 248, %v11360_v47  ;;  %v4494_v5 = vsel %vm12519_vm14, %v4386_v37, 0.0  ;;  %v12675_v37 = vpop.f32.mrf.mxu1  ;;  %v4564_v48 = vld [vmem:[#allocation3 + $0x1d] sm:$0xff]  ;;  %v14552_v16 = vld [vmem:[#allocation94_spill] sm:$0xff] }
 0x2f3   : > { %v14470_v20 = vsel %vm14467_vm4, %v14468_v41, %v14469_v11  ;;  %v4385_v54 = vmax.f32 %v4349_v1, 0.0  ;;  %v4352_v57 = vadd.f32 %v12453_v23, %v4311_v14  ;;  %v4310_v15 = vadd.f32 %v4155_v9, %v12309_v3  ;;  %4530 = vst [vmem:[#allocation3 + $0x40] sm:$0xff] %v4494_v5  ;;  %v4615_v11 = vld [vmem:[#allocation3 + $0x16] sm:$0xff]  ;;  %v4616_v5 = vld [vmem:[#allocation3 + $0x1e] sm:$0xff] }
 0x2f4   : > { %vm12645_vm9 = vcmp.lt.s32.totalorder %v14470_v20, 16  ;;  %vm14474_vm13 = vnez %v14473_v21  ;;  %v12672_v2 = vsub.s32 %v12348_v4, %v1088_v43  ;;  %v1109_v3 = vshrl.u32 %v12565_v7, 4  ;;  %v4563_v20 = vld [vmem:[#allocation3 + $0x15] sm:$0xff]  ;;  %v14480_v21 = vld [vmem:[#allocation34_spill] sm:$0xff]  ;;  %v4165_v7 = vpop.f32.mrf.mxu0  ;;  %9507 = vmatprep.mubr.f32.mxu1 %v4615_v11 }
 0x2f5   : > { %v14477_v42 = vsel %vm14474_vm13, %v14475_v58, %v14476_v30  ;;  %v4493_v1 = vsel %vm12539_vm6, %v4385_v54, 0.0  ;;  %v4388_v14 = vmax.f32 %v4352_v57, 0.0  ;;  %v4351_v9 = vadd.f32 %v12453_v23, %v4310_v15  ;;  %v14481_v58 = vld [vmem:[#allocation81_spill] sm:$0xff]  ;;  %v14482_v4 = vld [vmem:[#allocation35_spill] sm:$0xff]  ;;  %9593 = vmatprep.mubr.f32.mxu0 %v4563_v20  ;;  %v14483_v54 = vld [vmem:[#allocation78_spill] sm:$0xff]  ;;  %9508 = vmatmul.mubr.f32.gmra.mxu1 %v4616_v5 }
 0x2f6   : > { %vm12665_vm12 = vcmp.lt.s32.totalorder %v14477_v42, 16  ;;  %v4313_v41 = vadd.f32 %v9432_v24, %v12326_v32  ;;  %v3656_v30 = vadd.f32 %v14481_v58, %v14480_v21  ;;  %v12685_v43 = vadd.f32 %v12529_v34, %v14482_v4  ;;  %4529 = vst [vmem:[#allocation3 + $0x38] sm:$0xff] %v4493_v1  ;;  %v14485_v57 = vld [vmem:[#allocation77_spill] sm:$0xff]  ;;  %v14486_v15 = vld [vmem:[#allocation72_spill] sm:$0xff]  ;;  %9594 = vmatmul.mubr.f32.gmra.mxu0 %v4564_v48  ;;  %v9435_v58 = vpop.f32.mrf.mxu0 }
 0x2f7   : > { %vm14484_vm6 = vnez %v14483_v54  ;;  %v12697_v42 = vadd.s32 18, %v12629_v39  ;;  %v12700_v34 = vsub.s32 %v12423_v12, %v1121_v27  ;;  %v4496_v1 = vsel %vm12557_vm7, %v4388_v14, 0.0  ;;  %v12720_v27 = vpop.f32.mrf.mxu1 }
 0x2f8   : > { %v14487_v32 = vsel %vm14484_vm6, %v14485_v57, %v14486_v15  ;;  %v4387_v11 = vmax.f32 %v4351_v9, 0.0  ;;  %v4354_v20 = vadd.f32 %v12453_v23, %v4313_v41  ;;  %v4312_v21 = vadd.f32 %v4165_v7, %v12426_v0  ;;  %4532 = vst [vmem:[#allocation3 + $0x50] sm:$0xff] %v4496_v1  ;;  %v4617_v9 = vld [vmem:[#allocation3 + $0x26] sm:$0xff]  ;;  %v4618_v5 = vld [vmem:[#allocation3 + $0x2e] sm:$0xff]  ;;  %v4175_v7 = vpop.f32.mrf.mxu0 }
 0x2f9   : > { %vm12692_vm13 = vcmp.lt.s32.totalorder %v14487_v32, 16  ;;  %vm14490_vm6 = vnez %v14296_v13  ;;  %v1110_v28 = vmul.u32 18, %v1109_v3  ;;  %v12718_v0 = vadd.s32 240, %v11360_v47  ;;  %v4565_v41 = vld [vmem:[#allocation3 + $0x25] sm:$0xff]  ;;  %9510 = vmatprep.mubr.f32.mxu1 %v4617_v9  ;;  %v4566_v3 = vld [vmem:[#allocation3 + $0x2d] sm:$0xff] }
 0x2fa   : > { %v14491_v4 = vsel %vm14490_vm6, %v12030_v45, %v11974_v26  ;;  %v4495_v13 = vsel %vm12591_vm10, %v4387_v11, 0.0  ;;  %v4390_v14 = vmax.f32 %v4354_v20, 0.0  ;;  %v4353_v26 = vadd.f32 %v12453_v23, %v4312_v21  ;;  %9596 = vmatprep.mubr.f32.mxu0 %v4565_v41  ;;  %9511 = vmatmul.mubr.f32.gmra.mxu1 %v4618_v5  ;;  %v9438_v1 = vpop.f32.mrf.mxu0  ;;  %v14502_v11 = vld [vmem:[#allocation84_spill] sm:$0xff]  ;;  %v14505_v20 = vld [vmem:[#allocation43_spill] sm:$0xff] }
 0x2fb   : > { %vm12711_vm14 = vcmp.lt.s32.totalorder %v14491_v4, 16  ;;  %v4315_v45 = vadd.f32 %v9435_v58, %v12430_v50  ;;  %4531 = vst [vmem:[#allocation3 + $0x48] sm:$0xff] %v4495_v13  ;;  %vm14494_vm6 = vnez %v14301_v46  ;;  %v12736_v54 = vadd.s32 18, %v12672_v2  ;;  %9597 = vmatmul.mubr.f32.gmra.mxu0 %v4566_v3 }
 0x2fc   : > { %v14495_v48 = vsel %vm14494_vm6, %v12049_v18, %v12001_v8  ;;  %v12740_v50 = vmul.u32.u64.low 3817748708, %v12654_v36  ;;  %v12741_v57 = vmul.u32.u64.high 3817748708, %v12654_v36, %v12740_v50  ;;  %v4498_v15 = vsel %vm12620_vm11, %v4390_v14, 0.0 }
 0x2fd   : > { %vm12731_vm4 = vcmp.lt.s32.totalorder %v14495_v48, 16  ;;  %v4389_v46 = vmax.f32 %v4353_v26, 0.0  ;;  %v4356_v32 = vadd.f32 %v12453_v23, %v4315_v45  ;;  %v4314_v8 = vadd.f32 %v4175_v7, %v12447_v52  ;;  %4534 = vst [vmem:[#allocation3 + $0x60] sm:$0xff] %v4498_v15  ;;  %v12780_v26 = vpop.f32.mrf.mxu1  ;;  %v4619_v7 = vld [vmem:[#allocation3 + $0x36] sm:$0xff]  ;;  %v4620_v48 = vld [vmem:[#allocation3 + $0x3e] sm:$0xff]  ;;  %v14514_v50 = vld [vmem:[#allocation82_spill] sm:$0xff] }
 0x2fe   : > { %vm14498_vm6 = vcmp.ne.s32.totalorder %v12629_v39, 0  ;;  %vm14499_vm7 = vcmp.lt.s32.totalorder %v12629_v39, 0  ;;  %vm14503_vm10 = vnez %v14502_v11  ;;  %vm14509_vm2 = vcmp.ne.s32.totalorder %v12672_v2, 0  ;;  %v4567_v3 = vld [vmem:[#allocation3 + $0x35] sm:$0xff]  ;;  %v4185_v11 = vpop.f32.mrf.mxu0  ;;  %9513 = vmatprep.mubr.f32.mxu1 %v4619_v7  ;;  %v4568_v44 = vld [vmem:[#allocation3 + $0x3d] sm:$0xff] }
 0x2ff   : > { %vm12751_vm15 = vmand %vm14499_vm7, %vm14498_vm6  ;;  %v14506_v21 = vsel %vm14503_vm10, %v14504_v62, %v14505_v20  ;;  %vm14510_vm8 = vcmp.lt.s32.totalorder %v12672_v2, 0  ;;  %vm1256_vm7 = vcmp.lt.s32.totalorder %v12700_v34, 0  ;;  %v12774_v4 = vsub.s32 %v12527_v17, %v1110_v28  ;;  %v14513_v28 = vld [vmem:[#allocation37_spill] sm:$0xff]  ;;  %9599 = vmatprep.mubr.f32.mxu0 %v4567_v3  ;;  %9514 = vmatmul.mubr.f32.gmra.mxu1 %v4620_v48  ;;  %v14523_v7 = vld [vmem:[#allocation95_spill] sm:$0xff] }
 0x300   : > { %vm12760_vm11 = vcmp.lt.s32.totalorder %v14506_v21, 16  ;;  %vm12768_vm1 = vmand %vm14510_vm8, %vm14509_vm2  ;;  %v12777_v13 = vmul.u32.u64.low 3817748708, %v12718_v0  ;;  %v12778_v14 = vmul.u32.u64.high 3817748708, %v12718_v0, %v12777_v13  ;;  %v4497_v45 = vsel %vm12645_vm9, %v4389_v46, 0.0  ;;  %v14515_v46 = vld [vmem:[#allocation86_spill] sm:$0xff]  ;;  %9600 = vmatmul.mubr.f32.gmra.mxu0 %v4568_v44  ;;  %v14524_v3 = vld [vmem:[#allocation87_spill] sm:$0xff] }
 0x301   : > { %v4392_v9 = vmax.f32 %v4356_v32, 0.0  ;;  %v4355_v41 = vadd.f32 %v12453_v23, %v4314_v8  ;;  %v4317_v5 = vadd.f32 %v9438_v1, %v12451_v25  ;;  %v12787_v17 = vadd.f32 %v12567_v53, %v3656_v30  ;;  %4533 = vst [vmem:[#allocation3 + $0x58] sm:$0xff] %v4497_v45  ;;  %v14517_v32 = vld [vmem:[#allocation85_spill] sm:$0xff]  ;;  %v14518_v8 = vld [vmem:[#allocation80_spill] sm:$0xff]  ;;  %v9441_v13 = vpop.f32.mrf.mxu0  ;;  %v14565_v25 = vld [vmem:[#allocation7_spill] sm:$0xff] }
 0x302   : > { %v3658_v15 = vadd.f32 %v14514_v50, %v14513_v28  ;;  %vm14516_vm8 = vnez %v14515_v46  ;;  %v4316_v21 = vadd.f32 %v4185_v11, %v12469_v38  ;;  %v14525_v28 = vsel %vm12201_vm5, %v14523_v7, %v14524_v3  ;;  %v4621_v46 = vld [vmem:[#allocation3 + $0x46] sm:$0xff] }
 0x303   : > { %v14519_v62 = vsel %vm14516_vm8, %v14517_v32, %v14518_v8  ;;  %v4500_v30 = vsel %vm12665_vm12, %v4392_v9, 0.0  ;;  %v4391_v1 = vmax.f32 %v4355_v41, 0.0  ;;  %v4358_v20 = vadd.f32 %v12453_v23, %v4317_v5  ;;  %v12834_v41 = vpop.f32.mrf.mxu1  ;;  %v4569_v32 = vld [vmem:[#allocation3 + $0x45] sm:$0xff]  ;;  %v4622_v8 = vld [vmem:[#allocation3 + $0x4e] sm:$0xff]  ;;  %v4195_v7 = vpop.f32.mrf.mxu0  ;;  %9516 = vmatprep.mubr.f32.mxu1 %v4621_v46  ;;  %v14538_v46 = vld [vmem:[#allocation40_spill] sm:$0xff] }
 0x304   : > { %vm12796_vm2 = vcmp.lt.s32.totalorder %v14519_v62, 16  ;;  %4536 = vst [vmem:[#allocation3 + $0x70] sm:$0xff] %v4500_v30  ;;  %vm12813_vm9 = vcmp.lt.s32.totalorder %v14525_v28, 16  ;;  %vm14528_vm12 = vcmp.ne.s32.totalorder %v12700_v34, 0  ;;  %v12830_v9 = vadd.s32 18, %v12700_v34  ;;  %v14531_v62 = vld [vmem:[#allocation38_spill] sm:$0xff]  ;;  %9602 = vmatprep.mubr.f32.mxu0 %v4569_v32  ;;  %9517 = vmatmul.mubr.f32.gmra.mxu1 %v4622_v8 }
 0x305   : > { %vm12825_vm10 = vmand %vm1256_vm7, %vm14528_vm12  ;;  %vm1219_vm5 = vcmp.ne.s32.totalorder %v12774_v4, 0  ;;  %vm1255_vm6 = vcmp.lt.s32.totalorder %v12774_v4, 0  ;;  %v4499_v5 = vsel %vm12692_vm13, %v4391_v1, 0.0  ;;  %v4394_v48 = vmax.f32 %v4358_v20, 0.0  ;;  %v4570_v24 = vld [vmem:[#allocation3 + $0x4d] sm:$0xff]  ;;  %v14533_v20 = vld [vmem:[#allocation48_spill] sm:$0xff]  ;;  %v9444_v1 = vpop.f32.mrf.mxu0  ;;  %v12891_v8 = vpop.f32.mrf.mxu1 }
 0x306   : > { %v4357_v11 = vadd.f32 %v12453_v23, %v4316_v21  ;;  %v4319_v44 = vadd.f32 %v9441_v13, %v12501_v22  ;;  %v12842_v30 = vadd.f32 %v12631_v63, %v14531_v62  ;;  %v12845_v45 = vadd.f32 %v12675_v37, %v3658_v15  ;;  %4535 = vst [vmem:[#allocation3 + $0x68] sm:$0xff] %v4499_v5  ;;  %v14534_v21 = vld [vmem:[#allocation92_spill] sm:$0xff]  ;;  %v14539_v32 = vld [vmem:[#allocation91_spill] sm:$0xff] }
 0x307   : > { %v14535_v22 = vsel %vm12242_vm0, %v14533_v20, %v14534_v21  ;;  %v1142_v63 = vshrl.u32 %v12741_v57, 4  ;;  %v12858_v3 = vadd.s32 264, %v11360_v47  ;;  %v4502_v37 = vsel %vm12711_vm14, %v4394_v48, 0.0  ;;  %9603 = vmatmul.mubr.f32.gmra.mxu0 %v4570_v24  ;;  %v14540_v20 = vld [vmem:[#allocation47_spill] sm:$0xff]  ;;  %v14542_v57 = vld [vmem:[#allocation14_spill] sm:$0xff]  ;;  %v14543_v21 = vld [vmem:[#allocation93_spill] sm:$0xff] }
 0x308   : > { %vm12852_vm13 = vcmp.lt.s32.totalorder %v14535_v22, 16  ;;  %v4393_v15 = vmax.f32 %v4357_v11, 0.0  ;;  %v4360_v28 = vadd.f32 %v12453_v23, %v4319_v44  ;;  %v4318_v5 = vadd.f32 %v4195_v7, %v12504_v19  ;;  %4538 = vst [vmem:[#allocation3 + $0x80] sm:$0xff] %v4502_v37  ;;  %vm12883_vm14 = vmand %vm1255_vm6, %vm1219_vm5  ;;  %v14549_v19 = vld [vmem:[#allocation15_spill] sm:$0xff]  ;;  %v14580_v13 = vld [vmem:[#allocation12_spill] sm:$0xff] }
 0x309   : > { %v3660_v62 = vadd.f32 %v14539_v32, %v14538_v46  ;;  %vm14541_vm0 = vnez %v14540_v20  ;;  %v12888_v11 = vadd.s32 18, %v12774_v4  ;;  %v1131_v44 = vshrl.u32 %v12778_v14, 4  ;;  %v4623_v32 = vld [vmem:[#allocation3 + $0x56] sm:$0xff] }
 0x30a   : > { %v14544_v22 = vsel %vm14541_vm0, %v14542_v57, %v14543_v21  ;;  %v4501_v7 = vsel %vm12731_vm4, %v4393_v15, 0.0  ;;  %v4396_v24 = vmax.f32 %v4360_v28, 0.0  ;;  %v4359_v37 = vadd.f32 %v12453_v23, %v4318_v5  ;;  %v4571_v20 = vld [vmem:[#allocation3 + $0x55] sm:$0xff]  ;;  %v4624_v57 = vld [vmem:[#allocation3 + $0x5e] sm:$0xff]  ;;  %v4205_v21 = vpop.f32.mrf.mxu0  ;;  %9519 = vmatprep.mubr.f32.mxu1 %v4623_v32 }
 0x30b   : > { %vm12871_vm7 = vcmp.lt.s32.totalorder %v14544_v22, 16  ;;  %v4321_v46 = vadd.f32 %v9444_v1, %v12512_v31  ;;  %4537 = vst [vmem:[#allocation3 + $0x78] sm:$0xff] %v4501_v7  ;;  %9605 = vmatprep.mubr.f32.mxu0 %v4571_v20  ;;  %v4572_v22 = vld [vmem:[#allocation3 + $0x5d] sm:$0xff]  ;;  %vm14550_vm8 = vnez %v14549_v19  ;;  %v14551_v14 = vld [vmem:[#allocation55_spill] sm:$0xff]  ;;  %v1143_v15 = vmul.u32 18, %v1142_v63  ;;  %9520 = vmatmul.mubr.f32.gmra.mxu1 %v4624_v57 }
 0x30c   : > { %v14553_v53 = vsel %vm14550_vm8, %v14551_v14, %v14552_v16  ;;  %v12907_v31 = vmul.u32.u64.low 3817748708, %v12858_v3  ;;  %v12908_v28 = vmul.u32.u64.high 3817748708, %v12858_v3, %v12907_v31  ;;  %v12911_v5 = vadd.s32 256, %v11360_v47  ;;  %9606 = vmatmul.mubr.f32.gmra.mxu0 %v4572_v22  ;;  %v9447_v32 = vpop.f32.mrf.mxu0  ;;  %v14558_v14 = vld [vmem:[#allocation8_spill] sm:$0xff] }
 0x30d   : > { %vm12902_vm12 = vcmp.lt.s32.totalorder %v14553_v53, 16  ;;  %v4504_v1 = vsel %vm12760_vm11, %v4396_v24, 0.0  ;;  %v4395_v7 = vmax.f32 %v4359_v37, 0.0  ;;  %v4362_v19 = vadd.f32 %v12453_v23, %v4321_v46  ;;  %v14556_v53 = vld [vmem:[#allocation41_spill] sm:$0xff]  ;;  %v12937_v37 = vpop.f32.mrf.mxu1 }
 0x30e   : > { %v4320_v16 = vadd.f32 %v4205_v21, %v12582_v55  ;;  %v12919_v63 = vadd.f32 %v12720_v27, %v14556_v53  ;;  %4540 = vst [vmem:[#allocation3 + $0x90] sm:$0xff] %v4504_v1  ;;  %v14559_v31 = vld [vmem:[#allocation97_spill] sm:$0xff]  ;;  %v1363_v55 = vsel %vm12883_vm14, %v12888_v11, %v12774_v4  ;;  %v1132_v24 = vmul.u32 18, %v1131_v44  ;;  %v4626_v53 = vld [vmem:[#allocation3 + $0x6e] sm:$0xff]  ;;  %v4215_v44 = vpop.f32.mrf.mxu0 }
 0x30f   : > { %v14560_v10 = vsel %vm12371_vm3, %v14558_v14, %v14559_v31  ;;  %v12935_v27 = vadd.s32 280, %v11360_v47  ;;  %v4503_v46 = vsel %vm12796_vm2, %v4395_v7, 0.0  ;;  %v4398_v57 = vmax.f32 %v4362_v19, 0.0  ;;  %v4625_v22 = vld [vmem:[#allocation3 + $0x66] sm:$0xff] }
 0x310   : > { %vm12926_vm4 = vcmp.lt.s32.totalorder %v14560_v10, 16  ;;  %v4361_v10 = vadd.f32 %v12453_v23, %v4320_v16  ;;  %v4323_v21 = vadd.f32 %v9447_v32, %v12613_v6  ;;  %v4573_v1 = vld [vmem:[#allocation3 + $0x65] sm:$0xff]  ;;  %v12944_v20 = vadd.f32 %v12780_v26, %v3660_v62  ;;  %4539 = vst [vmem:[#allocation3 + $0x88] sm:$0xff] %v4503_v46  ;;  %9522 = vmatprep.mubr.f32.mxu1 %v4625_v22  ;;  %v4574_v14 = vld [vmem:[#allocation3 + $0x6d] sm:$0xff] }
 0x311   : > { %9608 = vmatprep.mubr.f32.mxu0 %v4573_v1  ;;  %v14563_v31 = vld [vmem:[#allocation50_spill] sm:$0xff]  ;;  %v12956_v6 = vsub.s32 %v12654_v36, %v1143_v15  ;;  %v12959_v26 = vmul.u32.u64.low 3817748708, %v12911_v5  ;;  %v12960_v62 = vmul.u32.u64.high 3817748708, %v12911_v5, %v12959_v26  ;;  %v4506_v16 = vsel %vm12813_vm9, %v4398_v57, 0.0  ;;  %9523 = vmatmul.mubr.f32.gmra.mxu1 %v4626_v53  ;;  %v14569_v1 = vld [vmem:[#allocation27_spill] sm:$0xff]  ;;  %v14571_v36 = vld [vmem:[#allocation20_spill] sm:$0xff] }
 0x312   : > { %vm14564_vm3 = vnez %v14563_v31  ;;  %v4397_v32 = vmax.f32 %v4361_v10, 0.0  ;;  %v4364_v46 = vadd.f32 %v12453_v23, %v4323_v21  ;;  %v4322_v22 = vadd.f32 %v4215_v44, %v12638_v59  ;;  %9609 = vmatmul.mubr.f32.gmra.mxu0 %v4574_v14  ;;  %4542 = vst [vmem:[#allocation3 + $0xa0] sm:$0xff] %v4506_v16  ;;  %v14572_v15 = vld [vmem:[#allocation98_spill] sm:$0xff]  ;;  %v12985_v21 = vpop.f32.mrf.mxu1  ;;  %v4627_v26 = vld [vmem:[#allocation3 + $0x76] sm:$0xff]  ;;  %v14576_v16 = vld [vmem:[#allocation33_spill] sm:$0xff] }
 0x313   : > { %v14566_v7 = vsel %vm14564_vm3, %v12354_v56, %v14565_v25  ;;  %v9450_v56 = vpop.f32.mrf.mxu0  ;;  %vm14570_vm2 = vnez %v14569_v1  ;;  %v12976_v50 = vsub.s32 %v12718_v0, %v1132_v24  ;;  %v12983_v59 = vadd.s32 272, %v11360_v47  ;;  %v4575_v0 = vld [vmem:[#allocation3 + $0x75] sm:$0xff]  ;;  %v4628_v24 = vld [vmem:[#allocation3 + $0x7e] sm:$0xff]  ;;  %v14577_v1 = vld [vmem:[#allocation10_spill] sm:$0xff]  ;;  %9525 = vmatprep.mubr.f32.mxu1 %v4627_v26 }
 0x314   : > { %vm12951_vm11 = vcmp.lt.s32.totalorder %v14566_v7, 16  ;;  %v14573_v31 = vsel %vm14570_vm2, %v14571_v36, %v14572_v15  ;;  %v12979_v57 = vmul.u32.u64.low 3817748708, %v12935_v27  ;;  %v12980_v10 = vmul.u32.u64.high 3817748708, %v12935_v27, %v12979_v57  ;;  %9611 = vmatprep.mubr.f32.mxu0 %v4575_v0  ;;  %v4576_v47 = vld [vmem:[#allocation3 + $0x7d] sm:$0xff] }
 0x315   : > { %vm12971_vm5 = vcmp.lt.s32.totalorder %v14573_v31, 16  ;;  %v4505_v53 = vsel %vm12852_vm13, %v4397_v32, 0.0  ;;  %v4400_v44 = vmax.f32 %v4364_v46, 0.0  ;;  %v4363_v14 = vadd.f32 %v12453_v23, %v4322_v22  ;;  %v4225_v15 = vpop.f32.mrf.mxu0  ;;  %v14578_v31 = vld [vmem:[#allocation26_spill] sm:$0xff]  ;;  %v14581_v32 = vld [vmem:[#allocation16_spill] sm:$0xff]  ;;  %9526 = vmatmul.mubr.f32.gmra.mxu1 %v4628_v24 }
 0x316   : > { %v4325_v7 = vadd.f32 %v9450_v56, %v12685_v43  ;;  %v3662_v36 = vadd.f32 %v14577_v1, %v14576_v16  ;;  %4541 = vst [vmem:[#allocation3 + $0x98] sm:$0xff] %v4505_v53  ;;  %vm14579_vm9 = vnez %v14578_v31  ;;  %vm1222_vm13 = vcmp.ne.s32.totalorder %v12956_v6, 0  ;;  %9612 = vmatmul.mubr.f32.gmra.mxu0 %v4576_v47  ;;  %v14588_v24 = vld [vmem:[#allocation44_spill] sm:$0xff]  ;;  %v14590_v47 = vld [vmem:[#allocation18_spill] sm:$0xff] }
 0x317   : > { %v14582_v46 = vsel %vm14579_vm9, %v14580_v13, %v14581_v32  ;;  %vm1258_vm0 = vcmp.lt.s32.totalorder %v12956_v6, 0  ;;  %v1164_v43 = vshrl.u32 %v12908_v28, 4  ;;  %v4508_v56 = vsel %vm12871_vm7, %v4400_v44, 0.0  ;;  %v9453_v0 = vpop.f32.mrf.mxu0  ;;  %v13024_v28 = vpop.f32.mrf.mxu1  ;;  %v4578_v51 = vld [vmem:[#allocation3 + $0x8d] sm:$0xff] }
 0x318   : > { %vm12998_vm6 = vcmp.lt.s32.totalorder %v14582_v46, 16  ;;  %v4399_v57 = vmax.f32 %v4363_v14, 0.0  ;;  %v4366_v53 = vadd.f32 %v12453_v23, %v4325_v7  ;;  %v4324_v26 = vadd.f32 %v4225_v15, %v12787_v17  ;;  %4544 = vst [vmem:[#allocation3 + $0xb0] sm:$0xff] %v4508_v56  ;;  %v4577_v14 = vld [vmem:[#allocation3 + $0x85] sm:$0xff]  ;;  %v4630_v7 = vld [vmem:[#allocation3 + $0x8e] sm:$0xff]  ;;  %vm13055_vm8 = vmand %vm1258_vm0, %vm1222_vm13 }
 0x319   : > { %vm13014_vm3 = vcmp.lt.s32.totalorder %v1360_v40, 16  ;;  %vm1221_vm7 = vcmp.ne.s32.totalorder %v12976_v50, 0  ;;  %vm1257_vm2 = vcmp.lt.s32.totalorder %v12976_v50, 0  ;;  %v4327_v35 = vadd.f32 %v9453_v0, %v12842_v30  ;;  %v4629_v40 = vld [vmem:[#allocation3 + $0x86] sm:$0xff]  ;;  %v14589_v15 = vld [vmem:[#allocation79_spill] sm:$0xff]  ;;  %v4235_v13 = vpop.f32.mrf.mxu0  ;;  %9614 = vmatprep.mubr.f32.mxu0 %v4577_v14  ;;  %v13081_v0 = vpop.f32.mrf.mxu1 }
 0x31a   : > { %v13021_v12 = vmul.u32.u64.low 3817748708, %v12983_v59  ;;  %v13022_v17 = vmul.u32.u64.high 3817748708, %v12983_v59, %v13021_v12  ;;  %v4507_v60 = vsel %vm12902_vm12, %v4399_v57, 0.0  ;;  %v4402_v44 = vmax.f32 %v4366_v53, 0.0  ;;  %9528 = vmatprep.mubr.f32.mxu1 %v4629_v40  ;;  %9615 = vmatmul.mubr.f32.gmra.mxu0 %v4578_v51  ;;  %vm13073_vm13 = vmand %vm1257_vm2, %vm1221_vm7  ;;  %v14602_v40 = vld [vmem:[#allocation45_spill] sm:$0xff] }
 0x31b   : > { %v4365_v49 = vadd.f32 %v12453_v23, %v4324_v26  ;;  %v3997_v1 = vadd.f32 %v12834_v41, %v14588_v24  ;;  %v3664_v31 = vadd.f32 %v14590_v47, %v14589_v15  ;;  %4543 = vst [vmem:[#allocation3 + $0xa8] sm:$0xff] %v4507_v60  ;;  %vm14591_vm12 = vnez %v14460_v33  ;;  %v9456_v58 = vpop.f32.mrf.mxu0  ;;  %v13126_v51 = vpop.f32.mrf.mxu1 }
 0x31c   : > { %v14592_v32 = vsel %vm14591_vm12, %v12596_v29, %v12524_v61  ;;  %v13044_v46 = vadd.s32 18, %v12956_v6  ;;  %v1153_v41 = vshrl.u32 %v12960_v62, 4  ;;  %v4510_v56 = vsel %vm12926_vm4, %v4402_v44, 0.0  ;;  %9529 = vmatmul.mubr.f32.gmra.mxu1 %v4630_v7 }
 0x31d   : > { %vm13039_vm9 = vcmp.lt.s32.totalorder %v14592_v32, 16  ;;  %v4401_v57 = vmax.f32 %v4365_v49, 0.0  ;;  %v4368_v53 = vadd.f32 %v12453_v23, %v4327_v35  ;;  %v4326_v33 = vadd.f32 %v4235_v13, %v12845_v45  ;;  %4546 = vst [vmem:[#allocation3 + $0xc0] sm:$0xff] %v4510_v56  ;;  %v4631_v44 = vld [vmem:[#allocation3 + $0x96] sm:$0xff]  ;;  %v4632_v35 = vld [vmem:[#allocation3 + $0x9e] sm:$0xff] }
 0x31e   : > { %v3996_v29 = vadd.f32 %v12891_v8, %v3662_v36  ;;  %v14597_v62 = vsel %vm12751_vm15, %v12697_v42, %v12629_v39  ;;  %v13078_v8 = vadd.s32 18, %v12976_v50  ;;  %v1165_v36 = vmul.u32 18, %v1164_v43  ;;  %v4579_v49 = vld [vmem:[#allocation3 + $0x95] sm:$0xff]  ;;  %9531 = vmatprep.mubr.f32.mxu1 %v4631_v44  ;;  %v4580_v19 = vld [vmem:[#allocation3 + $0x9d] sm:$0xff] }
 0x31f   : > { %vm13065_vm4 = vcmp.lt.s32.totalorder %v14597_v62, 16  ;;  %v1186_v18 = vshrl.u32 %v12980_v10, 4  ;;  %v4509_v39 = vsel %vm12951_vm11, %v4401_v57, 0.0  ;;  %v4404_v42 = vmax.f32 %v4368_v53, 0.0  ;;  %v4245_v10 = vpop.f32.mrf.mxu0  ;;  %9617 = vmatprep.mubr.f32.mxu0 %v4579_v49  ;;  %v14609_v57 = vld [vmem:[#allocation88_spill] sm:$0xff]  ;;  %v14610_v53 = vld [vmem:[#allocation21_spill] sm:$0xff] }
 0x320   : > { %v4367_v12 = vadd.f32 %v12453_v23, %v4326_v33  ;;  %v4329_v60 = vadd.f32 %v9456_v58, %v12919_v63  ;;  %v3999_v14 = vadd.f32 %v12937_v37, %v14602_v40  ;;  %v13090_v43 = vadd.f32 %v12985_v21, %v3664_v31  ;;  %4545 = vst [vmem:[#allocation3 + $0xb8] sm:$0xff] %v4509_v39  ;;  %v14617_v40 = vld [vmem:[#allocation23_spill] sm:$0xff] }
 0x321   : > { %v14603_v7 = vsel %vm12768_vm1, %v12736_v54, %v12672_v2  ;;  %v1366_v37 = vsel %vm13055_vm8, %v13044_v46, %v12956_v6  ;;  %v1154_v21 = vmul.u32 18, %v1153_v41  ;;  %v4512_v24 = vsel %vm12971_vm5, %v4404_v42, 0.0  ;;  %9532 = vmatmul.mubr.f32.gmra.mxu1 %v4632_v35  ;;  %9618 = vmatmul.mubr.f32.gmra.mxu0 %v4580_v19  ;;  %v9459_v2 = vpop.f32.mrf.mxu0  ;;  %v14616_v35 = vld [vmem:[#allocation89_spill] sm:$0xff] }
 0x322   : > { %vm13097_vm15 = vcmp.lt.s32.totalorder %v14603_v7, 16  ;;  %v4403_v15 = vmax.f32 %v4367_v12, 0.0  ;;  %v4370_v47 = vadd.f32 %v12453_v23, %v4329_v60  ;;  %v4328_v52 = vadd.f32 %v4245_v10, %v12944_v20  ;;  %4548 = vst [vmem:[#allocation3 + $0xd0] sm:$0xff] %v4512_v24  ;;  %v4633_v46 = vld [vmem:[#allocation3 + $0xa6] sm:$0xff]  ;;  %v4634_v56 = vld [vmem:[#allocation3 + $0xae] sm:$0xff] }
 0x323   : > { %v14606_v54 = vsel %vm12825_vm10, %v12830_v9, %v12700_v34  ;;  %v1365_v25 = vsel %vm13073_vm13, %v13078_v8, %v12976_v50  ;;  %v13123_v20 = vsub.s32 %v12858_v3, %v1165_v36  ;;  %v1187_v31 = vmul.u32 18, %v1186_v18  ;;  %v4581_v41 = vld [vmem:[#allocation3 + $0xa5] sm:$0xff]  ;;  %v14611_v3 = vld [vmem:[#allocation51_spill] sm:$0xff]  ;;  %9534 = vmatprep.mubr.f32.mxu1 %v4633_v46 }
 0x324   : > { %vm13114_vm1 = vcmp.lt.s32.totalorder %v14606_v54, 16  ;;  %v1175_v13 = vshrl.u32 %v13022_v17, 4  ;;  %v4511_v34 = vsel %vm12998_vm6, %v4403_v15, 0.0  ;;  %v4406_v38 = vmax.f32 %v4370_v47, 0.0  ;;  %v4255_v17 = vpop.f32.mrf.mxu0  ;;  %9620 = vmatprep.mubr.f32.mxu0 %v4581_v41  ;;  %v4582_v58 = vld [vmem:[#allocation3 + $0xad] sm:$0xff] }
 0x325   : > { %v4369_v9 = vadd.f32 %v12453_v23, %v4328_v52  ;;  %v4331_v32 = vadd.f32 %v9459_v2, %v3997_v1  ;;  %v3666_v33 = vadd.f32 %v14610_v53, %v14609_v57  ;;  %v4001_v61 = vadd.f32 %v13024_v28, %v14611_v3  ;;  %4547 = vst [vmem:[#allocation3 + $0xc8] sm:$0xff] %v4511_v34  ;;  %v14620_v34 = vld [vmem:[#allocation61_spill] sm:$0xff] }
 0x326   : > { %vm13140_vm10 = vcmp.lt.s32.totalorder %v1363_v55, 16  ;;  %v13145_v1 = vsub.s32 %v12911_v5, %v1154_v21  ;;  %v4514_v28 = vsel %vm13014_vm3, %v4406_v38, 0.0  ;;  %v4330_v18 = vadd.f32 %v4255_v17, %v3996_v29  ;;  %9535 = vmatmul.mubr.f32.gmra.mxu1 %v4634_v56  ;;  %9621 = vmatmul.mubr.f32.gmra.mxu0 %v4582_v58  ;;  %v9462_v48 = vpop.f32.mrf.mxu0  ;;  %v3951_v55 = vpop.f32.mrf.mxu1 }
 0x327   : > { %v4405_v62 = vmax.f32 %v4369_v9, 0.0  ;;  %v4372_v36 = vadd.f32 %v12453_v23, %v4331_v32  ;;  %4550 = vst [vmem:[#allocation3 + $0xe0] sm:$0xff] %v4514_v28  ;;  %vm13150_vm11 = vcmp.lt.s32.totalorder %v1366_v37, 16  ;;  %vm1224_vm14 = vcmp.ne.s32.totalorder %v13123_v20, 0  ;;  %v4635_v12 = vld [vmem:[#allocation3 + $0xb6] sm:$0xff]  ;;  %v4636_v44 = vld [vmem:[#allocation3 + $0xbe] sm:$0xff] }
 0x328   : > { %vm1260_vm5 = vcmp.lt.s32.totalorder %v13123_v20, 0  ;;  %v13157_v11 = vsub.s32 %v12935_v27, %v1187_v31  ;;  %v1176_v5 = vmul.u32 18, %v1175_v13  ;;  %v4371_v39 = vadd.f32 %v12453_v23, %v4330_v18  ;;  %v4583_v60 = vld [vmem:[#allocation3 + $0xb5] sm:$0xff]  ;;  %v4265_v27 = vpop.f32.mrf.mxu0  ;;  %9537 = vmatprep.mubr.f32.mxu1 %v4635_v12  ;;  %v4584_v19 = vld [vmem:[#allocation3 + $0xbd] sm:$0xff] }
 0x329   : > { %v4513_v16 = vsel %vm13039_vm9, %v4405_v62, 0.0  ;;  %v4408_v29 = vmax.f32 %v4372_v36, 0.0  ;;  %v4333_v42 = vadd.f32 %v9462_v48, %v3999_v14  ;;  %v4000_v49 = vadd.f32 %v13081_v0, %v3666_v33  ;;  %9623 = vmatprep.mubr.f32.mxu0 %v4583_v60  ;;  %vm13177_vm0 = vmand %vm1260_vm5, %vm1224_vm14  ;;  %v14624_v33 = vld [vmem:[#allocation9_spill] sm:$0xff] }
 0x32a   : > { %v3668_v10 = vadd.f32 %v14617_v40, %v14616_v35  ;;  %4549 = vst [vmem:[#allocation3 + $0xd8] sm:$0xff] %v4513_v16  ;;  %v13166_v30 = vadd.s32 18, %v13123_v20  ;;  %vm1223_vm6 = vcmp.ne.s32.totalorder %v13145_v1, 0  ;;  %v4407_v7 = vmax.f32 %v4371_v39, 0.0  ;;  %9538 = vmatmul.mubr.f32.gmra.mxu1 %v4636_v44  ;;  %9624 = vmatmul.mubr.f32.gmra.mxu0 %v4584_v19  ;;  %v9465_v24 = vpop.f32.mrf.mxu0  ;;  %v14627_v16 = vld [vmem:[#allocation66_spill] sm:$0xff] }
 0x32b   : > { %v4516_v14 = vsel %vm13065_vm4, %v4408_v29, 0.0  ;;  %v4374_v37 = vadd.f32 %v12453_v23, %v4333_v42  ;;  %v4332_v0 = vadd.f32 %v4265_v27, %v13090_v43  ;;  %vm1259_vm3 = vcmp.lt.s32.totalorder %v13145_v1, 0  ;;  %v9385_v43 = vpop.f32.mrf.mxu1  ;;  %v5496_v39 = vld [vmem:[#allocation3 + $0x47] sm:$0xff] }
 0x32c   : > { %4552 = vst [vmem:[#allocation3 + $0xf0] sm:$0xff] %v4516_v14  ;;  %vm1226_vm7 = vcmp.ne.s32.totalorder %v13157_v11, 0  ;;  %vm1262_vm2 = vcmp.lt.s32.totalorder %v13157_v11, 0  ;;  %v13185_v45 = vsub.s32 %v12983_v59, %v1176_v5  ;;  %v4515_v15 = vsel %vm13097_vm15, %v4407_v7, 0.0  ;;  %v4637_v54 = vld [vmem:[#allocation3 + $0xc6] sm:$0xff]  ;;  %v4638_v13 = vld [vmem:[#allocation3 + $0xce] sm:$0xff]  ;;  %v4275_v32 = vpop.f32.mrf.mxu0  ;;  %vm13204_vm12 = vmand %vm1259_vm3, %vm1223_vm6 }
 0x32d   : > { %v4410_v47 = vmax.f32 %v4374_v37, 0.0  ;;  %v4373_v52 = vadd.f32 %v12453_v23, %v4332_v0  ;;  %v4335_v2 = vadd.f32 %v9465_v24, %v4001_v61  ;;  %v4585_v31 = vld [vmem:[#allocation3 + $0xc5] sm:$0xff]  ;;  %v4003_v38 = vadd.f32 %v13126_v51, %v14620_v34  ;;  %4551 = vst [vmem:[#allocation3 + $0xe8] sm:$0xff] %v4515_v15  ;;  %9540 = vmatprep.mubr.f32.mxu1 %v4637_v54  ;;  %v4586_v59 = vld [vmem:[#allocation3 + $0xcd] sm:$0xff]  ;;  %vm13214_vm9 = vmand %vm1262_vm2, %vm1226_vm7  ;;  %v3961_v58 = vpop.f32.mrf.mxu1 }
 0x32e   : > { %v4002_v9 = vadd.f32 %v3951_v55, %v3668_v10  ;;  %9626 = vmatprep.mubr.f32.mxu0 %v4585_v31  ;;  %v1368_v63 = vsel %vm13177_vm0, %v13166_v30, %v13123_v20  ;;  %v1331_v46 = vadd.s32 18, %v13145_v1  ;;  %v4334_v51 = vadd.f32 %v4275_v32, %v4000_v49  ;;  %9541 = vmatmul.mubr.f32.gmra.mxu1 %v4638_v13  ;;  %v14623_v20 = vld [vmem:[#allocation90_spill] sm:$0xff]  ;;  %v9468_v6 = vpop.f32.mrf.mxu0 }
 0x32f   : > { %v4518_v41 = vsel %vm13114_vm1, %v4410_v47, 0.0  ;;  %v4409_v56 = vmax.f32 %v4373_v52, 0.0  ;;  %v4376_v57 = vadd.f32 %v12453_v23, %v4335_v2  ;;  %9627 = vmatmul.mubr.f32.gmra.mxu0 %v4586_v59  ;;  %v3670_v3 = vadd.f32 %v14624_v33, %v14623_v20  ;;  %v5157_v61 = vld [vmem:[#allocation3 + $0xf] sm:$0xff] }
 0x330   : > { %4554 = vst [vmem:[#allocation3 + $0x100] sm:$0xff] %v4518_v41  ;;  %v1334_v17 = vadd.s32 18, %v13157_v11  ;;  %vm1225_vm8 = vcmp.ne.s32.totalorder %v13185_v45, 0  ;;  %vm1261_vm4 = vcmp.lt.s32.totalorder %v13185_v45, 0  ;;  %v4375_v36 = vadd.f32 %v12453_v23, %v4334_v51  ;;  %v4285_v42 = vpop.f32.mrf.mxu0  ;;  %v9506_v41 = vpop.f32.mrf.mxu1  ;;  %v5501_v49 = vld [vmem:[#allocation3 + $0x6f] sm:$0xff] }
 0x331   : > { %v4517_v28 = vsel %vm13140_vm10, %v4409_v56, 0.0  ;;  %v4412_v62 = vmax.f32 %v4376_v57, 0.0  ;;  %v4337_v18 = vadd.f32 %v9468_v6, %v4003_v38  ;;  %v4639_v48 = vld [vmem:[#allocation3 + $0xd6] sm:$0xff]  ;;  %v4640_v55 = vld [vmem:[#allocation3 + $0xde] sm:$0xff]  ;;  %v4005_v29 = vadd.f32 %v9385_v43, %v14627_v16  ;;  %vm13245_vm13 = vmand %vm1261_vm4, %vm1225_vm8 }
 0x332   : > { %v4587_v5 = vld [vmem:[#allocation3 + $0xd5] sm:$0xff]  ;;  %4553 = vst [vmem:[#allocation3 + $0xf8] sm:$0xff] %v4517_v28  ;;  %vm13230_vm15 = vcmp.lt.s32.totalorder %v1365_v25, 16  ;;  %v1367_v22 = vsel %vm13204_vm12, %v1331_v46, %v13145_v1  ;;  %9543 = vmatprep.mubr.f32.mxu1 %v4639_v48  ;;  %v4588_v12 = vld [vmem:[#allocation3 + $0xdd] sm:$0xff]  ;;  %v1333_v60 = vadd.s32 18, %v13185_v45  ;;  %v4411_v44 = vmax.f32 %v4375_v36, 0.0  ;;  %v9471_v35 = vpop.f32.mrf.mxu0 }
 0x333   : > { %9629 = vmatprep.mubr.f32.mxu0 %v4587_v5  ;;  %v4520_v26 = vsel %vm13150_vm11, %v4412_v62, 0.0  ;;  %v4378_v50 = vadd.f32 %v12453_v23, %v4337_v18  ;;  %v4336_v8 = vadd.f32 %v4285_v42, %v4002_v9  ;;  %9544 = vmatmul.mubr.f32.gmra.mxu1 %v4640_v55  ;;  %v4004_v1 = vadd.f32 %v3961_v58, %v3670_v3  ;;  %v10329_v43 = vld [vmem:[#allocation6] ss:$0 sm:$0xff]  ;;  %v5156_v57 = vld [vmem:[#allocation3 + $0x7] sm:$0xff]  ;;  %v5490_v6 = vld [vmem:[#allocation3 + $0x17] sm:$0xff] }
 0x334   : > { %9630 = vmatmul.mubr.f32.gmra.mxu0 %v4588_v12  ;;  %4556 = vst [vmem:[#allocation3 + $0x110] sm:$0xff] %v4520_v26  ;;  %vm13249_vm1 = vcmp.lt.s32.totalorder %v1368_v63, 16  ;;  %v1370_v4 = vsel %vm13214_vm9, %v1334_v17, %v13157_v11  ;;  %v4519_v40 = vsel %vm13230_vm15, %v4411_v44, 0.0  ;;  %v4339_v19 = vadd.f32 %v9471_v35, %v4005_v29  ;;  %v4641_v30 = vld [vmem:[#allocation3 + $0xe6] sm:$0xff]  ;;  %v4642_v7 = vld [vmem:[#allocation3 + $0xee] sm:$0xff]  ;;  %v4295_v0 = vpop.f32.mrf.mxu0  ;;  %v5494_v5 = vld [vmem:[#allocation3 + $0x37] sm:$0xff] }
 0x335   : > { %v4414_v10 = vmax.f32 %v4378_v50, 0.0  ;;  %v4377_v27 = vadd.f32 %v12453_v23, %v4336_v8  ;;  %v4589_v14 = vld [vmem:[#allocation3 + $0xe5] sm:$0xff]  ;;  %4555 = vst [vmem:[#allocation3 + $0x108] sm:$0xff] %v4519_v40  ;;  %vm1403_vm10 = vcmp.lt.s32.totalorder %v1367_v22, 16  ;;  %v1369_v37 = vsel %vm13245_vm13, %v1333_v60, %v13185_v45  ;;  %9546 = vmatprep.mubr.f32.mxu1 %v4641_v30  ;;  %v4590_v11 = vld [vmem:[#allocation3 + $0xed] sm:$0xff]  ;;  %v5874_v55 = vld [vmem:[#allocation5 + $0x268] sm:$0xff] }
 0x336   : > { %9632 = vmatprep.mubr.f32.mxu0 %v4589_v14  ;;  %v4380_v23 = vadd.f32 %v10329_v43, %v4339_v19  ;;  %v4338_v15 = vadd.f32 %v4295_v0, %v4004_v1  ;;  %vm1406_vm11 = vcmp.lt.s32.totalorder %v1370_v4, 16  ;;  %vm1405_vm14 = vcmp.lt.s32.totalorder %v1369_v37, 16  ;;  %v9592_v56 = vpop.f32.mrf.mxu0  ;;  %v5491_v17 = vld [vmem:[#allocation3 + $0x1f] sm:$0xff]  ;;  %v5492_v58 = vld [vmem:[#allocation3 + $0x27] sm:$0xff]  ;;  %v5493_v48 = vld [vmem:[#allocation3 + $0x2f] sm:$0xff] }
 0x337   : > { %v4522_v21 = vsel %vm13249_vm1, %v4414_v10, 0.0  ;;  %v4413_v24 = vmax.f32 %v4377_v27, 0.0  ;;  %9547 = vmatmul.mubr.f32.gmra.mxu1 %v4642_v7  ;;  %v13264_v51 = vadd.f32 %v9592_v56, %v9506_v41  ;;  %v5875_v28 = vld [vmem:[#allocation5 + $0x270] sm:$0xff]  ;;  %v10330_v36 = vld [vmem:[#allocation5 + $0x278] sm:$0xff]  ;;  %v6208_v16 = vld [vmem:[#allocation5 + $0x2e8] sm:$0xff]  ;;  %vm14639_vm5 = vcmask 31744  }
 0x338   : > { %9633 = vmatmul.mubr.f32.gmra.mxu0 %v4590_v11  ;;  %4558 = vst [vmem:[#allocation3 + $0x120] sm:$0xff] %v4522_v21  ;;  %v4416_v52 = vmax.f32 %v4380_v23, 0.0  ;;  %v4379_v2 = vadd.f32 %v10329_v43, %v4338_v15  ;;  %v6209_v62 = vld [vmem:[#allocation5 + $0x2f0] sm:$0xff]  ;;  %v10331_v18 = vld [vmem:[#allocation5 + $0x2f8] sm:$0xff]  ;;  %v5873_v22 = vld [vmem:[#allocation5 + $0x260] sm:$0xff] }
 0x339   : > { %v4521_v47 = vsel %vm1403_vm10, %v4413_v24, 0.0  ;;  %v4643_v54 = vld [vmem:[#allocation3 + $0xf6] sm:$0xff]  ;;  %v4644_v31 = vld [vmem:[#allocation3 + $0xfe] sm:$0xff]  ;;  %v5872_v26 = vld [vmem:[#allocation5 + $0x258] sm:$0xff] }
 0x33a   : > { %v4591_v45 = vld [vmem:[#allocation3 + $0xf5] sm:$0xff]  ;;  %4557 = vst [vmem:[#allocation3 + $0x118] sm:$0xff] %v4521_v47  ;;  %9549 = vmatprep.mubr.f32.mxu1 %v4643_v54  ;;  %v4592_v13 = vld [vmem:[#allocation3 + $0xfd] sm:$0xff]  ;;  %v4524_v34 = vsel %vm1406_vm11, %v4416_v52, 0.0  ;;  %v4415_v38 = vmax.f32 %v4379_v2, 0.0  ;;  %v6206_v44 = vld [vmem:[#allocation5 + $0x2d8] sm:$0xff] }
 0x33b   : > { %9635 = vmatprep.mubr.f32.mxu0 %v4591_v45  ;;  %9550 = vmatmul.mubr.f32.gmra.mxu1 %v4644_v31  ;;  %4560 = vst [vmem:[#allocation3 + $0x130] sm:$0xff] %v4524_v34  ;;  %v5495_v29 = vld [vmem:[#allocation3 + $0x3f] sm:$0xff]  ;;  %v6207_v42 = vld [vmem:[#allocation5 + $0x2e0] sm:$0xff]  ;;  %v5500_v8 = vld [vmem:[#allocation3 + $0x67] sm:$0xff] }
 0x33c   : > { %9636 = vmatmul.mubr.f32.gmra.mxu0 %v4592_v13  ;;  %v4523_v9 = vsel %vm1405_vm14, %v4415_v38, 0.0  ;;  %v4645_v32 = vld [vmem:[#allocation3 + $0x106] sm:$0xff]  ;;  %v4646_v63 = vld [vmem:[#allocation3 + $0x10e] sm:$0xff]  ;;  %v5498_v60 = vld [vmem:[#allocation3 + $0x57] sm:$0xff] }
 0x33d   : > { %v4593_v59 = vld [vmem:[#allocation3 + $0x105] sm:$0xff]  ;;  %4559 = vst [vmem:[#allocation3 + $0x128] sm:$0xff] %v4523_v9  ;;  %9552 = vmatprep.mubr.f32.mxu1 %v4645_v32  ;;  %v4594_v46 = vld [vmem:[#allocation3 + $0x10d] sm:$0xff]  ;;  %v5502_v4 = vld [vmem:[#allocation3 + $0x77] sm:$0xff] }
 0x33e   : > { %9638 = vmatprep.mubr.f32.mxu0 %v4593_v59  ;;  %v5497_v12 = vld [vmem:[#allocation3 + $0x4f] sm:$0xff]  ;;  %v5499_v50 = vld [vmem:[#allocation3 + $0x5f] sm:$0xff]  ;;  %v5504_v27 = vld [vmem:[#allocation3 + $0x87] sm:$0xff] }
 0x33f   : > { %9553 = vmatmul.mubr.f32.gmra.mxu1 %v4646_v63  ;;  %v5871_v25 = vld [vmem:[#allocation5 + $0x250] sm:$0xff]  ;;  %v5870_v35 = vld [vmem:[#allocation5 + $0x248] sm:$0xff]  ;;  %v5869_v19 = vld [vmem:[#allocation5 + $0x240] sm:$0xff] }
 0x340   : > { %9639 = vmatmul.mubr.f32.gmra.mxu0 %v4594_v46  ;;  %v6205_v1 = vld [vmem:[#allocation5 + $0x2d0] sm:$0xff]  ;;  %v6204_v40 = vld [vmem:[#allocation5 + $0x2c8] sm:$0xff]  ;;  %v6203_v30 = vld [vmem:[#allocation5 + $0x2c0] sm:$0xff] }
 0x341   : > { %v4647_v53 = vld [vmem:[#allocation3 + $0x116] sm:$0xff]  ;;  %v4648_v33 = vld [vmem:[#allocation3 + $0x11e] sm:$0xff]  ;;  %v5868_v37 = vld [vmem:[#allocation5 + $0x238] sm:$0xff] }
 0x342   : > { %v4595_v20 = vld [vmem:[#allocation3 + $0x115] sm:$0xff]  ;;  %9555 = vmatprep.mubr.f32.mxu1 %v4647_v53  ;;  %v4596_v3 = vld [vmem:[#allocation3 + $0x11d] sm:$0xff]  ;;  %v6202_v0 = vld [vmem:[#allocation5 + $0x2b8] sm:$0xff] }
 0x343   : > { %9641 = vmatprep.mubr.f32.mxu0 %v4595_v20  ;;  %9556 = vmatmul.mubr.f32.gmra.mxu1 %v4648_v33  ;;  %v5503_v10 = vld [vmem:[#allocation3 + $0x7f] sm:$0xff]  ;;  %v5505_v14 = vld [vmem:[#allocation3 + $0x8f] sm:$0xff]  ;;  %v5506_v7 = vld [vmem:[#allocation3 + $0x97] sm:$0xff] }
 0x344   : > { %9642 = vmatmul.mubr.f32.gmra.mxu0 %v4596_v3  ;;  %9676 = vmatprep.mubr.f32.mxu1 %v5156_v57  ;;  %v5507_v11 = vld [vmem:[#allocation3 + $0x9f] sm:$0xff]  ;;  %v5508_v21 = vld [vmem:[#allocation3 + $0xa7] sm:$0xff]  ;;  %v5509_v23 = vld [vmem:[#allocation3 + $0xaf] sm:$0xff] }
 0x345   : > { %9762 = vmatprep.mubr.f32.mxu0 %v5490_v6  ;;  %v5867_v24 = vld [vmem:[#allocation5 + $0x230] sm:$0xff]  ;;  %v5510_v15 = vld [vmem:[#allocation3 + $0xb7] sm:$0xff]  ;;  %v5513_v13 = vld [vmem:[#allocation3 + $0xcf] sm:$0xff] }
 0x346   : > { %v6201_v43 = vld [vmem:[#allocation5 + $0x2b0] sm:$0xff]  ;;  %v5866_v47 = vld [vmem:[#allocation5 + $0x228] sm:$0xff]  ;;  %v5865_v45 = vld [vmem:[#allocation5 + $0x220] sm:$0xff] }
 0x347   : > { %9677 = vmatmul.mubr.f32.vlgmr.msra.gmra.mxu1 %v5157_v61  ;;  %v6200_v52 = vld [vmem:[#allocation5 + $0x2a8] sm:$0xff]  ;;  %v5512_v54 = vld [vmem:[#allocation3 + $0xc7] sm:$0xff]  ;;  %v6199_v31 = vld [vmem:[#allocation5 + $0x2a0] sm:$0xff] }
 0x348   : > { %9763 = vmatmul.mubr.f32.vlgmr.msra.gmra.mxu0 %v5491_v17  ;;  %9679 = vmatprep.mubr.f32.mxu1 %v5490_v6  ;;  %v5511_v2 = vld [vmem:[#allocation3 + $0xbf] sm:$0xff]  ;;  %v5514_v34 = vld [vmem:[#allocation3 + $0xd7] sm:$0xff]  ;;  %v5864_v38 = vld [vmem:[#allocation5 + $0x218] sm:$0xff] }
 0x349   : > { %9765 = vmatprep.mubr.f32.mxu0 %v5492_v58  ;;  %9817 = vmatpush3.msra.mxu1 %v10330_v36  ;;  %v6198_v9 = vld [vmem:[#allocation5 + $0x298] sm:$0xff]  ;;  %v5515_v32 = vld [vmem:[#allocation3 + $0xdf] sm:$0xff]  ;;  %v5518_v56 = vld [vmem:[#allocation3 + $0xf7] sm:$0xff] }
 0x34a   : > { %9903 = vmatpush3.msra.mxu0 %v10331_v18  ;;  %9818 = vmatprep.subr.mxu1 %v5875_v28  ;;  %v5516_v59 = vld [vmem:[#allocation3 + $0xe7] sm:$0xff]  ;;  %v5517_v41 = vld [vmem:[#allocation3 + $0xef] sm:$0xff]  ;;  %v5862_v57 = vld [vmem:[#allocation5 + $0x208] sm:$0xff] }
 0x34b   : > { %9904 = vmatprep.subr.mxu0 %v6209_v62  ;;  %9680 = vmatmul.mubr.f32.gmra.mxu1 %v5491_v17  ;;  %v5863_v63 = vld [vmem:[#allocation5 + $0x210] sm:$0xff]  ;;  %v6196_v53 = vld [vmem:[#allocation5 + $0x288] sm:$0xff]  ;;  %v5861_v3 = vld [vmem:[#allocation5 + $0x200] sm:$0xff] }
 0x34c   : > { %9766 = vmatmul.mubr.f32.gmra.mxu0 %v5493_v48  ;;  %9682 = vmatprep.mubr.f32.mxu1 %v5492_v58  ;;  %v6197_v46 = vld [vmem:[#allocation5 + $0x290] sm:$0xff]  ;;  %v6195_v6 = vld [vmem:[#allocation5 + $0x280] sm:$0xff]  ;;  %v6544_v58 = vld [vmem:[#allocation5 + $0x378] sm:$0xff] }
 0x34d   : > { %9768 = vmatprep.mubr.f32.mxu0 %v5494_v5  ;;  %9819 = vmatpush3.msra.mxu1 %v5875_v28  ;;  %v5519_v20 = vld [vmem:[#allocation3 + $0xff] sm:$0xff]  ;;  %v5520_v33 = vld [vmem:[#allocation3 + $0x107] sm:$0xff]  ;;  %v5521_v61 = vld [vmem:[#allocation3 + $0x10f] sm:$0xff] }
 0x34e   : > { %9905 = vmatpush3.msra.mxu0 %v6209_v62  ;;  %9820 = vmatprep.subr.mxu1 %v5874_v55  ;;  %v5522_v17 = vld [vmem:[#allocation3 + $0x117] sm:$0xff]  ;;  %v6878_v28 = vld [vmem:[#allocation5 + $0x3f8] sm:$0xff]  ;;  %v5523_v62 = vld [vmem:[#allocation3 + $0x11f] sm:$0xff] }
 0x34f   : > { %9906 = vmatprep.subr.mxu0 %v6208_v16  ;;  %9683 = vmatmul.mubr.f32.gmra.mxu1 %v5493_v48  ;;  %v5524_v36 = vld [vmem:[#allocation3 + $0x127] sm:$0xff]  ;;  %v5525_v18 = vld [vmem:[#allocation3 + $0x12f] sm:$0xff]  ;;  %v5824_v48 = vld [vmem:[#allocation3 + $0x18] sm:$0xff] }
 0x350   : > { %9769 = vmatmul.mubr.f32.gmra.mxu0 %v5495_v29  ;;  %9685 = vmatprep.mubr.f32.mxu1 %v5494_v5  ;;  %v6158_v5 = vld [vmem:[#allocation3 + $0x19] sm:$0xff]  ;;  %vm14640_vm6 = vmmov %vm14639_vm5 }
 0x351   : > { %9771 = vmatprep.mubr.f32.mxu0 %v5496_v39  ;;  %9821 = vmatpush3.msra.mxu1 %v5874_v55  ;;  %v5825_v55 = vld [vmem:[#allocation3 + $0x20] sm:$0xff]  ;;  %vm14641_vm0 = vmmov %vm14639_vm5 }
 0x352   : > { %9907 = vmatpush3.msra.mxu0 %v6208_v16  ;;  %9822 = vmatprep.subr.mxu1 %v5873_v22  ;;  %v6159_v16 = vld [vmem:[#allocation3 + $0x21] sm:$0xff]  ;;  %vm14642_vm3 = vmmov %vm14641_vm0 }
 0x353   : > { %9908 = vmatprep.subr.mxu0 %v6207_v42  ;;  %9686 = vmatmul.mubr.f32.gmra.mxu1 %v5495_v29  ;;  %v5826_v29 = vld [vmem:[#allocation3 + $0x28] sm:$0xff]  ;;  %vm14643_vm7 = vmmov %vm14641_vm0 }
 0x354   : > { %9772 = vmatmul.mubr.f32.gmra.mxu0 %v5497_v12  ;;  %9688 = vmatprep.mubr.f32.mxu1 %v5496_v39  ;;  %v13266_v39 = vld [vmem:[#allocation3 + $0x29] sm:$0xff]  ;;  %vm14644_vm2 = vmmov %vm14641_vm0 }
 0x355   : > { %9774 = vmatprep.mubr.f32.mxu0 %v5498_v60  ;;  %9823 = vmatpush3.msra.mxu1 %v5873_v22  ;;  %v6543_v22 = vld [vmem:[#allocation5 + $0x370] sm:$0xff]  ;;  %vm14645_vm12 = vmmov %vm14641_vm0 }
 0x356   : > { %9909 = vmatpush3.msra.mxu0 %v6207_v42  ;;  %9824 = vmatprep.subr.mxu1 %v5872_v26  ;;  %v6877_v42 = vld [vmem:[#allocation5 + $0x3f0] sm:$0xff]  ;;  %vm14646_vm9 = vmmov %vm14641_vm0 }
 0x357   : > { %9910 = vmatprep.subr.mxu0 %v6206_v44  ;;  %9689 = vmatmul.mubr.f32.gmra.mxu1 %v5497_v12  ;;  %v5827_v12 = vld [vmem:[#allocation3 + $0x30] sm:$0xff]  ;;  %vm14647_vm8 = vmmov %vm14641_vm0 }
 0x358   : > { %9775 = vmatmul.mubr.f32.gmra.mxu0 %v5499_v50  ;;  %9691 = vmatprep.mubr.f32.mxu1 %v5498_v60  ;;  %v13269_v60 = vld [vmem:[#allocation3 + $0x31] sm:$0xff]  ;;  %vm14648_vm4 = vmmov %vm14641_vm0 }
 0x359   : > { %9777 = vmatprep.mubr.f32.mxu0 %v5500_v8  ;;  %9825 = vmatpush3.msra.mxu1 %v5872_v26  ;;  %v5828_v26 = vld [vmem:[#allocation3 + $0x38] sm:$0xff]  ;;  %vm14649_vm15 = vmmov %vm14641_vm0 }
 0x35a   : > { %9911 = vmatpush3.msra.mxu0 %v6206_v44  ;;  %9826 = vmatprep.subr.mxu1 %v5871_v25  ;;  %v13272_v44 = vld [vmem:[#allocation3 + $0x39] sm:$0xff]  ;;  %vm14650_vm13 = vmmov %vm14641_vm0 }
 0x35b   : > { %9912 = vmatprep.subr.mxu0 %v6205_v1  ;;  %9692 = vmatmul.mubr.f32.gmra.mxu1 %v5499_v50  ;;  %v6542_v50 = vld [vmem:[#allocation5 + $0x368] sm:$0xff]  ;;  %vm14651_vm1 = vmmov %vm14641_vm0 }
 0x35c   : > { %9778 = vmatmul.mubr.f32.gmra.mxu0 %v5501_v49  ;;  %9694 = vmatprep.mubr.f32.mxu1 %v5500_v8  ;;  %v6876_v8 = vld [vmem:[#allocation5 + $0x3e8] sm:$0xff]  ;;  %vm14652_vm10 = vmmov %vm14641_vm0 }
 0x35d   : > { %9780 = vmatprep.mubr.f32.mxu0 %v5502_v4  ;;  %9827 = vmatpush3.msra.mxu1 %v5871_v25  ;;  %v5829_v25 = vld [vmem:[#allocation3 + $0x40] sm:$0xff]  ;;  %vm14653_vm11 = vmmov %vm14641_vm0 }
 0x35e   : > { %9913 = vmatpush3.msra.mxu0 %v6205_v1  ;;  %9828 = vmatprep.subr.mxu1 %v5870_v35  ;;  %v13275_v1 = vld [vmem:[#allocation3 + $0x41] sm:$0xff]  ;;  %vm14654_vm14 = vmmov %vm14641_vm0 }
 0x35f   : > { %9914 = vmatprep.subr.mxu0 %v6204_v40  ;;  %9695 = vmatmul.mubr.f32.gmra.mxu1 %v5501_v49  ;;  %v5830_v49 = vld [vmem:[#allocation3 + $0x48] sm:$0xff] }
 0x360   : > { %9781 = vmatmul.mubr.f32.gmra.mxu0 %v5503_v10  ;;  %9697 = vmatprep.mubr.f32.mxu1 %v5502_v4  ;;  %v13278_v4 = vld [vmem:[#allocation3 + $0x49] sm:$0xff] }
 0x361   : > { %9783 = vmatprep.mubr.f32.mxu0 %v5504_v27  ;;  %9829 = vmatpush3.msra.mxu1 %v5870_v35  ;;  %v6541_v35 = vld [vmem:[#allocation5 + $0x360] sm:$0xff] }
 0x362   : > { %9915 = vmatpush3.msra.mxu0 %v6204_v40  ;;  %9830 = vmatprep.subr.mxu1 %v5869_v19  ;;  %v6875_v40 = vld [vmem:[#allocation5 + $0x3e0] sm:$0xff] }
 0x363   : > { %9916 = vmatprep.subr.mxu0 %v6203_v30  ;;  %9698 = vmatmul.mubr.f32.gmra.mxu1 %v5503_v10  ;;  %v5831_v10 = vld [vmem:[#allocation3 + $0x50] sm:$0xff] }
 0x364   : > { %9784 = vmatmul.mubr.f32.gmra.mxu0 %v5505_v14  ;;  %9700 = vmatprep.mubr.f32.mxu1 %v5504_v27  ;;  %v13281_v27 = vld [vmem:[#allocation3 + $0x51] sm:$0xff] }
 0x365   : > { %9786 = vmatprep.mubr.f32.mxu0 %v5506_v7  ;;  %9831 = vmatpush3.msra.mxu1 %v5869_v19  ;;  %v5832_v19 = vld [vmem:[#allocation3 + $0x58] sm:$0xff] }
 0x366   : > { %9917 = vmatpush3.msra.mxu0 %v6203_v30  ;;  %9832 = vmatprep.subr.mxu1 %v5868_v37  ;;  %v13284_v30 = vld [vmem:[#allocation3 + $0x59] sm:$0xff] }
 0x367   : > { %9918 = vmatprep.subr.mxu0 %v6202_v0  ;;  %9701 = vmatmul.mubr.f32.gmra.mxu1 %v5505_v14  ;;  %v6540_v14 = vld [vmem:[#allocation5 + $0x358] sm:$0xff] }
 0x368   : > { %9787 = vmatmul.mubr.f32.gmra.mxu0 %v5507_v11  ;;  %9703 = vmatprep.mubr.f32.mxu1 %v5506_v7  ;;  %v6874_v7 = vld [vmem:[#allocation5 + $0x3d8] sm:$0xff] }
 0x369   : > { %9789 = vmatprep.mubr.f32.mxu0 %v5508_v21  ;;  %9833 = vmatpush3.msra.mxu1 %v5868_v37  ;;  %v5833_v37 = vld [vmem:[#allocation3 + $0x60] sm:$0xff] }
 0x36a   : > { %9919 = vmatpush3.msra.mxu0 %v6202_v0  ;;  %9834 = vmatprep.subr.mxu1 %v5867_v24  ;;  %v13287_v0 = vld [vmem:[#allocation3 + $0x61] sm:$0xff] }
 0x36b   : > { %9920 = vmatprep.subr.mxu0 %v6201_v43  ;;  %9704 = vmatmul.mubr.f32.gmra.mxu1 %v5507_v11  ;;  %v5834_v11 = vld [vmem:[#allocation3 + $0x68] sm:$0xff] }
 0x36c   : > { %9790 = vmatmul.mubr.f32.gmra.mxu0 %v5509_v23  ;;  %9706 = vmatprep.mubr.f32.mxu1 %v5508_v21  ;;  %v13290_v21 = vld [vmem:[#allocation3 + $0x69] sm:$0xff] }
 0x36d   : > { %9792 = vmatprep.mubr.f32.mxu0 %v5510_v15  ;;  %9835 = vmatpush3.msra.mxu1 %v5867_v24  ;;  %v6539_v24 = vld [vmem:[#allocation5 + $0x350] sm:$0xff] }
 0x36e   : > { %9921 = vmatpush3.msra.mxu0 %v6201_v43  ;;  %9836 = vmatprep.subr.mxu1 %v5866_v47  ;;  %v6873_v43 = vld [vmem:[#allocation5 + $0x3d0] sm:$0xff] }
 0x36f   : > { %9922 = vmatprep.subr.mxu0 %v6200_v52  ;;  %9707 = vmatmul.mubr.f32.gmra.mxu1 %v5509_v23  ;;  %v5835_v23 = vld [vmem:[#allocation3 + $0x70] sm:$0xff] }
 0x370   : > { %9793 = vmatmul.mubr.f32.gmra.mxu0 %v5511_v2  ;;  %9709 = vmatprep.mubr.f32.mxu1 %v5510_v15  ;;  %v13293_v15 = vld [vmem:[#allocation3 + $0x71] sm:$0xff] }
 0x371   : > { %9795 = vmatprep.mubr.f32.mxu0 %v5512_v54  ;;  %9837 = vmatpush3.msra.mxu1 %v5866_v47  ;;  %v5836_v47 = vld [vmem:[#allocation3 + $0x78] sm:$0xff] }
 0x372   : > { %9923 = vmatpush3.msra.mxu0 %v6200_v52  ;;  %9838 = vmatprep.subr.mxu1 %v5865_v45  ;;  %v13296_v52 = vld [vmem:[#allocation3 + $0x79] sm:$0xff] }
 0x373   : > { %9924 = vmatprep.subr.mxu0 %v6199_v31  ;;  %9710 = vmatmul.mubr.f32.gmra.mxu1 %v5511_v2  ;;  %v6538_v2 = vld [vmem:[#allocation5 + $0x348] sm:$0xff] }
 0x374   : > { %9796 = vmatmul.mubr.f32.gmra.mxu0 %v5513_v13  ;;  %9712 = vmatprep.mubr.f32.mxu1 %v5512_v54  ;;  %v6872_v54 = vld [vmem:[#allocation5 + $0x3c8] sm:$0xff] }
 0x375   : > { %9798 = vmatprep.mubr.f32.mxu0 %v5514_v34  ;;  %9839 = vmatpush3.msra.mxu1 %v5865_v45  ;;  %v5837_v45 = vld [vmem:[#allocation3 + $0x80] sm:$0xff] }
 0x376   : > { %9925 = vmatpush3.msra.mxu0 %v6199_v31  ;;  %9840 = vmatprep.subr.mxu1 %v5864_v38  ;;  %v13299_v31 = vld [vmem:[#allocation3 + $0x81] sm:$0xff] }
 0x377   : > { %9926 = vmatprep.subr.mxu0 %v6198_v9  ;;  %9713 = vmatmul.mubr.f32.gmra.mxu1 %v5513_v13  ;;  %v5838_v13 = vld [vmem:[#allocation3 + $0x88] sm:$0xff] }
 0x378   : > { %9799 = vmatmul.mubr.f32.gmra.mxu0 %v5515_v32  ;;  %9715 = vmatprep.mubr.f32.mxu1 %v5514_v34  ;;  %v13302_v34 = vld [vmem:[#allocation3 + $0x89] sm:$0xff] }
 0x379   : > { %9801 = vmatprep.mubr.f32.mxu0 %v5516_v59  ;;  %9841 = vmatpush3.msra.mxu1 %v5864_v38  ;;  %v6537_v38 = vld [vmem:[#allocation5 + $0x340] sm:$0xff] }
 0x37a   : > { %9927 = vmatpush3.msra.mxu0 %v6198_v9  ;;  %9842 = vmatprep.subr.mxu1 %v5863_v63  ;;  %v6871_v9 = vld [vmem:[#allocation5 + $0x3c0] sm:$0xff] }
 0x37b   : > { %9928 = vmatprep.subr.mxu0 %v6197_v46  ;;  %9716 = vmatmul.mubr.f32.gmra.mxu1 %v5515_v32  ;;  %v5839_v32 = vld [vmem:[#allocation3 + $0x90] sm:$0xff] }
 0x37c   : > { %9802 = vmatmul.mubr.f32.gmra.mxu0 %v5517_v41  ;;  %9718 = vmatprep.mubr.f32.mxu1 %v5516_v59  ;;  %v13305_v59 = vld [vmem:[#allocation3 + $0x91] sm:$0xff] }
 0x37d   : > { %9804 = vmatprep.mubr.f32.mxu0 %v5518_v56  ;;  %9843 = vmatpush3.msra.mxu1 %v5863_v63  ;;  %v5840_v63 = vld [vmem:[#allocation3 + $0x98] sm:$0xff] }
 0x37e   : > { %9929 = vmatpush3.msra.mxu0 %v6197_v46  ;;  %9844 = vmatprep.subr.mxu1 %v5862_v57  ;;  %v13308_v46 = vld [vmem:[#allocation3 + $0x99] sm:$0xff] }
 0x37f   : > { %9930 = vmatprep.subr.mxu0 %v6196_v53  ;;  %9719 = vmatmul.mubr.f32.gmra.mxu1 %v5517_v41  ;;  %v6536_v41 = vld [vmem:[#allocation5 + $0x338] sm:$0xff] }
 0x380   : > { %9805 = vmatmul.mubr.f32.gmra.mxu0 %v5519_v20  ;;  %9721 = vmatprep.mubr.f32.mxu1 %v5518_v56  ;;  %v6870_v56 = vld [vmem:[#allocation5 + $0x3b8] sm:$0xff] }
 0x381   : > { %9807 = vmatprep.mubr.f32.mxu0 %v5520_v33  ;;  %9845 = vmatpush3.msra.mxu1 %v5862_v57  ;;  %v5841_v57 = vld [vmem:[#allocation3 + $0xa0] sm:$0xff] }
 0x382   : > { %9931 = vmatpush3.msra.mxu0 %v6196_v53  ;;  %9846 = vmatprep.subr.mxu1 %v5861_v3  ;;  %v13311_v53 = vld [vmem:[#allocation3 + $0xa1] sm:$0xff] }
 0x383   : > { %9932 = vmatprep.subr.mxu0 %v6195_v6  ;;  %9722 = vmatmul.mubr.f32.gmra.mxu1 %v5519_v20  ;;  %v5842_v20 = vld [vmem:[#allocation3 + $0xa8] sm:$0xff] }
 0x384   : > { %9808 = vmatmul.mubr.f32.gmra.mxu0 %v5521_v61  ;;  %9724 = vmatprep.mubr.f32.mxu1 %v5520_v33  ;;  %v13314_v33 = vld [vmem:[#allocation3 + $0xa9] sm:$0xff] }
 0x385   : > { %9810 = vmatprep.mubr.f32.mxu0 %v5522_v17  ;;  %9847 = vmatpush3.msra.mxu1 %v5861_v3  ;;  %v6535_v3 = vld [vmem:[#allocation5 + $0x330] sm:$0xff] }
 0x386   : > { %9933 = vmatpush3.msra.mxu0 %v6195_v6  ;;  %9988 = vmatprep.subr.mxu1 %v6544_v58  ;;  %v6869_v6 = vld [vmem:[#allocation5 + $0x3b0] sm:$0xff] }
 0x387   : > { %10074 = vmatprep.subr.mxu0 %v6878_v28  ;;  %9725 = vmatmul.mubr.f32.gmra.mxu1 %v5521_v61  ;;  %v5843_v61 = vld [vmem:[#allocation3 + $0xb0] sm:$0xff] }
 0x388   : > { %9811 = vmatmul.mubr.f32.gmra.mxu0 %v5523_v62  ;;  %9727 = vmatprep.mubr.f32.mxu1 %v5522_v17  ;;  %v13317_v17 = vld [vmem:[#allocation3 + $0xb1] sm:$0xff] }
 0x389   : > { %9813 = vmatprep.mubr.f32.mxu0 %v5524_v36  ;;  %v6868_v36 = vld [vmem:[#allocation5 + $0x3a8] sm:$0xff] }
 0x38b   : > { %9728 = vmatmul.mubr.f32.gmra.mxu1 %v5523_v62  ;;  %v6534_v62 = vld [vmem:[#allocation5 + $0x328] sm:$0xff] }
 0x38c   : > { %9814 = vmatmul.mubr.f32.gmra.mxu0 %v5525_v18  ;;  %9848 = vmatprep.mubr.f32.mxu1 %v5824_v48  ;;  %v5845_v18 = vld [vmem:[#allocation3 + $0xc0] sm:$0xff] }
 0x38d   : > { %9934 = vmatprep.mubr.f32.mxu0 %v6158_v5  ;;  %v13323_v48 = vld [vmem:[#allocation3 + $0xc1] sm:$0xff] }
 0x38e   : > { %v5846_v5 = vld [vmem:[#allocation3 + $0xc8] sm:$0xff] }
 0x38f   : > { %9849 = vmatmul.mubr.f32.vlgmr.msra.gmra.mxu1 %v5825_v55  ;;  %v13326_v55 = vld [vmem:[#allocation3 + $0xc9] sm:$0xff] }
 0x390   : > { %9935 = vmatmul.mubr.f32.vlgmr.msra.gmra.mxu0 %v6159_v16  ;;  %9851 = vmatprep.mubr.f32.mxu1 %v5826_v29  ;;  %v6533_v16 = vld [vmem:[#allocation5 + $0x320] sm:$0xff] }
 0x391   : > { %9937 = vmatprep.mubr.f32.mxu0 %v13266_v39  ;;  %9989 = vmatpush3.msra.mxu1 %v6544_v58  ;;  %v5844_v58 = vld [vmem:[#allocation3 + $0xb8] sm:$0xff]  ;;  %v6867_v29 = vld [vmem:[#allocation5 + $0x3a0] sm:$0xff] }
 0x392   : > { %10075 = vmatpush3.msra.mxu0 %v6878_v28  ;;  %9990 = vmatprep.subr.mxu1 %v6543_v22  ;;  %v13320_v28 = vld [vmem:[#allocation3 + $0xb9] sm:$0xff] }
 0x393   : > { %10076 = vmatprep.subr.mxu0 %v6877_v42  ;;  %9852 = vmatmul.mubr.f32.gmra.mxu1 %v5827_v12  ;;  %v5848_v12 = vld [vmem:[#allocation3 + $0xd8] sm:$0xff] }
 0x394   : > { %9938 = vmatmul.mubr.f32.gmra.mxu0 %v13269_v60  ;;  %9854 = vmatprep.mubr.f32.mxu1 %v5828_v26  ;;  %v13332_v26 = vld [vmem:[#allocation3 + $0xd9] sm:$0xff] }
 0x395   : > { %9940 = vmatprep.mubr.f32.mxu0 %v13272_v44  ;;  %9991 = vmatpush3.msra.mxu1 %v6543_v22  ;;  %v5847_v22 = vld [vmem:[#allocation3 + $0xd0] sm:$0xff] }
 0x396   : > { %10077 = vmatpush3.msra.mxu0 %v6877_v42  ;;  %9992 = vmatprep.subr.mxu1 %v6542_v50  ;;  %v13329_v42 = vld [vmem:[#allocation3 + $0xd1] sm:$0xff] }
 0x397   : > { %10078 = vmatprep.subr.mxu0 %v6876_v8  ;;  %9855 = vmatmul.mubr.f32.gmra.mxu1 %v5829_v25  ;;  %v5849_v25 = vld [vmem:[#allocation3 + $0xe0] sm:$0xff] }
 0x398   : > { %9941 = vmatmul.mubr.f32.gmra.mxu0 %v13275_v1  ;;  %9857 = vmatprep.mubr.f32.mxu1 %v5830_v49  ;;  %v13335_v49 = vld [vmem:[#allocation3 + $0xe1] sm:$0xff] }
 0x399   : > { %9943 = vmatprep.mubr.f32.mxu0 %v13278_v4  ;;  %9993 = vmatpush3.msra.mxu1 %v6542_v50  ;;  %v6532_v50 = vld [vmem:[#allocation5 + $0x318] sm:$0xff] }
 0x39a   : > { %10079 = vmatpush3.msra.mxu0 %v6876_v8  ;;  %9994 = vmatprep.subr.mxu1 %v6541_v35  ;;  %v6866_v8 = vld [vmem:[#allocation5 + $0x398] sm:$0xff] }
 0x39b   : > { %10080 = vmatprep.subr.mxu0 %v6875_v40  ;;  %9858 = vmatmul.mubr.f32.gmra.mxu1 %v5831_v10  ;;  %v6531_v10 = vld [vmem:[#allocation5 + $0x310] sm:$0xff] }
 0x39c   : > { %9944 = vmatmul.mubr.f32.gmra.mxu0 %v13281_v27  ;;  %9860 = vmatprep.mubr.f32.mxu1 %v5832_v19  ;;  %v6865_v19 = vld [vmem:[#allocation5 + $0x390] sm:$0xff] }
 0x39d   : > { %9946 = vmatprep.mubr.f32.mxu0 %v13284_v30  ;;  %9995 = vmatpush3.msra.mxu1 %v6541_v35  ;;  %v5850_v35 = vld [vmem:[#allocation3 + $0xe8] sm:$0xff] }
 0x39e   : > { %10081 = vmatpush3.msra.mxu0 %v6875_v40  ;;  %9996 = vmatprep.subr.mxu1 %v6540_v14  ;;  %v13338_v40 = vld [vmem:[#allocation3 + $0xe9] sm:$0xff] }
 0x39f   : > { %10082 = vmatprep.subr.mxu0 %v6874_v7  ;;  %9861 = vmatmul.mubr.f32.gmra.mxu1 %v5833_v37  ;;  %v5851_v37 = vld [vmem:[#allocation3 + $0xf0] sm:$0xff] }
 0x3a0   : > { %9947 = vmatmul.mubr.f32.gmra.mxu0 %v13287_v0  ;;  %9863 = vmatprep.mubr.f32.mxu1 %v5834_v11  ;;  %v13345_v11 = vld [vmem:[#allocation3 + $0xf1] sm:$0xff] }
 0x3a1   : > { %9949 = vmatprep.mubr.f32.mxu0 %v13290_v21  ;;  %9997 = vmatpush3.msra.mxu1 %v6540_v14  ;;  %v13341_v14 = vpop.f32.mrf.mxu1 }
 0x3a2   : > { %10083 = vmatpush3.msra.mxu0 %v6874_v7  ;;  %9998 = vmatprep.subr.mxu1 %v6539_v24  ;;  %v13343_v7 = vpop.f32.mrf.mxu0 }
 0x3a3   : > { %10084 = vmatprep.subr.mxu0 %v6873_v43  ;;  %9864 = vmatmul.mubr.f32.gmra.mxu1 %v5835_v23 }
 0x3a4   : > { %9950 = vmatmul.mubr.f32.gmra.mxu0 %v13293_v15  ;;  %9866 = vmatprep.mubr.f32.mxu1 %v5836_v47  ;;  %v13348_v47 = vld [vmem:[#allocation3 + $0xf9] sm:$0xff] }
 0x3a5   : > { %9952 = vmatprep.mubr.f32.mxu0 %v13296_v52  ;;  %9999 = vmatpush3.msra.mxu1 %v6539_v24  ;;  %v5852_v24 = vld [vmem:[#allocation3 + $0xf8] sm:$0xff] }
 0x3a6   : > { %10085 = vmatpush3.msra.mxu0 %v6873_v43  ;;  %10000 = vmatprep.subr.mxu1 %v6538_v2 }
 0x3a7   : > { %10086 = vmatprep.subr.mxu0 %v6872_v54  ;;  %9867 = vmatmul.mubr.f32.gmra.mxu1 %v5837_v45 }
 0x3a8   : > { %9953 = vmatmul.mubr.f32.gmra.mxu0 %v13299_v31  ;;  %9869 = vmatprep.mubr.f32.mxu1 %v5838_v13 }
 0x3a9   : > { %9955 = vmatprep.mubr.f32.mxu0 %v13302_v34  ;;  %10001 = vmatpush3.msra.mxu1 %v6538_v2  ;;  %v6530_v2 = vld [vmem:[#allocation5 + $0x308] sm:$0xff] }
 0x3aa   : > { %10087 = vmatpush3.msra.mxu0 %v6872_v54  ;;  %10002 = vmatprep.subr.mxu1 %v6537_v38  ;;  %v6864_v54 = vld [vmem:[#allocation5 + $0x388] sm:$0xff] }
 0x3ab   : > { %10088 = vmatprep.subr.mxu0 %v6871_v9  ;;  %9870 = vmatmul.mubr.f32.gmra.mxu1 %v5839_v32  ;;  %v5853_v32 = vld [vmem:[#allocation3 + $0x100] sm:$0xff] }
 0x3ac   : > { %9956 = vmatmul.mubr.f32.gmra.mxu0 %v13305_v59  ;;  %9872 = vmatprep.mubr.f32.mxu1 %v5840_v63  ;;  %v13355_v63 = vld [vmem:[#allocation3 + $0x101] sm:$0xff] }
 0x3ad   : > { %9958 = vmatprep.mubr.f32.mxu0 %v13308_v46  ;;  %10003 = vmatpush3.msra.mxu1 %v6537_v38 }
 0x3ae   : > { %10089 = vmatpush3.msra.mxu0 %v6871_v9  ;;  %10004 = vmatprep.subr.mxu1 %v6536_v41 }
 0x3af   : > { %10090 = vmatprep.subr.mxu0 %v6870_v56  ;;  %9873 = vmatmul.mubr.f32.gmra.mxu1 %v5841_v57 }
 0x3b0   : > { %9959 = vmatmul.mubr.f32.gmra.mxu0 %v13311_v53  ;;  %9875 = vmatprep.mubr.f32.mxu1 %v5842_v20  ;;  %v13358_v20 = vld [vmem:[#allocation3 + $0x109] sm:$0xff] }
 0x3b1   : > { %9961 = vmatprep.mubr.f32.mxu0 %v13314_v33  ;;  %10005 = vmatpush3.msra.mxu1 %v6536_v41  ;;  %v5854_v41 = vld [vmem:[#allocation3 + $0x108] sm:$0xff] }
 0x3b2   : > { %10091 = vmatpush3.msra.mxu0 %v6870_v56  ;;  %10006 = vmatprep.subr.mxu1 %v6535_v3 }
 0x3b3   : > { %10092 = vmatprep.subr.mxu0 %v6869_v6  ;;  %9876 = vmatmul.mubr.f32.gmra.mxu1 %v5843_v61 }
 0x3b4   : > { %9962 = vmatmul.mubr.f32.gmra.mxu0 %v13317_v17  ;;  %9878 = vmatprep.mubr.f32.mxu1 %v5844_v58 }
 0x3b5   : > { %9964 = vmatprep.mubr.f32.mxu0 %v13320_v28  ;;  %10007 = vmatpush3.msra.mxu1 %v6535_v3  ;;  %v9509_v43 = vpop.f32.mrf.mxu1  ;;  %v6529_v3 = vld [vmem:[#allocation5 + $0x300] sm:$0xff] }
 0x3b6   : > { %10093 = vmatpush3.msra.mxu0 %v6869_v6  ;;  %10008 = vmatprep.subr.mxu1 %v6534_v62  ;;  %v9595_v23 = vpop.f32.mrf.mxu0  ;;  %v6863_v6 = vld [vmem:[#allocation5 + $0x380] sm:$0xff] }
 0x3b7   : > { %10094 = vmatprep.subr.mxu0 %v6868_v36  ;;  %9879 = vmatmul.mubr.f32.gmra.mxu1 %v5845_v18  ;;  %v13350_v45 = vadd.f32 %v9595_v23, %v9509_v43  ;;  %v4742_v13 = vpop.f32.mrf.mxu1  ;;  %v5855_v18 = vld [vmem:[#allocation3 + $0x110] sm:$0xff]  ;;  %v5858_v23 = vld [vmem:[#allocation3 + $0x128] sm:$0xff] }
 0x3b8   : > { %9965 = vmatmul.mubr.f32.gmra.mxu0 %v13323_v48  ;;  %9881 = vmatprep.mubr.f32.mxu1 %v5846_v5  ;;  %v4987_v38 = vpop.f32.mrf.mxu0  ;;  %v13365_v5 = vld [vmem:[#allocation3 + $0x111] sm:$0xff] }
 0x3b9   : > { %9967 = vmatprep.mubr.f32.mxu0 %v13326_v55  ;;  %10009 = vmatpush3.msra.mxu1 %v6534_v62  ;;  %v13353_v9 = vadd.f32 %v4987_v38, %v4742_v13 }
 0x3ba   : > { %10095 = vmatpush3.msra.mxu0 %v6868_v36  ;;  %10010 = vmatprep.subr.mxu1 %v6533_v16  ;;  %v9512_v56 = vpop.f32.mrf.mxu1 }
 0x3bb   : > { %10096 = vmatprep.subr.mxu0 %v6867_v29  ;;  %9882 = vmatmul.mubr.f32.gmra.mxu1 %v5847_v22  ;;  %v9598_v57 = vpop.f32.mrf.mxu0  ;;  %v5856_v22 = vld [vmem:[#allocation3 + $0x118] sm:$0xff] }
 0x3bc   : > { %9968 = vmatmul.mubr.f32.gmra.mxu0 %v13329_v42  ;;  %9884 = vmatprep.mubr.f32.mxu1 %v5848_v12  ;;  %v13360_v61 = vadd.f32 %v9598_v57, %v9512_v56  ;;  %v4752_v58 = vpop.f32.mrf.mxu1  ;;  %v13368_v12 = vld [vmem:[#allocation3 + $0x119] sm:$0xff]  ;;  %v13385_v56 = vld [vmem:[#allocation3 + $0x131] sm:$0xff] }
 0x3bd   : > { %9970 = vmatprep.mubr.f32.mxu0 %v13332_v26  ;;  %10011 = vmatpush3.msra.mxu1 %v6533_v16  ;;  %v4997_v62 = vpop.f32.mrf.mxu0 }
 0x3be   : > { %10097 = vmatpush3.msra.mxu0 %v6867_v29  ;;  %10012 = vmatprep.subr.mxu1 %v6532_v50  ;;  %v13363_v36 = vadd.f32 %v4997_v62, %v4752_v58 }
 0x3bf   : > { %10098 = vmatprep.subr.mxu0 %v6866_v8  ;;  %9885 = vmatmul.mubr.f32.gmra.mxu1 %v5849_v25  ;;  %v9515_v16 = vpop.f32.mrf.mxu1 }
 0x3c0   : > { %9971 = vmatmul.mubr.f32.gmra.mxu0 %v13335_v49  ;;  %9887 = vmatprep.mubr.f32.mxu1 %v5850_v35  ;;  %v9601_v29 = vpop.f32.mrf.mxu0 }
 0x3c1   : > { %9973 = vmatprep.mubr.f32.mxu0 %v13338_v40  ;;  %10013 = vmatpush3.msra.mxu1 %v6532_v50  ;;  %v7212_v50 = vld [vmem:[#allocation5 + $0x478] sm:$0xff]  ;;  %v4762_v25 = vpop.f32.mrf.mxu1 }
 0x3c2   : > { %10099 = vmatpush3.msra.mxu0 %v6866_v8  ;;  %10014 = vmatprep.subr.mxu1 %v6531_v10  ;;  %v13370_v8 = vadd.f32 %v9601_v29, %v9515_v16  ;;  %v5007_v35 = vpop.f32.mrf.mxu0  ;;  %v6827_v29 = vld [vmem:[#allocation3 + $0x32] sm:$0xff] }
 0x3c3   : > { %10100 = vmatprep.subr.mxu0 %v6865_v19  ;;  %9888 = vmatmul.mubr.f32.gmra.mxu1 %v5851_v37  ;;  %v13375_v37 = vld [vmem:[#allocation3 + $0x121] sm:$0xff] }
 0x3c4   : > { %9974 = vmatmul.mubr.f32.gmra.mxu0 %v13345_v11  ;;  %9890 = vmatprep.mubr.f32.mxu1 %v5852_v24  ;;  %v9518_v24 = vpop.f32.mrf.mxu1 }
 0x3c5   : > { %9976 = vmatprep.mubr.f32.mxu0 %v13348_v47  ;;  %10015 = vmatpush3.msra.mxu1 %v6531_v10  ;;  %v13373_v10 = vadd.f32 %v5007_v35, %v4762_v25  ;;  %v6828_v35 = vld [vmem:[#allocation3 + $0x3a] sm:$0xff] }
 0x3c6   : > { %10101 = vmatpush3.msra.mxu0 %v6865_v19  ;;  %10016 = vmatprep.subr.mxu1 %v6530_v2  ;;  %v5857_v19 = vld [vmem:[#allocation3 + $0x120] sm:$0xff]  ;;  %v4772_v13 = vpop.f32.mrf.mxu1 }
 0x3c7   : > { %10102 = vmatprep.subr.mxu0 %v6864_v54  ;;  %9891 = vmatmul.mubr.f32.gmra.mxu1 %v5853_v32  ;;  %v9604_v43 = vpop.f32.mrf.mxu0 }
 0x3c8   : > { %9977 = vmatmul.mubr.f32.gmra.mxu0 %v13355_v63  ;;  %9893 = vmatprep.mubr.f32.mxu1 %v5854_v41  ;;  %v5859_v41 = vld [vmem:[#allocation3 + $0x130] sm:$0xff] }
 0x3c9   : > { %9979 = vmatprep.mubr.f32.mxu0 %v13358_v20  ;;  %10017 = vmatpush3.msra.mxu1 %v6530_v2  ;;  %v13378_v2 = vld [vmem:[#allocation3 + $0x129] sm:$0xff]  ;;  %v5017_v38 = vpop.f32.mrf.mxu0 }
 0x3ca   : > { %10103 = vmatpush3.msra.mxu0 %v6864_v54  ;;  %10018 = vmatprep.subr.mxu1 %v6529_v3  ;;  %v13380_v54 = vadd.f32 %v9604_v43, %v9518_v24  ;;  %v13383_v32 = vadd.f32 %v5017_v38, %v4772_v13  ;;  %v6829_v13 = vld [vmem:[#allocation3 + $0x42] sm:$0xff] }
 0x3cb   : > { %10104 = vmatprep.subr.mxu0 %v6863_v6  ;;  %9894 = vmatmul.mubr.f32.gmra.mxu1 %v5855_v18  ;;  %v9521_v57 = vpop.f32.mrf.mxu1 }
 0x3cc   : > { %9980 = vmatmul.mubr.f32.gmra.mxu0 %v13365_v5  ;;  %9896 = vmatprep.mubr.f32.mxu1 %v5856_v22 }
 0x3cd   : > { %9982 = vmatprep.mubr.f32.mxu0 %v13368_v12  ;;  %10019 = vmatpush3.msra.mxu1 %v6529_v3  ;;  %v9607_v3 = vpop.f32.mrf.mxu0  ;;  %v4782_v62 = vpop.f32.mrf.mxu1 }
 0x3ce   : > { %10105 = vmatpush3.msra.mxu0 %v6863_v6  ;;  %10160 = vmatprep.subr.mxu1 %v7212_v50  ;;  %v6826_v6 = vld [vmem:[#allocation3 + $0x2a] sm:$0xff]  ;;  %v13388_v58 = vadd.f32 %v9607_v3, %v9521_v57  ;;  %v7210_v57 = vld [vmem:[#allocation5 + $0x468] sm:$0xff] }
 0x3cf   : > { %9897 = vmatmul.mubr.f32.gmra.mxu1 %v5857_v19  ;;  %v5027_v18 = vpop.f32.mrf.mxu0  ;;  %v7211_v19 = vld [vmem:[#allocation5 + $0x470] sm:$0xff] }
 0x3d0   : > { %9983 = vmatmul.mubr.f32.gmra.mxu0 %v13375_v37  ;;  %9899 = vmatprep.mubr.f32.mxu1 %v5858_v23  ;;  %v13391_v16 = vadd.f32 %v5027_v18, %v4782_v62  ;;  %v6831_v62 = vld [vmem:[#allocation3 + $0x52] sm:$0xff] }
 0x3d1   : > { %9985 = vmatprep.mubr.f32.mxu0 %v13378_v2  ;;  %v9524_v22 = vpop.f32.mrf.mxu1 }
 0x3d2   : > { %v9610_v25 = vpop.f32.mrf.mxu0 }
 0x3d3   : > { %9900 = vmatmul.mubr.f32.gmra.mxu1 %v5859_v41  ;;  %v13394_v24 = vadd.f32 %v9610_v25, %v9524_v22  ;;  %v7209_v22 = vld [vmem:[#allocation5 + $0x460] sm:$0xff] }
 0x3d4   : > { %9986 = vmatmul.mubr.f32.gmra.mxu0 %v13385_v56  ;;  %10020 = vmatprep.mubr.f32.mxu1 %v13266_v39  ;;  %v4792_v39 = vpop.f32.mrf.mxu1  ;;  %v5037_v43 = vpop.f32.mrf.mxu0 }
 0x3d5   : > { %10106 = vmatprep.mubr.f32.mxu0 %v6826_v6  ;;  %v13397_v23 = vadd.f32 %v5037_v43, %v4792_v39  ;;  %v6833_v39 = vld [vmem:[#allocation3 + $0x62] sm:$0xff] }
 0x3d6   : > { %v9527_v38 = vpop.f32.mrf.mxu1  ;;  %v9613_v41 = vpop.f32.mrf.mxu0 }
 0x3d7   : > { %10021 = vmatmul.mubr.f32.vlgmr.msra.gmra.mxu1 %v13269_v60  ;;  %v6830_v60 = vld [vmem:[#allocation3 + $0x4a] sm:$0xff]  ;;  %v13400_v3 = vadd.f32 %v9613_v41, %v9527_v38 }
 0x3d8   : > { %10107 = vmatmul.mubr.f32.vlgmr.msra.gmra.mxu0 %v6827_v29  ;;  %10023 = vmatprep.mubr.f32.mxu1 %v13272_v44  ;;  %v4802_v44 = vpop.f32.mrf.mxu1  ;;  %v7208_v38 = vld [vmem:[#allocation5 + $0x458] sm:$0xff] }
 0x3d9   : > { %10109 = vmatprep.mubr.f32.mxu0 %v6828_v35  ;;  %10161 = vmatpush3.msra.mxu1 %v7212_v50  ;;  %v5047_v50 = vpop.f32.mrf.mxu0 }
 0x3da   : > { %10162 = vmatprep.subr.mxu1 %v7211_v19  ;;  %v13403_v6 = vadd.f32 %v5047_v50, %v4802_v44  ;;  %v6835_v44 = vld [vmem:[#allocation3 + $0x72] sm:$0xff] }
 0x3db   : > { %10024 = vmatmul.mubr.f32.gmra.mxu1 %v13275_v1  ;;  %v9616_v29 = vpop.f32.mrf.mxu0  ;;  %v6832_v1 = vld [vmem:[#allocation3 + $0x5a] sm:$0xff] }
 0x3dc   : > { %10110 = vmatmul.mubr.f32.gmra.mxu0 %v6829_v13  ;;  %10026 = vmatprep.mubr.f32.mxu1 %v13278_v4  ;;  %v9530_v18 = vpop.f32.mrf.mxu1 }
 0x3dd   : > { %10112 = vmatprep.mubr.f32.mxu0 %v6830_v60  ;;  %10163 = vmatpush3.msra.mxu1 %v7211_v19  ;;  %v13406_v25 = vadd.f32 %v9616_v29, %v9530_v18  ;;  %v5057_v35 = vpop.f32.mrf.mxu0  ;;  %v7207_v18 = vld [vmem:[#allocation5 + $0x450] sm:$0xff] }
 0x3de   : > { %10164 = vmatprep.subr.mxu1 %v7210_v57  ;;  %v4812_v4 = vpop.f32.mrf.mxu1 }
 0x3df   : > { %10027 = vmatmul.mubr.f32.gmra.mxu1 %v13281_v27  ;;  %v13409_v19 = vadd.f32 %v5057_v35, %v4812_v4  ;;  %v6834_v27 = vld [vmem:[#allocation3 + $0x6a] sm:$0xff]  ;;  %v6837_v4 = vld [vmem:[#allocation3 + $0x82] sm:$0xff] }
 0x3e0   : > { %10113 = vmatmul.mubr.f32.gmra.mxu0 %v6831_v62  ;;  %10029 = vmatprep.mubr.f32.mxu1 %v13284_v30 }
 0x3e1   : > { %10115 = vmatprep.mubr.f32.mxu0 %v6832_v1  ;;  %10165 = vmatpush3.msra.mxu1 %v7210_v57  ;;  %v9533_v43 = vpop.f32.mrf.mxu1  ;;  %v9619_v13 = vpop.f32.mrf.mxu0 }
 0x3e2   : > { %10166 = vmatprep.subr.mxu1 %v7209_v22  ;;  %v13412_v41 = vadd.f32 %v9619_v13, %v9533_v43  ;;  %v7206_v43 = vld [vmem:[#allocation5 + $0x448] sm:$0xff] }
 0x3e3   : > { %10030 = vmatmul.mubr.f32.gmra.mxu1 %v13287_v0  ;;  %v4822_v30 = vpop.f32.mrf.mxu1  ;;  %v5067_v60 = vpop.f32.mrf.mxu0  ;;  %v6836_v0 = vld [vmem:[#allocation3 + $0x7a] sm:$0xff] }
 0x3e4   : > { %10116 = vmatmul.mubr.f32.gmra.mxu0 %v6833_v39  ;;  %10032 = vmatprep.mubr.f32.mxu1 %v13290_v21  ;;  %v13415_v57 = vadd.f32 %v5067_v60, %v4822_v30  ;;  %v6839_v30 = vld [vmem:[#allocation3 + $0x92] sm:$0xff] }
 0x3e5   : > { %10118 = vmatprep.mubr.f32.mxu0 %v6834_v27  ;;  %10167 = vmatpush3.msra.mxu1 %v7209_v22 }
 0x3e6   : > { %10168 = vmatprep.subr.mxu1 %v7208_v38  ;;  %v9536_v50 = vpop.f32.mrf.mxu1  ;;  %v9622_v62 = vpop.f32.mrf.mxu0 }
 0x3e7   : > { %10033 = vmatmul.mubr.f32.gmra.mxu1 %v13293_v15  ;;  %v13418_v29 = vadd.f32 %v9622_v62, %v9536_v50  ;;  %v6838_v15 = vld [vmem:[#allocation3 + $0x8a] sm:$0xff] }
 0x3e8   : > { %10119 = vmatmul.mubr.f32.gmra.mxu0 %v6835_v44  ;;  %10035 = vmatprep.mubr.f32.mxu1 %v13296_v52  ;;  %v4832_v21 = vpop.f32.mrf.mxu1  ;;  %v5077_v1 = vpop.f32.mrf.mxu0  ;;  %v7205_v50 = vld [vmem:[#allocation5 + $0x440] sm:$0xff] }
 0x3e9   : > { %10121 = vmatprep.mubr.f32.mxu0 %v6836_v0  ;;  %10169 = vmatpush3.msra.mxu1 %v7208_v38  ;;  %v13421_v22 = vadd.f32 %v5077_v1, %v4832_v21  ;;  %v6841_v21 = vld [vmem:[#allocation3 + $0xa2] sm:$0xff] }
 0x3ea   : > { %10170 = vmatprep.subr.mxu1 %v7207_v18  ;;  %v9539_v35 = vpop.f32.mrf.mxu1  ;;  %v9625_v39 = vpop.f32.mrf.mxu0 }
 0x3eb   : > { %10036 = vmatmul.mubr.f32.gmra.mxu1 %v13299_v31  ;;  %v13424_v13 = vadd.f32 %v9625_v39, %v9539_v35  ;;  %v6840_v31 = vld [vmem:[#allocation3 + $0x9a] sm:$0xff]  ;;  %v7204_v35 = vld [vmem:[#allocation5 + $0x438] sm:$0xff] }
 0x3ec   : > { %10122 = vmatmul.mubr.f32.gmra.mxu0 %v6837_v4  ;;  %10038 = vmatprep.mubr.f32.mxu1 %v13302_v34  ;;  %v4842_v52 = vpop.f32.mrf.mxu1  ;;  %v5087_v27 = vpop.f32.mrf.mxu0 }
 0x3ed   : > { %10124 = vmatprep.mubr.f32.mxu0 %v6838_v15  ;;  %10171 = vmatpush3.msra.mxu1 %v7207_v18  ;;  %v13427_v38 = vadd.f32 %v5087_v27, %v4842_v52  ;;  %v6843_v52 = vld [vmem:[#allocation3 + $0xb2] sm:$0xff] }
 0x3ee   : > { %10172 = vmatprep.subr.mxu1 %v7206_v43  ;;  %v9542_v60 = vpop.f32.mrf.mxu1 }
 0x3ef   : > { %v9628_v44 = vpop.f32.mrf.mxu0  ;;  %10039 = vmatmul.mubr.f32.gmra.mxu1 %v13305_v59  ;;  %v6842_v59 = vld [vmem:[#allocation3 + $0xaa] sm:$0xff] }
 0x3f0   : > { %10125 = vmatmul.mubr.f32.gmra.mxu0 %v6839_v30  ;;  %v13430_v62 = vadd.f32 %v9628_v44, %v9542_v60  ;;  %10041 = vmatprep.mubr.f32.mxu1 %v13308_v46  ;;  %v4852_v34 = vpop.f32.mrf.mxu1  ;;  %v7203_v60 = vld [vmem:[#allocation5 + $0x430] sm:$0xff] }
 0x3f1   : > { %10127 = vmatprep.mubr.f32.mxu0 %v6840_v31  ;;  %v5097_v0 = vpop.f32.mrf.mxu0  ;;  %10173 = vmatpush3.msra.mxu1 %v7206_v43 }
 0x3f2   : > { %v13433_v18 = vadd.f32 %v5097_v0, %v4852_v34  ;;  %10174 = vmatprep.subr.mxu1 %v7205_v50  ;;  %v6845_v34 = vld [vmem:[#allocation3 + $0xc2] sm:$0xff] }
 0x3f3   : > { %v9545_v1 = vpop.f32.mrf.mxu1  ;;  %10042 = vmatmul.mubr.f32.gmra.mxu1 %v13311_v53  ;;  %v6844_v53 = vld [vmem:[#allocation3 + $0xba] sm:$0xff] }
 0x3f4   : > { %v9631_v4 = vpop.f32.mrf.mxu0  ;;  %10128 = vmatmul.mubr.f32.gmra.mxu0 %v6841_v21  ;;  %10044 = vmatprep.mubr.f32.mxu1 %v13314_v33 }
 0x3f5   : > { %v13436_v39 = vadd.f32 %v9631_v4, %v9545_v1  ;;  %10130 = vmatprep.mubr.f32.mxu0 %v6842_v59  ;;  %v4862_v46 = vpop.f32.mrf.mxu1  ;;  %10175 = vmatpush3.msra.mxu1 %v7205_v50  ;;  %v7202_v1 = vld [vmem:[#allocation5 + $0x428] sm:$0xff] }
 0x3f6   : > { %v5107_v15 = vpop.f32.mrf.mxu0  ;;  %10176 = vmatprep.subr.mxu1 %v7204_v35 }
 0x3f7   : > { %v13439_v43 = vadd.f32 %v5107_v15, %v4862_v46  ;;  %v9548_v27 = vpop.f32.mrf.mxu1  ;;  %10045 = vmatmul.mubr.f32.gmra.mxu1 %v13317_v17  ;;  %v6846_v17 = vld [vmem:[#allocation3 + $0xca] sm:$0xff]  ;;  %v6847_v46 = vld [vmem:[#allocation3 + $0xd2] sm:$0xff] }
 0x3f8   : > { %v9634_v30 = vpop.f32.mrf.mxu0  ;;  %10131 = vmatmul.mubr.f32.gmra.mxu0 %v6843_v52  ;;  %10047 = vmatprep.mubr.f32.mxu1 %v13320_v28 }
 0x3f9   : > { %v13442_v44 = vadd.f32 %v9634_v30, %v9548_v27  ;;  %10133 = vmatprep.mubr.f32.mxu0 %v6844_v53  ;;  %v4872_v33 = vpop.f32.mrf.mxu1  ;;  %10177 = vmatpush3.msra.mxu1 %v7204_v35  ;;  %v7201_v27 = vld [vmem:[#allocation5 + $0x420] sm:$0xff] }
 0x3fa   : > { %v5117_v31 = vpop.f32.mrf.mxu0  ;;  %10178 = vmatprep.subr.mxu1 %v7203_v60 }
 0x3fb   : > { %v13445_v50 = vadd.f32 %v5117_v31, %v4872_v33  ;;  %v9551_v0 = vpop.f32.mrf.mxu1  ;;  %10048 = vmatmul.mubr.f32.gmra.mxu1 %v13323_v48  ;;  %v6848_v48 = vld [vmem:[#allocation3 + $0xda] sm:$0xff]  ;;  %v6849_v33 = vld [vmem:[#allocation3 + $0xe2] sm:$0xff] }
 0x3fc   : > { %v9637_v21 = vpop.f32.mrf.mxu0  ;;  %10134 = vmatmul.mubr.f32.gmra.mxu0 %v6845_v34  ;;  %10050 = vmatprep.mubr.f32.mxu1 %v13326_v55 }
 0x3fd   : > { %v13448_v4 = vadd.f32 %v9637_v21, %v9551_v0  ;;  %10136 = vmatprep.mubr.f32.mxu0 %v6846_v17  ;;  %v4882_v28 = vpop.f32.mrf.mxu1  ;;  %10179 = vmatpush3.msra.mxu1 %v7203_v60  ;;  %v7200_v0 = vld [vmem:[#allocation5 + $0x418] sm:$0xff] }
 0x3fe   : > { %v5127_v59 = vpop.f32.mrf.mxu0  ;;  %10180 = vmatprep.subr.mxu1 %v7202_v1 }
 0x3ff   : > { %v13451_v35 = vadd.f32 %v5127_v59, %v4882_v28  ;;  %v9554_v15 = vpop.f32.mrf.mxu1  ;;  %10051 = vmatmul.mubr.f32.gmra.mxu1 %v13329_v42  ;;  %v6850_v42 = vld [vmem:[#allocation3 + $0xea] sm:$0xff]  ;;  %v6851_v28 = vld [vmem:[#allocation3 + $0xf2] sm:$0xff] }
 0x400   : > { %v9640_v52 = vpop.f32.mrf.mxu0  ;;  %10137 = vmatmul.mubr.f32.gmra.mxu0 %v6847_v46  ;;  %10053 = vmatprep.mubr.f32.mxu1 %v13332_v26 }
 0x401   : > { %v13454_v30 = vadd.f32 %v9640_v52, %v9554_v15  ;;  %10139 = vmatprep.mubr.f32.mxu0 %v6848_v48  ;;  %v4892_v55 = vpop.f32.mrf.mxu1  ;;  %10181 = vmatpush3.msra.mxu1 %v7202_v1  ;;  %v7199_v15 = vld [vmem:[#allocation5 + $0x410] sm:$0xff]  ;;  %v4978_v52 = vadd.f32 %v13343_v7, %v13341_v14  ;;  %v7198_v14 = vld [vmem:[#allocation5 + $0x408] sm:$0xff] }
 0x402   : > { %v5137_v53 = vpop.f32.mrf.mxu0  ;;  %10182 = vmatprep.subr.mxu1 %v7201_v27 }
 0x403   : > { %v13457_v60 = vadd.f32 %v5137_v53, %v4892_v55  ;;  %v9557_v31 = vpop.f32.mrf.mxu1  ;;  %10054 = vmatmul.mubr.f32.gmra.mxu1 %v13335_v49  ;;  %v6852_v49 = vld [vmem:[#allocation3 + $0xfa] sm:$0xff] }
 0x404   : > { %v9643_v34 = vpop.f32.mrf.mxu0  ;;  %10140 = vmatmul.mubr.f32.gmra.mxu0 %v6849_v33  ;;  %10056 = vmatprep.mubr.f32.mxu1 %v13338_v40  ;;  %v6853_v33 = vld [vmem:[#allocation3 + $0x102] sm:$0xff] }
 0x405   : > { %v13460_v21 = vadd.f32 %v9643_v34, %v9557_v31  ;;  %10142 = vmatprep.mubr.f32.mxu0 %v6850_v42  ;;  %v4902_v26 = vpop.f32.mrf.mxu1  ;;  %10183 = vmatpush3.msra.mxu1 %v7201_v27  ;;  %v6854_v34 = vld [vmem:[#allocation3 + $0x10a] sm:$0xff] }
 0x406   : > { %v5147_v17 = vpop.f32.mrf.mxu0  ;;  %10184 = vmatprep.subr.mxu1 %v7200_v0 }
 0x407   : > { %v13463_v1 = vadd.f32 %v5147_v17, %v4902_v26  ;;  %v9678_v59 = vpop.f32.mrf.mxu1  ;;  %10057 = vmatmul.mubr.f32.gmra.mxu1 %v13345_v11  ;;  %v6855_v17 = vld [vmem:[#allocation3 + $0x112] sm:$0xff] }
 0x408   : > { %v9764_v46 = vpop.f32.mrf.mxu0  ;;  %10143 = vmatmul.mubr.f32.gmra.mxu0 %v6851_v28  ;;  %v5455_v40 = vadd.f32 %v9678_v59, %v13264_v51  ;;  %10059 = vmatprep.mubr.f32.mxu1 %v13348_v47  ;;  %v6856_v59 = vld [vmem:[#allocation3 + $0x11a] sm:$0xff] }
 0x409   : > { %10145 = vmatprep.mubr.f32.mxu0 %v6852_v49  ;;  %v5275_v48 = vpop.f32.mrf.mxu1  ;;  %10185 = vmatpush3.msra.mxu1 %v7200_v0 }
 0x40a   : > { %v5609_v27 = vpop.f32.mrf.mxu0  ;;  %v13470_v55 = vadd.f32 %v9764_v46, %v5455_v40  ;;  %v5454_v53 = vadd.f32 %v5275_v48, %v4978_v52  ;;  %10186 = vmatprep.subr.mxu1 %v7199_v15  ;;  %v7197_v46 = vld [vmem:[#allocation5 + $0x400] sm:$0xff]  ;;  %v6857_v40 = vld [vmem:[#allocation3 + $0x122] sm:$0xff] }
 0x40b   : > { %v9681_v11 = vpop.f32.mrf.mxu1  ;;  %10060 = vmatmul.mubr.f32.gmra.mxu1 %v13355_v63 }
 0x40c   : > { %v9767_v31 = vpop.f32.mrf.mxu0  ;;  %10146 = vmatmul.mubr.f32.gmra.mxu0 %v6853_v33  ;;  %v13473_v7 = vadd.f32 %v5609_v27, %v5454_v53  ;;  %v5457_v51 = vadd.f32 %v9681_v11, %v13350_v45  ;;  %10062 = vmatprep.mubr.f32.mxu1 %v13358_v20  ;;  %v6858_v27 = vld [vmem:[#allocation3 + $0x12a] sm:$0xff]  ;;  %v6526_v11 = vld [vmem:[#allocation3 + $0x139] sm:$0xff] }
 0x40d   : > { %10148 = vmatprep.mubr.f32.mxu0 %v6854_v34  ;;  %v5285_v47 = vpop.f32.mrf.mxu1  ;;  %10187 = vmatpush3.msra.mxu1 %v7199_v15 }
 0x40e   : > { %v5619_v42 = vpop.f32.mrf.mxu0  ;;  %v13477_v0 = vadd.f32 %v9767_v31, %v5457_v51  ;;  %v5456_v26 = vadd.f32 %v5285_v47, %v13353_v9  ;;  %10188 = vmatprep.subr.mxu1 %v7198_v14  ;;  %v6860_v31 = vld [vmem:[#allocation3 + $0x13a] sm:$0xff] }
 0x40f   : > { %v9684_v63 = vpop.f32.mrf.mxu1  ;;  %10063 = vmatmul.mubr.f32.gmra.mxu1 %v13365_v5 }
 0x410   : > { %v9770_v28 = vpop.f32.mrf.mxu0  ;;  %10149 = vmatmul.mubr.f32.gmra.mxu0 %v6855_v17  ;;  %v13481_v45 = vadd.f32 %v5619_v42, %v5456_v26  ;;  %v5459_v20 = vadd.f32 %v9684_v63, %v13360_v61  ;;  %10065 = vmatprep.mubr.f32.mxu1 %v13368_v12  ;;  %v6861_v42 = vld [vmem:[#allocation3 + $0x142] sm:$0xff] }
 0x411   : > { %10151 = vmatprep.mubr.f32.mxu0 %v6856_v59  ;;  %v5295_v49 = vpop.f32.mrf.mxu1  ;;  %10189 = vmatpush3.msra.mxu1 %v7198_v14  ;;  %v6859_v14 = vld [vmem:[#allocation3 + $0x132] sm:$0xff] }
 0x412   : > { %v5629_v15 = vpop.f32.mrf.mxu0  ;;  %v13485_v9 = vadd.f32 %v9770_v28, %v5459_v20  ;;  %v5458_v52 = vadd.f32 %v5295_v49, %v13363_v36  ;;  %10190 = vmatprep.subr.mxu1 %v7197_v46 }
 0x413   : > { %v9687_v5 = vpop.f32.mrf.mxu1  ;;  %10066 = vmatmul.mubr.f32.gmra.mxu1 %v13375_v37 }
 0x414   : > { %v9773_v48 = vpop.f32.mrf.mxu0  ;;  %10152 = vmatmul.mubr.f32.gmra.mxu0 %v6857_v40  ;;  %v13489_v53 = vadd.f32 %v5629_v15, %v5458_v52  ;;  %v5461_v61 = vadd.f32 %v9687_v5, %v13370_v8  ;;  %10068 = vmatprep.mubr.f32.mxu1 %v13378_v2  ;;  %v6527_v2 = vld [vmem:[#allocation3 + $0x141] sm:$0xff]  ;;  %v7161_v40 = vld [vmem:[#allocation3 + $0x33] sm:$0xff] }
 0x415   : > { %10154 = vmatprep.mubr.f32.mxu0 %v6858_v27  ;;  %v5305_v12 = vpop.f32.mrf.mxu1  ;;  %10191 = vmatpush3.msra.mxu1 %v7197_v46  ;;  %v7160_v46 = vld [vmem:[#allocation3 + $0x2b] sm:$0xff] }
 0x416   : > { %v5639_v33 = vpop.f32.mrf.mxu0  ;;  %v13493_v36 = vadd.f32 %v9773_v48, %v5461_v61  ;;  %v5460_v34 = vadd.f32 %v5305_v12, %v13373_v10 }
 0x417   : > { %v9690_v37 = vpop.f32.mrf.mxu1  ;;  %10069 = vmatmul.mubr.f32.gmra.mxu1 %v13385_v56 }
 0x418   : > { %v9776_v51 = vpop.f32.mrf.mxu0  ;;  %10155 = vmatmul.mubr.f32.gmra.mxu0 %v6859_v14  ;;  %v13497_v47 = vadd.f32 %v5639_v33, %v5460_v34  ;;  %v5463_v8 = vadd.f32 %v9690_v37, %v13380_v54  ;;  %10071 = vmatprep.mubr.f32.mxu1 %v6526_v11 }
 0x419   : > { %10157 = vmatprep.mubr.f32.mxu0 %v6860_v31  ;;  %v5315_v26 = vpop.f32.mrf.mxu1  ;;  %v7163_v31 = vld [vmem:[#allocation3 + $0x43] sm:$0xff] }
 0x41a   : > { %v5649_v17 = vpop.f32.mrf.mxu0  ;;  %v13500_v63 = vadd.f32 %v9776_v51, %v5463_v8  ;;  %v5462_v10 = vadd.f32 %v5315_v26, %v13383_v32  ;;  %v7162_v32 = vld [vmem:[#allocation3 + $0x3b] sm:$0xff]  ;;  %v7165_v26 = vld [vmem:[#allocation3 + $0x53] sm:$0xff] }
 0x41b   : > { %v9693_v28 = vpop.f32.mrf.mxu1  ;;  %10072 = vmatmul.mubr.f32.gmra.mxu1 %v6527_v2 }
 0x41c   : > { %v9779_v59 = vpop.f32.mrf.mxu0  ;;  %10158 = vmatmul.mubr.f32.gmra.mxu0 %v6861_v42  ;;  %v13503_v56 = vadd.f32 %v5649_v17, %v5462_v10  ;;  %v5465_v20 = vadd.f32 %v9693_v28, %v13388_v58  ;;  %10192 = vmatprep.mubr.f32.mxu1 %v7160_v46 }
 0x41d   : > { %v5325_v54 = vpop.f32.mrf.mxu1 }
 0x41e   : > { %v5659_v49 = vpop.f32.mrf.mxu0  ;;  %v13506_v15 = vadd.f32 %v9779_v59, %v5465_v20  ;;  %v5464_v52 = vadd.f32 %v5325_v54, %v13391_v16  ;;  %v7164_v16 = vld [vmem:[#allocation3 + $0x4b] sm:$0xff] }
 0x41f   : > { %v9696_v5 = vpop.f32.mrf.mxu1  ;;  %10193 = vmatmul.mubr.f32.vlgmr.msra.gmra.mxu1 %v7161_v40 }
 0x420   : > { %v9782_v48 = vpop.f32.mrf.mxu0  ;;  %v13509_v27 = vadd.f32 %v5659_v49, %v5464_v52  ;;  %v5467_v61 = vadd.f32 %v9696_v5, %v13394_v24  ;;  %10195 = vmatprep.mubr.f32.mxu1 %v7162_v32  ;;  %v7167_v49 = vld [vmem:[#allocation3 + $0x63] sm:$0xff] }
 0x421   : > { %v5335_v12 = vpop.f32.mrf.mxu1 }
 0x422   : > { %v5669_v33 = vpop.f32.mrf.mxu0  ;;  %v13512_v58 = vadd.f32 %v9782_v48, %v5467_v61  ;;  %v5466_v11 = vadd.f32 %v5335_v12, %v13397_v23  ;;  %v7166_v23 = vld [vmem:[#allocation3 + $0x5b] sm:$0xff] }
 0x423   : > { %v9699_v34 = vpop.f32.mrf.mxu1  ;;  %10196 = vmatmul.mubr.f32.gmra.mxu1 %v7163_v31 }
 0x424   : > { %v9785_v14 = vpop.f32.mrf.mxu0  ;;  %v13515_v37 = vadd.f32 %v5669_v33, %v5466_v11  ;;  %v5469_v51 = vadd.f32 %v9699_v34, %v13400_v3  ;;  %10198 = vmatprep.mubr.f32.mxu1 %v7164_v16  ;;  %v7169_v33 = vld [vmem:[#allocation3 + $0x73] sm:$0xff] }
 0x425   : > { %v5345_v8 = vpop.f32.mrf.mxu1 }
 0x426   : > { %v5679_v2 = vpop.f32.mrf.mxu0  ;;  %v13518_v24 = vadd.f32 %v9785_v14, %v5469_v51  ;;  %v5468_v42 = vadd.f32 %v5345_v8, %v13403_v6  ;;  %v7168_v6 = vld [vmem:[#allocation3 + $0x6b] sm:$0xff] }
 0x427   : > { %v9702_v17 = vpop.f32.mrf.mxu1  ;;  %10199 = vmatmul.mubr.f32.gmra.mxu1 %v7165_v26 }
 0x428   : > { %v9788_v10 = vpop.f32.mrf.mxu0  ;;  %v13521_v28 = vadd.f32 %v5679_v2, %v5468_v42  ;;  %v5471_v59 = vadd.f32 %v9702_v17, %v13406_v25  ;;  %10201 = vmatprep.mubr.f32.mxu1 %v7166_v23  ;;  %v7171_v2 = vld [vmem:[#allocation3 + $0x83] sm:$0xff] }
 0x429   : > { %v5355_v46 = vpop.f32.mrf.mxu1 }
 0x42a   : > { %v5689_v20 = vpop.f32.mrf.mxu0  ;;  %v13524_v3 = vadd.f32 %v9788_v10, %v5471_v59  ;;  %v5470_v54 = vadd.f32 %v5355_v46, %v13409_v19  ;;  %v7170_v19 = vld [vmem:[#allocation3 + $0x7b] sm:$0xff] }
 0x42b   : > { %v9705_v52 = vpop.f32.mrf.mxu1  ;;  %10202 = vmatmul.mubr.f32.gmra.mxu1 %v7167_v49 }
 0x42c   : > { %v9791_v40 = vpop.f32.mrf.mxu0  ;;  %v13527_v5 = vadd.f32 %v5689_v20, %v5470_v54  ;;  %v5473_v48 = vadd.f32 %v9705_v52, %v13412_v41  ;;  %10204 = vmatprep.mubr.f32.mxu1 %v7168_v6  ;;  %v7173_v20 = vld [vmem:[#allocation3 + $0x93] sm:$0xff] }
 0x42d   : > { %v5365_v32 = vpop.f32.mrf.mxu1 }
 0x42e   : > { %v5699_v61 = vpop.f32.mrf.mxu0  ;;  %v13530_v25 = vadd.f32 %v9791_v40, %v5473_v48  ;;  %v5472_v12 = vadd.f32 %v5365_v32, %v13415_v57  ;;  %v7172_v57 = vld [vmem:[#allocation3 + $0x8b] sm:$0xff] }
 0x42f   : > { %v9708_v11 = vpop.f32.mrf.mxu1  ;;  %10205 = vmatmul.mubr.f32.gmra.mxu1 %v7169_v33 }
 0x430   : > { %v9794_v31 = vpop.f32.mrf.mxu0  ;;  %v13533_v34 = vadd.f32 %v5699_v61, %v5472_v12  ;;  %v5475_v14 = vadd.f32 %v9708_v11, %v13418_v29  ;;  %10207 = vmatprep.mubr.f32.mxu1 %v7170_v19  ;;  %v7175_v61 = vld [vmem:[#allocation3 + $0xa3] sm:$0xff] }
 0x431   : > { %v5375_v16 = vpop.f32.mrf.mxu1 }
 0x432   : > { %v5709_v51 = vpop.f32.mrf.mxu0  ;;  %v13536_v41 = vadd.f32 %v9794_v31, %v5475_v14  ;;  %v5474_v8 = vadd.f32 %v5375_v16, %v13421_v22  ;;  %v7174_v22 = vld [vmem:[#allocation3 + $0x9b] sm:$0xff] }
 0x433   : > { %v9711_v42 = vpop.f32.mrf.mxu1  ;;  %10208 = vmatmul.mubr.f32.gmra.mxu1 %v7171_v2 }
 0x434   : > { %v9797_v26 = vpop.f32.mrf.mxu0  ;;  %v13539_v17 = vadd.f32 %v5709_v51, %v5474_v8  ;;  %v5477_v10 = vadd.f32 %v9711_v42, %v13424_v13  ;;  %10210 = vmatprep.mubr.f32.mxu1 %v7172_v57  ;;  %v7177_v51 = vld [vmem:[#allocation3 + $0xb3] sm:$0xff] }
 0x435   : > { %v5385_v23 = vpop.f32.mrf.mxu1 }
 0x436   : > { %v5719_v59 = vpop.f32.mrf.mxu0  ;;  %v13542_v29 = vadd.f32 %v9797_v26, %v5477_v10  ;;  %v5476_v46 = vadd.f32 %v5385_v23, %v13427_v38  ;;  %v7176_v38 = vld [vmem:[#allocation3 + $0xab] sm:$0xff] }
 0x437   : > { %v9714_v54 = vpop.f32.mrf.mxu1  ;;  %10211 = vmatmul.mubr.f32.gmra.mxu1 %v7173_v20 }
 0x438   : > { %v9800_v49 = vpop.f32.mrf.mxu0  ;;  %v13545_v52 = vadd.f32 %v5719_v59, %v5476_v46  ;;  %v5479_v40 = vadd.f32 %v9714_v54, %v13430_v62  ;;  %10213 = vmatprep.mubr.f32.mxu1 %v7174_v22  ;;  %v7179_v59 = vld [vmem:[#allocation3 + $0xc3] sm:$0xff] }
 0x439   : > { %v5395_v6 = vpop.f32.mrf.mxu1 }
 0x43a   : > { %v5729_v48 = vpop.f32.mrf.mxu0  ;;  %v13548_v13 = vadd.f32 %v9800_v49, %v5479_v40  ;;  %v5478_v32 = vadd.f32 %v5395_v6, %v13433_v18  ;;  %v7178_v18 = vld [vmem:[#allocation3 + $0xbb] sm:$0xff] }
 0x43b   : > { %v9717_v12 = vpop.f32.mrf.mxu1  ;;  %10214 = vmatmul.mubr.f32.gmra.mxu1 %v7175_v61 }
 0x43c   : > { %v9803_v33 = vpop.f32.mrf.mxu0  ;;  %v13551_v11 = vadd.f32 %v5729_v48, %v5478_v32  ;;  %v5481_v31 = vadd.f32 %v9717_v12, %v13436_v39  ;;  %10216 = vmatprep.mubr.f32.mxu1 %v7176_v38  ;;  %v7181_v48 = vld [vmem:[#allocation3 + $0xd3] sm:$0xff] }
 0x43d   : > { %v5405_v19 = vpop.f32.mrf.mxu1 }
 0x43e   : > { %v5739_v14 = vpop.f32.mrf.mxu0  ;;  %v13554_v62 = vadd.f32 %v9803_v33, %v5481_v31  ;;  %v5480_v16 = vadd.f32 %v5405_v19, %v13439_v43  ;;  %v7180_v43 = vld [vmem:[#allocation3 + $0xcb] sm:$0xff] }
 0x43f   : > { %v9720_v8 = vpop.f32.mrf.mxu1  ;;  %10217 = vmatmul.mubr.f32.gmra.mxu1 %v7177_v51 }
 0x440   : > { %v9806_v2 = vpop.f32.mrf.mxu0  ;;  %v13557_v42 = vadd.f32 %v5739_v14, %v5480_v16  ;;  %v5483_v26 = vadd.f32 %v9720_v8, %v13442_v44  ;;  %10219 = vmatprep.mubr.f32.mxu1 %v7178_v18  ;;  %v7183_v14 = vld [vmem:[#allocation3 + $0xe3] sm:$0xff] }
 0x441   : > { %v5415_v57 = vpop.f32.mrf.mxu1 }
 0x442   : > { %v5749_v10 = vpop.f32.mrf.mxu0  ;;  %v13560_v39 = vadd.f32 %v9806_v2, %v5483_v26  ;;  %v5482_v23 = vadd.f32 %v5415_v57, %v13445_v50  ;;  %v7182_v50 = vld [vmem:[#allocation3 + $0xdb] sm:$0xff] }
 0x443   : > { %v9723_v46 = vpop.f32.mrf.mxu1  ;;  %10220 = vmatmul.mubr.f32.gmra.mxu1 %v7179_v59 }
 0x444   : > { %v9809_v20 = vpop.f32.mrf.mxu0  ;;  %v13563_v54 = vadd.f32 %v5749_v10, %v5482_v23  ;;  %v5485_v49 = vadd.f32 %v9723_v46, %v13448_v4  ;;  %10222 = vmatprep.mubr.f32.mxu1 %v7180_v43  ;;  %v7185_v10 = vld [vmem:[#allocation3 + $0xf3] sm:$0xff] }
 0x445   : > { %v5425_v22 = vpop.f32.mrf.mxu1 }
 0x446   : > { %v5759_v40 = vpop.f32.mrf.mxu0  ;;  %v13566_v44 = vadd.f32 %v9809_v20, %v5485_v49  ;;  %v5484_v6 = vadd.f32 %v5425_v22, %v13451_v35  ;;  %v7184_v35 = vld [vmem:[#allocation3 + $0xeb] sm:$0xff] }
 0x447   : > { %v9726_v32 = vpop.f32.mrf.mxu1  ;;  %10223 = vmatmul.mubr.f32.gmra.mxu1 %v7181_v48 }
 0x448   : > { %v9812_v61 = vpop.f32.mrf.mxu0  ;;  %v13569_v12 = vadd.f32 %v5759_v40, %v5484_v6  ;;  %v5487_v33 = vadd.f32 %v9726_v32, %v13454_v30  ;;  %10225 = vmatprep.mubr.f32.mxu1 %v7182_v50  ;;  %v7187_v40 = vld [vmem:[#allocation3 + $0x103] sm:$0xff] }
 0x449   : > { %v5435_v38 = vpop.f32.mrf.mxu1 }
 0x44a   : > { %v5769_v31 = vpop.f32.mrf.mxu0  ;;  %v13572_v4 = vadd.f32 %v9812_v61, %v5487_v33  ;;  %v5486_v19 = vadd.f32 %v5435_v38, %v13457_v60  ;;  %v7186_v60 = vld [vmem:[#allocation3 + $0xfb] sm:$0xff] }
 0x44b   : > { %v9729_v16 = vpop.f32.mrf.mxu1  ;;  %10226 = vmatmul.mubr.f32.gmra.mxu1 %v7183_v14 }
 0x44c   : > { %v9815_v51 = vpop.f32.mrf.mxu0  ;;  %v13575_v8 = vadd.f32 %v5769_v31, %v5486_v19  ;;  %v5489_v2 = vadd.f32 %v9729_v16, %v13460_v21  ;;  %10228 = vmatprep.mubr.f32.mxu1 %v7184_v35  ;;  %v7189_v31 = vld [vmem:[#allocation3 + $0x113] sm:$0xff] }
 0x44d   : > { %v5445_v18 = vpop.f32.mrf.mxu1 }
 0x44e   : > { %v5779_v26 = vpop.f32.mrf.mxu0  ;;  %v13578_v30 = vadd.f32 %v9815_v51, %v5489_v2  ;;  %v5488_v57 = vadd.f32 %v5445_v18, %v13463_v1  ;;  %v7188_v1 = vld [vmem:[#allocation3 + $0x10b] sm:$0xff] }
 0x44f   : > { %v9850_v23 = vpop.f32.mrf.mxu1  ;;  %10229 = vmatmul.mubr.f32.gmra.mxu1 %v7185_v10 }
 0x450   : > { %v9936_v59 = vpop.f32.mrf.mxu0  ;;  %v13581_v46 = vadd.f32 %v5779_v26, %v5488_v57  ;;  %v6123_v20 = vadd.f32 %v9850_v23, %v13470_v55  ;;  %10231 = vmatprep.mubr.f32.mxu1 %v7186_v60  ;;  %v7191_v26 = vld [vmem:[#allocation3 + $0x123] sm:$0xff] }
 0x451   : > { %v5943_v43 = vpop.f32.mrf.mxu1 }
 0x452   : > { %v6277_v49 = vpop.f32.mrf.mxu0  ;;  %v13584_v21 = vadd.f32 %v9936_v59, %v6123_v20  ;;  %v6122_v22 = vadd.f32 %v5943_v43, %v13473_v7  ;;  %v7190_v7 = vld [vmem:[#allocation3 + $0x11b] sm:$0xff] }
 0x453   : > { %v9853_v6 = vpop.f32.mrf.mxu1  ;;  %10232 = vmatmul.mubr.f32.gmra.mxu1 %v7187_v40 }
 0x454   : > { %v9939_v48 = vpop.f32.mrf.mxu0  ;;  %v13587_v32 = vadd.f32 %v6277_v49, %v6122_v22  ;;  %v6125_v61 = vadd.f32 %v9853_v6, %v13477_v0  ;;  %10234 = vmatprep.mubr.f32.mxu1 %v7188_v1  ;;  %v7193_v22 = vld [vmem:[#allocation3 + $0x133] sm:$0xff]  ;;  %v7195_v1 = vld [vmem:[#allocation3 + $0x143] sm:$0xff] }
 0x455   : > { %v5953_v50 = vpop.f32.mrf.mxu1 }
 0x456   : > { %v6287_v33 = vpop.f32.mrf.mxu0  ;;  %v13590_v55 = vadd.f32 %v9939_v48, %v6125_v61  ;;  %v6124_v38 = vadd.f32 %v5953_v50, %v13481_v45  ;;  %v7192_v45 = vld [vmem:[#allocation3 + $0x12b] sm:$0xff] }
 0x457   : > { %v9856_v19 = vpop.f32.mrf.mxu1  ;;  %10235 = vmatmul.mubr.f32.gmra.mxu1 %v7189_v31 }
 0x458   : > { %v9942_v14 = vpop.f32.mrf.mxu0  ;;  %v13593_v16 = vadd.f32 %v6287_v33, %v6124_v38  ;;  %v6127_v51 = vadd.f32 %v9856_v19, %v13485_v9  ;;  %10237 = vmatprep.mubr.f32.mxu1 %v7190_v7  ;;  %v7194_v9 = vld [vmem:[#allocation3 + $0x13b] sm:$0xff] }
 0x459   : > { %v5963_v35 = vpop.f32.mrf.mxu1 }
 0x45a   : > { %v6297_v2 = vpop.f32.mrf.mxu0  ;;  %v13596_v0 = vadd.f32 %v9942_v14, %v6127_v51  ;;  %v6126_v18 = vadd.f32 %v5963_v35, %v13489_v53 }
 0x45b   : > { %v9859_v57 = vpop.f32.mrf.mxu1  ;;  %10238 = vmatmul.mubr.f32.gmra.mxu1 %v7191_v26 }
 0x45c   : > { %v9945_v10 = vpop.f32.mrf.mxu0  ;;  %v13599_v23 = vadd.f32 %v6297_v2, %v6126_v18  ;;  %v6129_v59 = vadd.f32 %v9859_v57, %v13493_v36  ;;  %10240 = vmatprep.mubr.f32.mxu1 %v7192_v45 }
 0x45d   : > { %v5973_v60 = vpop.f32.mrf.mxu1 }
 0x45e   : > { %v6307_v20 = vpop.f32.mrf.mxu0  ;;  %v13602_v43 = vadd.f32 %v9945_v10, %v6129_v59  ;;  %v6128_v49 = vadd.f32 %v5973_v60, %v13497_v47 }
 0x45f   : > { %v9862_v40 = vpop.f32.mrf.mxu1  ;;  %10241 = vmatmul.mubr.f32.gmra.mxu1 %v7193_v22 }
 0x460   : > { %v9948_v53 = vpop.f32.mrf.mxu0  ;;  %v13605_v6 = vadd.f32 %v6307_v20, %v6128_v49  ;;  %v6131_v48 = vadd.f32 %v9862_v40, %v13500_v63  ;;  %10243 = vmatprep.mubr.f32.mxu1 %v7194_v9 }
 0x461   : > { %v5983_v61 = vpop.f32.mrf.mxu1 }
 0x462   : > { %v6317_v36 = vpop.f32.mrf.mxu0  ;;  %v13608_v50 = vadd.f32 %v9948_v53, %v6131_v48  ;;  %v6130_v33 = vadd.f32 %v5983_v61, %v13503_v56 }
 0x463   : > { %v9865_v38 = vpop.f32.mrf.mxu1  ;;  %10244 = vmatmul.mubr.f32.gmra.mxu1 %v7195_v1 }
 0x464   : > { %v9951_v31 = vpop.f32.mrf.mxu0  ;;  %v13611_v47 = vadd.f32 %v6317_v36, %v6130_v33  ;;  %v6133_v19 = vadd.f32 %v9865_v38, %v13506_v15 }
 0x465   : > { %v5993_v14 = vpop.f32.mrf.mxu1 }
 0x466   : > { %v6327_v7 = vpop.f32.mrf.mxu0  ;;  %v13614_v51 = vadd.f32 %v9951_v31, %v6133_v19  ;;  %v6132_v63 = vadd.f32 %v5993_v14, %v13509_v27 }
 0x467   : > { %v9868_v35 = vpop.f32.mrf.mxu1 }
 0x468   : > { %v9954_v2 = vpop.f32.mrf.mxu0  ;;  %v13617_v18 = vadd.f32 %v6327_v7, %v6132_v63  ;;  %v6135_v26 = vadd.f32 %v9868_v35, %v13512_v58 }
 0x469   : > { %v6003_v56 = vpop.f32.mrf.mxu1 }
 0x46a   : > { %v6337_v57 = vpop.f32.mrf.mxu0  ;;  %v13620_v10 = vadd.f32 %v9954_v2, %v6135_v26  ;;  %v6134_v45 = vadd.f32 %v6003_v56, %v13515_v37 }
 0x46b   : > { %v9871_v59 = vpop.f32.mrf.mxu1 }
 0x46c   : > { %v9957_v15 = vpop.f32.mrf.mxu0  ;;  %v13623_v60 = vadd.f32 %v6337_v57, %v6134_v45  ;;  %v6137_v20 = vadd.f32 %v9871_v59, %v13518_v24 }
 0x46d   : > { %v6013_v9 = vpop.f32.mrf.mxu1 }
 0x46e   : > { %v6347_v27 = vpop.f32.mrf.mxu0  ;;  %v13626_v49 = vadd.f32 %v9957_v15, %v6137_v20  ;;  %v6136_v22 = vadd.f32 %v6013_v9, %v13521_v28 }
 0x46f   : > { %v9874_v40 = vpop.f32.mrf.mxu1 }
 0x470   : > { %v9960_v58 = vpop.f32.mrf.mxu0  ;;  %v13629_v53 = vadd.f32 %v6347_v27, %v6136_v22  ;;  %v6139_v48 = vadd.f32 %v9874_v40, %v13524_v3 }
 0x471   : > { %v6023_v1 = vpop.f32.mrf.mxu1 }
 0x472   : > { %v6357_v37 = vpop.f32.mrf.mxu0  ;;  %v13632_v61 = vadd.f32 %v9960_v58, %v6139_v48  ;;  %v6138_v36 = vadd.f32 %v6023_v1, %v13527_v5 }
 0x473   : > { %v9877_v33 = vpop.f32.mrf.mxu1 }
 0x474   : > { %v9963_v24 = vpop.f32.mrf.mxu0  ;;  %v13635_v38 = vadd.f32 %v6357_v37, %v6138_v36  ;;  %v6141_v31 = vadd.f32 %v9877_v33, %v13530_v25 }
 0x475   : > { %v6033_v19 = vpop.f32.mrf.mxu1 }
 0x476   : > { %v6367_v28 = vpop.f32.mrf.mxu0  ;;  %v13638_v14 = vadd.f32 %v9963_v24, %v6141_v31  ;;  %v6140_v7 = vadd.f32 %v6033_v19, %v13533_v34 }
 0x477   : > { %v9880_v63 = vpop.f32.mrf.mxu1 }
 0x478   : > { %v9966_v3 = vpop.f32.mrf.mxu0  ;;  %v13641_v35 = vadd.f32 %v6367_v28, %v6140_v7  ;;  %v6143_v2 = vadd.f32 %v9880_v63, %v13536_v41 }
 0x479   : > { %v6043_v26 = vpop.f32.mrf.mxu1 }
 0x47a   : > { %v6377_v5 = vpop.f32.mrf.mxu0  ;;  %v13644_v56 = vadd.f32 %v9966_v3, %v6143_v2  ;;  %v6142_v57 = vadd.f32 %v6043_v26, %v13539_v17 }
 0x47b   : > { %v9883_v45 = vpop.f32.mrf.mxu1 }
 0x47c   : > { %v9969_v25 = vpop.f32.mrf.mxu0  ;;  %v13647_v59 = vadd.f32 %v6377_v5, %v6142_v57  ;;  %v6145_v15 = vadd.f32 %v9883_v45, %v13542_v29 }
 0x47d   : > { %v6053_v20 = vpop.f32.mrf.mxu1 }
 0x47e   : > { %v6387_v34 = vpop.f32.mrf.mxu0  ;;  %v13650_v9 = vadd.f32 %v9969_v25, %v6145_v15  ;;  %v6144_v27 = vadd.f32 %v6053_v20, %v13545_v52 }
 0x47f   : > { %v9886_v22 = vpop.f32.mrf.mxu1 }
 0x480   : > { %v9972_v41 = vpop.f32.mrf.mxu0  ;;  %v13653_v40 = vadd.f32 %v6387_v34, %v6144_v27  ;;  %v6147_v58 = vadd.f32 %v9886_v22, %v13548_v13 }
 0x481   : > { %v6063_v48 = vpop.f32.mrf.mxu1 }
 0x482   : > { %v6397_v17 = vpop.f32.mrf.mxu0  ;;  %v13656_v1 = vadd.f32 %v9972_v41, %v6147_v58  ;;  %v6146_v37 = vadd.f32 %v6063_v48, %v13551_v11 }
 0x483   : > { %v9889_v36 = vpop.f32.mrf.mxu1 }
 0x484   : > { %v9975_v29 = vpop.f32.mrf.mxu0  ;;  %v13659_v33 = vadd.f32 %v6397_v17, %v6146_v37  ;;  %v6149_v24 = vadd.f32 %v9889_v36, %v13554_v62 }
 0x485   : > { %v6073_v31 = vpop.f32.mrf.mxu1 }
 0x486   : > { %v6407_v52 = vpop.f32.mrf.mxu0  ;;  %v13662_v19 = vadd.f32 %v9975_v29, %v6149_v24  ;;  %v6148_v28 = vadd.f32 %v6073_v31, %v13557_v42 }
 0x487   : > { %v9892_v7 = vpop.f32.mrf.mxu1 }
 0x488   : > { %v9978_v13 = vpop.f32.mrf.mxu0  ;;  %v13665_v63 = vadd.f32 %v6407_v52, %v6148_v28  ;;  %v6151_v3 = vadd.f32 %v9892_v7, %v13560_v39 }
 0x489   : > { %v6083_v2 = vpop.f32.mrf.mxu1 }
 0x48a   : > { %v6417_v11 = vpop.f32.mrf.mxu0  ;;  %v13668_v26 = vadd.f32 %v9978_v13, %v6151_v3  ;;  %v6150_v5 = vadd.f32 %v6083_v2, %v13563_v54 }
 0x48b   : > { %v9895_v57 = vpop.f32.mrf.mxu1 }
 0x48c   : > { %v9981_v62 = vpop.f32.mrf.mxu0  ;;  %v13671_v45 = vadd.f32 %v6417_v11, %v6150_v5  ;;  %v6153_v25 = vadd.f32 %v9895_v57, %v13566_v44 }
 0x48d   : > { %v6093_v15 = vpop.f32.mrf.mxu1 }
 0x48e   : > { %v6427_v42 = vpop.f32.mrf.mxu0  ;;  %v13674_v20 = vadd.f32 %v9981_v62, %v6153_v25  ;;  %v6152_v34 = vadd.f32 %v6093_v15, %v13569_v12 }
 0x48f   : > { %v9898_v27 = vpop.f32.mrf.mxu1 }
 0x490   : > { %v9984_v39 = vpop.f32.mrf.mxu0  ;;  %v13677_v22 = vadd.f32 %v6427_v42, %v6152_v34  ;;  %v6155_v41 = vadd.f32 %v9898_v27, %v13572_v4 }
 0x491   : > { %v6103_v58 = vpop.f32.mrf.mxu1 }
 0x492   : > { %v6437_v54 = vpop.f32.mrf.mxu0  ;;  %v13680_v48 = vadd.f32 %v9984_v39, %v6155_v41  ;;  %v6154_v17 = vadd.f32 %v6103_v58, %v13575_v8 }
 0x493   : > { %v9901_v37 = vpop.f32.mrf.mxu1 }
 0x494   : > { %v9987_v44 = vpop.f32.mrf.mxu0  ;;  %v13683_v36 = vadd.f32 %v6437_v54, %v6154_v17  ;;  %v6157_v29 = vadd.f32 %v9901_v37, %v13578_v30 }
 0x495   : > { %v6113_v24 = vpop.f32.mrf.mxu1 }
 0x496   : > { %v6447_v12 = vpop.f32.mrf.mxu0  ;;  %v13686_v31 = vadd.f32 %v9987_v44, %v6157_v29  ;;  %v6156_v52 = vadd.f32 %v6113_v24, %v13581_v46 }
 0x497   : > { %v10022_v28 = vpop.f32.mrf.mxu1 }
 0x498   : > { %v13689_v4 = vpop.f32.mrf.mxu0  ;;  %v13691_v7 = vadd.f32 %v6447_v12, %v6156_v52  ;;  %v13694_v13 = vadd.f32 %v10022_v28, %v13584_v21 }
 0x499   : > { %v6611_v8 = vpop.f32.mrf.mxu1 }
 0x49a   : > { %v13697_v3 = vadd.f32 %v6611_v8, %v13587_v32  ;;  %v13699_v2 = vpop.f32.mrf.mxu0 }
 0x49b   : > { %v10025_v30 = vpop.f32.mrf.mxu1 }
 0x49c   : > { %v13702_v11 = vadd.f32 %v10025_v30, %v13590_v55  ;;  %v13704_v46 = vpop.f32.mrf.mxu0 }
 0x49d   : > { %v6621_v5 = vpop.f32.mrf.mxu1 }
 0x49e   : > { %v13707_v57 = vadd.f32 %v6621_v5, %v13593_v16  ;;  %v13712_v15 = vpop.f32.mrf.mxu0 }
 0x49f   : > { %v10028_v62 = vpop.f32.mrf.mxu1 }
 0x4a0   : > { %v13710_v21 = vadd.f32 %v10028_v62, %v13596_v0  ;;  %v13720_v27 = vpop.f32.mrf.mxu0 }
 0x4a1   : > { %v6631_v25 = vpop.f32.mrf.mxu1 }
 0x4a2   : > { %v13715_v32 = vadd.f32 %v6631_v25, %v13599_v23  ;;  %v13728_v58 = vpop.f32.mrf.mxu0 }
 0x4a3   : > { %v10031_v42 = vpop.f32.mrf.mxu1 }
 0x4a4   : > { %v13718_v55 = vadd.f32 %v10031_v42, %v13602_v43  ;;  %v13736_v37 = vpop.f32.mrf.mxu0 }
 0x4a5   : > { %v6641_v34 = vpop.f32.mrf.mxu1 }
 0x4a6   : > { %v13723_v16 = vadd.f32 %v6641_v34, %v13605_v6  ;;  %v13744_v24 = vpop.f32.mrf.mxu0 }
 0x4a7   : > { %v10034_v39 = vpop.f32.mrf.mxu1 }
 0x4a8   : > { %v13726_v0 = vadd.f32 %v10034_v39, %v13608_v50  ;;  %v13752_v28 = vpop.f32.mrf.mxu0 }
 0x4a9   : > { %v6651_v41 = vpop.f32.mrf.mxu1 }
 0x4aa   : > { %v13731_v23 = vadd.f32 %v6651_v41, %v13611_v47  ;;  %v13760_v5 = vpop.f32.mrf.mxu0 }
 0x4ab   : > { %v10037_v54 = vpop.f32.mrf.mxu1 }
 0x4ac   : > { %v13734_v43 = vadd.f32 %v10037_v54, %v13614_v51  ;;  %v13768_v42 = vpop.f32.mrf.mxu0 }
 0x4ad   : > { %v6661_v17 = vpop.f32.mrf.mxu1 }
 0x4ae   : > { %v13739_v6 = vadd.f32 %v6661_v17, %v13617_v18  ;;  %v13776_v41 = vpop.f32.mrf.mxu0 }
 0x4af   : > { %v10040_v44 = vpop.f32.mrf.mxu1 }
 0x4b0   : > { %v13742_v50 = vadd.f32 %v10040_v44, %v13620_v10  ;;  %v13784_v44 = vpop.f32.mrf.mxu0 }
 0x4b1   : > { %v6671_v29 = vpop.f32.mrf.mxu1 }
 0x4b2   : > { %v13747_v47 = vadd.f32 %v6671_v29, %v13623_v60 }
 0x4b3   : > { %v10043_v12 = vpop.f32.mrf.mxu1 }
 0x4b4   : > { %v13750_v51 = vadd.f32 %v10043_v12, %v13626_v49 }
 0x4b5   : > { %v6681_v52 = vpop.f32.mrf.mxu1 }
 0x4b6   : > { %v13755_v18 = vadd.f32 %v6681_v52, %v13629_v53  ;;  %v13792_v52 = vpop.f32.mrf.mxu0 }
 0x4b7   : > { %v10046_v8 = vpop.f32.mrf.mxu1 }
 0x4b8   : > { %v13758_v10 = vadd.f32 %v10046_v8, %v13632_v61 }
 0x4b9   : > { %v6691_v30 = vpop.f32.mrf.mxu1 }
 0x4ba   : > { %v13763_v60 = vadd.f32 %v6691_v30, %v13635_v38 }
 0x4bb   : > { %v10049_v62 = vpop.f32.mrf.mxu1 }
 0x4bc   : > { %v13766_v49 = vadd.f32 %v10049_v62, %v13638_v14  ;;  %v13800_v62 = vpop.f32.mrf.mxu0 }
 0x4bd   : > { %v6701_v25 = vpop.f32.mrf.mxu1 }
 0x4be   : > { %v13771_v53 = vadd.f32 %v6701_v25, %v13641_v35 }
 0x4bf   : > { %v10052_v34 = vpop.f32.mrf.mxu1 }
 0x4c0   : > { %v13774_v61 = vadd.f32 %v10052_v34, %v13644_v56 }
 0x4c1   : > { %v6711_v39 = vpop.f32.mrf.mxu1 }
 0x4c2   : > { %v13779_v38 = vadd.f32 %v6711_v39, %v13647_v59  ;;  %v13808_v39 = vpop.f32.mrf.mxu0 }
 0x4c3   : > { %v10055_v54 = vpop.f32.mrf.mxu1 }
 0x4c4   : > { %v13782_v14 = vadd.f32 %v10055_v54, %v13650_v9 }
 0x4c5   : > { %v6721_v17 = vpop.f32.mrf.mxu1 }
 0x4c6   : > { %v13787_v35 = vadd.f32 %v6721_v17, %v13653_v40 }
 0x4c7   : > { %v10058_v29 = vpop.f32.mrf.mxu1 }
 0x4c8   : > { %v13790_v56 = vadd.f32 %v10058_v29, %v13656_v1  ;;  %v13816_v29 = vpop.f32.mrf.mxu0 }
 0x4c9   : > { %v6731_v12 = vpop.f32.mrf.mxu1 }
 0x4ca   : > { %v13795_v59 = vadd.f32 %v6731_v12, %v13659_v33 }
 0x4cb   : > { %v10061_v8 = vpop.f32.mrf.mxu1 }
 0x4cc   : > { %v13798_v9 = vadd.f32 %v10061_v8, %v13662_v19 }
 0x4cd   : > { %v6741_v30 = vpop.f32.mrf.mxu1 }
 0x4ce   : > { %v13803_v40 = vadd.f32 %v6741_v30, %v13665_v63  ;;  %v13824_v30 = vpop.f32.mrf.mxu0 }
 0x4cf   : > { %v10064_v25 = vpop.f32.mrf.mxu1 }
 0x4d0   : > { %v13806_v1 = vadd.f32 %v10064_v25, %v13668_v26 }
 0x4d1   : > { %v6751_v34 = vpop.f32.mrf.mxu1 }
 0x4d2   : > { %v13811_v33 = vadd.f32 %v6751_v34, %v13671_v45 }
 0x4d3   : > { %v10067_v54 = vpop.f32.mrf.mxu1 }
 0x4d4   : > { %v13814_v19 = vadd.f32 %v10067_v54, %v13674_v20  ;;  %v7125_v54 = vadd.f32 %v13689_v4, %v13694_v13 }
 0x4d5   : > { %v6761_v17 = vpop.f32.mrf.mxu1 }
 0x4d6   : > { %v13819_v63 = vadd.f32 %v6761_v17, %v13677_v22  ;;  %v13834_v22 = vpop.f32.mrf.mxu0 }
 0x4d7   : > { %v10070_v12 = vpop.f32.mrf.mxu1 }
 0x4d8   : > { %14634 = vst [vmem:[#allocation46_spill] sm:$0xff] %v13819_v63  ;;  %v13822_v26 = vadd.f32 %v10070_v12, %v13680_v48  ;;  %v13839_v12 = vld [vmem:[#allocation6 + $0x1] ss:$0 sm:$0xff] }
 0x4d9   : > { %v6771_v8 = vpop.f32.mrf.mxu1 }
 0x4da   : > { %14635 = vst [vmem:[#allocation11_spill] sm:$0xff] %v13822_v26  ;;  %v13827_v45 = vadd.f32 %v6771_v8, %v13683_v36  ;;  %v7124_v36 = vadd.f32 %v13699_v2, %v13697_v3 }
 0x4db   : > { %v10073_v25 = vpop.f32.mrf.mxu1 }
 0x4dc   : > { %14636 = vst [vmem:[#allocation25_spill] sm:$0xff] %v13827_v45  ;;  %v13830_v20 = vadd.f32 %v10073_v25, %v13686_v31  ;;  %v7536_v45 = vld [vmem:[#allocation2 + $0x1b] sm:$0xff]  ;;  %v7127_v31 = vadd.f32 %v13704_v46, %v13702_v11  ;;  %v13845_v25 = vpop.f32.mrf.mxu0 }
 0x4dd   : > { %v6781_v34 = vpop.f32.mrf.mxu1 }
 0x4de   : > { %14637 = vst [vmem:[#allocation29_spill] sm:$0xff] %v13830_v20  ;;  %v13837_v17 = vadd.f32 %v6781_v34, %v13691_v7  ;;  %v7535_v20 = vld [vmem:[#allocation2 + $0x13] sm:$0xff]  ;;  %v7126_v34 = vadd.f32 %v13712_v15, %v13707_v57  ;;  %v13853_v46 = vpop.f32.mrf.mxu0  ;;  %v7128_v57 = vadd.f32 %v13728_v58, %v13715_v32  ;;  %v7537_v15 = vld [vmem:[#allocation2 + $0x23] sm:$0xff] }
 0x4df   : > { %v10194_v48 = vpop.f32.mrf.mxu1 }
 0x4e0   : > { %14638 = vst [vmem:[#allocation73_spill] sm:$0xff] %v13837_v17  ;;  %v7459_v8 = vadd.f32 %v10194_v48, %v7125_v54  ;;  %v7129_v54 = vadd.f32 %v13720_v27, %v13710_v21  ;;  %v7538_v48 = vld [vmem:[#allocation2 + $0x2b] sm:$0xff] }
 0x4e1   : > { %v7279_v26 = vpop.f32.mrf.mxu1 }
 0x4e2   : > { %v7500_v4 = vadd.f32 %v13839_v12, %v7459_v8  ;;  %v7458_v13 = vadd.f32 %v7279_v26, %v7124_v36 }
 0x4e3   : > { %v10197_v7 = vpop.f32.mrf.mxu1 }
 0x4e4   : > { %v7572_v17 = vadd.f32 %v7536_v45, %v7500_v4  ;;  %v7499_v3 = vadd.f32 %v13839_v12, %v7458_v13  ;;  %v7461_v2 = vadd.f32 %v10197_v7, %v7127_v31  ;;  %v13863_v7 = vpop.f32.mrf.mxu0 }
 0x4e5   : > { %v7289_v11 = vpop.f32.mrf.mxu1 }
 0x4e6   : > { %v7608_v63 = vmax.f32 %v7572_v17, 0.0  ;;  %v7571_v26 = vadd.f32 %v7535_v20, %v7499_v3  ;;  %v7502_v36 = vadd.f32 %v13839_v12, %v7461_v2  ;;  %v7460_v8 = vadd.f32 %v7289_v11, %v7126_v34  ;;  %v7540_v20 = vld [vmem:[#allocation2 + $0x3b] sm:$0xff]  ;;  %v7539_v2 = vld [vmem:[#allocation2 + $0x33] sm:$0xff] }
 0x4e7   : > { %v10200_v45 = vpop.f32.mrf.mxu1  ;;  %v7131_v17 = vadd.f32 %v13736_v37, %v13718_v55  ;;  %v7130_v3 = vadd.f32 %v13744_v24, %v13723_v16 }
 0x4e8   : > { %7644 = vst.msk [vmem:[%s10387_s28 + $0x8] sm:$0xff] %vm14639_vm5, %v7608_v63  ;;  %v7607_v31 = vmax.f32 %v7571_v26, 0.0  ;;  %v7574_v21 = vadd.f32 %v7538_v48, %v7502_v36  ;;  %v7501_v27 = vadd.f32 %v13839_v12, %v7460_v8  ;;  %v7463_v4 = vadd.f32 %v10200_v45, %v7129_v54  ;;  %v7542_v36 = vld [vmem:[#allocation2 + $0x4b] sm:$0xff]  ;;  %vm14655_vm5 = vmmov %vm14641_vm0 }
 0x4e9   : > { %v7299_v13 = vpop.f32.mrf.mxu1  ;;  %v7133_v26 = vadd.f32 %v13752_v28, %v13726_v0 }
 0x4ea   : > { %7643 = vst.msk [vmem:[%s10387_s28] sm:$0xff] %vm14640_vm6, %v7607_v31  ;;  %v7610_v32 = vmax.f32 %v7574_v21, 0.0  ;;  %v7573_v58 = vadd.f32 %v7537_v15, %v7501_v27  ;;  %v7504_v63 = vadd.f32 %v13839_v12, %v7463_v4  ;;  %v7462_v34 = vadd.f32 %v7299_v13, %v7128_v57  ;;  %v13875_v15 = vpop.f32.mrf.mxu0  ;;  %v7541_v21 = vld [vmem:[#allocation2 + $0x43] sm:$0xff]  ;;  %v7544_v13 = vld [vmem:[#allocation2 + $0x5b] sm:$0xff]  ;;  %vm14656_vm6 = vmmov %vm14641_vm0 }
 0x4eb   : > { %v10203_v54 = vpop.f32.mrf.mxu1  ;;  %v7132_v31 = vadd.f32 %v13760_v5, %v13731_v23 }
 0x4ec   : > { %7646 = vst.msk [vmem:[%s10387_s28 + $0x18] sm:$0xff] %vm14641_vm0, %v7610_v32  ;;  %v7609_v55 = vmax.f32 %v7573_v58, 0.0  ;;  %v7576_v37 = vadd.f32 %v7540_v20, %v7504_v63  ;;  %v7503_v48 = vadd.f32 %v13839_v12, %v7462_v34  ;;  %v7465_v11 = vadd.f32 %v10203_v54, %v7131_v17  ;;  %v13887_v58 = vpop.f32.mrf.mxu0 }
 0x4ed   : > { %v7309_v8 = vpop.f32.mrf.mxu1  ;;  %v7135_v20 = vadd.f32 %v13768_v42, %v13734_v43 }
 0x4ee   : > { %7645 = vst.msk [vmem:[%s10387_s28 + $0x10] sm:$0xff] %vm14642_vm3, %v7609_v55  ;;  %v7612_v16 = vmax.f32 %v7576_v37, 0.0  ;;  %v7575_v24 = vadd.f32 %v7539_v2, %v7503_v48  ;;  %v7506_v57 = vadd.f32 %v13839_v12, %v7465_v11  ;;  %v7464_v45 = vadd.f32 %v7309_v8, %v7130_v3  ;;  %v7543_v2 = vld [vmem:[#allocation2 + $0x53] sm:$0xff]  ;;  %v7546_v11 = vld [vmem:[#allocation2 + $0x6b] sm:$0xff]  ;;  %vm14657_vm3 = vmmov %vm14641_vm0 }
 0x4ef   : > { %v10206_v27 = vpop.f32.mrf.mxu1  ;;  %v7134_v3 = vadd.f32 %v13776_v41, %v13739_v6  ;;  %v7137_v48 = vadd.f32 %v13784_v44, %v13742_v50 }
 0x4f0   : > { %7648 = vst.msk [vmem:[%s10387_s28 + $0x28] sm:$0xff] %vm14643_vm7, %v7612_v16  ;;  %v7611_v0 = vmax.f32 %v7575_v24, 0.0  ;;  %v7578_v28 = vadd.f32 %v7542_v36, %v7506_v57  ;;  %v7505_v4 = vadd.f32 %v13839_v12, %v7464_v45  ;;  %v7467_v17 = vadd.f32 %v10206_v27, %v7133_v26  ;;  %v13899_v36 = vpop.f32.mrf.mxu0  ;;  %v7545_v57 = vld [vmem:[#allocation2 + $0x63] sm:$0xff]  ;;  %vm14658_vm7 = vmmov %vm14641_vm0 }
 0x4f1   : > { %v7319_v32 = vpop.f32.mrf.mxu1  ;;  %v7136_v24 = vadd.f32 %v13792_v52, %v13747_v47  ;;  %v7139_v27 = vadd.f32 %v13800_v62, %v13750_v51 }
 0x4f2   : > { %7647 = vst.msk [vmem:[%s10387_s28 + $0x20] sm:$0xff] %vm14644_vm2, %v7611_v0  ;;  %v7614_v23 = vmax.f32 %v7578_v28, 0.0  ;;  %v7577_v5 = vadd.f32 %v7541_v21, %v7505_v4  ;;  %v7508_v63 = vadd.f32 %v13839_v12, %v7467_v17  ;;  %v7466_v34 = vadd.f32 %v7319_v32, %v7132_v31  ;;  %v7548_v0 = vld [vmem:[#allocation2 + $0x7b] sm:$0xff]  ;;  %v13911_v4 = vpop.f32.mrf.mxu0  ;;  %v7547_v32 = vld [vmem:[#allocation2 + $0x73] sm:$0xff]  ;;  %vm14659_vm2 = vmmov %vm14641_vm0 }
 0x4f3   : > { %v10209_v54 = vpop.f32.mrf.mxu1 }
 0x4f4   : > { %7650 = vst.msk [vmem:[%s10387_s28 + $0x38] sm:$0xff] %vm14645_vm12, %v7614_v23  ;;  %v7613_v43 = vmax.f32 %v7577_v5, 0.0  ;;  %v7580_v42 = vadd.f32 %v7544_v13, %v7508_v63  ;;  %v7507_v55 = vadd.f32 %v13839_v12, %v7466_v34  ;;  %v7469_v37 = vadd.f32 %v10209_v54, %v7135_v20  ;;  %v13923_v54 = vpop.f32.mrf.mxu0  ;;  %vm14660_vm12 = vmmov %vm14641_vm0 }
 0x4f5   : > { %v7329_v26 = vpop.f32.mrf.mxu1  ;;  %v7138_v13 = vadd.f32 %v13808_v39, %v13755_v18  ;;  %v7141_v34 = vadd.f32 %v13816_v29, %v13758_v10 }
 0x4f6   : > { %7649 = vst.msk [vmem:[%s10387_s28 + $0x30] sm:$0xff] %vm14646_vm9, %v7613_v43  ;;  %v7616_v6 = vmax.f32 %v7580_v42, 0.0  ;;  %v7579_v41 = vadd.f32 %v7543_v2, %v7507_v55  ;;  %v7510_v8 = vadd.f32 %v13839_v12, %v7469_v37  ;;  %v7468_v16 = vadd.f32 %v7329_v26, %v7134_v3  ;;  %v7550_v3 = vld [vmem:[#allocation2 + $0x8b] sm:$0xff]  ;;  %v7549_v37 = vld [vmem:[#allocation2 + $0x83] sm:$0xff]  ;;  %vm14661_vm9 = vmmov %vm14641_vm0 }
 0x4f7   : > { %v10212_v45 = vpop.f32.mrf.mxu1  ;;  %v7140_v55 = vadd.f32 %v13824_v30, %v13763_v60 }
 0x4f8   : > { %7652 = vst.msk [vmem:[%s10387_s28 + $0x48] sm:$0xff] %vm14647_vm8, %v7616_v6  ;;  %v7615_v50 = vmax.f32 %v7579_v41, 0.0  ;;  %v7582_v44 = vadd.f32 %v7546_v11, %v7510_v8  ;;  %v7509_v31 = vadd.f32 %v13839_v12, %v7468_v16  ;;  %v7471_v21 = vadd.f32 %v10212_v45, %v7137_v48  ;;  %v7552_v41 = vld [vmem:[#allocation2 + $0x9b] sm:$0xff]  ;;  %v13935_v16 = vpop.f32.mrf.mxu0  ;;  %vm14662_vm8 = vmmov %vm14641_vm0 }
 0x4f9   : > { %v7339_v28 = vpop.f32.mrf.mxu1  ;;  %v7143_v6 = vadd.f32 %v13834_v22, %v13766_v49  ;;  %v7142_v45 = vadd.f32 %v13845_v25, %v13771_v53 }
 0x4fa   : > { %7651 = vst.msk [vmem:[%s10387_s28 + $0x40] sm:$0xff] %vm14648_vm4, %v7615_v50  ;;  %v7618_v47 = vmax.f32 %v7582_v44, 0.0  ;;  %v7581_v52 = vadd.f32 %v7545_v57, %v7509_v31  ;;  %v7512_v17 = vadd.f32 %v13839_v12, %v7471_v21  ;;  %v7470_v20 = vadd.f32 %v7339_v28, %v7136_v24  ;;  %v7551_v50 = vld [vmem:[#allocation2 + $0x93] sm:$0xff]  ;;  %vm14663_vm4 = vmmov %vm14641_vm0 }
 0x4fb   : > { %v10215_v23 = vpop.f32.mrf.mxu1 }
 0x4fc   : > { %7654 = vst.msk [vmem:[%s10387_s28 + $0x58] sm:$0xff] %vm14649_vm15, %v7618_v47  ;;  %v7617_v51 = vmax.f32 %v7581_v52, 0.0  ;;  %v7584_v62 = vadd.f32 %v7548_v0, %v7512_v17  ;;  %v7511_v5 = vadd.f32 %v13839_v12, %v7470_v20  ;;  %v7473_v63 = vadd.f32 %v10215_v23, %v7139_v27  ;;  %v7554_v0 = vld [vmem:[#allocation2 + $0xab] sm:$0xff]  ;;  %v13947_v47 = vpop.f32.mrf.mxu0  ;;  %vm14665_vm15 = vmmov %vm14641_vm0 }
 0x4fd   : > { %v7349_v2 = vpop.f32.mrf.mxu1  ;;  %v7145_v27 = vadd.f32 %v13853_v46, %v13774_v61  ;;  %v7144_v20 = vadd.f32 %v13863_v7, %v13779_v38 }
 0x4fe   : > { %7653 = vst.msk [vmem:[%s10387_s28 + $0x50] sm:$0xff] %vm14650_vm13, %v7617_v51  ;;  %v7620_v18 = vmax.f32 %v7584_v62, 0.0  ;;  %v7583_v39 = vadd.f32 %v7547_v32, %v7511_v5  ;;  %v7514_v43 = vadd.f32 %v13839_v12, %v7473_v63  ;;  %v7472_v42 = vadd.f32 %v7349_v2, %v7138_v13  ;;  %v7553_v13 = vld [vmem:[#allocation2 + $0xa3] sm:$0xff]  ;;  %v7556_v5 = vld [vmem:[#allocation2 + $0xbb] sm:$0xff]  ;;  %vm14667_vm13 = vmmov %vm14641_vm0 }
 0x4ff   : > { %v10218_v48 = vpop.f32.mrf.mxu1  ;;  %v7147_v62 = vadd.f32 %v13875_v15, %v13782_v14 }
 0x500   : > { %7656 = vst.msk [vmem:[%s10387_s28 + $0x68] sm:$0xff] %vm14651_vm1, %v7620_v18  ;;  %v7619_v10 = vmax.f32 %v7583_v39, 0.0  ;;  %v7586_v29 = vadd.f32 %v7550_v3, %v7514_v43  ;;  %v7513_v11 = vadd.f32 %v13839_v12, %v7472_v42  ;;  %v7475_v26 = vadd.f32 %v10218_v48, %v7141_v34  ;;  %v7085_v34 = vpop.f32.mrf.mxu0  ;;  %v7555_v39 = vld [vmem:[#allocation2 + $0xb3] sm:$0xff]  ;;  %v7558_v48 = vld [vmem:[#allocation2 + $0xcb] sm:$0xff]  ;;  %vm14669_vm1 = vmmov %vm14641_vm0 }
 0x501   : > { %v7359_v8 = vpop.f32.mrf.mxu1  ;;  %v7146_v18 = vadd.f32 %v13887_v58, %v13787_v35 }
 0x502   : > { %7655 = vst.msk [vmem:[%s10387_s28 + $0x60] sm:$0xff] %vm14652_vm10, %v7619_v10  ;;  %v7622_v60 = vmax.f32 %v7586_v29, 0.0  ;;  %v7585_v30 = vadd.f32 %v7549_v37, %v7513_v11  ;;  %v7516_v24 = vadd.f32 %v13839_v12, %v7475_v26  ;;  %v7474_v57 = vadd.f32 %v7359_v8, %v7140_v55  ;;  %v10153_v29 = vpop.f32.mrf.mxu0  ;;  %vm14671_vm10 = vmmov %vm14641_vm0 }
 0x503   : > { %v10221_v44 = vpop.f32.mrf.mxu1  ;;  %v7149_v37 = vadd.f32 %v13899_v36, %v13790_v56 }
 0x504   : > { %7658 = vst.msk [vmem:[%s10387_s28 + $0x78] sm:$0xff] %vm14653_vm11, %v7622_v60  ;;  %v7621_v49 = vmax.f32 %v7585_v30, 0.0  ;;  %v7588_v22 = vadd.f32 %v7552_v41, %v7516_v24  ;;  %v7515_v31 = vadd.f32 %v13839_v12, %v7474_v57  ;;  %v7477_v21 = vadd.f32 %v10221_v44, %v7143_v6  ;;  %v7557_v41 = vld [vmem:[#allocation2 + $0xc3] sm:$0xff]  ;;  %v7560_v57 = vld [vmem:[#allocation2 + $0xdb] sm:$0xff]  ;;  %vm14673_vm11 = vmmov %vm14641_vm0 }
 0x505   : > { %v7369_v28 = vpop.f32.mrf.mxu1  ;;  %v7148_v6 = vadd.f32 %v13911_v4, %v13795_v59  ;;  %v7151_v24 = vadd.f32 %v13923_v54, %v13798_v9 }
 0x506   : > { %7657 = vst.msk [vmem:[%s10387_s28 + $0x70] sm:$0xff] %vm14654_vm14, %v7621_v49  ;;  %v7624_v53 = vmax.f32 %v7588_v22, 0.0  ;;  %v7587_v25 = vadd.f32 %v7551_v50, %v7515_v31  ;;  %v7518_v52 = vadd.f32 %v13839_v12, %v7477_v21  ;;  %v7476_v17 = vadd.f32 %v7369_v28, %v7142_v45  ;;  %v7095_v50 = vpop.f32.mrf.mxu0  ;;  %v7559_v31 = vld [vmem:[#allocation2 + $0xd3] sm:$0xff]  ;;  %vm14674_vm14 = vmmov %vm14641_vm0 }
 0x507   : > { %v10224_v32 = vpop.f32.mrf.mxu1  ;;  %v7150_v22 = vadd.f32 %v13935_v16, %v13803_v40  ;;  %v7153_v28 = vadd.f32 %v13947_v47, %v13806_v1 }
 0x508   : > { %7660 = vst.msk [vmem:[%s10387_s28 + $0x88] sm:$0xff] %vm14655_vm5, %v7624_v53  ;;  %v7623_v61 = vmax.f32 %v7587_v25, 0.0  ;;  %v7590_v46 = vadd.f32 %v7554_v0, %v7518_v52  ;;  %v7517_v23 = vadd.f32 %v13839_v12, %v7476_v17  ;;  %v7479_v51 = vadd.f32 %v10224_v32, %v7145_v27  ;;  %v7562_v53 = vld [vmem:[#allocation2 + $0xeb] sm:$0xff]  ;;  %v10156_v52 = vpop.f32.mrf.mxu0  ;;  %v7561_v32 = vld [vmem:[#allocation2 + $0xe3] sm:$0xff]  ;;  %vm14675_vm5 = vmmov %vm14641_vm0 }
 0x509   : > { %v7379_v63 = vpop.f32.mrf.mxu1 }
 0x50a   : > { %7659 = vst.msk [vmem:[%s10387_s28 + $0x80] sm:$0xff] %vm14656_vm6, %v7623_v61  ;;  %v7626_v3 = vmax.f32 %v7590_v46, 0.0  ;;  %v7589_v38 = vadd.f32 %v7553_v13, %v7517_v23  ;;  %v7520_v7 = vadd.f32 %v13839_v12, %v7479_v51  ;;  %v7478_v2 = vadd.f32 %v7379_v63, %v7144_v20  ;;  %v7105_v63 = vpop.f32.mrf.mxu0  ;;  %vm14676_vm6 = vmmov %vm14641_vm0 }
 0x50b   : > { %v10227_v43 = vpop.f32.mrf.mxu1  ;;  %v7152_v13 = vadd.f32 %v7085_v34, %v13811_v33  ;;  %v7155_v51 = vadd.f32 %v10153_v29, %v13814_v19 }
 0x50c   : > { %7662 = vst.msk [vmem:[%s10387_s28 + $0x98] sm:$0xff] %vm14641_vm0, %v7626_v3  ;;  %v7625_v42 = vmax.f32 %v7589_v38, 0.0  ;;  %v7592_v14 = vadd.f32 %v7556_v5, %v7520_v7  ;;  %v7519_v15 = vadd.f32 %v13839_v12, %v7478_v2  ;;  %v7481_v55 = vadd.f32 %v10227_v43, %v7147_v62  ;;  %v7564_v62 = vld [vmem:[#allocation2 + $0xfb] sm:$0xff]  ;;  %v14664_v7 = vld [vmem:[#allocation46_spill] sm:$0xff]  ;;  %v10159_v43 = vpop.f32.mrf.mxu0 }
 0x50d   : > { %v7389_v10 = vpop.f32.mrf.mxu1  ;;  %v7154_v2 = vadd.f32 %v7095_v50, %v14664_v7  ;;  %v7568_v50 = vld [vmem:[#allocation2 + $0x11b] sm:$0xff] }
 0x50e   : > { %7661 = vst.msk [vmem:[%s10387_s28 + $0x90] sm:$0xff] %vm14657_vm3, %v7625_v42  ;;  %v7628_v11 = vmax.f32 %v7592_v14, 0.0  ;;  %v7591_v35 = vadd.f32 %v7555_v39, %v7519_v15  ;;  %v7522_v58 = vadd.f32 %v13839_v12, %v7481_v55  ;;  %v7480_v26 = vadd.f32 %v7389_v10, %v7146_v18  ;;  %v7563_v18 = vld [vmem:[#allocation2 + $0xf3] sm:$0xff]  ;;  %vm14677_vm3 = vmmov %vm14641_vm0 }
 0x50f   : > { %v10230_v8 = vpop.f32.mrf.mxu1  ;;  %v14666_v55 = vld [vmem:[#allocation11_spill] sm:$0xff] }
 0x510   : > { %7664 = vst.msk [vmem:[%s10387_s28 + $0xa8] sm:$0xff] %vm14658_vm7, %v7628_v11  ;;  %v7627_v60 = vmax.f32 %v7591_v35, 0.0  ;;  %v7594_v56 = vadd.f32 %v7558_v48, %v7522_v58  ;;  %v7521_v36 = vadd.f32 %v13839_v12, %v7480_v26  ;;  %v7483_v30 = vadd.f32 %v10230_v8, %v7149_v37  ;;  %v7566_v48 = vld [vmem:[#allocation2 + $0x10b] sm:$0xff] }
 0x511   : > { %v7399_v45 = vpop.f32.mrf.mxu1  ;;  %v7157_v37 = vadd.f32 %v10156_v52, %v14666_v55  ;;  %v14668_v26 = vld [vmem:[#allocation25_spill] sm:$0xff] }
 0x512   : > { %7663 = vst.msk [vmem:[%s10387_s28 + $0xa0] sm:$0xff] %vm14659_vm2, %v7627_v60  ;;  %v7630_v44 = vmax.f32 %v7594_v56, 0.0  ;;  %v7593_v59 = vadd.f32 %v7557_v41, %v7521_v36  ;;  %v7524_v4 = vadd.f32 %v13839_v12, %v7483_v30  ;;  %v7482_v49 = vadd.f32 %v7399_v45, %v7148_v6  ;;  %v7565_v41 = vld [vmem:[#allocation2 + $0x103] sm:$0xff]  ;;  %v7115_v60 = vpop.f32.mrf.mxu0 }
 0x513   : > { %v10233_v21 = vpop.f32.mrf.mxu1  ;;  %v7156_v6 = vadd.f32 %v7105_v63, %v14668_v26 }
 0x514   : > { %7666 = vst.msk [vmem:[%s10387_s28 + $0xb8] sm:$0xff] %vm14660_vm12, %v7630_v44  ;;  %v7629_v27 = vmax.f32 %v7593_v59, 0.0  ;;  %v7596_v9 = vadd.f32 %v7560_v57, %v7524_v4  ;;  %v7523_v54 = vadd.f32 %v13839_v12, %v7482_v49  ;;  %v7485_v0 = vadd.f32 %v10233_v21, %v7151_v24  ;;  %v14670_v57 = vld [vmem:[#allocation29_spill] sm:$0xff] }
 0x515   : > { %v7409_v25 = vpop.f32.mrf.mxu1  ;;  %v7159_v45 = vadd.f32 %v10159_v43, %v14670_v57 }
 0x516   : > { %7665 = vst.msk [vmem:[%s10387_s28 + $0xb0] sm:$0xff] %vm14661_vm9, %v7629_v27  ;;  %v7632_v17 = vmax.f32 %v7596_v9, 0.0  ;;  %v7595_v40 = vadd.f32 %v7559_v31, %v7523_v54  ;;  %v7526_v16 = vadd.f32 %v13839_v12, %v7485_v0  ;;  %v7484_v20 = vadd.f32 %v7409_v25, %v7150_v22  ;;  %v14672_v31 = vld [vmem:[#allocation73_spill] sm:$0xff]  ;;  %v7567_v27 = vld [vmem:[#allocation2 + $0x113] sm:$0xff] }
 0x517   : > { %v10236_v61 = vpop.f32.mrf.mxu1  ;;  %v7158_v21 = vadd.f32 %v7115_v60, %v14672_v31  ;;  %v7570_v25 = vld [vmem:[#allocation2 + $0x12b] sm:$0xff] }
 0x518   : > { %7668 = vst.msk [vmem:[%s10387_s28 + $0xc8] sm:$0xff] %vm14662_vm8, %v7632_v17  ;;  %v7631_v46 = vmax.f32 %v7595_v40, 0.0  ;;  %v7598_v23 = vadd.f32 %v7562_v53, %v7526_v16  ;;  %v7525_v1 = vadd.f32 %v13839_v12, %v7484_v20  ;;  %v7487_v47 = vadd.f32 %v10236_v61, %v7153_v28 }
 0x519   : > { %v7419_v5 = vpop.f32.mrf.mxu1 }
 0x51a   : > { %7667 = vst.msk [vmem:[%s10387_s28 + $0xc0] sm:$0xff] %vm14663_vm4, %v7631_v46  ;;  %v7634_v3 = vmax.f32 %v7598_v23, 0.0  ;;  %v7597_v33 = vadd.f32 %v7561_v32, %v7525_v1  ;;  %v7528_v34 = vadd.f32 %v13839_v12, %v7487_v47  ;;  %v7486_v38 = vadd.f32 %v7419_v5, %v7152_v13  ;;  %v7569_v13 = vld [vmem:[#allocation2 + $0x123] sm:$0xff] }
 0x51b   : > { %v10239_v39 = vpop.f32.mrf.mxu1 }
 0x51c   : > { %7670 = vst.msk [vmem:[%s10387_s28 + $0xd8] sm:$0xff] %vm14665_vm15, %v7634_v3  ;;  %v7633_v42 = vmax.f32 %v7597_v33, 0.0  ;;  %v7600_v19 = vadd.f32 %v7564_v62, %v7528_v34  ;;  %v7527_v14 = vadd.f32 %v13839_v12, %v7486_v38  ;;  %v7489_v15 = vadd.f32 %v10239_v39, %v7155_v51 }
 0x51d   : > { %v7429_v10 = vpop.f32.mrf.mxu1 }
 0x51e   : > { %7669 = vst.msk [vmem:[%s10387_s28 + $0xd0] sm:$0xff] %vm14667_vm13, %v7633_v42  ;;  %v7636_v29 = vmax.f32 %v7600_v19, 0.0  ;;  %v7599_v11 = vadd.f32 %v7563_v18, %v7527_v14  ;;  %v7530_v35 = vadd.f32 %v13839_v12, %v7489_v15  ;;  %v7488_v58 = vadd.f32 %v7429_v10, %v7154_v2 }
 0x51f   : > { %v10242_v8 = vpop.f32.mrf.mxu1 }
 0x520   : > { %7672 = vst.msk [vmem:[%s10387_s28 + $0xe8] sm:$0xff] %vm14669_vm1, %v7636_v29  ;;  %v7635_v56 = vmax.f32 %v7599_v11, 0.0  ;;  %v7602_v36 = vadd.f32 %v7566_v48, %v7530_v35  ;;  %v7529_v30 = vadd.f32 %v13839_v12, %v7488_v58  ;;  %v7491_v24 = vadd.f32 %v10242_v8, %v7157_v37 }
 0x521   : > { %v7439_v44 = vpop.f32.mrf.mxu1 }
 0x522   : > { %7671 = vst.msk [vmem:[%s10387_s28 + $0xe0] sm:$0xff] %vm14671_vm10, %v7635_v56  ;;  %v7638_v59 = vmax.f32 %v7602_v36, 0.0  ;;  %v7601_v4 = vadd.f32 %v7565_v41, %v7529_v30  ;;  %v7532_v49 = vadd.f32 %v13839_v12, %v7491_v24  ;;  %v7490_v22 = vadd.f32 %v7439_v44, %v7156_v6 }
 0x523   : > { %v10245_v9 = vpop.f32.mrf.mxu1 }
 0x524   : > { %7674 = vst.msk [vmem:[%s10387_s28 + $0xf8] sm:$0xff] %vm14673_vm11, %v7638_v59  ;;  %v7637_v54 = vmax.f32 %v7601_v4, 0.0  ;;  %v7604_v0 = vadd.f32 %v7568_v50, %v7532_v49  ;;  %v7531_v28 = vadd.f32 %v13839_v12, %v7490_v22  ;;  %v7493_v53 = vadd.f32 %v10245_v9, %v7159_v45 }
 0x525   : > { %v7449_v52 = vpop.f32.mrf.mxu1 }
 0x526   : > { %7673 = vst.msk [vmem:[%s10387_s28 + $0xf0] sm:$0xff] %vm14674_vm14, %v7637_v54  ;;  %v7640_v17 = vmax.f32 %v7604_v0, 0.0  ;;  %v7603_v40 = vadd.f32 %v7567_v27, %v7531_v28  ;;  %v7534_v16 = vadd.f32 %v13839_v12, %v7493_v53  ;;  %v7492_v20 = vadd.f32 %v7449_v52, %v7158_v21 }
 0x528   : > { %7676 = vst.msk [vmem:[%s10387_s28 + $0x108] sm:$0xff] %vm14675_vm5, %v7640_v17  ;;  %v7639_v32 = vmax.f32 %v7603_v40, 0.0  ;;  %v7606_v61 = vadd.f32 %v7570_v25, %v7534_v16  ;;  %v7533_v46 = vadd.f32 %v13839_v12, %v7492_v20 }
 0x52a   : > { %7675 = vst.msk [vmem:[%s10387_s28 + $0x100] sm:$0xff] %vm14676_vm6, %v7639_v32  ;;  %v7642_v23 = vmax.f32 %v7606_v61, 0.0  ;;  %v7605_v1 = vadd.f32 %v7569_v13, %v7533_v46 }
 0x52c   : > { %7678 = vst.msk [vmem:[%s10387_s28 + $0x118] sm:$0xff] %vm14641_vm0, %v7642_v23  ;;  %v7641_v47 = vmax.f32 %v7605_v1, 0.0 }
 0x52e   : > { %7677 = vst.msk [vmem:[%s10387_s28 + $0x110] sm:$0xff] %vm14677_vm3, %v7641_v47 }
 0x52f PF: > { %s15_s18 = sadd.s32 1, %s10338_s18  }
 0x530   : > { %p12_p5 = scmp.ge.s32.totalorder %s15_s18, 4  }
 0x532   :  { %14 = sbr.rel (!%p12_p5) target bundleno = 1 (0x1), region = 122 }

</bundles_post_ra>
